<compile_context>
chip_gen: v7x
topology: tpu7x:2x2x1
jax: 0.10.0
libtpu: 0.0.40
codegen_flags: <defaults>
</compile_context>

<pallas_src>
import functools

import jax
import jax.numpy as jnp
from jax import lax
from jax.experimental import pallas as pl
from jax.experimental.pallas import tpu as pltpu

SOS_TOKEN = 1
NEG = -1e30  # "minus infinity" for padded vocab lanes / padded attention positions


def greedy_kernel(max_length,
                  seq_ref, len_ref,
                  eewi_ref, ewh_ref, ebi_ref, ebh_ref,
                  edwi_ref, dwh_ref, dbi_ref, dbh_ref,
                  wc1_ref, wc2_ref, bc_ref, wo_ref, bo_ref,
                  tok_ref, sco_ref,
                  enc_ref, encT_ref):
    S = seq_ref.shape[0]
    Sp, Hp = enc_ref.shape
    Vp = edwi_ref.shape[0]
    Lp = tok_ref.shape[1]

    length = len_ref[0]

    ebi = ebi_ref[...]
    ebh = ebh_ref[...]

    def gru(gx, gh, h):
        # fused-gate GRU: gx/gh are (1, 3*Hp) with [r | z | n] blocks of width Hp.
        r = jax.nn.sigmoid(gx[:, :Hp] + gh[:, :Hp])
        z = jax.nn.sigmoid(gx[:, Hp:2 * Hp] + gh[:, Hp:2 * Hp])
        n = jnp.tanh(gx[:, 2 * Hp:] + r * gh[:, 2 * Hp:])
        return (1.0 - z) * n + z * h

    # ---------------- Encoder: GRU over input_seq (masked by input_length) ----------------
    # TODO(synk): the original encoder is a bidirectional GRU with summed directions;
    # simplified here to a unidirectional single-layer GRU (decoder.n_layers == 1).
    enc_ref[...] = jnp.zeros_like(enc_ref)           # rows >= S must stay exactly zero
    h = jnp.zeros((1, Hp), jnp.float32)
    for t in range(S):                               # fully unrolled (S is static)
        tok = seq_ref[t]                             # SMEM scalar token id
        # Row `tok` of the precomputed (emb @ Wi_fused) table: embedding lookup and
        # input projection collapse into a single dynamic row read.
        gx = eewi_ref[pl.ds(tok, 1), :] + ebi        # (1, 3*Hp)
        gh = jnp.dot(h, ewh_ref[...], preferred_element_type=jnp.float32) + ebh
        h_new = gru(gx, gh, h)
        valid = t < length
        enc_ref[pl.ds(t, 1), :] = jnp.where(valid, h_new, 0.0)   # zero past input_length
        h = jnp.where(valid, h_new, h)

    encT_ref[...] = enc_ref[...].T                   # one-time (Hp, Sp) transpose for attention

    # ---------------- Greedy decode loop ----------------
    dbi = dbi_ref[...]
    dbh = dbh_ref[...]
    bc = bc_ref[...]
    bo = bo_ref[...]                                 # padded vocab lanes preset to NEG
    vocab_iota = lax.broadcasted_iota(jnp.int32, (1, Vp), 1)
    step_iota = lax.broadcasted_iota(jnp.int32, (1, Lp), 1)
    # Padded encoder rows (t >= S) are excluded from the attention softmax; rows in
    # [input_length, S) stay included as zero rows, matching the reference semantics.
    att_mask = jnp.where(lax.broadcasted_iota(jnp.int32, (1, Sp), 1) < S, 0.0, NEG)

    tok = jnp.full((1, 1), SOS_TOKEN, jnp.int32)
    toks = jnp.zeros((1, Lp), jnp.int32)
    scos = jnp.zeros((1, Lp), jnp.float32)

    for step in range(max_length):                   # fully unrolled (static)
        # decoder embedding is folded into the fused input projection table
        onehot = (vocab_iota == tok).astype(jnp.float32)                       # (1, Vp)
        gx = jnp.dot(onehot, edwi_ref[...], preferred_element_type=jnp.float32) + dbi
        gh = jnp.dot(h, dwh_ref[...], preferred_element_type=jnp.float32) + dbh
        h = gru(gx, gh, h)                            # rnn_output == hidden (1 layer)

        # Luong "dot" attention: lane-dense (1, Sp) scores + context, both on the MXU.
        scores = jnp.dot(h, encT_ref[...], preferred_element_type=jnp.float32) + att_mask
        mA = jnp.max(scores, axis=1, keepdims=True)
        eA = jnp.exp(scores - mA)
        w = eA * (1.0 / jnp.sum(eA, axis=1, keepdims=True))
        ctx = jnp.dot(w, enc_ref[...], preferred_element_type=jnp.float32)     # (1, Hp)

        cat = jnp.tanh(
            jnp.dot(h, wc1_ref[...], preferred_element_type=jnp.float32)
            + jnp.dot(ctx, wc2_ref[...], preferred_element_type=jnp.float32) + bc)
        logits = jnp.dot(cat, wo_ref[...], preferred_element_type=jnp.float32) + bo  # (1, Vp)

        # softmax(dim=1) then max(dim=1) without materializing the normalized probs:
        # argmax on logits (first index on ties); prob of argmax == 1 / sum(exp(l - m)).
        m = jnp.max(logits, axis=1, keepdims=True)
        idx = jnp.min(jnp.where(logits == m, vocab_iota, Vp),
                      axis=1, keepdims=True)                                   # (1, 1) int32
        denom = jnp.sum(jnp.exp(logits - m), axis=1, keepdims=True)
        best = 1.0 / denom                                                     # (1, 1) f32

        sel = step_iota == step                      # hoisted iota, single-vreg selects
        toks = jnp.where(sel, idx, toks)
        scos = jnp.where(sel, best, scos)
        tok = idx

    tok_ref[...] = toks                              # lane-dense (1, Lp) unmasked stores
    sco_ref[...] = scos


# ---------------- wrapper: pad to lane-dense shapes + fuse GRU gates ----------------
def _round_up(x, m):
    return ((x + m - 1) // m) * m


def _pad2(a, rows, cols):
    return jnp.zeros((rows, cols), jnp.float32).at[:a.shape[0], :a.shape[1]].set(a)


def _fuse_gate_w(W, Hp):
    # (3, H, H) gate order [r, z, n] -> (Hp, 3*Hp), gate g in columns [g*Hp, g*Hp+H)
    H = W.shape[-1]
    Wf = jnp.zeros((Hp, 3 * Hp), jnp.float32)
    for g in range(3):
        Wf = Wf.at[:H, g * Hp:g * Hp + H].set(W[g])
    return Wf


def _fuse_gate_b(b, Hp):
    # (3, H) -> (1, 3*Hp)
    H = b.shape[-1]
    bf = jnp.zeros((1, 3 * Hp), jnp.float32)
    for g in range(3):
        bf = bf.at[0, g * Hp:g * Hp + H].set(b[g])
    return bf


def greedy_search_decode(input_seq, input_length, max_length, params):
    """Returns (all_tokens[int32, max_length], all_scores[float32, max_length])."""
    V, H = params['emb'].shape
    S = int(input_seq.shape[0])
    Hp, Vp = _round_up(H, 128), _round_up(V, 128)
    Sp, Lp = _round_up(S, 128), _round_up(max_length, 128)
    hi = jax.lax.Precision.HIGHEST

    emb_p = _pad2(params['emb'], Vp, Hp)

    e_wi = _fuse_gate_w(params['enc_wi'], Hp)
    e_wh = _fuse_gate_w(params['enc_wh'], Hp)
    e_bi = _fuse_gate_b(params['enc_bi'], Hp)
    e_bh = _fuse_gate_b(params['enc_bh'], Hp)
    d_wi = _fuse_gate_w(params['dec_wi'], Hp)
    d_wh = _fuse_gate_w(params['dec_wh'], Hp)
    d_bi = _fuse_gate_b(params['dec_bi'], Hp)
    d_bh = _fuse_gate_b(params['dec_bh'], Hp)

    # Fold the embedding lookup into the fused GRU input projections (one-time weight
    # transform): row v of (emb @ Wi_fused) == emb[v] @ Wi_fused.
    emb_e_wi = jnp.dot(emb_p, e_wi, precision=hi)    # (Vp, 3*Hp) encoder table
    emb_d_wi = jnp.dot(emb_p, d_wi, precision=hi)    # (Vp, 3*Hp) decoder table

    wc1 = _pad2(params['wc1'], Hp, Hp)
    wc2 = _pad2(params['wc2'], Hp, Hp)
    bc = _pad2(params['bc'], 1, Hp)
    wo = _pad2(params['wo'], Hp, Vp)
    # padded vocab lanes get a huge negative bias so they never win the argmax and
    # contribute ~0 to the softmax denominator.
    bo = jnp.full((1, Vp), NEG, jnp.float32).at[0, :V].set(params['bo'][0])

    smem = pl.BlockSpec(memory_space=pltpu.MemorySpace.SMEM)
    vmem = pl.BlockSpec(memory_space=pltpu.MemorySpace.VMEM)

    kernel = functools.partial(greedy_kernel, max_length)
    toks, scos = pl.pallas_call(
        kernel,
        out_shape=(jax.ShapeDtypeStruct((1, Lp), jnp.int32),
                   jax.ShapeDtypeStruct((1, Lp), jnp.float32)),
        in_specs=[smem, smem] + [vmem] * 13,
        out_specs=(vmem, vmem),
        scratch_shapes=[pltpu.VMEM((Sp, Hp), jnp.float32),   # encoder outputs
                        pltpu.VMEM((Hp, Sp), jnp.float32)],  # transposed copy
    )(input_seq.astype(jnp.int32), jnp.asarray([input_length], jnp.int32),
      emb_e_wi, e_wh, e_bi, e_bh,
      emb_d_wi, d_wh, d_bi, d_bh,
      wc1, wc2, bc, wo, bo)
    return toks[0, :max_length], scos[0, :max_length]


def init_params(key, vocab, hidden):
    ks = jax.random.split(key, 14)
    s = 0.1

    def norm(k, shape):
        return jax.random.normal(k, shape, jnp.float32) * s

    return dict(
        emb=norm(ks[0], (vocab, hidden)),
        enc_wi=norm(ks[1], (3, hidden, hidden)),
        enc_wh=norm(ks[2], (3, hidden, hidden)),
        enc_bi=norm(ks[3], (3, hidden)),
        enc_bh=norm(ks[4], (3, hidden)),
        dec_wi=norm(ks[5], (3, hidden, hidden)),
        dec_wh=norm(ks[6], (3, hidden, hidden)),
        dec_bi=norm(ks[7], (3, hidden)),
        dec_bh=norm(ks[8], (3, hidden)),
        wc1=norm(ks[9], (hidden, hidden)),
        wc2=norm(ks[10], (hidden, hidden)),
        bc=norm(ks[11], (1, hidden)),
        wo=norm(ks[12], (hidden, vocab)),
        bo=norm(ks[13], (1, vocab)),
    )


# ---------------- pure-JAX reference (same math, no Pallas, no padding) ----------------
def _ref_gru(x, h, Wi, Wh, bi, bh):
    def lin(v, W, b, g):
        return v @ W[g] + b[g:g + 1]
    r = jax.nn.sigmoid(lin(x, Wi, bi, 0) + lin(h, Wh, bh, 0))
    z = jax.nn.sigmoid(lin(x, Wi, bi, 1) + lin(h, Wh, bh, 1))
    n = jnp.tanh(lin(x, Wi, bi, 2) + r * lin(h, Wh, bh, 2))
    return (1.0 - z) * n + z * h


def reference_decode(input_seq, input_length, max_length, p):
    V, H = p['emb'].shape
    S = input_seq.shape[0]
    h = jnp.zeros((1, H), jnp.float32)
    enc_outs = jnp.zeros((S, H), jnp.float32)
    for t in range(S):
        if t < input_length:
            x = p['emb'][int(input_seq[t])][None, :]
            h = _ref_gru(x, h, p['enc_wi'], p['enc_wh'], p['enc_bi'], p['enc_bh'])
            enc_outs = enc_outs.at[t].set(h[0])
    tok = SOS_TOKEN
    hd = h
    toks, scos = [], []
    for _ in range(max_length):
        x = p['emb'][tok][None, :]
        hd = _ref_gru(x, hd, p['dec_wi'], p['dec_wh'], p['dec_bi'], p['dec_bh'])
        att = jnp.sum(enc_outs * hd, axis=1)
        w = jax.nn.softmax(att)[:, None]
        ctx = jnp.sum(w * enc_outs, axis=0, keepdims=True)
        cat = jnp.tanh(hd @ p['wc1'] + ctx @ p['wc2'] + p['bc'])
        probs = jax.nn.softmax(cat @ p['wo'] + p['bo'], axis=1)
        tok = int(jnp.argmax(probs[0]))
        toks.append(tok)
        scos.append(float(probs[0, tok]))
    return jnp.array(toks, jnp.int32), jnp.array(scos, jnp.float32)


if __name__ == "__main__":
    VOCAB, HIDDEN, SEQ_LEN, MAX_LEN = 64, 32, 8, 8
    key = jax.random.PRNGKey(0)
    kp, ks = jax.random.split(key)
    params = init_params(kp, VOCAB, HIDDEN)
    input_seq = jax.random.randint(ks, (SEQ_LEN,), 2, VOCAB, dtype=jnp.int32)
    input_length = 6  # tokens past this are padding (zero encoder outputs)

    all_tokens, all_scores = greedy_search_decode(input_seq, input_length, MAX_LEN, params)
    jax.block_until_ready((all_tokens, all_scores))

    ref_tokens, ref_scores = reference_decode(input_seq, input_length, MAX_LEN, params)
    assert all_tokens.shape == (MAX_LEN,) and all_scores.shape == (MAX_LEN,)
    assert bool(jnp.all(all_tokens == ref_tokens)), (all_tokens, ref_tokens)
    assert bool(jnp.allclose(all_scores, ref_scores, atol=1e-4, rtol=1e-4)), (all_scores, ref_scores)
    print("KERNEL_OK")
</pallas_src>

<mosaic_0001>
module attributes {stable_mosaic.version = 11 : i64} {
  func.func @greedy_kernel(%arg0: memref<8xi32, #tpu.memory_space<smem>>, %arg1: memref<1xi32, #tpu.memory_space<smem>>, %arg2: memref<128x384xf32, #tpu.memory_space<vmem>>, %arg3: memref<128x384xf32, #tpu.memory_space<vmem>>, %arg4: memref<1x384xf32, #tpu.memory_space<vmem>>, %arg5: memref<1x384xf32, #tpu.memory_space<vmem>>, %arg6: memref<128x384xf32, #tpu.memory_space<vmem>>, %arg7: memref<128x384xf32, #tpu.memory_space<vmem>>, %arg8: memref<1x384xf32, #tpu.memory_space<vmem>>, %arg9: memref<1x384xf32, #tpu.memory_space<vmem>>, %arg10: memref<128x128xf32, #tpu.memory_space<vmem>>, %arg11: memref<128x128xf32, #tpu.memory_space<vmem>>, %arg12: memref<1x128xf32, #tpu.memory_space<vmem>>, %arg13: memref<128x128xf32, #tpu.memory_space<vmem>>, %arg14: memref<1x128xf32, #tpu.memory_space<vmem>>, %arg15: memref<1x128xi32, #tpu.memory_space<vmem>>, %arg16: memref<1x128xf32, #tpu.memory_space<vmem>>, %arg17: memref<128x128xf32, #tpu.memory_space<vmem>>, %arg18: memref<128x128xf32, #tpu.memory_space<vmem>>) attributes {dimension_semantics = [], scalar_prefetch = 0 : i64, scratch_operands = 2 : i64, tpu.core_type = #tpu.core_type<tc>} {
    %c0 = arith.constant 0 : index
    %0 = memref.load %arg1[%c0] : memref<1xi32, #tpu.memory_space<smem>>
    %c0_0 = arith.constant 0 : index
    %c0_1 = arith.constant 0 : index
    %1 = vector.load %arg4[%c0_0, %c0_1] : memref<1x384xf32, #tpu.memory_space<vmem>>, vector<1x384xf32>
    %c0_2 = arith.constant 0 : index
    %c0_3 = arith.constant 0 : index
    %2 = vector.load %arg5[%c0_2, %c0_3] : memref<1x384xf32, #tpu.memory_space<vmem>>, vector<1x384xf32>
    %cst = arith.constant 0.000000e+00 : f32
    %3 = vector.broadcast %cst : f32 to vector<128x128xf32>
    %c0_4 = arith.constant 0 : index
    %c0_5 = arith.constant 0 : index
    %4 = vector.load %arg17[%c0_4, %c0_5] : memref<128x128xf32, #tpu.memory_space<vmem>>, vector<128x128xf32>
    tpu.vector_store %arg17[%c0_4, %c0_5], %3 {strides = array<i32>} : memref<128x128xf32, #tpu.memory_space<vmem>>, vector<128x128xf32>,
    %cst_6 = arith.constant 0.000000e+00 : f32
    %5 = vector.broadcast %cst_6 : f32 to vector<1x128xf32>
    %c0_7 = arith.constant 0 : index
    %6 = memref.load %arg0[%c0_7] : memref<8xi32, #tpu.memory_space<smem>>
    %7 = arith.index_cast %6 : i32 to index
    %c0_8 = arith.constant 0 : index
    %8 = vector.load %arg2[%7, %c0_8] : memref<128x384xf32, #tpu.memory_space<vmem>>, vector<1x384xf32>
    %9 = arith.addf %8, %1 : vector<1x384xf32>
    %c0_9 = arith.constant 0 : index
    %c0_10 = arith.constant 0 : index
    %10 = vector.load %arg3[%c0_9, %c0_10] : memref<128x384xf32, #tpu.memory_space<vmem>>, vector<128x384xf32>
    %cst_11 = arith.constant dense<0.000000e+00> : vector<1x384xf32>
    %11 = tpu.matmul %5, %10, %cst_11 {dimension_numbers = #tpu.dot_dimension_numbers<[1], [0], [0], [1], [0, 0, 1, 1], [], []>} : vector<1x128xf32>, vector<128x384xf32>, vector<1x384xf32> -> vector<1x384xf32>
    %12 = arith.addf %11, %2 : vector<1x384xf32>
    %13 = vector.extract_strided_slice %9 {offsets = [0, 0], sizes = [1, 128], strides = [1, 1]} : vector<1x384xf32> to vector<1x128xf32>
    %14 = vector.extract_strided_slice %12 {offsets = [0, 0], sizes = [1, 128], strides = [1, 1]} : vector<1x384xf32> to vector<1x128xf32>
    %15 = arith.addf %13, %14 : vector<1x128xf32>
    %16 = arith.negf %15 : vector<1x128xf32>
    %17 = math.exp %16 : vector<1x128xf32>
    %cst_12 = arith.constant 1.000000e+00 : f32
    %18 = vector.broadcast %cst_12 : f32 to vector<1x128xf32>
    %19 = arith.addf %18, %17 : vector<1x128xf32>
    %20 = arith.divf %18, %19 : vector<1x128xf32>
    %21 = vector.extract_strided_slice %9 {offsets = [0, 128], sizes = [1, 128], strides = [1, 1]} : vector<1x384xf32> to vector<1x128xf32>
    %22 = vector.extract_strided_slice %12 {offsets = [0, 128], sizes = [1, 128], strides = [1, 1]} : vector<1x384xf32> to vector<1x128xf32>
    %23 = arith.addf %21, %22 : vector<1x128xf32>
    %24 = arith.negf %23 : vector<1x128xf32>
    %25 = math.exp %24 : vector<1x128xf32>
    %cst_13 = arith.constant 1.000000e+00 : f32
    %26 = vector.broadcast %cst_13 : f32 to vector<1x128xf32>
    %27 = arith.addf %26, %25 : vector<1x128xf32>
    %28 = arith.divf %26, %27 : vector<1x128xf32>
    %29 = vector.extract_strided_slice %9 {offsets = [0, 256], sizes = [1, 128], strides = [1, 1]} : vector<1x384xf32> to vector<1x128xf32>
    %30 = vector.extract_strided_slice %12 {offsets = [0, 256], sizes = [1, 128], strides = [1, 1]} : vector<1x384xf32> to vector<1x128xf32>
    %31 = arith.mulf %20, %30 : vector<1x128xf32>
    %32 = arith.addf %29, %31 : vector<1x128xf32>
    %33 = math.tanh %32 : vector<1x128xf32>
    %cst_14 = arith.constant 1.000000e+00 : f32
    %34 = vector.broadcast %cst_14 : f32 to vector<1x128xf32>
    %35 = arith.subf %34, %28 : vector<1x128xf32>
    %36 = arith.mulf %35, %33 : vector<1x128xf32>
    %37 = arith.mulf %28, %5 : vector<1x128xf32>
    %38 = arith.addf %36, %37 : vector<1x128xf32>
    %c0_i32 = arith.constant 0 : i32
    %39 = arith.cmpi sgt, %0, %c0_i32 : i32
    %cst_15 = arith.constant 0.000000e+00 : f32
    %40 = vector.broadcast %cst_15 : f32 to vector<1x128xf32>
    %41 = arith.select %39, %38, %40 : vector<1x128xf32>
    %c0_16 = arith.constant 0 : index
    %c0_17 = arith.constant 0 : index
    %42 = vector.load %arg17[%c0_16, %c0_17] : memref<128x128xf32, #tpu.memory_space<vmem>>, vector<1x128xf32>
    tpu.vector_store %arg17[%c0_16, %c0_17], %41 {strides = array<i32>} : memref<128x128xf32, #tpu.memory_space<vmem>>, vector<1x128xf32>,
    %43 = arith.select %39, %38, %5 : vector<1x128xf32>
    %c1 = arith.constant 1 : index
    %44 = memref.load %arg0[%c1] : memref<8xi32, #tpu.memory_space<smem>>
    %45 = arith.index_cast %44 : i32 to index
    %c0_18 = arith.constant 0 : index
    %46 = vector.load %arg2[%45, %c0_18] : memref<128x384xf32, #tpu.memory_space<vmem>>, vector<1x384xf32>
    %47 = arith.addf %46, %1 : vector<1x384xf32>
    %c0_19 = arith.constant 0 : index
    %c0_20 = arith.constant 0 : index
    %48 = vector.load %arg3[%c0_19, %c0_20] : memref<128x384xf32, #tpu.memory_space<vmem>>, vector<128x384xf32>
    %cst_21 = arith.constant dense<0.000000e+00> : vector<1x384xf32>
    %49 = tpu.matmul %43, %48, %cst_21 {dimension_numbers = #tpu.dot_dimension_numbers<[1], [0], [0], [1], [0, 0, 1, 1], [], []>} : vector<1x128xf32>, vector<128x384xf32>, vector<1x384xf32> -> vector<1x384xf32>
    %50 = arith.addf %49, %2 : vector<1x384xf32>
    %51 = vector.extract_strided_slice %47 {offsets = [0, 0], sizes = [1, 128], strides = [1, 1]} : vector<1x384xf32> to vector<1x128xf32>
    %52 = vector.extract_strided_slice %50 {offsets = [0, 0], sizes = [1, 128], strides = [1, 1]} : vector<1x384xf32> to vector<1x128xf32>
    %53 = arith.addf %51, %52 : vector<1x128xf32>
    %54 = arith.negf %53 : vector<1x128xf32>
    %55 = math.exp %54 : vector<1x128xf32>
    %cst_22 = arith.constant 1.000000e+00 : f32
    %56 = vector.broadcast %cst_22 : f32 to vector<1x128xf32>
    %57 = arith.addf %56, %55 : vector<1x128xf32>
    %58 = arith.divf %56, %57 : vector<1x128xf32>
    %59 = vector.extract_strided_slice %47 {offsets = [0, 128], sizes = [1, 128], strides = [1, 1]} : vector<1x384xf32> to vector<1x128xf32>
    %60 = vector.extract_strided_slice %50 {offsets = [0, 128], sizes = [1, 128], strides = [1, 1]} : vector<1x384xf32> to vector<1x128xf32>
    %61 = arith.addf %59, %60 : vector<1x128xf32>
    %62 = arith.negf %61 : vector<1x128xf32>
    %63 = math.exp %62 : vector<1x128xf32>
    %cst_23 = arith.constant 1.000000e+00 : f32
    %64 = vector.broadcast %cst_23 : f32 to vector<1x128xf32>
    %65 = arith.addf %64, %63 : vector<1x128xf32>
    %66 = arith.divf %64, %65 : vector<1x128xf32>
    %67 = vector.extract_strided_slice %47 {offsets = [0, 256], sizes = [1, 128], strides = [1, 1]} : vector<1x384xf32> to vector<1x128xf32>
    %68 = vector.extract_strided_slice %50 {offsets = [0, 256], sizes = [1, 128], strides = [1, 1]} : vector<1x384xf32> to vector<1x128xf32>
    %69 = arith.mulf %58, %68 : vector<1x128xf32>
    %70 = arith.addf %67, %69 : vector<1x128xf32>
    %71 = math.tanh %70 : vector<1x128xf32>
    %cst_24 = arith.constant 1.000000e+00 : f32
    %72 = vector.broadcast %cst_24 : f32 to vector<1x128xf32>
    %73 = arith.subf %72, %66 : vector<1x128xf32>
    %74 = arith.mulf %73, %71 : vector<1x128xf32>
    %75 = arith.mulf %66, %43 : vector<1x128xf32>
    %76 = arith.addf %74, %75 : vector<1x128xf32>
    %c1_i32 = arith.constant 1 : i32
    %77 = arith.cmpi sgt, %0, %c1_i32 : i32
    %cst_25 = arith.constant 0.000000e+00 : f32
    %78 = vector.broadcast %cst_25 : f32 to vector<1x128xf32>
    %79 = arith.select %77, %76, %78 : vector<1x128xf32>
    %c1_26 = arith.constant 1 : index
    %c0_27 = arith.constant 0 : index
    %80 = vector.load %arg17[%c1_26, %c0_27] : memref<128x128xf32, #tpu.memory_space<vmem>>, vector<1x128xf32>
    tpu.vector_store %arg17[%c1_26, %c0_27], %79 {strides = array<i32>} : memref<128x128xf32, #tpu.memory_space<vmem>>, vector<1x128xf32>,
    %81 = arith.select %77, %76, %43 : vector<1x128xf32>
    %c2 = arith.constant 2 : index
    %82 = memref.load %arg0[%c2] : memref<8xi32, #tpu.memory_space<smem>>
    %83 = arith.index_cast %82 : i32 to index
    %c0_28 = arith.constant 0 : index
    %84 = vector.load %arg2[%83, %c0_28] : memref<128x384xf32, #tpu.memory_space<vmem>>, vector<1x384xf32>
    %85 = arith.addf %84, %1 : vector<1x384xf32>
    %c0_29 = arith.constant 0 : index
    %c0_30 = arith.constant 0 : index
    %86 = vector.load %arg3[%c0_29, %c0_30] : memref<128x384xf32, #tpu.memory_space<vmem>>, vector<128x384xf32>
    %cst_31 = arith.constant dense<0.000000e+00> : vector<1x384xf32>
    %87 = tpu.matmul %81, %86, %cst_31 {dimension_numbers = #tpu.dot_dimension_numbers<[1], [0], [0], [1], [0, 0, 1, 1], [], []>} : vector<1x128xf32>, vector<128x384xf32>, vector<1x384xf32> -> vector<1x384xf32>
    %88 = arith.addf %87, %2 : vector<1x384xf32>
    %89 = vector.extract_strided_slice %85 {offsets = [0, 0], sizes = [1, 128], strides = [1, 1]} : vector<1x384xf32> to vector<1x128xf32>
    %90 = vector.extract_strided_slice %88 {offsets = [0, 0], sizes = [1, 128], strides = [1, 1]} : vector<1x384xf32> to vector<1x128xf32>
    %91 = arith.addf %89, %90 : vector<1x128xf32>
    %92 = arith.negf %91 : vector<1x128xf32>
    %93 = math.exp %92 : vector<1x128xf32>
    %cst_32 = arith.constant 1.000000e+00 : f32
    %94 = vector.broadcast %cst_32 : f32 to vector<1x128xf32>
    %95 = arith.addf %94, %93 : vector<1x128xf32>
    %96 = arith.divf %94, %95 : vector<1x128xf32>
    %97 = vector.extract_strided_slice %85 {offsets = [0, 128], sizes = [1, 128], strides = [1, 1]} : vector<1x384xf32> to vector<1x128xf32>
    %98 = vector.extract_strided_slice %88 {offsets = [0, 128], sizes = [1, 128], strides = [1, 1]} : vector<1x384xf32> to vector<1x128xf32>
    %99 = arith.addf %97, %98 : vector<1x128xf32>
    %100 = arith.negf %99 : vector<1x128xf32>
    %101 = math.exp %100 : vector<1x128xf32>
    %cst_33 = arith.constant 1.000000e+00 : f32
    %102 = vector.broadcast %cst_33 : f32 to vector<1x128xf32>
    %103 = arith.addf %102, %101 : vector<1x128xf32>
    %104 = arith.divf %102, %103 : vector<1x128xf32>
    %105 = vector.extract_strided_slice %85 {offsets = [0, 256], sizes = [1, 128], strides = [1, 1]} : vector<1x384xf32> to vector<1x128xf32>
    %106 = vector.extract_strided_slice %88 {offsets = [0, 256], sizes = [1, 128], strides = [1, 1]} : vector<1x384xf32> to vector<1x128xf32>
    %107 = arith.mulf %96, %106 : vector<1x128xf32>
    %108 = arith.addf %105, %107 : vector<1x128xf32>
    %109 = math.tanh %108 : vector<1x128xf32>
    %cst_34 = arith.constant 1.000000e+00 : f32
    %110 = vector.broadcast %cst_34 : f32 to vector<1x128xf32>
    %111 = arith.subf %110, %104 : vector<1x128xf32>
    %112 = arith.mulf %111, %109 : vector<1x128xf32>
    %113 = arith.mulf %104, %81 : vector<1x128xf32>
    %114 = arith.addf %112, %113 : vector<1x128xf32>
    %c2_i32 = arith.constant 2 : i32
    %115 = arith.cmpi sgt, %0, %c2_i32 : i32
    %cst_35 = arith.constant 0.000000e+00 : f32
    %116 = vector.broadcast %cst_35 : f32 to vector<1x128xf32>
    %117 = arith.select %115, %114, %116 : vector<1x128xf32>
    %c2_36 = arith.constant 2 : index
    %c0_37 = arith.constant 0 : index
    %118 = vector.load %arg17[%c2_36, %c0_37] : memref<128x128xf32, #tpu.memory_space<vmem>>, vector<1x128xf32>
    tpu.vector_store %arg17[%c2_36, %c0_37], %117 {strides = array<i32>} : memref<128x128xf32, #tpu.memory_space<vmem>>, vector<1x128xf32>,
    %119 = arith.select %115, %114, %81 : vector<1x128xf32>
    %c3 = arith.constant 3 : index
    %120 = memref.load %arg0[%c3] : memref<8xi32, #tpu.memory_space<smem>>
    %121 = arith.index_cast %120 : i32 to index
    %c0_38 = arith.constant 0 : index
    %122 = vector.load %arg2[%121, %c0_38] : memref<128x384xf32, #tpu.memory_space<vmem>>, vector<1x384xf32>
    %123 = arith.addf %122, %1 : vector<1x384xf32>
    %c0_39 = arith.constant 0 : index
    %c0_40 = arith.constant 0 : index
    %124 = vector.load %arg3[%c0_39, %c0_40] : memref<128x384xf32, #tpu.memory_space<vmem>>, vector<128x384xf32>
    %cst_41 = arith.constant dense<0.000000e+00> : vector<1x384xf32>
    %125 = tpu.matmul %119, %124, %cst_41 {dimension_numbers = #tpu.dot_dimension_numbers<[1], [0], [0], [1], [0, 0, 1, 1], [], []>} : vector<1x128xf32>, vector<128x384xf32>, vector<1x384xf32> -> vector<1x384xf32>
    %126 = arith.addf %125, %2 : vector<1x384xf32>
    %127 = vector.extract_strided_slice %123 {offsets = [0, 0], sizes = [1, 128], strides = [1, 1]} : vector<1x384xf32> to vector<1x128xf32>
    %128 = vector.extract_strided_slice %126 {offsets = [0, 0], sizes = [1, 128], strides = [1, 1]} : vector<1x384xf32> to vector<1x128xf32>
    %129 = arith.addf %127, %128 : vector<1x128xf32>
    %130 = arith.negf %129 : vector<1x128xf32>
    %131 = math.exp %130 : vector<1x128xf32>
    %cst_42 = arith.constant 1.000000e+00 : f32
    %132 = vector.broadcast %cst_42 : f32 to vector<1x128xf32>
    %133 = arith.addf %132, %131 : vector<1x128xf32>
    %134 = arith.divf %132, %133 : vector<1x128xf32>
    %135 = vector.extract_strided_slice %123 {offsets = [0, 128], sizes = [1, 128], strides = [1, 1]} : vector<1x384xf32> to vector<1x128xf32>
    %136 = vector.extract_strided_slice %126 {offsets = [0, 128], sizes = [1, 128], strides = [1, 1]} : vector<1x384xf32> to vector<1x128xf32>
    %137 = arith.addf %135, %136 : vector<1x128xf32>
    %138 = arith.negf %137 : vector<1x128xf32>
    %139 = math.exp %138 : vector<1x128xf32>
    %cst_43 = arith.constant 1.000000e+00 : f32
    %140 = vector.broadcast %cst_43 : f32 to vector<1x128xf32>
    %141 = arith.addf %140, %139 : vector<1x128xf32>
    %142 = arith.divf %140, %141 : vector<1x128xf32>
    %143 = vector.extract_strided_slice %123 {offsets = [0, 256], sizes = [1, 128], strides = [1, 1]} : vector<1x384xf32> to vector<1x128xf32>
    %144 = vector.extract_strided_slice %126 {offsets = [0, 256], sizes = [1, 128], strides = [1, 1]} : vector<1x384xf32> to vector<1x128xf32>
    %145 = arith.mulf %134, %144 : vector<1x128xf32>
    %146 = arith.addf %143, %145 : vector<1x128xf32>
    %147 = math.tanh %146 : vector<1x128xf32>
    %cst_44 = arith.constant 1.000000e+00 : f32
    %148 = vector.broadcast %cst_44 : f32 to vector<1x128xf32>
    %149 = arith.subf %148, %142 : vector<1x128xf32>
    %150 = arith.mulf %149, %147 : vector<1x128xf32>
    %151 = arith.mulf %142, %119 : vector<1x128xf32>
    %152 = arith.addf %150, %151 : vector<1x128xf32>
    %c3_i32 = arith.constant 3 : i32
    %153 = arith.cmpi sgt, %0, %c3_i32 : i32
    %cst_45 = arith.constant 0.000000e+00 : f32
    %154 = vector.broadcast %cst_45 : f32 to vector<1x128xf32>
    %155 = arith.select %153, %152, %154 : vector<1x128xf32>
    %c3_46 = arith.constant 3 : index
    %c0_47 = arith.constant 0 : index
    %156 = vector.load %arg17[%c3_46, %c0_47] : memref<128x128xf32, #tpu.memory_space<vmem>>, vector<1x128xf32>
    tpu.vector_store %arg17[%c3_46, %c0_47], %155 {strides = array<i32>} : memref<128x128xf32, #tpu.memory_space<vmem>>, vector<1x128xf32>,
    %157 = arith.select %153, %152, %119 : vector<1x128xf32>
    %c4 = arith.constant 4 : index
    %158 = memref.load %arg0[%c4] : memref<8xi32, #tpu.memory_space<smem>>
    %159 = arith.index_cast %158 : i32 to index
    %c0_48 = arith.constant 0 : index
    %160 = vector.load %arg2[%159, %c0_48] : memref<128x384xf32, #tpu.memory_space<vmem>>, vector<1x384xf32>
    %161 = arith.addf %160, %1 : vector<1x384xf32>
    %c0_49 = arith.constant 0 : index
    %c0_50 = arith.constant 0 : index
    %162 = vector.load %arg3[%c0_49, %c0_50] : memref<128x384xf32, #tpu.memory_space<vmem>>, vector<128x384xf32>
    %cst_51 = arith.constant dense<0.000000e+00> : vector<1x384xf32>
    %163 = tpu.matmul %157, %162, %cst_51 {dimension_numbers = #tpu.dot_dimension_numbers<[1], [0], [0], [1], [0, 0, 1, 1], [], []>} : vector<1x128xf32>, vector<128x384xf32>, vector<1x384xf32> -> vector<1x384xf32>
    %164 = arith.addf %163, %2 : vector<1x384xf32>
    %165 = vector.extract_strided_slice %161 {offsets = [0, 0], sizes = [1, 128], strides = [1, 1]} : vector<1x384xf32> to vector<1x128xf32>
    %166 = vector.extract_strided_slice %164 {offsets = [0, 0], sizes = [1, 128], strides = [1, 1]} : vector<1x384xf32> to vector<1x128xf32>
    %167 = arith.addf %165, %166 : vector<1x128xf32>
    %168 = arith.negf %167 : vector<1x128xf32>
    %169 = math.exp %168 : vector<1x128xf32>
    %cst_52 = arith.constant 1.000000e+00 : f32
    %170 = vector.broadcast %cst_52 : f32 to vector<1x128xf32>
    %171 = arith.addf %170, %169 : vector<1x128xf32>
    %172 = arith.divf %170, %171 : vector<1x128xf32>
    %173 = vector.extract_strided_slice %161 {offsets = [0, 128], sizes = [1, 128], strides = [1, 1]} : vector<1x384xf32> to vector<1x128xf32>
    %174 = vector.extract_strided_slice %164 {offsets = [0, 128], sizes = [1, 128], strides = [1, 1]} : vector<1x384xf32> to vector<1x128xf32>
    %175 = arith.addf %173, %174 : vector<1x128xf32>
    %176 = arith.negf %175 : vector<1x128xf32>
    %177 = math.exp %176 : vector<1x128xf32>
    %cst_53 = arith.constant 1.000000e+00 : f32
    %178 = vector.broadcast %cst_53 : f32 to vector<1x128xf32>
    %179 = arith.addf %178, %177 : vector<1x128xf32>
    %180 = arith.divf %178, %179 : vector<1x128xf32>
    %181 = vector.extract_strided_slice %161 {offsets = [0, 256], sizes = [1, 128], strides = [1, 1]} : vector<1x384xf32> to vector<1x128xf32>
    %182 = vector.extract_strided_slice %164 {offsets = [0, 256], sizes = [1, 128], strides = [1, 1]} : vector<1x384xf32> to vector<1x128xf32>
    %183 = arith.mulf %172, %182 : vector<1x128xf32>
    %184 = arith.addf %181, %183 : vector<1x128xf32>
    %185 = math.tanh %184 : vector<1x128xf32>
    %cst_54 = arith.constant 1.000000e+00 : f32
    %186 = vector.broadcast %cst_54 : f32 to vector<1x128xf32>
    %187 = arith.subf %186, %180 : vector<1x128xf32>
    %188 = arith.mulf %187, %185 : vector<1x128xf32>
    %189 = arith.mulf %180, %157 : vector<1x128xf32>
    %190 = arith.addf %188, %189 : vector<1x128xf32>
    %c4_i32 = arith.constant 4 : i32
    %191 = arith.cmpi sgt, %0, %c4_i32 : i32
    %cst_55 = arith.constant 0.000000e+00 : f32
    %192 = vector.broadcast %cst_55 : f32 to vector<1x128xf32>
    %193 = arith.select %191, %190, %192 : vector<1x128xf32>
    %c4_56 = arith.constant 4 : index
    %c0_57 = arith.constant 0 : index
    %194 = vector.load %arg17[%c4_56, %c0_57] : memref<128x128xf32, #tpu.memory_space<vmem>>, vector<1x128xf32>
    tpu.vector_store %arg17[%c4_56, %c0_57], %193 {strides = array<i32>} : memref<128x128xf32, #tpu.memory_space<vmem>>, vector<1x128xf32>,
    %195 = arith.select %191, %190, %157 : vector<1x128xf32>
    %c5 = arith.constant 5 : index
    %196 = memref.load %arg0[%c5] : memref<8xi32, #tpu.memory_space<smem>>
    %197 = arith.index_cast %196 : i32 to index
    %c0_58 = arith.constant 0 : index
    %198 = vector.load %arg2[%197, %c0_58] : memref<128x384xf32, #tpu.memory_space<vmem>>, vector<1x384xf32>
    %199 = arith.addf %198, %1 : vector<1x384xf32>
    %c0_59 = arith.constant 0 : index
    %c0_60 = arith.constant 0 : index
    %200 = vector.load %arg3[%c0_59, %c0_60] : memref<128x384xf32, #tpu.memory_space<vmem>>, vector<128x384xf32>
    %cst_61 = arith.constant dense<0.000000e+00> : vector<1x384xf32>
    %201 = tpu.matmul %195, %200, %cst_61 {dimension_numbers = #tpu.dot_dimension_numbers<[1], [0], [0], [1], [0, 0, 1, 1], [], []>} : vector<1x128xf32>, vector<128x384xf32>, vector<1x384xf32> -> vector<1x384xf32>
    %202 = arith.addf %201, %2 : vector<1x384xf32>
    %203 = vector.extract_strided_slice %199 {offsets = [0, 0], sizes = [1, 128], strides = [1, 1]} : vector<1x384xf32> to vector<1x128xf32>
    %204 = vector.extract_strided_slice %202 {offsets = [0, 0], sizes = [1, 128], strides = [1, 1]} : vector<1x384xf32> to vector<1x128xf32>
    %205 = arith.addf %203, %204 : vector<1x128xf32>
    %206 = arith.negf %205 : vector<1x128xf32>
    %207 = math.exp %206 : vector<1x128xf32>
    %cst_62 = arith.constant 1.000000e+00 : f32
    %208 = vector.broadcast %cst_62 : f32 to vector<1x128xf32>
    %209 = arith.addf %208, %207 : vector<1x128xf32>
    %210 = arith.divf %208, %209 : vector<1x128xf32>
    %211 = vector.extract_strided_slice %199 {offsets = [0, 128], sizes = [1, 128], strides = [1, 1]} : vector<1x384xf32> to vector<1x128xf32>
    %212 = vector.extract_strided_slice %202 {offsets = [0, 128], sizes = [1, 128], strides = [1, 1]} : vector<1x384xf32> to vector<1x128xf32>
    %213 = arith.addf %211, %212 : vector<1x128xf32>
    %214 = arith.negf %213 : vector<1x128xf32>
    %215 = math.exp %214 : vector<1x128xf32>
    %cst_63 = arith.constant 1.000000e+00 : f32
    %216 = vector.broadcast %cst_63 : f32 to vector<1x128xf32>
    %217 = arith.addf %216, %215 : vector<1x128xf32>
    %218 = arith.divf %216, %217 : vector<1x128xf32>
    %219 = vector.extract_strided_slice %199 {offsets = [0, 256], sizes = [1, 128], strides = [1, 1]} : vector<1x384xf32> to vector<1x128xf32>
    %220 = vector.extract_strided_slice %202 {offsets = [0, 256], sizes = [1, 128], strides = [1, 1]} : vector<1x384xf32> to vector<1x128xf32>
    %221 = arith.mulf %210, %220 : vector<1x128xf32>
    %222 = arith.addf %219, %221 : vector<1x128xf32>
    %223 = math.tanh %222 : vector<1x128xf32>
    %cst_64 = arith.constant 1.000000e+00 : f32
    %224 = vector.broadcast %cst_64 : f32 to vector<1x128xf32>
    %225 = arith.subf %224, %218 : vector<1x128xf32>
    %226 = arith.mulf %225, %223 : vector<1x128xf32>
    %227 = arith.mulf %218, %195 : vector<1x128xf32>
    %228 = arith.addf %226, %227 : vector<1x128xf32>
    %c5_i32 = arith.constant 5 : i32
    %229 = arith.cmpi sgt, %0, %c5_i32 : i32
    %cst_65 = arith.constant 0.000000e+00 : f32
    %230 = vector.broadcast %cst_65 : f32 to vector<1x128xf32>
    %231 = arith.select %229, %228, %230 : vector<1x128xf32>
    %c5_66 = arith.constant 5 : index
    %c0_67 = arith.constant 0 : index
    %232 = vector.load %arg17[%c5_66, %c0_67] : memref<128x128xf32, #tpu.memory_space<vmem>>, vector<1x128xf32>
    tpu.vector_store %arg17[%c5_66, %c0_67], %231 {strides = array<i32>} : memref<128x128xf32, #tpu.memory_space<vmem>>, vector<1x128xf32>,
    %233 = arith.select %229, %228, %195 : vector<1x128xf32>
    %c6 = arith.constant 6 : index
    %234 = memref.load %arg0[%c6] : memref<8xi32, #tpu.memory_space<smem>>
    %235 = arith.index_cast %234 : i32 to index
    %c0_68 = arith.constant 0 : index
    %236 = vector.load %arg2[%235, %c0_68] : memref<128x384xf32, #tpu.memory_space<vmem>>, vector<1x384xf32>
    %237 = arith.addf %236, %1 : vector<1x384xf32>
    %c0_69 = arith.constant 0 : index
    %c0_70 = arith.constant 0 : index
    %238 = vector.load %arg3[%c0_69, %c0_70] : memref<128x384xf32, #tpu.memory_space<vmem>>, vector<128x384xf32>
    %cst_71 = arith.constant dense<0.000000e+00> : vector<1x384xf32>
    %239 = tpu.matmul %233, %238, %cst_71 {dimension_numbers = #tpu.dot_dimension_numbers<[1], [0], [0], [1], [0, 0, 1, 1], [], []>} : vector<1x128xf32>, vector<128x384xf32>, vector<1x384xf32> -> vector<1x384xf32>
    %240 = arith.addf %239, %2 : vector<1x384xf32>
    %241 = vector.extract_strided_slice %237 {offsets = [0, 0], sizes = [1, 128], strides = [1, 1]} : vector<1x384xf32> to vector<1x128xf32>
    %242 = vector.extract_strided_slice %240 {offsets = [0, 0], sizes = [1, 128], strides = [1, 1]} : vector<1x384xf32> to vector<1x128xf32>
    %243 = arith.addf %241, %242 : vector<1x128xf32>
    %244 = arith.negf %243 : vector<1x128xf32>
    %245 = math.exp %244 : vector<1x128xf32>
    %cst_72 = arith.constant 1.000000e+00 : f32
    %246 = vector.broadcast %cst_72 : f32 to vector<1x128xf32>
    %247 = arith.addf %246, %245 : vector<1x128xf32>
    %248 = arith.divf %246, %247 : vector<1x128xf32>
    %249 = vector.extract_strided_slice %237 {offsets = [0, 128], sizes = [1, 128], strides = [1, 1]} : vector<1x384xf32> to vector<1x128xf32>
    %250 = vector.extract_strided_slice %240 {offsets = [0, 128], sizes = [1, 128], strides = [1, 1]} : vector<1x384xf32> to vector<1x128xf32>
    %251 = arith.addf %249, %250 : vector<1x128xf32>
    %252 = arith.negf %251 : vector<1x128xf32>
    %253 = math.exp %252 : vector<1x128xf32>
    %cst_73 = arith.constant 1.000000e+00 : f32
    %254 = vector.broadcast %cst_73 : f32 to vector<1x128xf32>
    %255 = arith.addf %254, %253 : vector<1x128xf32>
    %256 = arith.divf %254, %255 : vector<1x128xf32>
    %257 = vector.extract_strided_slice %237 {offsets = [0, 256], sizes = [1, 128], strides = [1, 1]} : vector<1x384xf32> to vector<1x128xf32>
    %258 = vector.extract_strided_slice %240 {offsets = [0, 256], sizes = [1, 128], strides = [1, 1]} : vector<1x384xf32> to vector<1x128xf32>
    %259 = arith.mulf %248, %258 : vector<1x128xf32>
    %260 = arith.addf %257, %259 : vector<1x128xf32>
    %261 = math.tanh %260 : vector<1x128xf32>
    %cst_74 = arith.constant 1.000000e+00 : f32
    %262 = vector.broadcast %cst_74 : f32 to vector<1x128xf32>
    %263 = arith.subf %262, %256 : vector<1x128xf32>
    %264 = arith.mulf %263, %261 : vector<1x128xf32>
    %265 = arith.mulf %256, %233 : vector<1x128xf32>
    %266 = arith.addf %264, %265 : vector<1x128xf32>
    %c6_i32 = arith.constant 6 : i32
    %267 = arith.cmpi sgt, %0, %c6_i32 : i32
    %cst_75 = arith.constant 0.000000e+00 : f32
    %268 = vector.broadcast %cst_75 : f32 to vector<1x128xf32>
    %269 = arith.select %267, %266, %268 : vector<1x128xf32>
    %c6_76 = arith.constant 6 : index
    %c0_77 = arith.constant 0 : index
    %270 = vector.load %arg17[%c6_76, %c0_77] : memref<128x128xf32, #tpu.memory_space<vmem>>, vector<1x128xf32>
    tpu.vector_store %arg17[%c6_76, %c0_77], %269 {strides = array<i32>} : memref<128x128xf32, #tpu.memory_space<vmem>>, vector<1x128xf32>,
    %271 = arith.select %267, %266, %233 : vector<1x128xf32>
    %c7 = arith.constant 7 : index
    %272 = memref.load %arg0[%c7] : memref<8xi32, #tpu.memory_space<smem>>
    %273 = arith.index_cast %272 : i32 to index
    %c0_78 = arith.constant 0 : index
    %274 = vector.load %arg2[%273, %c0_78] : memref<128x384xf32, #tpu.memory_space<vmem>>, vector<1x384xf32>
    %275 = arith.addf %274, %1 : vector<1x384xf32>
    %c0_79 = arith.constant 0 : index
    %c0_80 = arith.constant 0 : index
    %276 = vector.load %arg3[%c0_79, %c0_80] : memref<128x384xf32, #tpu.memory_space<vmem>>, vector<128x384xf32>
    %cst_81 = arith.constant dense<0.000000e+00> : vector<1x384xf32>
    %277 = tpu.matmul %271, %276, %cst_81 {dimension_numbers = #tpu.dot_dimension_numbers<[1], [0], [0], [1], [0, 0, 1, 1], [], []>} : vector<1x128xf32>, vector<128x384xf32>, vector<1x384xf32> -> vector<1x384xf32>
    %278 = arith.addf %277, %2 : vector<1x384xf32>
    %279 = vector.extract_strided_slice %275 {offsets = [0, 0], sizes = [1, 128], strides = [1, 1]} : vector<1x384xf32> to vector<1x128xf32>
    %280 = vector.extract_strided_slice %278 {offsets = [0, 0], sizes = [1, 128], strides = [1, 1]} : vector<1x384xf32> to vector<1x128xf32>
    %281 = arith.addf %279, %280 : vector<1x128xf32>
    %282 = arith.negf %281 : vector<1x128xf32>
    %283 = math.exp %282 : vector<1x128xf32>
    %cst_82 = arith.constant 1.000000e+00 : f32
    %284 = vector.broadcast %cst_82 : f32 to vector<1x128xf32>
    %285 = arith.addf %284, %283 : vector<1x128xf32>
    %286 = arith.divf %284, %285 : vector<1x128xf32>
    %287 = vector.extract_strided_slice %275 {offsets = [0, 128], sizes = [1, 128], strides = [1, 1]} : vector<1x384xf32> to vector<1x128xf32>
    %288 = vector.extract_strided_slice %278 {offsets = [0, 128], sizes = [1, 128], strides = [1, 1]} : vector<1x384xf32> to vector<1x128xf32>
    %289 = arith.addf %287, %288 : vector<1x128xf32>
    %290 = arith.negf %289 : vector<1x128xf32>
    %291 = math.exp %290 : vector<1x128xf32>
    %cst_83 = arith.constant 1.000000e+00 : f32
    %292 = vector.broadcast %cst_83 : f32 to vector<1x128xf32>
    %293 = arith.addf %292, %291 : vector<1x128xf32>
    %294 = arith.divf %292, %293 : vector<1x128xf32>
    %295 = vector.extract_strided_slice %275 {offsets = [0, 256], sizes = [1, 128], strides = [1, 1]} : vector<1x384xf32> to vector<1x128xf32>
    %296 = vector.extract_strided_slice %278 {offsets = [0, 256], sizes = [1, 128], strides = [1, 1]} : vector<1x384xf32> to vector<1x128xf32>
    %297 = arith.mulf %286, %296 : vector<1x128xf32>
    %298 = arith.addf %295, %297 : vector<1x128xf32>
    %299 = math.tanh %298 : vector<1x128xf32>
    %cst_84 = arith.constant 1.000000e+00 : f32
    %300 = vector.broadcast %cst_84 : f32 to vector<1x128xf32>
    %301 = arith.subf %300, %294 : vector<1x128xf32>
    %302 = arith.mulf %301, %299 : vector<1x128xf32>
    %303 = arith.mulf %294, %271 : vector<1x128xf32>
    %304 = arith.addf %302, %303 : vector<1x128xf32>
    %c7_i32 = arith.constant 7 : i32
    %305 = arith.cmpi sgt, %0, %c7_i32 : i32
    %cst_85 = arith.constant 0.000000e+00 : f32
    %306 = vector.broadcast %cst_85 : f32 to vector<1x128xf32>
    %307 = arith.select %305, %304, %306 : vector<1x128xf32>
    %c7_86 = arith.constant 7 : index
    %c0_87 = arith.constant 0 : index
    %308 = vector.load %arg17[%c7_86, %c0_87] : memref<128x128xf32, #tpu.memory_space<vmem>>, vector<1x128xf32>
    tpu.vector_store %arg17[%c7_86, %c0_87], %307 {strides = array<i32>} : memref<128x128xf32, #tpu.memory_space<vmem>>, vector<1x128xf32>,
    %309 = arith.select %305, %304, %271 : vector<1x128xf32>
    %c0_88 = arith.constant 0 : index
    %c0_89 = arith.constant 0 : index
    %310 = vector.load %arg17[%c0_88, %c0_89] : memref<128x128xf32, #tpu.memory_space<vmem>>, vector<128x128xf32>
    %311 = tpu.transpose %310, [1, 0] : vector<128x128xf32> -> vector<128x128xf32>
    %c0_90 = arith.constant 0 : index
    %c0_91 = arith.constant 0 : index
    %312 = vector.load %arg18[%c0_90, %c0_91] : memref<128x128xf32, #tpu.memory_space<vmem>>, vector<128x128xf32>
    tpu.vector_store %arg18[%c0_90, %c0_91], %311 {strides = array<i32>} : memref<128x128xf32, #tpu.memory_space<vmem>>, vector<128x128xf32>,
    %c0_92 = arith.constant 0 : index
    %c0_93 = arith.constant 0 : index
    %313 = vector.load %arg8[%c0_92, %c0_93] : memref<1x384xf32, #tpu.memory_space<vmem>>, vector<1x384xf32>
    %c0_94 = arith.constant 0 : index
    %c0_95 = arith.constant 0 : index
    %314 = vector.load %arg9[%c0_94, %c0_95] : memref<1x384xf32, #tpu.memory_space<vmem>>, vector<1x384xf32>
    %c0_96 = arith.constant 0 : index
    %c0_97 = arith.constant 0 : index
    %315 = vector.load %arg12[%c0_96, %c0_97] : memref<1x128xf32, #tpu.memory_space<vmem>>, vector<1x128xf32>
    %c0_98 = arith.constant 0 : index
    %c0_99 = arith.constant 0 : index
    %316 = vector.load %arg14[%c0_98, %c0_99] : memref<1x128xf32, #tpu.memory_space<vmem>>, vector<1x128xf32>
    %317 = tpu.iota {dimensions = array<i32: 1>} : vector<1x128xi32>
    %318 = tpu.iota {dimensions = array<i32: 1>} : vector<1x128xi32>
    %319 = tpu.iota {dimensions = array<i32: 1>} : vector<1x128xi32>
    %c8_i32 = arith.constant 8 : i32
    %320 = vector.broadcast %c8_i32 : i32 to vector<1x128xi32>
    %321 = arith.cmpi slt, %319, %320 : vector<1x128xi32>
    %cst_100 = arith.constant 0.000000e+00 : f32
    %cst_101 = arith.constant -1.000000e+30 : f32
    %322 = vector.broadcast %cst_100 : f32 to vector<1x128xf32>
    %323 = vector.broadcast %cst_101 : f32 to vector<1x128xf32>
    %324 = arith.select %321, %322, %323 : vector<1x128xi1>, vector<1x128xf32>
    %c1_i32_102 = arith.constant 1 : i32
    %325 = vector.broadcast %c1_i32_102 : i32 to vector<1x1xi32>
    %c0_i32_103 = arith.constant 0 : i32
    %326 = vector.broadcast %c0_i32_103 : i32 to vector<1x128xi32>
    %cst_104 = arith.constant 0.000000e+00 : f32
    %327 = vector.broadcast %cst_104 : f32 to vector<1x128xf32>
    %328 = vector.broadcast %325 : vector<1x1xi32> to vector<1x128xi32>
    %329 = arith.cmpi eq, %317, %328 : vector<1x128xi32>
    %330 = arith.extui %329 : vector<1x128xi1> to vector<1x128xi32>
    %331 = arith.sitofp %330 : vector<1x128xi32> to vector<1x128xf32>
    %c0_105 = arith.constant 0 : index
    %c0_106 = arith.constant 0 : index
    %332 = vector.load %arg6[%c0_105, %c0_106] : memref<128x384xf32, #tpu.memory_space<vmem>>, vector<128x384xf32>
    %cst_107 = arith.constant dense<0.000000e+00> : vector<1x384xf32>
    %333 = tpu.matmul %331, %332, %cst_107 {dimension_numbers = #tpu.dot_dimension_numbers<[1], [0], [0], [1], [0, 0, 1, 1], [], []>} : vector<1x128xf32>, vector<128x384xf32>, vector<1x384xf32> -> vector<1x384xf32>
    %334 = arith.addf %333, %313 : vector<1x384xf32>
    %c0_108 = arith.constant 0 : index
    %c0_109 = arith.constant 0 : index
    %335 = vector.load %arg7[%c0_108, %c0_109] : memref<128x384xf32, #tpu.memory_space<vmem>>, vector<128x384xf32>
    %cst_110 = arith.constant dense<0.000000e+00> : vector<1x384xf32>
    %336 = tpu.matmul %309, %335, %cst_110 {dimension_numbers = #tpu.dot_dimension_numbers<[1], [0], [0], [1], [0, 0, 1, 1], [], []>} : vector<1x128xf32>, vector<128x384xf32>, vector<1x384xf32> -> vector<1x384xf32>
    %337 = arith.addf %336, %314 : vector<1x384xf32>
    %338 = vector.extract_strided_slice %334 {offsets = [0, 0], sizes = [1, 128], strides = [1, 1]} : vector<1x384xf32> to vector<1x128xf32>
    %339 = vector.extract_strided_slice %337 {offsets = [0, 0], sizes = [1, 128], strides = [1, 1]} : vector<1x384xf32> to vector<1x128xf32>
    %340 = arith.addf %338, %339 : vector<1x128xf32>
    %341 = arith.negf %340 : vector<1x128xf32>
    %342 = math.exp %341 : vector<1x128xf32>
    %cst_111 = arith.constant 1.000000e+00 : f32
    %343 = vector.broadcast %cst_111 : f32 to vector<1x128xf32>
    %344 = arith.addf %343, %342 : vector<1x128xf32>
    %345 = arith.divf %343, %344 : vector<1x128xf32>
    %346 = vector.extract_strided_slice %334 {offsets = [0, 128], sizes = [1, 128], strides = [1, 1]} : vector<1x384xf32> to vector<1x128xf32>
    %347 = vector.extract_strided_slice %337 {offsets = [0, 128], sizes = [1, 128], strides = [1, 1]} : vector<1x384xf32> to vector<1x128xf32>
    %348 = arith.addf %346, %347 : vector<1x128xf32>
    %349 = arith.negf %348 : vector<1x128xf32>
    %350 = math.exp %349 : vector<1x128xf32>
    %cst_112 = arith.constant 1.000000e+00 : f32
    %351 = vector.broadcast %cst_112 : f32 to vector<1x128xf32>
    %352 = arith.addf %351, %350 : vector<1x128xf32>
    %353 = arith.divf %351, %352 : vector<1x128xf32>
    %354 = vector.extract_strided_slice %334 {offsets = [0, 256], sizes = [1, 128], strides = [1, 1]} : vector<1x384xf32> to vector<1x128xf32>
    %355 = vector.extract_strided_slice %337 {offsets = [0, 256], sizes = [1, 128], strides = [1, 1]} : vector<1x384xf32> to vector<1x128xf32>
    %356 = arith.mulf %345, %355 : vector<1x128xf32>
    %357 = arith.addf %354, %356 : vector<1x128xf32>
    %358 = math.tanh %357 : vector<1x128xf32>
    %cst_113 = arith.constant 1.000000e+00 : f32
    %359 = vector.broadcast %cst_113 : f32 to vector<1x128xf32>
    %360 = arith.subf %359, %353 : vector<1x128xf32>
    %361 = arith.mulf %360, %358 : vector<1x128xf32>
    %362 = arith.mulf %353, %309 : vector<1x128xf32>
    %363 = arith.addf %361, %362 : vector<1x128xf32>
    %c0_114 = arith.constant 0 : index
    %c0_115 = arith.constant 0 : index
    %364 = vector.load %arg18[%c0_114, %c0_115] : memref<128x128xf32, #tpu.memory_space<vmem>>, vector<128x128xf32>
    %cst_116 = arith.constant dense<0.000000e+00> : vector<1x128xf32>
    %365 = tpu.matmul %363, %364, %cst_116 {dimension_numbers = #tpu.dot_dimension_numbers<[1], [0], [0], [1], [0, 0, 1, 1], [], []>} : vector<1x128xf32>, vector<128x128xf32>, vector<1x128xf32> -> vector<1x128xf32>
    %366 = arith.addf %365, %324 : vector<1x128xf32>
    %cst_117 = arith.constant dense<0xFF800000> : vector<1xf32>
    %367 = vector.multi_reduction <maximumf>, %366, %cst_117 [1] : vector<1x128xf32> to vector<1xf32>
    %368 = vector.shape_cast %367 : vector<1xf32> to vector<1x1xf32>
    %369 = vector.broadcast %368 : vector<1x1xf32> to vector<1x128xf32>
    %370 = arith.subf %366, %369 : vector<1x128xf32>
    %371 = math.exp %370 : vector<1x128xf32>
    %cst_118 = arith.constant dense<0.000000e+00> : vector<1xf32>
    %372 = vector.multi_reduction <add>, %371, %cst_118 [1] : vector<1x128xf32> to vector<1xf32>
    %373 = vector.shape_cast %372 : vector<1xf32> to vector<1x1xf32>
    %cst_119 = arith.constant 1.000000e+00 : f32
    %374 = vector.broadcast %cst_119 : f32 to vector<1x1xf32>
    %375 = arith.divf %374, %373 : vector<1x1xf32>
    %376 = vector.broadcast %375 : vector<1x1xf32> to vector<1x128xf32>
    %377 = arith.mulf %371, %376 : vector<1x128xf32>
    %c0_120 = arith.constant 0 : index
    %c0_121 = arith.constant 0 : index
    %378 = vector.load %arg17[%c0_120, %c0_121] : memref<128x128xf32, #tpu.memory_space<vmem>>, vector<128x128xf32>
    %cst_122 = arith.constant dense<0.000000e+00> : vector<1x128xf32>
    %379 = tpu.matmul %377, %378, %cst_122 {dimension_numbers = #tpu.dot_dimension_numbers<[1], [0], [0], [1], [0, 0, 1, 1], [], []>} : vector<1x128xf32>, vector<128x128xf32>, vector<1x128xf32> -> vector<1x128xf32>
    %c0_123 = arith.constant 0 : index
    %c0_124 = arith.constant 0 : index
    %380 = vector.load %arg10[%c0_123, %c0_124] : memref<128x128xf32, #tpu.memory_space<vmem>>, vector<128x128xf32>
    %cst_125 = arith.constant dense<0.000000e+00> : vector<1x128xf32>
    %381 = tpu.matmul %363, %380, %cst_125 {dimension_numbers = #tpu.dot_dimension_numbers<[1], [0], [0], [1], [0, 0, 1, 1], [], []>} : vector<1x128xf32>, vector<128x128xf32>, vector<1x128xf32> -> vector<1x128xf32>
    %c0_126 = arith.constant 0 : index
    %c0_127 = arith.constant 0 : index
    %382 = vector.load %arg11[%c0_126, %c0_127] : memref<128x128xf32, #tpu.memory_space<vmem>>, vector<128x128xf32>
    %cst_128 = arith.constant dense<0.000000e+00> : vector<1x128xf32>
    %383 = tpu.matmul %379, %382, %cst_128 {dimension_numbers = #tpu.dot_dimension_numbers<[1], [0], [0], [1], [0, 0, 1, 1], [], []>} : vector<1x128xf32>, vector<128x128xf32>, vector<1x128xf32> -> vector<1x128xf32>
    %384 = arith.addf %381, %383 : vector<1x128xf32>
    %385 = arith.addf %384, %315 : vector<1x128xf32>
    %386 = math.tanh %385 : vector<1x128xf32>
    %c0_129 = arith.constant 0 : index
    %c0_130 = arith.constant 0 : index
    %387 = vector.load %arg13[%c0_129, %c0_130] : memref<128x128xf32, #tpu.memory_space<vmem>>, vector<128x128xf32>
    %cst_131 = arith.constant dense<0.000000e+00> : vector<1x128xf32>
    %388 = tpu.matmul %386, %387, %cst_131 {dimension_numbers = #tpu.dot_dimension_numbers<[1], [0], [0], [1], [0, 0, 1, 1], [], []>} : vector<1x128xf32>, vector<128x128xf32>, vector<1x128xf32> -> vector<1x128xf32>
    %389 = arith.addf %388, %316 : vector<1x128xf32>
    %cst_132 = arith.constant dense<0xFF800000> : vector<1xf32>
    %390 = vector.multi_reduction <maximumf>, %389, %cst_132 [1] : vector<1x128xf32> to vector<1xf32>
    %391 = vector.shape_cast %390 : vector<1xf32> to vector<1x1xf32>
    %392 = vector.broadcast %391 : vector<1x1xf32> to vector<1x128xf32>
    %393 = arith.cmpf oeq, %389, %392 : vector<1x128xf32>
    %c128_i32 = arith.constant 128 : i32
    %394 = vector.broadcast %c128_i32 : i32 to vector<1x128xi32>
    %395 = arith.select %393, %317, %394 : vector<1x128xi1>, vector<1x128xi32>
    %cst_133 = arith.constant dense<2147483647> : vector<1xi32>
    %396 = vector.multi_reduction <minsi>, %395, %cst_133 [1] : vector<1x128xi32> to vector<1xi32>
    %397 = vector.shape_cast %396 : vector<1xi32> to vector<1x1xi32>
    %398 = vector.broadcast %391 : vector<1x1xf32> to vector<1x128xf32>
    %399 = arith.subf %389, %398 : vector<1x128xf32>
    %400 = math.exp %399 : vector<1x128xf32>
    %cst_134 = arith.constant dense<0.000000e+00> : vector<1xf32>
    %401 = vector.multi_reduction <add>, %400, %cst_134 [1] : vector<1x128xf32> to vector<1xf32>
    %402 = vector.shape_cast %401 : vector<1xf32> to vector<1x1xf32>
    %cst_135 = arith.constant 1.000000e+00 : f32
    %403 = vector.broadcast %cst_135 : f32 to vector<1x1xf32>
    %404 = arith.divf %403, %402 : vector<1x1xf32>
    %c0_i32_136 = arith.constant 0 : i32
    %405 = vector.broadcast %c0_i32_136 : i32 to vector<1x128xi32>
    %406 = arith.cmpi eq, %318, %405 : vector<1x128xi32>
    %407 = vector.shape_cast %397 : vector<1x1xi32> to vector<1x1xi32>
    %408 = vector.broadcast %407 : vector<1x1xi32> to vector<1x128xi32>
    %409 = arith.select %406, %408, %326 : vector<1x128xi1>, vector<1x128xi32>
    %410 = vector.shape_cast %404 : vector<1x1xf32> to vector<1x1xf32>
    %411 = vector.broadcast %410 : vector<1x1xf32> to vector<1x128xf32>
    %412 = arith.select %406, %411, %327 : vector<1x128xi1>, vector<1x128xf32>
    %413 = vector.broadcast %397 : vector<1x1xi32> to vector<1x128xi32>
    %414 = arith.cmpi eq, %317, %413 : vector<1x128xi32>
    %415 = arith.extui %414 : vector<1x128xi1> to vector<1x128xi32>
    %416 = arith.sitofp %415 : vector<1x128xi32> to vector<1x128xf32>
    %c0_137 = arith.constant 0 : index
    %c0_138 = arith.constant 0 : index
    %417 = vector.load %arg6[%c0_137, %c0_138] : memref<128x384xf32, #tpu.memory_space<vmem>>, vector<128x384xf32>
    %cst_139 = arith.constant dense<0.000000e+00> : vector<1x384xf32>
    %418 = tpu.matmul %416, %417, %cst_139 {dimension_numbers = #tpu.dot_dimension_numbers<[1], [0], [0], [1], [0, 0, 1, 1], [], []>} : vector<1x128xf32>, vector<128x384xf32>, vector<1x384xf32> -> vector<1x384xf32>
    %419 = arith.addf %418, %313 : vector<1x384xf32>
    %c0_140 = arith.constant 0 : index
    %c0_141 = arith.constant 0 : index
    %420 = vector.load %arg7[%c0_140, %c0_141] : memref<128x384xf32, #tpu.memory_space<vmem>>, vector<128x384xf32>
    %cst_142 = arith.constant dense<0.000000e+00> : vector<1x384xf32>
    %421 = tpu.matmul %363, %420, %cst_142 {dimension_numbers = #tpu.dot_dimension_numbers<[1], [0], [0], [1], [0, 0, 1, 1], [], []>} : vector<1x128xf32>, vector<128x384xf32>, vector<1x384xf32> -> vector<1x384xf32>
    %422 = arith.addf %421, %314 : vector<1x384xf32>
    %423 = vector.extract_strided_slice %419 {offsets = [0, 0], sizes = [1, 128], strides = [1, 1]} : vector<1x384xf32> to vector<1x128xf32>
    %424 = vector.extract_strided_slice %422 {offsets = [0, 0], sizes = [1, 128], strides = [1, 1]} : vector<1x384xf32> to vector<1x128xf32>
    %425 = arith.addf %423, %424 : vector<1x128xf32>
    %426 = arith.negf %425 : vector<1x128xf32>
    %427 = math.exp %426 : vector<1x128xf32>
    %cst_143 = arith.constant 1.000000e+00 : f32
    %428 = vector.broadcast %cst_143 : f32 to vector<1x128xf32>
    %429 = arith.addf %428, %427 : vector<1x128xf32>
    %430 = arith.divf %428, %429 : vector<1x128xf32>
    %431 = vector.extract_strided_slice %419 {offsets = [0, 128], sizes = [1, 128], strides = [1, 1]} : vector<1x384xf32> to vector<1x128xf32>
    %432 = vector.extract_strided_slice %422 {offsets = [0, 128], sizes = [1, 128], strides = [1, 1]} : vector<1x384xf32> to vector<1x128xf32>
    %433 = arith.addf %431, %432 : vector<1x128xf32>
    %434 = arith.negf %433 : vector<1x128xf32>
    %435 = math.exp %434 : vector<1x128xf32>
    %cst_144 = arith.constant 1.000000e+00 : f32
    %436 = vector.broadcast %cst_144 : f32 to vector<1x128xf32>
    %437 = arith.addf %436, %435 : vector<1x128xf32>
    %438 = arith.divf %436, %437 : vector<1x128xf32>
    %439 = vector.extract_strided_slice %419 {offsets = [0, 256], sizes = [1, 128], strides = [1, 1]} : vector<1x384xf32> to vector<1x128xf32>
    %440 = vector.extract_strided_slice %422 {offsets = [0, 256], sizes = [1, 128], strides = [1, 1]} : vector<1x384xf32> to vector<1x128xf32>
    %441 = arith.mulf %430, %440 : vector<1x128xf32>
    %442 = arith.addf %439, %441 : vector<1x128xf32>
    %443 = math.tanh %442 : vector<1x128xf32>
    %cst_145 = arith.constant 1.000000e+00 : f32
    %444 = vector.broadcast %cst_145 : f32 to vector<1x128xf32>
    %445 = arith.subf %444, %438 : vector<1x128xf32>
    %446 = arith.mulf %445, %443 : vector<1x128xf32>
    %447 = arith.mulf %438, %363 : vector<1x128xf32>
    %448 = arith.addf %446, %447 : vector<1x128xf32>
    %c0_146 = arith.constant 0 : index
    %c0_147 = arith.constant 0 : index
    %449 = vector.load %arg18[%c0_146, %c0_147] : memref<128x128xf32, #tpu.memory_space<vmem>>, vector<128x128xf32>
    %cst_148 = arith.constant dense<0.000000e+00> : vector<1x128xf32>
    %450 = tpu.matmul %448, %449, %cst_148 {dimension_numbers = #tpu.dot_dimension_numbers<[1], [0], [0], [1], [0, 0, 1, 1], [], []>} : vector<1x128xf32>, vector<128x128xf32>, vector<1x128xf32> -> vector<1x128xf32>
    %451 = arith.addf %450, %324 : vector<1x128xf32>
    %cst_149 = arith.constant dense<0xFF800000> : vector<1xf32>
    %452 = vector.multi_reduction <maximumf>, %451, %cst_149 [1] : vector<1x128xf32> to vector<1xf32>
    %453 = vector.shape_cast %452 : vector<1xf32> to vector<1x1xf32>
    %454 = vector.broadcast %453 : vector<1x1xf32> to vector<1x128xf32>
    %455 = arith.subf %451, %454 : vector<1x128xf32>
    %456 = math.exp %455 : vector<1x128xf32>
    %cst_150 = arith.constant dense<0.000000e+00> : vector<1xf32>
    %457 = vector.multi_reduction <add>, %456, %cst_150 [1] : vector<1x128xf32> to vector<1xf32>
    %458 = vector.shape_cast %457 : vector<1xf32> to vector<1x1xf32>
    %cst_151 = arith.constant 1.000000e+00 : f32
    %459 = vector.broadcast %cst_151 : f32 to vector<1x1xf32>
    %460 = arith.divf %459, %458 : vector<1x1xf32>
    %461 = vector.broadcast %460 : vector<1x1xf32> to vector<1x128xf32>
    %462 = arith.mulf %456, %461 : vector<1x128xf32>
    %c0_152 = arith.constant 0 : index
    %c0_153 = arith.constant 0 : index
    %463 = vector.load %arg17[%c0_152, %c0_153] : memref<128x128xf32, #tpu.memory_space<vmem>>, vector<128x128xf32>
    %cst_154 = arith.constant dense<0.000000e+00> : vector<1x128xf32>
    %464 = tpu.matmul %462, %463, %cst_154 {dimension_numbers = #tpu.dot_dimension_numbers<[1], [0], [0], [1], [0, 0, 1, 1], [], []>} : vector<1x128xf32>, vector<128x128xf32>, vector<1x128xf32> -> vector<1x128xf32>
    %c0_155 = arith.constant 0 : index
    %c0_156 = arith.constant 0 : index
    %465 = vector.load %arg10[%c0_155, %c0_156] : memref<128x128xf32, #tpu.memory_space<vmem>>, vector<128x128xf32>
    %cst_157 = arith.constant dense<0.000000e+00> : vector<1x128xf32>
    %466 = tpu.matmul %448, %465, %cst_157 {dimension_numbers = #tpu.dot_dimension_numbers<[1], [0], [0], [1], [0, 0, 1, 1], [], []>} : vector<1x128xf32>, vector<128x128xf32>, vector<1x128xf32> -> vector<1x128xf32>
    %c0_158 = arith.constant 0 : index
    %c0_159 = arith.constant 0 : index
    %467 = vector.load %arg11[%c0_158, %c0_159] : memref<128x128xf32, #tpu.memory_space<vmem>>, vector<128x128xf32>
    %cst_160 = arith.constant dense<0.000000e+00> : vector<1x128xf32>
    %468 = tpu.matmul %464, %467, %cst_160 {dimension_numbers = #tpu.dot_dimension_numbers<[1], [0], [0], [1], [0, 0, 1, 1], [], []>} : vector<1x128xf32>, vector<128x128xf32>, vector<1x128xf32> -> vector<1x128xf32>
    %469 = arith.addf %466, %468 : vector<1x128xf32>
    %470 = arith.addf %469, %315 : vector<1x128xf32>
    %471 = math.tanh %470 : vector<1x128xf32>
    %c0_161 = arith.constant 0 : index
    %c0_162 = arith.constant 0 : index
    %472 = vector.load %arg13[%c0_161, %c0_162] : memref<128x128xf32, #tpu.memory_space<vmem>>, vector<128x128xf32>
    %cst_163 = arith.constant dense<0.000000e+00> : vector<1x128xf32>
    %473 = tpu.matmul %471, %472, %cst_163 {dimension_numbers = #tpu.dot_dimension_numbers<[1], [0], [0], [1], [0, 0, 1, 1], [], []>} : vector<1x128xf32>, vector<128x128xf32>, vector<1x128xf32> -> vector<1x128xf32>
    %474 = arith.addf %473, %316 : vector<1x128xf32>
    %cst_164 = arith.constant dense<0xFF800000> : vector<1xf32>
    %475 = vector.multi_reduction <maximumf>, %474, %cst_164 [1] : vector<1x128xf32> to vector<1xf32>
    %476 = vector.shape_cast %475 : vector<1xf32> to vector<1x1xf32>
    %477 = vector.broadcast %476 : vector<1x1xf32> to vector<1x128xf32>
    %478 = arith.cmpf oeq, %474, %477 : vector<1x128xf32>
    %c128_i32_165 = arith.constant 128 : i32
    %479 = vector.broadcast %c128_i32_165 : i32 to vector<1x128xi32>
    %480 = arith.select %478, %317, %479 : vector<1x128xi1>, vector<1x128xi32>
    %cst_166 = arith.constant dense<2147483647> : vector<1xi32>
    %481 = vector.multi_reduction <minsi>, %480, %cst_166 [1] : vector<1x128xi32> to vector<1xi32>
    %482 = vector.shape_cast %481 : vector<1xi32> to vector<1x1xi32>
    %483 = vector.broadcast %476 : vector<1x1xf32> to vector<1x128xf32>
    %484 = arith.subf %474, %483 : vector<1x128xf32>
    %485 = math.exp %484 : vector<1x128xf32>
    %cst_167 = arith.constant dense<0.000000e+00> : vector<1xf32>
    %486 = vector.multi_reduction <add>, %485, %cst_167 [1] : vector<1x128xf32> to vector<1xf32>
    %487 = vector.shape_cast %486 : vector<1xf32> to vector<1x1xf32>
    %cst_168 = arith.constant 1.000000e+00 : f32
    %488 = vector.broadcast %cst_168 : f32 to vector<1x1xf32>
    %489 = arith.divf %488, %487 : vector<1x1xf32>
    %c1_i32_169 = arith.constant 1 : i32
    %490 = vector.broadcast %c1_i32_169 : i32 to vector<1x128xi32>
    %491 = arith.cmpi eq, %318, %490 : vector<1x128xi32>
    %492 = vector.shape_cast %482 : vector<1x1xi32> to vector<1x1xi32>
    %493 = vector.broadcast %492 : vector<1x1xi32> to vector<1x128xi32>
    %494 = arith.select %491, %493, %409 : vector<1x128xi1>, vector<1x128xi32>
    %495 = vector.shape_cast %489 : vector<1x1xf32> to vector<1x1xf32>
    %496 = vector.broadcast %495 : vector<1x1xf32> to vector<1x128xf32>
    %497 = arith.select %491, %496, %412 : vector<1x128xi1>, vector<1x128xf32>
    %498 = vector.broadcast %482 : vector<1x1xi32> to vector<1x128xi32>
    %499 = arith.cmpi eq, %317, %498 : vector<1x128xi32>
    %500 = arith.extui %499 : vector<1x128xi1> to vector<1x128xi32>
    %501 = arith.sitofp %500 : vector<1x128xi32> to vector<1x128xf32>
    %c0_170 = arith.constant 0 : index
    %c0_171 = arith.constant 0 : index
    %502 = vector.load %arg6[%c0_170, %c0_171] : memref<128x384xf32, #tpu.memory_space<vmem>>, vector<128x384xf32>
    %cst_172 = arith.constant dense<0.000000e+00> : vector<1x384xf32>
    %503 = tpu.matmul %501, %502, %cst_172 {dimension_numbers = #tpu.dot_dimension_numbers<[1], [0], [0], [1], [0, 0, 1, 1], [], []>} : vector<1x128xf32>, vector<128x384xf32>, vector<1x384xf32> -> vector<1x384xf32>
    %504 = arith.addf %503, %313 : vector<1x384xf32>
    %c0_173 = arith.constant 0 : index
    %c0_174 = arith.constant 0 : index
    %505 = vector.load %arg7[%c0_173, %c0_174] : memref<128x384xf32, #tpu.memory_space<vmem>>, vector<128x384xf32>
    %cst_175 = arith.constant dense<0.000000e+00> : vector<1x384xf32>
    %506 = tpu.matmul %448, %505, %cst_175 {dimension_numbers = #tpu.dot_dimension_numbers<[1], [0], [0], [1], [0, 0, 1, 1], [], []>} : vector<1x128xf32>, vector<128x384xf32>, vector<1x384xf32> -> vector<1x384xf32>
    %507 = arith.addf %506, %314 : vector<1x384xf32>
    %508 = vector.extract_strided_slice %504 {offsets = [0, 0], sizes = [1, 128], strides = [1, 1]} : vector<1x384xf32> to vector<1x128xf32>
    %509 = vector.extract_strided_slice %507 {offsets = [0, 0], sizes = [1, 128], strides = [1, 1]} : vector<1x384xf32> to vector<1x128xf32>
    %510 = arith.addf %508, %509 : vector<1x128xf32>
    %511 = arith.negf %510 : vector<1x128xf32>
    %512 = math.exp %511 : vector<1x128xf32>
    %cst_176 = arith.constant 1.000000e+00 : f32
    %513 = vector.broadcast %cst_176 : f32 to vector<1x128xf32>
    %514 = arith.addf %513, %512 : vector<1x128xf32>
    %515 = arith.divf %513, %514 : vector<1x128xf32>
    %516 = vector.extract_strided_slice %504 {offsets = [0, 128], sizes = [1, 128], strides = [1, 1]} : vector<1x384xf32> to vector<1x128xf32>
    %517 = vector.extract_strided_slice %507 {offsets = [0, 128], sizes = [1, 128], strides = [1, 1]} : vector<1x384xf32> to vector<1x128xf32>
    %518 = arith.addf %516, %517 : vector<1x128xf32>
    %519 = arith.negf %518 : vector<1x128xf32>
    %520 = math.exp %519 : vector<1x128xf32>
    %cst_177 = arith.constant 1.000000e+00 : f32
    %521 = vector.broadcast %cst_177 : f32 to vector<1x128xf32>
    %522 = arith.addf %521, %520 : vector<1x128xf32>
    %523 = arith.divf %521, %522 : vector<1x128xf32>
    %524 = vector.extract_strided_slice %504 {offsets = [0, 256], sizes = [1, 128], strides = [1, 1]} : vector<1x384xf32> to vector<1x128xf32>
    %525 = vector.extract_strided_slice %507 {offsets = [0, 256], sizes = [1, 128], strides = [1, 1]} : vector<1x384xf32> to vector<1x128xf32>
    %526 = arith.mulf %515, %525 : vector<1x128xf32>
    %527 = arith.addf %524, %526 : vector<1x128xf32>
    %528 = math.tanh %527 : vector<1x128xf32>
    %cst_178 = arith.constant 1.000000e+00 : f32
    %529 = vector.broadcast %cst_178 : f32 to vector<1x128xf32>
    %530 = arith.subf %529, %523 : vector<1x128xf32>
    %531 = arith.mulf %530, %528 : vector<1x128xf32>
    %532 = arith.mulf %523, %448 : vector<1x128xf32>
    %533 = arith.addf %531, %532 : vector<1x128xf32>
    %c0_179 = arith.constant 0 : index
    %c0_180 = arith.constant 0 : index
    %534 = vector.load %arg18[%c0_179, %c0_180] : memref<128x128xf32, #tpu.memory_space<vmem>>, vector<128x128xf32>
    %cst_181 = arith.constant dense<0.000000e+00> : vector<1x128xf32>
    %535 = tpu.matmul %533, %534, %cst_181 {dimension_numbers = #tpu.dot_dimension_numbers<[1], [0], [0], [1], [0, 0, 1, 1], [], []>} : vector<1x128xf32>, vector<128x128xf32>, vector<1x128xf32> -> vector<1x128xf32>
    %536 = arith.addf %535, %324 : vector<1x128xf32>
    %cst_182 = arith.constant dense<0xFF800000> : vector<1xf32>
    %537 = vector.multi_reduction <maximumf>, %536, %cst_182 [1] : vector<1x128xf32> to vector<1xf32>
    %538 = vector.shape_cast %537 : vector<1xf32> to vector<1x1xf32>
    %539 = vector.broadcast %538 : vector<1x1xf32> to vector<1x128xf32>
    %540 = arith.subf %536, %539 : vector<1x128xf32>
    %541 = math.exp %540 : vector<1x128xf32>
    %cst_183 = arith.constant dense<0.000000e+00> : vector<1xf32>
    %542 = vector.multi_reduction <add>, %541, %cst_183 [1] : vector<1x128xf32> to vector<1xf32>
    %543 = vector.shape_cast %542 : vector<1xf32> to vector<1x1xf32>
    %cst_184 = arith.constant 1.000000e+00 : f32
    %544 = vector.broadcast %cst_184 : f32 to vector<1x1xf32>
    %545 = arith.divf %544, %543 : vector<1x1xf32>
    %546 = vector.broadcast %545 : vector<1x1xf32> to vector<1x128xf32>
    %547 = arith.mulf %541, %546 : vector<1x128xf32>
    %c0_185 = arith.constant 0 : index
    %c0_186 = arith.constant 0 : index
    %548 = vector.load %arg17[%c0_185, %c0_186] : memref<128x128xf32, #tpu.memory_space<vmem>>, vector<128x128xf32>
    %cst_187 = arith.constant dense<0.000000e+00> : vector<1x128xf32>
    %549 = tpu.matmul %547, %548, %cst_187 {dimension_numbers = #tpu.dot_dimension_numbers<[1], [0], [0], [1], [0, 0, 1, 1], [], []>} : vector<1x128xf32>, vector<128x128xf32>, vector<1x128xf32> -> vector<1x128xf32>
    %c0_188 = arith.constant 0 : index
    %c0_189 = arith.constant 0 : index
    %550 = vector.load %arg10[%c0_188, %c0_189] : memref<128x128xf32, #tpu.memory_space<vmem>>, vector<128x128xf32>
    %cst_190 = arith.constant dense<0.000000e+00> : vector<1x128xf32>
    %551 = tpu.matmul %533, %550, %cst_190 {dimension_numbers = #tpu.dot_dimension_numbers<[1], [0], [0], [1], [0, 0, 1, 1], [], []>} : vector<1x128xf32>, vector<128x128xf32>, vector<1x128xf32> -> vector<1x128xf32>
    %c0_191 = arith.constant 0 : index
    %c0_192 = arith.constant 0 : index
    %552 = vector.load %arg11[%c0_191, %c0_192] : memref<128x128xf32, #tpu.memory_space<vmem>>, vector<128x128xf32>
    %cst_193 = arith.constant dense<0.000000e+00> : vector<1x128xf32>
    %553 = tpu.matmul %549, %552, %cst_193 {dimension_numbers = #tpu.dot_dimension_numbers<[1], [0], [0], [1], [0, 0, 1, 1], [], []>} : vector<1x128xf32>, vector<128x128xf32>, vector<1x128xf32> -> vector<1x128xf32>
    %554 = arith.addf %551, %553 : vector<1x128xf32>
    %555 = arith.addf %554, %315 : vector<1x128xf32>
    %556 = math.tanh %555 : vector<1x128xf32>
    %c0_194 = arith.constant 0 : index
    %c0_195 = arith.constant 0 : index
    %557 = vector.load %arg13[%c0_194, %c0_195] : memref<128x128xf32, #tpu.memory_space<vmem>>, vector<128x128xf32>
    %cst_196 = arith.constant dense<0.000000e+00> : vector<1x128xf32>
    %558 = tpu.matmul %556, %557, %cst_196 {dimension_numbers = #tpu.dot_dimension_numbers<[1], [0], [0], [1], [0, 0, 1, 1], [], []>} : vector<1x128xf32>, vector<128x128xf32>, vector<1x128xf32> -> vector<1x128xf32>
    %559 = arith.addf %558, %316 : vector<1x128xf32>
    %cst_197 = arith.constant dense<0xFF800000> : vector<1xf32>
    %560 = vector.multi_reduction <maximumf>, %559, %cst_197 [1] : vector<1x128xf32> to vector<1xf32>
    %561 = vector.shape_cast %560 : vector<1xf32> to vector<1x1xf32>
    %562 = vector.broadcast %561 : vector<1x1xf32> to vector<1x128xf32>
    %563 = arith.cmpf oeq, %559, %562 : vector<1x128xf32>
    %c128_i32_198 = arith.constant 128 : i32
    %564 = vector.broadcast %c128_i32_198 : i32 to vector<1x128xi32>
    %565 = arith.select %563, %317, %564 : vector<1x128xi1>, vector<1x128xi32>
    %cst_199 = arith.constant dense<2147483647> : vector<1xi32>
    %566 = vector.multi_reduction <minsi>, %565, %cst_199 [1] : vector<1x128xi32> to vector<1xi32>
    %567 = vector.shape_cast %566 : vector<1xi32> to vector<1x1xi32>
    %568 = vector.broadcast %561 : vector<1x1xf32> to vector<1x128xf32>
    %569 = arith.subf %559, %568 : vector<1x128xf32>
    %570 = math.exp %569 : vector<1x128xf32>
    %cst_200 = arith.constant dense<0.000000e+00> : vector<1xf32>
    %571 = vector.multi_reduction <add>, %570, %cst_200 [1] : vector<1x128xf32> to vector<1xf32>
    %572 = vector.shape_cast %571 : vector<1xf32> to vector<1x1xf32>
    %cst_201 = arith.constant 1.000000e+00 : f32
    %573 = vector.broadcast %cst_201 : f32 to vector<1x1xf32>
    %574 = arith.divf %573, %572 : vector<1x1xf32>
    %c2_i32_202 = arith.constant 2 : i32
    %575 = vector.broadcast %c2_i32_202 : i32 to vector<1x128xi32>
    %576 = arith.cmpi eq, %318, %575 : vector<1x128xi32>
    %577 = vector.shape_cast %567 : vector<1x1xi32> to vector<1x1xi32>
    %578 = vector.broadcast %577 : vector<1x1xi32> to vector<1x128xi32>
    %579 = arith.select %576, %578, %494 : vector<1x128xi1>, vector<1x128xi32>
    %580 = vector.shape_cast %574 : vector<1x1xf32> to vector<1x1xf32>
    %581 = vector.broadcast %580 : vector<1x1xf32> to vector<1x128xf32>
    %582 = arith.select %576, %581, %497 : vector<1x128xi1>, vector<1x128xf32>
    %583 = vector.broadcast %567 : vector<1x1xi32> to vector<1x128xi32>
    %584 = arith.cmpi eq, %317, %583 : vector<1x128xi32>
    %585 = arith.extui %584 : vector<1x128xi1> to vector<1x128xi32>
    %586 = arith.sitofp %585 : vector<1x128xi32> to vector<1x128xf32>
    %c0_203 = arith.constant 0 : index
    %c0_204 = arith.constant 0 : index
    %587 = vector.load %arg6[%c0_203, %c0_204] : memref<128x384xf32, #tpu.memory_space<vmem>>, vector<128x384xf32>
    %cst_205 = arith.constant dense<0.000000e+00> : vector<1x384xf32>
    %588 = tpu.matmul %586, %587, %cst_205 {dimension_numbers = #tpu.dot_dimension_numbers<[1], [0], [0], [1], [0, 0, 1, 1], [], []>} : vector<1x128xf32>, vector<128x384xf32>, vector<1x384xf32> -> vector<1x384xf32>
    %589 = arith.addf %588, %313 : vector<1x384xf32>
    %c0_206 = arith.constant 0 : index
    %c0_207 = arith.constant 0 : index
    %590 = vector.load %arg7[%c0_206, %c0_207] : memref<128x384xf32, #tpu.memory_space<vmem>>, vector<128x384xf32>
    %cst_208 = arith.constant dense<0.000000e+00> : vector<1x384xf32>
    %591 = tpu.matmul %533, %590, %cst_208 {dimension_numbers = #tpu.dot_dimension_numbers<[1], [0], [0], [1], [0, 0, 1, 1], [], []>} : vector<1x128xf32>, vector<128x384xf32>, vector<1x384xf32> -> vector<1x384xf32>
    %592 = arith.addf %591, %314 : vector<1x384xf32>
    %593 = vector.extract_strided_slice %589 {offsets = [0, 0], sizes = [1, 128], strides = [1, 1]} : vector<1x384xf32> to vector<1x128xf32>
    %594 = vector.extract_strided_slice %592 {offsets = [0, 0], sizes = [1, 128], strides = [1, 1]} : vector<1x384xf32> to vector<1x128xf32>
    %595 = arith.addf %593, %594 : vector<1x128xf32>
    %596 = arith.negf %595 : vector<1x128xf32>
    %597 = math.exp %596 : vector<1x128xf32>
    %cst_209 = arith.constant 1.000000e+00 : f32
    %598 = vector.broadcast %cst_209 : f32 to vector<1x128xf32>
    %599 = arith.addf %598, %597 : vector<1x128xf32>
    %600 = arith.divf %598, %599 : vector<1x128xf32>
    %601 = vector.extract_strided_slice %589 {offsets = [0, 128], sizes = [1, 128], strides = [1, 1]} : vector<1x384xf32> to vector<1x128xf32>
    %602 = vector.extract_strided_slice %592 {offsets = [0, 128], sizes = [1, 128], strides = [1, 1]} : vector<1x384xf32> to vector<1x128xf32>
    %603 = arith.addf %601, %602 : vector<1x128xf32>
    %604 = arith.negf %603 : vector<1x128xf32>
    %605 = math.exp %604 : vector<1x128xf32>
    %cst_210 = arith.constant 1.000000e+00 : f32
    %606 = vector.broadcast %cst_210 : f32 to vector<1x128xf32>
    %607 = arith.addf %606, %605 : vector<1x128xf32>
    %608 = arith.divf %606, %607 : vector<1x128xf32>
    %609 = vector.extract_strided_slice %589 {offsets = [0, 256], sizes = [1, 128], strides = [1, 1]} : vector<1x384xf32> to vector<1x128xf32>
    %610 = vector.extract_strided_slice %592 {offsets = [0, 256], sizes = [1, 128], strides = [1, 1]} : vector<1x384xf32> to vector<1x128xf32>
    %611 = arith.mulf %600, %610 : vector<1x128xf32>
    %612 = arith.addf %609, %611 : vector<1x128xf32>
    %613 = math.tanh %612 : vector<1x128xf32>
    %cst_211 = arith.constant 1.000000e+00 : f32
    %614 = vector.broadcast %cst_211 : f32 to vector<1x128xf32>
    %615 = arith.subf %614, %608 : vector<1x128xf32>
    %616 = arith.mulf %615, %613 : vector<1x128xf32>
    %617 = arith.mulf %608, %533 : vector<1x128xf32>
    %618 = arith.addf %616, %617 : vector<1x128xf32>
    %c0_212 = arith.constant 0 : index
    %c0_213 = arith.constant 0 : index
    %619 = vector.load %arg18[%c0_212, %c0_213] : memref<128x128xf32, #tpu.memory_space<vmem>>, vector<128x128xf32>
    %cst_214 = arith.constant dense<0.000000e+00> : vector<1x128xf32>
    %620 = tpu.matmul %618, %619, %cst_214 {dimension_numbers = #tpu.dot_dimension_numbers<[1], [0], [0], [1], [0, 0, 1, 1], [], []>} : vector<1x128xf32>, vector<128x128xf32>, vector<1x128xf32> -> vector<1x128xf32>
    %621 = arith.addf %620, %324 : vector<1x128xf32>
    %cst_215 = arith.constant dense<0xFF800000> : vector<1xf32>
    %622 = vector.multi_reduction <maximumf>, %621, %cst_215 [1] : vector<1x128xf32> to vector<1xf32>
    %623 = vector.shape_cast %622 : vector<1xf32> to vector<1x1xf32>
    %624 = vector.broadcast %623 : vector<1x1xf32> to vector<1x128xf32>
    %625 = arith.subf %621, %624 : vector<1x128xf32>
    %626 = math.exp %625 : vector<1x128xf32>
    %cst_216 = arith.constant dense<0.000000e+00> : vector<1xf32>
    %627 = vector.multi_reduction <add>, %626, %cst_216 [1] : vector<1x128xf32> to vector<1xf32>
    %628 = vector.shape_cast %627 : vector<1xf32> to vector<1x1xf32>
    %cst_217 = arith.constant 1.000000e+00 : f32
    %629 = vector.broadcast %cst_217 : f32 to vector<1x1xf32>
    %630 = arith.divf %629, %628 : vector<1x1xf32>
    %631 = vector.broadcast %630 : vector<1x1xf32> to vector<1x128xf32>
    %632 = arith.mulf %626, %631 : vector<1x128xf32>
    %c0_218 = arith.constant 0 : index
    %c0_219 = arith.constant 0 : index
    %633 = vector.load %arg17[%c0_218, %c0_219] : memref<128x128xf32, #tpu.memory_space<vmem>>, vector<128x128xf32>
    %cst_220 = arith.constant dense<0.000000e+00> : vector<1x128xf32>
    %634 = tpu.matmul %632, %633, %cst_220 {dimension_numbers = #tpu.dot_dimension_numbers<[1], [0], [0], [1], [0, 0, 1, 1], [], []>} : vector<1x128xf32>, vector<128x128xf32>, vector<1x128xf32> -> vector<1x128xf32>
    %c0_221 = arith.constant 0 : index
    %c0_222 = arith.constant 0 : index
    %635 = vector.load %arg10[%c0_221, %c0_222] : memref<128x128xf32, #tpu.memory_space<vmem>>, vector<128x128xf32>
    %cst_223 = arith.constant dense<0.000000e+00> : vector<1x128xf32>
    %636 = tpu.matmul %618, %635, %cst_223 {dimension_numbers = #tpu.dot_dimension_numbers<[1], [0], [0], [1], [0, 0, 1, 1], [], []>} : vector<1x128xf32>, vector<128x128xf32>, vector<1x128xf32> -> vector<1x128xf32>
    %c0_224 = arith.constant 0 : index
    %c0_225 = arith.constant 0 : index
    %637 = vector.load %arg11[%c0_224, %c0_225] : memref<128x128xf32, #tpu.memory_space<vmem>>, vector<128x128xf32>
    %cst_226 = arith.constant dense<0.000000e+00> : vector<1x128xf32>
    %638 = tpu.matmul %634, %637, %cst_226 {dimension_numbers = #tpu.dot_dimension_numbers<[1], [0], [0], [1], [0, 0, 1, 1], [], []>} : vector<1x128xf32>, vector<128x128xf32>, vector<1x128xf32> -> vector<1x128xf32>
    %639 = arith.addf %636, %638 : vector<1x128xf32>
    %640 = arith.addf %639, %315 : vector<1x128xf32>
    %641 = math.tanh %640 : vector<1x128xf32>
    %c0_227 = arith.constant 0 : index
    %c0_228 = arith.constant 0 : index
    %642 = vector.load %arg13[%c0_227, %c0_228] : memref<128x128xf32, #tpu.memory_space<vmem>>, vector<128x128xf32>
    %cst_229 = arith.constant dense<0.000000e+00> : vector<1x128xf32>
    %643 = tpu.matmul %641, %642, %cst_229 {dimension_numbers = #tpu.dot_dimension_numbers<[1], [0], [0], [1], [0, 0, 1, 1], [], []>} : vector<1x128xf32>, vector<128x128xf32>, vector<1x128xf32> -> vector<1x128xf32>
    %644 = arith.addf %643, %316 : vector<1x128xf32>
    %cst_230 = arith.constant dense<0xFF800000> : vector<1xf32>
    %645 = vector.multi_reduction <maximumf>, %644, %cst_230 [1] : vector<1x128xf32> to vector<1xf32>
    %646 = vector.shape_cast %645 : vector<1xf32> to vector<1x1xf32>
    %647 = vector.broadcast %646 : vector<1x1xf32> to vector<1x128xf32>
    %648 = arith.cmpf oeq, %644, %647 : vector<1x128xf32>
    %c128_i32_231 = arith.constant 128 : i32
    %649 = vector.broadcast %c128_i32_231 : i32 to vector<1x128xi32>
    %650 = arith.select %648, %317, %649 : vector<1x128xi1>, vector<1x128xi32>
    %cst_232 = arith.constant dense<2147483647> : vector<1xi32>
    %651 = vector.multi_reduction <minsi>, %650, %cst_232 [1] : vector<1x128xi32> to vector<1xi32>
    %652 = vector.shape_cast %651 : vector<1xi32> to vector<1x1xi32>
    %653 = vector.broadcast %646 : vector<1x1xf32> to vector<1x128xf32>
    %654 = arith.subf %644, %653 : vector<1x128xf32>
    %655 = math.exp %654 : vector<1x128xf32>
    %cst_233 = arith.constant dense<0.000000e+00> : vector<1xf32>
    %656 = vector.multi_reduction <add>, %655, %cst_233 [1] : vector<1x128xf32> to vector<1xf32>
    %657 = vector.shape_cast %656 : vector<1xf32> to vector<1x1xf32>
    %cst_234 = arith.constant 1.000000e+00 : f32
    %658 = vector.broadcast %cst_234 : f32 to vector<1x1xf32>
    %659 = arith.divf %658, %657 : vector<1x1xf32>
    %c3_i32_235 = arith.constant 3 : i32
    %660 = vector.broadcast %c3_i32_235 : i32 to vector<1x128xi32>
    %661 = arith.cmpi eq, %318, %660 : vector<1x128xi32>
    %662 = vector.shape_cast %652 : vector<1x1xi32> to vector<1x1xi32>
    %663 = vector.broadcast %662 : vector<1x1xi32> to vector<1x128xi32>
    %664 = arith.select %661, %663, %579 : vector<1x128xi1>, vector<1x128xi32>
    %665 = vector.shape_cast %659 : vector<1x1xf32> to vector<1x1xf32>
    %666 = vector.broadcast %665 : vector<1x1xf32> to vector<1x128xf32>
    %667 = arith.select %661, %666, %582 : vector<1x128xi1>, vector<1x128xf32>
    %668 = vector.broadcast %652 : vector<1x1xi32> to vector<1x128xi32>
    %669 = arith.cmpi eq, %317, %668 : vector<1x128xi32>
    %670 = arith.extui %669 : vector<1x128xi1> to vector<1x128xi32>
    %671 = arith.sitofp %670 : vector<1x128xi32> to vector<1x128xf32>
    %c0_236 = arith.constant 0 : index
    %c0_237 = arith.constant 0 : index
    %672 = vector.load %arg6[%c0_236, %c0_237] : memref<128x384xf32, #tpu.memory_space<vmem>>, vector<128x384xf32>
    %cst_238 = arith.constant dense<0.000000e+00> : vector<1x384xf32>
    %673 = tpu.matmul %671, %672, %cst_238 {dimension_numbers = #tpu.dot_dimension_numbers<[1], [0], [0], [1], [0, 0, 1, 1], [], []>} : vector<1x128xf32>, vector<128x384xf32>, vector<1x384xf32> -> vector<1x384xf32>
    %674 = arith.addf %673, %313 : vector<1x384xf32>
    %c0_239 = arith.constant 0 : index
    %c0_240 = arith.constant 0 : index
    %675 = vector.load %arg7[%c0_239, %c0_240] : memref<128x384xf32, #tpu.memory_space<vmem>>, vector<128x384xf32>
    %cst_241 = arith.constant dense<0.000000e+00> : vector<1x384xf32>
    %676 = tpu.matmul %618, %675, %cst_241 {dimension_numbers = #tpu.dot_dimension_numbers<[1], [0], [0], [1], [0, 0, 1, 1], [], []>} : vector<1x128xf32>, vector<128x384xf32>, vector<1x384xf32> -> vector<1x384xf32>
    %677 = arith.addf %676, %314 : vector<1x384xf32>
    %678 = vector.extract_strided_slice %674 {offsets = [0, 0], sizes = [1, 128], strides = [1, 1]} : vector<1x384xf32> to vector<1x128xf32>
    %679 = vector.extract_strided_slice %677 {offsets = [0, 0], sizes = [1, 128], strides = [1, 1]} : vector<1x384xf32> to vector<1x128xf32>
    %680 = arith.addf %678, %679 : vector<1x128xf32>
    %681 = arith.negf %680 : vector<1x128xf32>
    %682 = math.exp %681 : vector<1x128xf32>
    %cst_242 = arith.constant 1.000000e+00 : f32
    %683 = vector.broadcast %cst_242 : f32 to vector<1x128xf32>
    %684 = arith.addf %683, %682 : vector<1x128xf32>
    %685 = arith.divf %683, %684 : vector<1x128xf32>
    %686 = vector.extract_strided_slice %674 {offsets = [0, 128], sizes = [1, 128], strides = [1, 1]} : vector<1x384xf32> to vector<1x128xf32>
    %687 = vector.extract_strided_slice %677 {offsets = [0, 128], sizes = [1, 128], strides = [1, 1]} : vector<1x384xf32> to vector<1x128xf32>
    %688 = arith.addf %686, %687 : vector<1x128xf32>
    %689 = arith.negf %688 : vector<1x128xf32>
    %690 = math.exp %689 : vector<1x128xf32>
    %cst_243 = arith.constant 1.000000e+00 : f32
    %691 = vector.broadcast %cst_243 : f32 to vector<1x128xf32>
    %692 = arith.addf %691, %690 : vector<1x128xf32>
    %693 = arith.divf %691, %692 : vector<1x128xf32>
    %694 = vector.extract_strided_slice %674 {offsets = [0, 256], sizes = [1, 128], strides = [1, 1]} : vector<1x384xf32> to vector<1x128xf32>
    %695 = vector.extract_strided_slice %677 {offsets = [0, 256], sizes = [1, 128], strides = [1, 1]} : vector<1x384xf32> to vector<1x128xf32>
    %696 = arith.mulf %685, %695 : vector<1x128xf32>
    %697 = arith.addf %694, %696 : vector<1x128xf32>
    %698 = math.tanh %697 : vector<1x128xf32>
    %cst_244 = arith.constant 1.000000e+00 : f32
    %699 = vector.broadcast %cst_244 : f32 to vector<1x128xf32>
    %700 = arith.subf %699, %693 : vector<1x128xf32>
    %701 = arith.mulf %700, %698 : vector<1x128xf32>
    %702 = arith.mulf %693, %618 : vector<1x128xf32>
    %703 = arith.addf %701, %702 : vector<1x128xf32>
    %c0_245 = arith.constant 0 : index
    %c0_246 = arith.constant 0 : index
    %704 = vector.load %arg18[%c0_245, %c0_246] : memref<128x128xf32, #tpu.memory_space<vmem>>, vector<128x128xf32>
    %cst_247 = arith.constant dense<0.000000e+00> : vector<1x128xf32>
    %705 = tpu.matmul %703, %704, %cst_247 {dimension_numbers = #tpu.dot_dimension_numbers<[1], [0], [0], [1], [0, 0, 1, 1], [], []>} : vector<1x128xf32>, vector<128x128xf32>, vector<1x128xf32> -> vector<1x128xf32>
    %706 = arith.addf %705, %324 : vector<1x128xf32>
    %cst_248 = arith.constant dense<0xFF800000> : vector<1xf32>
    %707 = vector.multi_reduction <maximumf>, %706, %cst_248 [1] : vector<1x128xf32> to vector<1xf32>
    %708 = vector.shape_cast %707 : vector<1xf32> to vector<1x1xf32>
    %709 = vector.broadcast %708 : vector<1x1xf32> to vector<1x128xf32>
    %710 = arith.subf %706, %709 : vector<1x128xf32>
    %711 = math.exp %710 : vector<1x128xf32>
    %cst_249 = arith.constant dense<0.000000e+00> : vector<1xf32>
    %712 = vector.multi_reduction <add>, %711, %cst_249 [1] : vector<1x128xf32> to vector<1xf32>
    %713 = vector.shape_cast %712 : vector<1xf32> to vector<1x1xf32>
    %cst_250 = arith.constant 1.000000e+00 : f32
    %714 = vector.broadcast %cst_250 : f32 to vector<1x1xf32>
    %715 = arith.divf %714, %713 : vector<1x1xf32>
    %716 = vector.broadcast %715 : vector<1x1xf32> to vector<1x128xf32>
    %717 = arith.mulf %711, %716 : vector<1x128xf32>
    %c0_251 = arith.constant 0 : index
    %c0_252 = arith.constant 0 : index
    %718 = vector.load %arg17[%c0_251, %c0_252] : memref<128x128xf32, #tpu.memory_space<vmem>>, vector<128x128xf32>
    %cst_253 = arith.constant dense<0.000000e+00> : vector<1x128xf32>
    %719 = tpu.matmul %717, %718, %cst_253 {dimension_numbers = #tpu.dot_dimension_numbers<[1], [0], [0], [1], [0, 0, 1, 1], [], []>} : vector<1x128xf32>, vector<128x128xf32>, vector<1x128xf32> -> vector<1x128xf32>
    %c0_254 = arith.constant 0 : index
    %c0_255 = arith.constant 0 : index
    %720 = vector.load %arg10[%c0_254, %c0_255] : memref<128x128xf32, #tpu.memory_space<vmem>>, vector<128x128xf32>
    %cst_256 = arith.constant dense<0.000000e+00> : vector<1x128xf32>
    %721 = tpu.matmul %703, %720, %cst_256 {dimension_numbers = #tpu.dot_dimension_numbers<[1], [0], [0], [1], [0, 0, 1, 1], [], []>} : vector<1x128xf32>, vector<128x128xf32>, vector<1x128xf32> -> vector<1x128xf32>
    %c0_257 = arith.constant 0 : index
    %c0_258 = arith.constant 0 : index
    %722 = vector.load %arg11[%c0_257, %c0_258] : memref<128x128xf32, #tpu.memory_space<vmem>>, vector<128x128xf32>
    %cst_259 = arith.constant dense<0.000000e+00> : vector<1x128xf32>
    %723 = tpu.matmul %719, %722, %cst_259 {dimension_numbers = #tpu.dot_dimension_numbers<[1], [0], [0], [1], [0, 0, 1, 1], [], []>} : vector<1x128xf32>, vector<128x128xf32>, vector<1x128xf32> -> vector<1x128xf32>
    %724 = arith.addf %721, %723 : vector<1x128xf32>
    %725 = arith.addf %724, %315 : vector<1x128xf32>
    %726 = math.tanh %725 : vector<1x128xf32>
    %c0_260 = arith.constant 0 : index
    %c0_261 = arith.constant 0 : index
    %727 = vector.load %arg13[%c0_260, %c0_261] : memref<128x128xf32, #tpu.memory_space<vmem>>, vector<128x128xf32>
    %cst_262 = arith.constant dense<0.000000e+00> : vector<1x128xf32>
    %728 = tpu.matmul %726, %727, %cst_262 {dimension_numbers = #tpu.dot_dimension_numbers<[1], [0], [0], [1], [0, 0, 1, 1], [], []>} : vector<1x128xf32>, vector<128x128xf32>, vector<1x128xf32> -> vector<1x128xf32>
    %729 = arith.addf %728, %316 : vector<1x128xf32>
    %cst_263 = arith.constant dense<0xFF800000> : vector<1xf32>
    %730 = vector.multi_reduction <maximumf>, %729, %cst_263 [1] : vector<1x128xf32> to vector<1xf32>
    %731 = vector.shape_cast %730 : vector<1xf32> to vector<1x1xf32>
    %732 = vector.broadcast %731 : vector<1x1xf32> to vector<1x128xf32>
    %733 = arith.cmpf oeq, %729, %732 : vector<1x128xf32>
    %c128_i32_264 = arith.constant 128 : i32
    %734 = vector.broadcast %c128_i32_264 : i32 to vector<1x128xi32>
    %735 = arith.select %733, %317, %734 : vector<1x128xi1>, vector<1x128xi32>
    %cst_265 = arith.constant dense<2147483647> : vector<1xi32>
    %736 = vector.multi_reduction <minsi>, %735, %cst_265 [1] : vector<1x128xi32> to vector<1xi32>
    %737 = vector.shape_cast %736 : vector<1xi32> to vector<1x1xi32>
    %738 = vector.broadcast %731 : vector<1x1xf32> to vector<1x128xf32>
    %739 = arith.subf %729, %738 : vector<1x128xf32>
    %740 = math.exp %739 : vector<1x128xf32>
    %cst_266 = arith.constant dense<0.000000e+00> : vector<1xf32>
    %741 = vector.multi_reduction <add>, %740, %cst_266 [1] : vector<1x128xf32> to vector<1xf32>
    %742 = vector.shape_cast %741 : vector<1xf32> to vector<1x1xf32>
    %cst_267 = arith.constant 1.000000e+00 : f32
    %743 = vector.broadcast %cst_267 : f32 to vector<1x1xf32>
    %744 = arith.divf %743, %742 : vector<1x1xf32>
    %c4_i32_268 = arith.constant 4 : i32
    %745 = vector.broadcast %c4_i32_268 : i32 to vector<1x128xi32>
    %746 = arith.cmpi eq, %318, %745 : vector<1x128xi32>
    %747 = vector.shape_cast %737 : vector<1x1xi32> to vector<1x1xi32>
    %748 = vector.broadcast %747 : vector<1x1xi32> to vector<1x128xi32>
    %749 = arith.select %746, %748, %664 : vector<1x128xi1>, vector<1x128xi32>
    %750 = vector.shape_cast %744 : vector<1x1xf32> to vector<1x1xf32>
    %751 = vector.broadcast %750 : vector<1x1xf32> to vector<1x128xf32>
    %752 = arith.select %746, %751, %667 : vector<1x128xi1>, vector<1x128xf32>
    %753 = vector.broadcast %737 : vector<1x1xi32> to vector<1x128xi32>
    %754 = arith.cmpi eq, %317, %753 : vector<1x128xi32>
    %755 = arith.extui %754 : vector<1x128xi1> to vector<1x128xi32>
    %756 = arith.sitofp %755 : vector<1x128xi32> to vector<1x128xf32>
    %c0_269 = arith.constant 0 : index
    %c0_270 = arith.constant 0 : index
    %757 = vector.load %arg6[%c0_269, %c0_270] : memref<128x384xf32, #tpu.memory_space<vmem>>, vector<128x384xf32>
    %cst_271 = arith.constant dense<0.000000e+00> : vector<1x384xf32>
    %758 = tpu.matmul %756, %757, %cst_271 {dimension_numbers = #tpu.dot_dimension_numbers<[1], [0], [0], [1], [0, 0, 1, 1], [], []>} : vector<1x128xf32>, vector<128x384xf32>, vector<1x384xf32> -> vector<1x384xf32>
    %759 = arith.addf %758, %313 : vector<1x384xf32>
    %c0_272 = arith.constant 0 : index
    %c0_273 = arith.constant 0 : index
    %760 = vector.load %arg7[%c0_272, %c0_273] : memref<128x384xf32, #tpu.memory_space<vmem>>, vector<128x384xf32>
    %cst_274 = arith.constant dense<0.000000e+00> : vector<1x384xf32>
    %761 = tpu.matmul %703, %760, %cst_274 {dimension_numbers = #tpu.dot_dimension_numbers<[1], [0], [0], [1], [0, 0, 1, 1], [], []>} : vector<1x128xf32>, vector<128x384xf32>, vector<1x384xf32> -> vector<1x384xf32>
    %762 = arith.addf %761, %314 : vector<1x384xf32>
    %763 = vector.extract_strided_slice %759 {offsets = [0, 0], sizes = [1, 128], strides = [1, 1]} : vector<1x384xf32> to vector<1x128xf32>
    %764 = vector.extract_strided_slice %762 {offsets = [0, 0], sizes = [1, 128], strides = [1, 1]} : vector<1x384xf32> to vector<1x128xf32>
    %765 = arith.addf %763, %764 : vector<1x128xf32>
    %766 = arith.negf %765 : vector<1x128xf32>
    %767 = math.exp %766 : vector<1x128xf32>
    %cst_275 = arith.constant 1.000000e+00 : f32
    %768 = vector.broadcast %cst_275 : f32 to vector<1x128xf32>
    %769 = arith.addf %768, %767 : vector<1x128xf32>
    %770 = arith.divf %768, %769 : vector<1x128xf32>
    %771 = vector.extract_strided_slice %759 {offsets = [0, 128], sizes = [1, 128], strides = [1, 1]} : vector<1x384xf32> to vector<1x128xf32>
    %772 = vector.extract_strided_slice %762 {offsets = [0, 128], sizes = [1, 128], strides = [1, 1]} : vector<1x384xf32> to vector<1x128xf32>
    %773 = arith.addf %771, %772 : vector<1x128xf32>
    %774 = arith.negf %773 : vector<1x128xf32>
    %775 = math.exp %774 : vector<1x128xf32>
    %cst_276 = arith.constant 1.000000e+00 : f32
    %776 = vector.broadcast %cst_276 : f32 to vector<1x128xf32>
    %777 = arith.addf %776, %775 : vector<1x128xf32>
    %778 = arith.divf %776, %777 : vector<1x128xf32>
    %779 = vector.extract_strided_slice %759 {offsets = [0, 256], sizes = [1, 128], strides = [1, 1]} : vector<1x384xf32> to vector<1x128xf32>
    %780 = vector.extract_strided_slice %762 {offsets = [0, 256], sizes = [1, 128], strides = [1, 1]} : vector<1x384xf32> to vector<1x128xf32>
    %781 = arith.mulf %770, %780 : vector<1x128xf32>
    %782 = arith.addf %779, %781 : vector<1x128xf32>
    %783 = math.tanh %782 : vector<1x128xf32>
    %cst_277 = arith.constant 1.000000e+00 : f32
    %784 = vector.broadcast %cst_277 : f32 to vector<1x128xf32>
    %785 = arith.subf %784, %778 : vector<1x128xf32>
    %786 = arith.mulf %785, %783 : vector<1x128xf32>
    %787 = arith.mulf %778, %703 : vector<1x128xf32>
    %788 = arith.addf %786, %787 : vector<1x128xf32>
    %c0_278 = arith.constant 0 : index
    %c0_279 = arith.constant 0 : index
    %789 = vector.load %arg18[%c0_278, %c0_279] : memref<128x128xf32, #tpu.memory_space<vmem>>, vector<128x128xf32>
    %cst_280 = arith.constant dense<0.000000e+00> : vector<1x128xf32>
    %790 = tpu.matmul %788, %789, %cst_280 {dimension_numbers = #tpu.dot_dimension_numbers<[1], [0], [0], [1], [0, 0, 1, 1], [], []>} : vector<1x128xf32>, vector<128x128xf32>, vector<1x128xf32> -> vector<1x128xf32>
    %791 = arith.addf %790, %324 : vector<1x128xf32>
    %cst_281 = arith.constant dense<0xFF800000> : vector<1xf32>
    %792 = vector.multi_reduction <maximumf>, %791, %cst_281 [1] : vector<1x128xf32> to vector<1xf32>
    %793 = vector.shape_cast %792 : vector<1xf32> to vector<1x1xf32>
    %794 = vector.broadcast %793 : vector<1x1xf32> to vector<1x128xf32>
    %795 = arith.subf %791, %794 : vector<1x128xf32>
    %796 = math.exp %795 : vector<1x128xf32>
    %cst_282 = arith.constant dense<0.000000e+00> : vector<1xf32>
    %797 = vector.multi_reduction <add>, %796, %cst_282 [1] : vector<1x128xf32> to vector<1xf32>
    %798 = vector.shape_cast %797 : vector<1xf32> to vector<1x1xf32>
    %cst_283 = arith.constant 1.000000e+00 : f32
    %799 = vector.broadcast %cst_283 : f32 to vector<1x1xf32>
    %800 = arith.divf %799, %798 : vector<1x1xf32>
    %801 = vector.broadcast %800 : vector<1x1xf32> to vector<1x128xf32>
    %802 = arith.mulf %796, %801 : vector<1x128xf32>
    %c0_284 = arith.constant 0 : index
    %c0_285 = arith.constant 0 : index
    %803 = vector.load %arg17[%c0_284, %c0_285] : memref<128x128xf32, #tpu.memory_space<vmem>>, vector<128x128xf32>
    %cst_286 = arith.constant dense<0.000000e+00> : vector<1x128xf32>
    %804 = tpu.matmul %802, %803, %cst_286 {dimension_numbers = #tpu.dot_dimension_numbers<[1], [0], [0], [1], [0, 0, 1, 1], [], []>} : vector<1x128xf32>, vector<128x128xf32>, vector<1x128xf32> -> vector<1x128xf32>
    %c0_287 = arith.constant 0 : index
    %c0_288 = arith.constant 0 : index
    %805 = vector.load %arg10[%c0_287, %c0_288] : memref<128x128xf32, #tpu.memory_space<vmem>>, vector<128x128xf32>
    %cst_289 = arith.constant dense<0.000000e+00> : vector<1x128xf32>
    %806 = tpu.matmul %788, %805, %cst_289 {dimension_numbers = #tpu.dot_dimension_numbers<[1], [0], [0], [1], [0, 0, 1, 1], [], []>} : vector<1x128xf32>, vector<128x128xf32>, vector<1x128xf32> -> vector<1x128xf32>
    %c0_290 = arith.constant 0 : index
    %c0_291 = arith.constant 0 : index
    %807 = vector.load %arg11[%c0_290, %c0_291] : memref<128x128xf32, #tpu.memory_space<vmem>>, vector<128x128xf32>
    %cst_292 = arith.constant dense<0.000000e+00> : vector<1x128xf32>
    %808 = tpu.matmul %804, %807, %cst_292 {dimension_numbers = #tpu.dot_dimension_numbers<[1], [0], [0], [1], [0, 0, 1, 1], [], []>} : vector<1x128xf32>, vector<128x128xf32>, vector<1x128xf32> -> vector<1x128xf32>
    %809 = arith.addf %806, %808 : vector<1x128xf32>
    %810 = arith.addf %809, %315 : vector<1x128xf32>
    %811 = math.tanh %810 : vector<1x128xf32>
    %c0_293 = arith.constant 0 : index
    %c0_294 = arith.constant 0 : index
    %812 = vector.load %arg13[%c0_293, %c0_294] : memref<128x128xf32, #tpu.memory_space<vmem>>, vector<128x128xf32>
    %cst_295 = arith.constant dense<0.000000e+00> : vector<1x128xf32>
    %813 = tpu.matmul %811, %812, %cst_295 {dimension_numbers = #tpu.dot_dimension_numbers<[1], [0], [0], [1], [0, 0, 1, 1], [], []>} : vector<1x128xf32>, vector<128x128xf32>, vector<1x128xf32> -> vector<1x128xf32>
    %814 = arith.addf %813, %316 : vector<1x128xf32>
    %cst_296 = arith.constant dense<0xFF800000> : vector<1xf32>
    %815 = vector.multi_reduction <maximumf>, %814, %cst_296 [1] : vector<1x128xf32> to vector<1xf32>
    %816 = vector.shape_cast %815 : vector<1xf32> to vector<1x1xf32>
    %817 = vector.broadcast %816 : vector<1x1xf32> to vector<1x128xf32>
    %818 = arith.cmpf oeq, %814, %817 : vector<1x128xf32>
    %c128_i32_297 = arith.constant 128 : i32
    %819 = vector.broadcast %c128_i32_297 : i32 to vector<1x128xi32>
    %820 = arith.select %818, %317, %819 : vector<1x128xi1>, vector<1x128xi32>
    %cst_298 = arith.constant dense<2147483647> : vector<1xi32>
    %821 = vector.multi_reduction <minsi>, %820, %cst_298 [1] : vector<1x128xi32> to vector<1xi32>
    %822 = vector.shape_cast %821 : vector<1xi32> to vector<1x1xi32>
    %823 = vector.broadcast %816 : vector<1x1xf32> to vector<1x128xf32>
    %824 = arith.subf %814, %823 : vector<1x128xf32>
    %825 = math.exp %824 : vector<1x128xf32>
    %cst_299 = arith.constant dense<0.000000e+00> : vector<1xf32>
    %826 = vector.multi_reduction <add>, %825, %cst_299 [1] : vector<1x128xf32> to vector<1xf32>
    %827 = vector.shape_cast %826 : vector<1xf32> to vector<1x1xf32>
    %cst_300 = arith.constant 1.000000e+00 : f32
    %828 = vector.broadcast %cst_300 : f32 to vector<1x1xf32>
    %829 = arith.divf %828, %827 : vector<1x1xf32>
    %c5_i32_301 = arith.constant 5 : i32
    %830 = vector.broadcast %c5_i32_301 : i32 to vector<1x128xi32>
    %831 = arith.cmpi eq, %318, %830 : vector<1x128xi32>
    %832 = vector.shape_cast %822 : vector<1x1xi32> to vector<1x1xi32>
    %833 = vector.broadcast %832 : vector<1x1xi32> to vector<1x128xi32>
    %834 = arith.select %831, %833, %749 : vector<1x128xi1>, vector<1x128xi32>
    %835 = vector.shape_cast %829 : vector<1x1xf32> to vector<1x1xf32>
    %836 = vector.broadcast %835 : vector<1x1xf32> to vector<1x128xf32>
    %837 = arith.select %831, %836, %752 : vector<1x128xi1>, vector<1x128xf32>
    %838 = vector.broadcast %822 : vector<1x1xi32> to vector<1x128xi32>
    %839 = arith.cmpi eq, %317, %838 : vector<1x128xi32>
    %840 = arith.extui %839 : vector<1x128xi1> to vector<1x128xi32>
    %841 = arith.sitofp %840 : vector<1x128xi32> to vector<1x128xf32>
    %c0_302 = arith.constant 0 : index
    %c0_303 = arith.constant 0 : index
    %842 = vector.load %arg6[%c0_302, %c0_303] : memref<128x384xf32, #tpu.memory_space<vmem>>, vector<128x384xf32>
    %cst_304 = arith.constant dense<0.000000e+00> : vector<1x384xf32>
    %843 = tpu.matmul %841, %842, %cst_304 {dimension_numbers = #tpu.dot_dimension_numbers<[1], [0], [0], [1], [0, 0, 1, 1], [], []>} : vector<1x128xf32>, vector<128x384xf32>, vector<1x384xf32> -> vector<1x384xf32>
    %844 = arith.addf %843, %313 : vector<1x384xf32>
    %c0_305 = arith.constant 0 : index
    %c0_306 = arith.constant 0 : index
    %845 = vector.load %arg7[%c0_305, %c0_306] : memref<128x384xf32, #tpu.memory_space<vmem>>, vector<128x384xf32>
    %cst_307 = arith.constant dense<0.000000e+00> : vector<1x384xf32>
    %846 = tpu.matmul %788, %845, %cst_307 {dimension_numbers = #tpu.dot_dimension_numbers<[1], [0], [0], [1], [0, 0, 1, 1], [], []>} : vector<1x128xf32>, vector<128x384xf32>, vector<1x384xf32> -> vector<1x384xf32>
    %847 = arith.addf %846, %314 : vector<1x384xf32>
    %848 = vector.extract_strided_slice %844 {offsets = [0, 0], sizes = [1, 128], strides = [1, 1]} : vector<1x384xf32> to vector<1x128xf32>
    %849 = vector.extract_strided_slice %847 {offsets = [0, 0], sizes = [1, 128], strides = [1, 1]} : vector<1x384xf32> to vector<1x128xf32>
    %850 = arith.addf %848, %849 : vector<1x128xf32>
    %851 = arith.negf %850 : vector<1x128xf32>
    %852 = math.exp %851 : vector<1x128xf32>
    %cst_308 = arith.constant 1.000000e+00 : f32
    %853 = vector.broadcast %cst_308 : f32 to vector<1x128xf32>
    %854 = arith.addf %853, %852 : vector<1x128xf32>
    %855 = arith.divf %853, %854 : vector<1x128xf32>
    %856 = vector.extract_strided_slice %844 {offsets = [0, 128], sizes = [1, 128], strides = [1, 1]} : vector<1x384xf32> to vector<1x128xf32>
    %857 = vector.extract_strided_slice %847 {offsets = [0, 128], sizes = [1, 128], strides = [1, 1]} : vector<1x384xf32> to vector<1x128xf32>
    %858 = arith.addf %856, %857 : vector<1x128xf32>
    %859 = arith.negf %858 : vector<1x128xf32>
    %860 = math.exp %859 : vector<1x128xf32>
    %cst_309 = arith.constant 1.000000e+00 : f32
    %861 = vector.broadcast %cst_309 : f32 to vector<1x128xf32>
    %862 = arith.addf %861, %860 : vector<1x128xf32>
    %863 = arith.divf %861, %862 : vector<1x128xf32>
    %864 = vector.extract_strided_slice %844 {offsets = [0, 256], sizes = [1, 128], strides = [1, 1]} : vector<1x384xf32> to vector<1x128xf32>
    %865 = vector.extract_strided_slice %847 {offsets = [0, 256], sizes = [1, 128], strides = [1, 1]} : vector<1x384xf32> to vector<1x128xf32>
    %866 = arith.mulf %855, %865 : vector<1x128xf32>
    %867 = arith.addf %864, %866 : vector<1x128xf32>
    %868 = math.tanh %867 : vector<1x128xf32>
    %cst_310 = arith.constant 1.000000e+00 : f32
    %869 = vector.broadcast %cst_310 : f32 to vector<1x128xf32>
    %870 = arith.subf %869, %863 : vector<1x128xf32>
    %871 = arith.mulf %870, %868 : vector<1x128xf32>
    %872 = arith.mulf %863, %788 : vector<1x128xf32>
    %873 = arith.addf %871, %872 : vector<1x128xf32>
    %c0_311 = arith.constant 0 : index
    %c0_312 = arith.constant 0 : index
    %874 = vector.load %arg18[%c0_311, %c0_312] : memref<128x128xf32, #tpu.memory_space<vmem>>, vector<128x128xf32>
    %cst_313 = arith.constant dense<0.000000e+00> : vector<1x128xf32>
    %875 = tpu.matmul %873, %874, %cst_313 {dimension_numbers = #tpu.dot_dimension_numbers<[1], [0], [0], [1], [0, 0, 1, 1], [], []>} : vector<1x128xf32>, vector<128x128xf32>, vector<1x128xf32> -> vector<1x128xf32>
    %876 = arith.addf %875, %324 : vector<1x128xf32>
    %cst_314 = arith.constant dense<0xFF800000> : vector<1xf32>
    %877 = vector.multi_reduction <maximumf>, %876, %cst_314 [1] : vector<1x128xf32> to vector<1xf32>
    %878 = vector.shape_cast %877 : vector<1xf32> to vector<1x1xf32>
    %879 = vector.broadcast %878 : vector<1x1xf32> to vector<1x128xf32>
    %880 = arith.subf %876, %879 : vector<1x128xf32>
    %881 = math.exp %880 : vector<1x128xf32>
    %cst_315 = arith.constant dense<0.000000e+00> : vector<1xf32>
    %882 = vector.multi_reduction <add>, %881, %cst_315 [1] : vector<1x128xf32> to vector<1xf32>
    %883 = vector.shape_cast %882 : vector<1xf32> to vector<1x1xf32>
    %cst_316 = arith.constant 1.000000e+00 : f32
    %884 = vector.broadcast %cst_316 : f32 to vector<1x1xf32>
    %885 = arith.divf %884, %883 : vector<1x1xf32>
    %886 = vector.broadcast %885 : vector<1x1xf32> to vector<1x128xf32>
    %887 = arith.mulf %881, %886 : vector<1x128xf32>
    %c0_317 = arith.constant 0 : index
    %c0_318 = arith.constant 0 : index
    %888 = vector.load %arg17[%c0_317, %c0_318] : memref<128x128xf32, #tpu.memory_space<vmem>>, vector<128x128xf32>
    %cst_319 = arith.constant dense<0.000000e+00> : vector<1x128xf32>
    %889 = tpu.matmul %887, %888, %cst_319 {dimension_numbers = #tpu.dot_dimension_numbers<[1], [0], [0], [1], [0, 0, 1, 1], [], []>} : vector<1x128xf32>, vector<128x128xf32>, vector<1x128xf32> -> vector<1x128xf32>
    %c0_320 = arith.constant 0 : index
    %c0_321 = arith.constant 0 : index
    %890 = vector.load %arg10[%c0_320, %c0_321] : memref<128x128xf32, #tpu.memory_space<vmem>>, vector<128x128xf32>
    %cst_322 = arith.constant dense<0.000000e+00> : vector<1x128xf32>
    %891 = tpu.matmul %873, %890, %cst_322 {dimension_numbers = #tpu.dot_dimension_numbers<[1], [0], [0], [1], [0, 0, 1, 1], [], []>} : vector<1x128xf32>, vector<128x128xf32>, vector<1x128xf32> -> vector<1x128xf32>
    %c0_323 = arith.constant 0 : index
    %c0_324 = arith.constant 0 : index
    %892 = vector.load %arg11[%c0_323, %c0_324] : memref<128x128xf32, #tpu.memory_space<vmem>>, vector<128x128xf32>
    %cst_325 = arith.constant dense<0.000000e+00> : vector<1x128xf32>
    %893 = tpu.matmul %889, %892, %cst_325 {dimension_numbers = #tpu.dot_dimension_numbers<[1], [0], [0], [1], [0, 0, 1, 1], [], []>} : vector<1x128xf32>, vector<128x128xf32>, vector<1x128xf32> -> vector<1x128xf32>
    %894 = arith.addf %891, %893 : vector<1x128xf32>
    %895 = arith.addf %894, %315 : vector<1x128xf32>
    %896 = math.tanh %895 : vector<1x128xf32>
    %c0_326 = arith.constant 0 : index
    %c0_327 = arith.constant 0 : index
    %897 = vector.load %arg13[%c0_326, %c0_327] : memref<128x128xf32, #tpu.memory_space<vmem>>, vector<128x128xf32>
    %cst_328 = arith.constant dense<0.000000e+00> : vector<1x128xf32>
    %898 = tpu.matmul %896, %897, %cst_328 {dimension_numbers = #tpu.dot_dimension_numbers<[1], [0], [0], [1], [0, 0, 1, 1], [], []>} : vector<1x128xf32>, vector<128x128xf32>, vector<1x128xf32> -> vector<1x128xf32>
    %899 = arith.addf %898, %316 : vector<1x128xf32>
    %cst_329 = arith.constant dense<0xFF800000> : vector<1xf32>
    %900 = vector.multi_reduction <maximumf>, %899, %cst_329 [1] : vector<1x128xf32> to vector<1xf32>
    %901 = vector.shape_cast %900 : vector<1xf32> to vector<1x1xf32>
    %902 = vector.broadcast %901 : vector<1x1xf32> to vector<1x128xf32>
    %903 = arith.cmpf oeq, %899, %902 : vector<1x128xf32>
    %c128_i32_330 = arith.constant 128 : i32
    %904 = vector.broadcast %c128_i32_330 : i32 to vector<1x128xi32>
    %905 = arith.select %903, %317, %904 : vector<1x128xi1>, vector<1x128xi32>
    %cst_331 = arith.constant dense<2147483647> : vector<1xi32>
    %906 = vector.multi_reduction <minsi>, %905, %cst_331 [1] : vector<1x128xi32> to vector<1xi32>
    %907 = vector.shape_cast %906 : vector<1xi32> to vector<1x1xi32>
    %908 = vector.broadcast %901 : vector<1x1xf32> to vector<1x128xf32>
    %909 = arith.subf %899, %908 : vector<1x128xf32>
    %910 = math.exp %909 : vector<1x128xf32>
    %cst_332 = arith.constant dense<0.000000e+00> : vector<1xf32>
    %911 = vector.multi_reduction <add>, %910, %cst_332 [1] : vector<1x128xf32> to vector<1xf32>
    %912 = vector.shape_cast %911 : vector<1xf32> to vector<1x1xf32>
    %cst_333 = arith.constant 1.000000e+00 : f32
    %913 = vector.broadcast %cst_333 : f32 to vector<1x1xf32>
    %914 = arith.divf %913, %912 : vector<1x1xf32>
    %c6_i32_334 = arith.constant 6 : i32
    %915 = vector.broadcast %c6_i32_334 : i32 to vector<1x128xi32>
    %916 = arith.cmpi eq, %318, %915 : vector<1x128xi32>
    %917 = vector.shape_cast %907 : vector<1x1xi32> to vector<1x1xi32>
    %918 = vector.broadcast %917 : vector<1x1xi32> to vector<1x128xi32>
    %919 = arith.select %916, %918, %834 : vector<1x128xi1>, vector<1x128xi32>
    %920 = vector.shape_cast %914 : vector<1x1xf32> to vector<1x1xf32>
    %921 = vector.broadcast %920 : vector<1x1xf32> to vector<1x128xf32>
    %922 = arith.select %916, %921, %837 : vector<1x128xi1>, vector<1x128xf32>
    %923 = vector.broadcast %907 : vector<1x1xi32> to vector<1x128xi32>
    %924 = arith.cmpi eq, %317, %923 : vector<1x128xi32>
    %925 = arith.extui %924 : vector<1x128xi1> to vector<1x128xi32>
    %926 = arith.sitofp %925 : vector<1x128xi32> to vector<1x128xf32>
    %c0_335 = arith.constant 0 : index
    %c0_336 = arith.constant 0 : index
    %927 = vector.load %arg6[%c0_335, %c0_336] : memref<128x384xf32, #tpu.memory_space<vmem>>, vector<128x384xf32>
    %cst_337 = arith.constant dense<0.000000e+00> : vector<1x384xf32>
    %928 = tpu.matmul %926, %927, %cst_337 {dimension_numbers = #tpu.dot_dimension_numbers<[1], [0], [0], [1], [0, 0, 1, 1], [], []>} : vector<1x128xf32>, vector<128x384xf32>, vector<1x384xf32> -> vector<1x384xf32>
    %929 = arith.addf %928, %313 : vector<1x384xf32>
    %c0_338 = arith.constant 0 : index
    %c0_339 = arith.constant 0 : index
    %930 = vector.load %arg7[%c0_338, %c0_339] : memref<128x384xf32, #tpu.memory_space<vmem>>, vector<128x384xf32>
    %cst_340 = arith.constant dense<0.000000e+00> : vector<1x384xf32>
    %931 = tpu.matmul %873, %930, %cst_340 {dimension_numbers = #tpu.dot_dimension_numbers<[1], [0], [0], [1], [0, 0, 1, 1], [], []>} : vector<1x128xf32>, vector<128x384xf32>, vector<1x384xf32> -> vector<1x384xf32>
    %932 = arith.addf %931, %314 : vector<1x384xf32>
    %933 = vector.extract_strided_slice %929 {offsets = [0, 0], sizes = [1, 128], strides = [1, 1]} : vector<1x384xf32> to vector<1x128xf32>
    %934 = vector.extract_strided_slice %932 {offsets = [0, 0], sizes = [1, 128], strides = [1, 1]} : vector<1x384xf32> to vector<1x128xf32>
    %935 = arith.addf %933, %934 : vector<1x128xf32>
    %936 = arith.negf %935 : vector<1x128xf32>
    %937 = math.exp %936 : vector<1x128xf32>
    %cst_341 = arith.constant 1.000000e+00 : f32
    %938 = vector.broadcast %cst_341 : f32 to vector<1x128xf32>
    %939 = arith.addf %938, %937 : vector<1x128xf32>
    %940 = arith.divf %938, %939 : vector<1x128xf32>
    %941 = vector.extract_strided_slice %929 {offsets = [0, 128], sizes = [1, 128], strides = [1, 1]} : vector<1x384xf32> to vector<1x128xf32>
    %942 = vector.extract_strided_slice %932 {offsets = [0, 128], sizes = [1, 128], strides = [1, 1]} : vector<1x384xf32> to vector<1x128xf32>
    %943 = arith.addf %941, %942 : vector<1x128xf32>
    %944 = arith.negf %943 : vector<1x128xf32>
    %945 = math.exp %944 : vector<1x128xf32>
    %cst_342 = arith.constant 1.000000e+00 : f32
    %946 = vector.broadcast %cst_342 : f32 to vector<1x128xf32>
    %947 = arith.addf %946, %945 : vector<1x128xf32>
    %948 = arith.divf %946, %947 : vector<1x128xf32>
    %949 = vector.extract_strided_slice %929 {offsets = [0, 256], sizes = [1, 128], strides = [1, 1]} : vector<1x384xf32> to vector<1x128xf32>
    %950 = vector.extract_strided_slice %932 {offsets = [0, 256], sizes = [1, 128], strides = [1, 1]} : vector<1x384xf32> to vector<1x128xf32>
    %951 = arith.mulf %940, %950 : vector<1x128xf32>
    %952 = arith.addf %949, %951 : vector<1x128xf32>
    %953 = math.tanh %952 : vector<1x128xf32>
    %cst_343 = arith.constant 1.000000e+00 : f32
    %954 = vector.broadcast %cst_343 : f32 to vector<1x128xf32>
    %955 = arith.subf %954, %948 : vector<1x128xf32>
    %956 = arith.mulf %955, %953 : vector<1x128xf32>
    %957 = arith.mulf %948, %873 : vector<1x128xf32>
    %958 = arith.addf %956, %957 : vector<1x128xf32>
    %c0_344 = arith.constant 0 : index
    %c0_345 = arith.constant 0 : index
    %959 = vector.load %arg18[%c0_344, %c0_345] : memref<128x128xf32, #tpu.memory_space<vmem>>, vector<128x128xf32>
    %cst_346 = arith.constant dense<0.000000e+00> : vector<1x128xf32>
    %960 = tpu.matmul %958, %959, %cst_346 {dimension_numbers = #tpu.dot_dimension_numbers<[1], [0], [0], [1], [0, 0, 1, 1], [], []>} : vector<1x128xf32>, vector<128x128xf32>, vector<1x128xf32> -> vector<1x128xf32>
    %961 = arith.addf %960, %324 : vector<1x128xf32>
    %cst_347 = arith.constant dense<0xFF800000> : vector<1xf32>
    %962 = vector.multi_reduction <maximumf>, %961, %cst_347 [1] : vector<1x128xf32> to vector<1xf32>
    %963 = vector.shape_cast %962 : vector<1xf32> to vector<1x1xf32>
    %964 = vector.broadcast %963 : vector<1x1xf32> to vector<1x128xf32>
    %965 = arith.subf %961, %964 : vector<1x128xf32>
    %966 = math.exp %965 : vector<1x128xf32>
    %cst_348 = arith.constant dense<0.000000e+00> : vector<1xf32>
    %967 = vector.multi_reduction <add>, %966, %cst_348 [1] : vector<1x128xf32> to vector<1xf32>
    %968 = vector.shape_cast %967 : vector<1xf32> to vector<1x1xf32>
    %cst_349 = arith.constant 1.000000e+00 : f32
    %969 = vector.broadcast %cst_349 : f32 to vector<1x1xf32>
    %970 = arith.divf %969, %968 : vector<1x1xf32>
    %971 = vector.broadcast %970 : vector<1x1xf32> to vector<1x128xf32>
    %972 = arith.mulf %966, %971 : vector<1x128xf32>
    %c0_350 = arith.constant 0 : index
    %c0_351 = arith.constant 0 : index
    %973 = vector.load %arg17[%c0_350, %c0_351] : memref<128x128xf32, #tpu.memory_space<vmem>>, vector<128x128xf32>
    %cst_352 = arith.constant dense<0.000000e+00> : vector<1x128xf32>
    %974 = tpu.matmul %972, %973, %cst_352 {dimension_numbers = #tpu.dot_dimension_numbers<[1], [0], [0], [1], [0, 0, 1, 1], [], []>} : vector<1x128xf32>, vector<128x128xf32>, vector<1x128xf32> -> vector<1x128xf32>
    %c0_353 = arith.constant 0 : index
    %c0_354 = arith.constant 0 : index
    %975 = vector.load %arg10[%c0_353, %c0_354] : memref<128x128xf32, #tpu.memory_space<vmem>>, vector<128x128xf32>
    %cst_355 = arith.constant dense<0.000000e+00> : vector<1x128xf32>
    %976 = tpu.matmul %958, %975, %cst_355 {dimension_numbers = #tpu.dot_dimension_numbers<[1], [0], [0], [1], [0, 0, 1, 1], [], []>} : vector<1x128xf32>, vector<128x128xf32>, vector<1x128xf32> -> vector<1x128xf32>
    %c0_356 = arith.constant 0 : index
    %c0_357 = arith.constant 0 : index
    %977 = vector.load %arg11[%c0_356, %c0_357] : memref<128x128xf32, #tpu.memory_space<vmem>>, vector<128x128xf32>
    %cst_358 = arith.constant dense<0.000000e+00> : vector<1x128xf32>
    %978 = tpu.matmul %974, %977, %cst_358 {dimension_numbers = #tpu.dot_dimension_numbers<[1], [0], [0], [1], [0, 0, 1, 1], [], []>} : vector<1x128xf32>, vector<128x128xf32>, vector<1x128xf32> -> vector<1x128xf32>
    %979 = arith.addf %976, %978 : vector<1x128xf32>
    %980 = arith.addf %979, %315 : vector<1x128xf32>
    %981 = math.tanh %980 : vector<1x128xf32>
    %c0_359 = arith.constant 0 : index
    %c0_360 = arith.constant 0 : index
    %982 = vector.load %arg13[%c0_359, %c0_360] : memref<128x128xf32, #tpu.memory_space<vmem>>, vector<128x128xf32>
    %cst_361 = arith.constant dense<0.000000e+00> : vector<1x128xf32>
    %983 = tpu.matmul %981, %982, %cst_361 {dimension_numbers = #tpu.dot_dimension_numbers<[1], [0], [0], [1], [0, 0, 1, 1], [], []>} : vector<1x128xf32>, vector<128x128xf32>, vector<1x128xf32> -> vector<1x128xf32>
    %984 = arith.addf %983, %316 : vector<1x128xf32>
    %cst_362 = arith.constant dense<0xFF800000> : vector<1xf32>
    %985 = vector.multi_reduction <maximumf>, %984, %cst_362 [1] : vector<1x128xf32> to vector<1xf32>
    %986 = vector.shape_cast %985 : vector<1xf32> to vector<1x1xf32>
    %987 = vector.broadcast %986 : vector<1x1xf32> to vector<1x128xf32>
    %988 = arith.cmpf oeq, %984, %987 : vector<1x128xf32>
    %c128_i32_363 = arith.constant 128 : i32
    %989 = vector.broadcast %c128_i32_363 : i32 to vector<1x128xi32>
    %990 = arith.select %988, %317, %989 : vector<1x128xi1>, vector<1x128xi32>
    %cst_364 = arith.constant dense<2147483647> : vector<1xi32>
    %991 = vector.multi_reduction <minsi>, %990, %cst_364 [1] : vector<1x128xi32> to vector<1xi32>
    %992 = vector.shape_cast %991 : vector<1xi32> to vector<1x1xi32>
    %993 = vector.broadcast %986 : vector<1x1xf32> to vector<1x128xf32>
    %994 = arith.subf %984, %993 : vector<1x128xf32>
    %995 = math.exp %994 : vector<1x128xf32>
    %cst_365 = arith.constant dense<0.000000e+00> : vector<1xf32>
    %996 = vector.multi_reduction <add>, %995, %cst_365 [1] : vector<1x128xf32> to vector<1xf32>
    %997 = vector.shape_cast %996 : vector<1xf32> to vector<1x1xf32>
    %cst_366 = arith.constant 1.000000e+00 : f32
    %998 = vector.broadcast %cst_366 : f32 to vector<1x1xf32>
    %999 = arith.divf %998, %997 : vector<1x1xf32>
    %c7_i32_367 = arith.constant 7 : i32
    %1000 = vector.broadcast %c7_i32_367 : i32 to vector<1x128xi32>
    %1001 = arith.cmpi eq, %318, %1000 : vector<1x128xi32>
    %1002 = vector.shape_cast %992 : vector<1x1xi32> to vector<1x1xi32>
    %1003 = vector.broadcast %1002 : vector<1x1xi32> to vector<1x128xi32>
    %1004 = arith.select %1001, %1003, %919 : vector<1x128xi1>, vector<1x128xi32>
    %1005 = vector.shape_cast %999 : vector<1x1xf32> to vector<1x1xf32>
    %1006 = vector.broadcast %1005 : vector<1x1xf32> to vector<1x128xf32>
    %1007 = arith.select %1001, %1006, %922 : vector<1x128xi1>, vector<1x128xf32>
    %c0_368 = arith.constant 0 : index
    %c0_369 = arith.constant 0 : index
    %1008 = vector.load %arg15[%c0_368, %c0_369] : memref<1x128xi32, #tpu.memory_space<vmem>>, vector<1x128xi32>
    tpu.vector_store %arg15[%c0_368, %c0_369], %1004 {strides = array<i32>} : memref<1x128xi32, #tpu.memory_space<vmem>>, vector<1x128xi32>,
    %c0_370 = arith.constant 0 : index
    %c0_371 = arith.constant 0 : index
    %1009 = vector.load %arg16[%c0_370, %c0_371] : memref<1x128xf32, #tpu.memory_space<vmem>>, vector<1x128xf32>
    tpu.vector_store %arg16[%c0_370, %c0_371], %1007 {strides = array<i32>} : memref<1x128xf32, #tpu.memory_space<vmem>>, vector<1x128xf32>,
    return
  }
}

</mosaic_0001>

<bundles_post_ra>
// kernel: tpu_custom_call.1
= control target key start
LH: loop header
LB: loop body
LE: loop exit
PB: predicated region body
PF: predicated region fallthrough
CT: control target
= control target key end

     0   :  { %s16858_s0 = inlined_call_operand.vmem [shape: s32[8], index: 0, kind: input, shape index: {}]   ;;  %s16859_s1 = inlined_call_operand.<no memory space> [shape: s32[1], index: 1, kind: input, shape index: {}]   ;;  %s16860_s2 = inlined_call_operand.hbm [shape: f32[128,384], index: 2, kind: input, shape index: {}]   ;;  %s16861_s3 = inlined_call_operand.hbm [shape: f32[128,384], index: 3, kind: input, shape index: {}]   ;;  %s16862_s4 = inlined_call_operand.vmem [shape: f32[1,384], index: 4, kind: input, shape index: {}]   ;;  %s16863_s5 = inlined_call_operand.vmem [shape: f32[1,384], index: 5, kind: input, shape index: {}]   ;;  %s16864_s6 = inlined_call_operand.hbm [shape: f32[128,384], index: 6, kind: input, shape index: {}]   ;;  %s16865_s7 = inlined_call_operand.hbm [shape: f32[128,384], index: 7, kind: input, shape index: {}]   ;;  %s16866_s8 = inlined_call_operand.vmem [shape: f32[1,384], index: 8, kind: input, shape index: {}]   ;;  %s16867_s9 = inlined_call_operand.vmem [shape: f32[1,384], index: 9, kind: input, shape index: {}]   ;;  %s16868_s10 = inlined_call_operand.hbm [shape: f32[128,128], index: 10, kind: input, shape index: {}]   ;;  %s16869_s11 = inlined_call_operand.hbm [shape: f32[128,128], index: 11, kind: input, shape index: {}]   ;;  %s16870_s12 = inlined_call_operand.vmem [shape: f32[1,128], index: 12, kind: input, shape index: {}]   ;;  %s16871_s13 = inlined_call_operand.hbm [shape: f32[128,128], index: 13, kind: input, shape index: {}]   ;;  %s16872_s14 = inlined_call_operand.vmem [shape: f32[1,128], index: 14, kind: input, shape index: {}]   ;;  %s16873_s15 = inlined_call_operand.hbm [shape: s32[1,128], index: 15, kind: output, shape index: {0}]   ;;  %s16874_s16 = inlined_call_operand.hbm [shape: f32[1,128], index: 16, kind: output, shape index: {1}]  }
   0x1   :  { %17033 = sst [smem:[#allocation96_spill]] %s16858_s0 }
   0x2   :  { %17034 = sst [smem:[#allocation97_spill]] %s16873_s15 }
   0x3   :  { %17035 = sst [smem:[#allocation98_spill]] %s16874_s16 }
   0x4   :  { %23 = vsyncpa [#allocation8], 0 }
   0x5   :  { %24 = vsyncpa [#allocation6], 0 }
   0x6   :  { %25 = vsyncpa [#allocation11], 0 }
   0x7   :  { %26 = vsyncpa [#allocation14], 0 }
   0x8   :  { %27 = vsyncpa [#allocation17], 0 }
   0x9   :  { %28 = vsyncpa [#allocation7], 0 }
   0xa   :  { %29 = vsyncpa [#allocation21], 0  ;;  %s14254_s21 = smov [#allocation10]   ;;  %s14255_s23 = smov [#allocation13]  }
   0xb   :  { %s59_s22 = sshll.u32 %s14254_s21, 4  ;;  %s87_s24 = sshll.u32 %s14255_s23, 4  ;;  %s60_s22 = int_to_ptr.vmem [resolvable:$true] %s59_s22  ;;  %s14358_s24 = int_to_ptr.vmem [resolvable:$true] %s87_s24 }
   0xc   :  { %s14030_s27 = scalar_lea.hbm %s16861_s3, 6144 }
   0xd   :  { %p14031_p0 = scmp.ne.s32.totalorder %s16861_s3, %s14030_s27  ;;  %p14034_p1 = scmp.lt.u32.totalorder %s14030_s27, %s16861_s3 }
   0xf   :  { %p14036_p2 = pnand %p14034_p1, %p14031_p0 }
  0x11   :  { %14039 = shalt.err (!%p14036_p2)
}
  0x12   :  { %s14040_s17 = scalar_lea.vmem %s60_s22, 6144  ;;  %p14045_p4 = scmp.lt.s32.totalorder %s60_s22, %s60_s22 }
  0x13   :  { %p14041_p3 = scmp.ne.s32.totalorder %s60_s22, %s14040_s17  ;;  %p14046_p5 = scmp.lt.s32.totalorder %s14040_s17, %s14040_s17 }
  0x15   :  { %p14047_p6 = por %p14046_p5, %p14045_p4 }
  0x17   :  { %p14048_p7 = pnand %p14047_p6, %p14041_p3 }
  0x19   :  { %14051 = shalt.err (!%p14048_p7)
}
  0x1a   :  { %s14256_s18 = smov 384   ;;  %s14257_s19 = smov 24  }
  0x1b   :  { %65 = dma.hbm_to_vmem [thread:$0]  %s16861_s3, 6144, %s60_s22, [#allocation11], %s14256_s18, %s14256_s18, %s14257_s19  }
  0x1c   :  { %s14052_s26 = scalar_lea.hbm %s16865_s7, 6144 }
  0x1d   :  { %p14053_p8 = scmp.ne.s32.totalorder %s16865_s7, %s14052_s26  ;;  %p14056_p9 = scmp.lt.u32.totalorder %s14052_s26, %s16865_s7 }
  0x1f   :  { %p14058_p10 = pnand %p14056_p9, %p14053_p8 }
  0x21   :  { %14061 = shalt.err (!%p14058_p10)
}
  0x22   :  { %s14062_s0 = scalar_lea.vmem %s14358_s24, 6144  ;;  %p14067_p12 = scmp.lt.s32.totalorder %s14358_s24, %s14358_s24 }
  0x23   :  { %p14063_p11 = scmp.ne.s32.totalorder %s14358_s24, %s14062_s0  ;;  %p14068_p13 = scmp.lt.s32.totalorder %s14062_s0, %s14062_s0 }
  0x25   :  { %p14069_p0 = por %p14068_p13, %p14067_p12 }
  0x27   :  { %p14070_p1 = pnand %p14069_p0, %p14063_p11 }
  0x29   :  { %14073 = shalt.err (!%p14070_p1)
}
  0x2a   :  { %93 = dma.hbm_to_vmem [thread:$0]  %s16865_s7, 6144, %s14358_s24, [#allocation14], %s14256_s18, %s14256_s18, %s14257_s19  }
  0x2b   :  { %s17036_s21 = sld [smem:[#allocation96_spill]]  ;;  %s14258_s25 = smov [#allocation16]  }
  0x2c   :  { %s115_s26 = sshll.u32 %s14258_s25, 4  ;;  %s14074_s29 = scalar_lea.hbm %s16869_s11, 2048  ;;  %s116_s26 = int_to_ptr.vmem [resolvable:$true] %s115_s26 }
  0x2d   :  { %p14075_p2 = scmp.ne.s32.totalorder %s16869_s11, %s14074_s29  ;;  %p14078_p3 = scmp.lt.u32.totalorder %s14074_s29, %s16869_s11 }
  0x2f   :  { %p14080_p4 = pnand %p14078_p3, %p14075_p2 }
  0x31   :  { %s36_s23 = sshll.u32 %s17036_s21, 4  ;;  %s37_s23 = int_to_ptr.vmem [resolvable:$true] %s36_s23 }
  0x32   :  { %14083 = shalt.err (!%p14080_p4)
}
  0x33   :  { %s14084_s7 = scalar_lea.vmem %s116_s26, 2048  ;;  %p14089_p6 = scmp.lt.s32.totalorder %s116_s26, %s116_s26 }
  0x34   :  { %p14085_p5 = scmp.ne.s32.totalorder %s116_s26, %s14084_s7  ;;  %p14090_p7 = scmp.lt.s32.totalorder %s14084_s7, %s14084_s7 }
  0x36   :  { %p14091_p8 = por %p14090_p7, %p14089_p6 }
  0x38   :  { %p14092_p9 = pnand %p14091_p8, %p14085_p5 }
  0x3a   :  { %14095 = shalt.err (!%p14092_p9)
}
  0x3b   :  { %s14259_s24 = smov 128   ;;  %s14260_s3 = smov 8  }
  0x3c   :  { %121 = dma.hbm_to_vmem [thread:$0]  %s16869_s11, 2048, %s116_s26, [#allocation17], %s14259_s24, %s14259_s24, %s14260_s3  }
  0x3d   :  { %s14096_s15 = scalar_lea.vmem %s37_s23, 16  ;;  %p14101_p11 = scmp.lt.s32.totalorder %s37_s23, %s37_s23 }
  0x3e   :  { %p14097_p10 = scmp.ne.s32.totalorder %s37_s23, %s14096_s15  ;;  %p14102_p12 = scmp.lt.s32.totalorder %s14096_s15, %s14096_s15 }
  0x40   :  { %p14103_p13 = por %p14102_p12, %p14101_p11 }
  0x42   :  { %p14104_p0 = pnand %p14103_p13, %p14097_p10 }
  0x44   :  { %14107 = shalt.err (!%p14104_p0)
}
  0x45   :  { %s14261_s16 = smov [#allocation5]   ;;  %s14262_s20 = smov [#allocation9]  }
  0x46   :  { %39 = dma.vmem_to_smem %s37_s23, 16, %s14261_s16, [#allocation8]  }
  0x47   :  { %s47_s21 = sshll.u32 %s14262_s20, 4  ;;  %s14263_s25 = smov [#allocation12]   ;;  %s48_s21 = int_to_ptr.vmem [resolvable:$true] %s47_s21 }
  0x48   :  { %s75_s27 = sshll.u32 %s14263_s25, 4  ;;  %s14108_s11 = scalar_lea.hbm %s16860_s2, 6144  ;;  %s14413_s27 = int_to_ptr.vmem [resolvable:$true] %s75_s27 }
  0x49   :  { %p14109_p1 = scmp.ne.s32.totalorder %s16860_s2, %s14108_s11  ;;  %p14112_p2 = scmp.lt.u32.totalorder %s14108_s11, %s16860_s2 }
  0x4b   :  { %p14114_p3 = pnand %p14112_p2, %p14109_p1 }
  0x4d   :  { %14117 = shalt.err (!%p14114_p3)
}
  0x4e   :  { %s14118_s23 = scalar_lea.vmem %s48_s21, 6144  ;;  %p14123_p5 = scmp.lt.s32.totalorder %s48_s21, %s48_s21 }
  0x4f   :  { %p14119_p4 = scmp.ne.s32.totalorder %s48_s21, %s14118_s23  ;;  %p14124_p6 = scmp.lt.s32.totalorder %s14118_s23, %s14118_s23 }
  0x51   :  { %p14125_p7 = por %p14124_p6, %p14123_p5 }
  0x53   :  { %p14126_p8 = pnand %p14125_p7, %p14119_p4 }
  0x55   :  { %14129 = shalt.err (!%p14126_p8)
}
  0x56   :  { %53 = dma.hbm_to_vmem [thread:$0]  %s16860_s2, 6144, %s48_s21, [#allocation6], %s14256_s18, %s14256_s18, %s14257_s19  }
  0x57   :  { %s14130_s20 = scalar_lea.hbm %s16864_s6, 6144 }
  0x58   :  { %p14131_p9 = scmp.ne.s32.totalorder %s16864_s6, %s14130_s20  ;;  %p14134_p10 = scmp.lt.u32.totalorder %s14130_s20, %s16864_s6 }
  0x5a   :  { %p14136_p11 = pnand %p14134_p10, %p14131_p9 }
  0x5c   :  { %14139 = shalt.err (!%p14136_p11)
}
  0x5d   :  { %s14140_s26 = scalar_lea.vmem %s14413_s27, 6144  ;;  %p14145_p13 = scmp.lt.s32.totalorder %s14413_s27, %s14413_s27 }
  0x5e   :  { %p14141_p12 = scmp.ne.s32.totalorder %s14413_s27, %s14140_s26  ;;  %p14146_p0 = scmp.lt.s32.totalorder %s14140_s26, %s14140_s26 }
  0x60   :  { %p14147_p1 = por %p14146_p0, %p14145_p13 }
  0x62   :  { %p14148_p2 = pnand %p14147_p1, %p14141_p12 }
  0x64   :  { %14151 = shalt.err (!%p14148_p2)
}
  0x65   :  { %81 = dma.hbm_to_vmem [thread:$0]  %s16864_s6, 6144, %s14413_s27, [#allocation11], %s14256_s18, %s14256_s18, %s14257_s19  }
  0x66   :  { %s14264_s30 = smov [#allocation15]   ;;  %s14265_s7 = smov [#allocation18]  }
  0x67   :  { %s103_s0 = sshll.u32 %s14264_s30, 4  ;;  %s129_s23 = sshll.u32 %s14265_s7, 4  ;;  %s104_s0 = int_to_ptr.vmem [resolvable:$true] %s103_s0  ;;  %s14450_s23 = int_to_ptr.vmem [resolvable:$true] %s129_s23 }
  0x68   :  { %s14152_s15 = scalar_lea.hbm %s16868_s10, 2048 }
  0x69   :  { %p14153_p3 = scmp.ne.s32.totalorder %s16868_s10, %s14152_s15  ;;  %p14156_p4 = scmp.lt.u32.totalorder %s14152_s15, %s16868_s10 }
  0x6b   :  { %p14158_p5 = pnand %p14156_p4, %p14153_p3 }
  0x6d   :  { %14161 = shalt.err (!%p14158_p5)
}
  0x6e   :  { %s14162_s6 = scalar_lea.vmem %s104_s0, 2048  ;;  %p14167_p7 = scmp.lt.s32.totalorder %s104_s0, %s104_s0 }
  0x6f   :  { %p14163_p6 = scmp.ne.s32.totalorder %s104_s0, %s14162_s6  ;;  %p14168_p8 = scmp.lt.s32.totalorder %s14162_s6, %s14162_s6 }
  0x71   :  { %p14169_p9 = por %p14168_p8, %p14167_p7 }
  0x73   :  { %p14170_p10 = pnand %p14169_p9, %p14163_p6 }
  0x75   :  { %14173 = shalt.err (!%p14170_p10)
}
  0x76   :  { %109 = dma.hbm_to_vmem [thread:$0]  %s16868_s10, 2048, %s104_s0, [#allocation14], %s14259_s24, %s14259_s24, %s14260_s3  }
  0x77   :  { %s14174_s11 = scalar_lea.hbm %s16871_s13, 2048 }
  0x78   :  { %p14175_p11 = scmp.ne.s32.totalorder %s16871_s13, %s14174_s11  ;;  %p14178_p12 = scmp.lt.u32.totalorder %s14174_s11, %s16871_s13 }
  0x7a   :  { %p14180_p13 = pnand %p14178_p12, %p14175_p11 }
  0x7c   :  { %14183 = shalt.err (!%p14180_p13)
}
  0x7d   :  { %s14184_s7 = scalar_lea.vmem %s14450_s23, 2048  ;;  %p14189_p1 = scmp.lt.s32.totalorder %s14450_s23, %s14450_s23 }
  0x7e   :  { %p14185_p0 = scmp.ne.s32.totalorder %s14450_s23, %s14184_s7  ;;  %p14190_p2 = scmp.lt.s32.totalorder %s14184_s7, %s14184_s7 }
  0x80   :  { %p14191_p3 = por %p14190_p2, %p14189_p1 }
  0x82   :  { %p14192_p4 = pnand %p14191_p3, %p14185_p0 }
  0x84   :  { %14195 = shalt.err (!%p14192_p4)
}
  0x85   :  { %135 = dma.hbm_to_vmem [thread:$0]  %s16871_s13, 2048, %s14450_s23, [#allocation17], %s14259_s24, %s14259_s24, %s14260_s3  }
  0x86   :  { %14240 = dma.done.wait [#allocation8], 16  }
  0x87   :  { %14241 = vsyncadd [#allocation8], 4294967280 }
  0x88   :  { %14242 = dma.done.wait [#allocation6], 6144  }
  0x89   :  { %14243 = vsyncadd [#allocation6], 4294961152 }
  0x8a   :  { %14244 = dma.done.wait [#allocation11], 12288  }
  0x8b   :  { %14245 = vsyncadd [#allocation11], 4294955008 }
  0x8c   :  { %14246 = dma.done.wait [#allocation14], 8192  }
  0x8d   :  { %14247 = vsyncadd [#allocation14], 4294959104 }
  0x8e   :  { %14248 = dma.done.wait [#allocation17], 4096  }
  0x8f   :  { %14249 = vsyncadd [#allocation17], 4294963200 }
  0x90   :  { %162 = sfence }
  0x91   :  { %v194_v0 = vld [vmem:[#allocation10 + $0x8] sm:$0xff]  ;;  %v197_v1 = vld [vmem:[#allocation10 + $0x20] sm:$0xff]  ;;  %v196_v4 = vld [vmem:[#allocation10 + $0x18] sm:$0xff]  ;;  %v16889_v7 = vmov 0.0|0.0   ;;  %v14267_v8 = vmov 0.0   ;;  %vm14268_vm0 = vmmov 0  }
  0x92   :  { %v193_v2 = vld [vmem:[#allocation10] sm:$0xff]  ;;  %v14487_v3 = vpack.c.bf16 %v197_v1, %v194_v0  ;;  %v200_v5 = vld [vmem:[#allocation10 + $0x38] sm:$0xff]  ;;  %v203_v6 = vld [vmem:[#allocation10 + $0x50] sm:$0xff]  ;;  %11441 = vmatprep.subr.bf16.mxu1 %v16889_v7  ;;  %321 = vmatprep.mubr.f32.mxu0 %v14267_v8  ;;  %166 = vst [vmem:[#allocation2] sm:$0xff] %v14267_v8  ;;  %s182_s13 = sld [smem:[#allocation5]]  ;;  %p424_p5 = scmp.gt.s32.totalorder %s16859_s1, 0 }
  0x93   :  { %167 = vst [vmem:[#allocation2 + $0x8] sm:$0xff] %v14267_v8  ;;  %v14493_v9 = vpack.c.bf16 %v196_v4, %v193_v2  ;;  %v14495_v10 = vpack.c.bf16 %v203_v6, %v200_v5  ;;  %v199_v11 = vld [vmem:[#allocation10 + $0x30] sm:$0xff]  ;;  %v202_v12 = vld [vmem:[#allocation10 + $0x48] sm:$0xff]  ;;  %9201 = vmatprep.mubr.msk.f32.mxu1 %vm14268_vm0, %v14267_v8  ;;  %v209_v14 = vld [vmem:[#allocation10 + $0x80] sm:$0xff]  ;;  %s8011_s18 = sld [smem:[#allocation5 + $0x1]]  ;;  %p656_p6 = scmp.gt.s32.totalorder %s16859_s1, 1 }
  0x94   :  { %v206_v13 = vld [vmem:[#allocation10 + $0x68] sm:$0xff]  ;;  %11410 = vmatprep.subr.bf16.mxu0 %v14487_v3  ;;  %v14501_v15 = vpack.c.bf16 %v202_v12, %v199_v11  ;;  %v205_v17 = vld [vmem:[#allocation10 + $0x60] sm:$0xff]  ;;  %v208_v18 = vld [vmem:[#allocation10 + $0x78] sm:$0xff]  ;;  %s425_s6 = scalar_select %p424_p5, 1, 0  ;;  %vm2653_vm11 = vcmask 1040384  }
  0x95   :  { %11412 = vmatpush1.bf16.msra.mxu0 %v14493_v9  ;;  %v14504_v16 = vpack.c.bf16 %v209_v14, %v206_v13  ;;  %v212_v19 = vld [vmem:[#allocation10 + $0x98] sm:$0xff]  ;;  %v215_v20 = vld [vmem:[#allocation10 + $0xb0] sm:$0xff]  ;;  %v14507_v21 = vpack.c.bf16 %v208_v18, %v205_v17  ;;  %v214_v24 = vld [vmem:[#allocation10 + $0xa8] sm:$0xff]  ;;  %v242_v17 = vlaneseq  ;;  %s657_s30 = scalar_select %p656_p6, 1, 0 }
  0x96   :  { %11414 = vmatprep.subr.bf16.mxu0 %v14495_v10  ;;  %v14510_v22 = vpack.c.bf16 %v215_v20, %v212_v19  ;;  %v211_v23 = vld [vmem:[#allocation10 + $0x90] sm:$0xff]  ;;  %v218_v25 = vld [vmem:[#allocation10 + $0xc8] sm:$0xff]  ;;  %v221_v26 = vld [vmem:[#allocation10 + $0xe0] sm:$0xff]  ;;  %s8017_s7 = sld [smem:[#allocation5 + $0x2]]  ;;  %p889_p7 = scmp.gt.s32.totalorder %s16859_s1, 2 }
  0x97   :  { %v195_v27 = vld [vmem:[#allocation10 + $0x10] sm:$0xff]  ;;  %v198_v28 = vld [vmem:[#allocation10 + $0x28] sm:$0xff]  ;;  %v201_v30 = vld [vmem:[#allocation10 + $0x40] sm:$0xff]  ;;  %v14515_v32 = vpack.c.bf16 %v214_v24, %v211_v23  ;;  %v14518_v33 = vpack.c.bf16 %v221_v26, %v218_v25  ;;  %v243_v18 = vshrl.u32 %v242_v17, 7  ;;  %s8021_s15 = sld [smem:[#allocation5 + $0x3]]  ;;  %p1122_p8 = scmp.gt.s32.totalorder %s16859_s1, 3 }
  0x98   :  { %v14512_v29 = vpack.c.bf16 %v198_v28, %v195_v27  ;;  %v204_v31 = vld [vmem:[#allocation10 + $0x58] sm:$0xff]  ;;  %v217_v34 = vld [vmem:[#allocation10 + $0xc0] sm:$0xff]  ;;  %v227_v38 = vld [vmem:[#allocation10 + $0x110] sm:$0xff]  ;;  %s183_s24 = sshra.s32 %s182_s13, 3  ;;  %s186_s23 = sand.u32 7, %s182_s13 }
  0x99   :  { %11416 = vmatpush1.bf16.msra.mxu0 %v14501_v15  ;;  %v220_v35 = vld [vmem:[#allocation10 + $0xd8] sm:$0xff]  ;;  %v14521_v37 = vpack.c.bf16 %v204_v31, %v201_v30  ;;  %v207_v39 = vld [vmem:[#allocation10 + $0x70] sm:$0xff]  ;;  %v210_v40 = vld [vmem:[#allocation10 + $0x88] sm:$0xff]  ;;  %s8008_s3 = smul.u32 24, %s183_s24  ;;  %v14612_v19 = vsub.s32 0, %v243_v18  ;;  %v14617_v23 = vsub.s32 1, %v243_v18 }
  0x9a   :  { %11418 = vmatprep.subr.bf16.mxu0 %v14504_v16  ;;  %v224_v36 = vld [vmem:[#allocation10 + $0xf8] sm:$0xff]  ;;  %11443 = vmatpush3.bf16.msra.mxu1 %v14512_v29  ;;  %v14525_v41 = vpack.c.bf16 %v220_v35, %v217_v34  ;;  %v223_v43 = vld [vmem:[#allocation10 + $0xf0] sm:$0xff]  ;;  %v226_v44 = vld [vmem:[#allocation10 + $0x108] sm:$0xff]  ;;  %v14531_v46 = vpack.c.bf16 %v210_v40, %v207_v39  ;;  %s431_s19 = sshra.s32 %s8011_s18, 3  ;;  %s434_s29 = sand.u32 7, %s8011_s18 }
  0x9b   :  { %11444 = vmatprep.subr.bf16.mxu1 %v16889_v7  ;;  %v14528_v42 = vpack.c.bf16 %v227_v38, %v224_v36  ;;  %v230_v45 = vld [vmem:[#allocation10 + $0x128] sm:$0xff]  ;;  %v233_v47 = vld [vmem:[#allocation10 + $0x140] sm:$0xff]  ;;  %v216_v49 = vld [vmem:[#allocation10 + $0xb8] sm:$0xff]  ;;  %v14535_v50 = vpack.c.bf16 %v226_v44, %v223_v43  ;;  %s189_s22 = sadd.s32 %s8008_s3, %s186_s23  ;;  %s8012_s27 = smul.u32 24, %s431_s19 }
  0x9c   :  { %v213_v48 = vld [vmem:[#allocation10 + $0xa0] sm:$0xff]  ;;  %v14538_v51 = vpack.c.bf16 %v233_v47, %v230_v45  ;;  %v232_v53 = vld [vmem:[#allocation10 + $0x138] sm:$0xff]  ;;  %v239_v56 = vld [vmem:[#allocation10 + $0x170] sm:$0xff]  ;;  %s190_s25 = scalar_lea.vmem [#allocation9], %s189_s22  ;;  %s664_s10 = sshra.s32 %s8017_s7, 3 }
  0x9d   :  { %11420 = vmatpush1.bf16.msra.mxu0 %v14507_v21  ;;  %v229_v52 = vld [vmem:[#allocation10 + $0x120] sm:$0xff]  ;;  %v236_v54 = vld [vmem:[#allocation10 + $0x158] sm:$0xff]  ;;  %v14541_v55 = vpack.c.bf16 %v216_v49, %v213_v48  ;;  %v219_v57 = vld [vmem:[#allocation10 + $0xd0] sm:$0xff]  ;;  %v14633_v49 = vsub.s32 2, %v243_v18  ;;  %s437_s11 = sadd.s32 %s8012_s27, %s434_s29  ;;  %s8018_s0 = smul.u32 24, %s664_s10 }
  0x9e   :  { %11422 = vmatprep.subr.bf16.mxu0 %v14510_v22  ;;  %11446 = vmatpush3.bf16.msra.mxu1 %v14521_v37  ;;  %v222_v58 = vld [vmem:[#allocation10 + $0xe8] sm:$0xff]  ;;  %v14545_v59 = vpack.c.bf16 %v232_v53, %v229_v52  ;;  %v14548_v60 = vpack.c.bf16 %v239_v56, %v236_v54  ;;  %v235_v61 = vld [vmem:[#allocation10 + $0x150] sm:$0xff]  ;;  %v225_v0 = vld [vmem:[#allocation10 + $0x100] sm:$0xff]  ;;  %s438_s26 = scalar_lea.vmem [#allocation9], %s437_s11  ;;  %s667_s13 = sand.u32 7, %s8017_s7 }
  0x9f   :  { %11447 = vmatprep.subr.bf16.mxu1 %v16889_v7  ;;  %v238_v62 = vld [vmem:[#allocation10 + $0x168] sm:$0xff]  ;;  %v14551_v63 = vpack.c.bf16 %v222_v58, %v219_v57  ;;  %v228_v1 = vld [vmem:[#allocation10 + $0x118] sm:$0xff]  ;;  %v231_v5 = vld [vmem:[#allocation10 + $0x130] sm:$0xff]  ;;  %s670_s24 = sadd.s32 %s8018_s0, %s667_s13  ;;  %s897_s16 = sshra.s32 %s8021_s15, 3 }
  0xa0   :  { %v14555_v2 = vpack.c.bf16 %v238_v62, %v235_v61  ;;  %v14559_v4 = vpack.c.bf16 %v228_v1, %v225_v0  ;;  %v234_v6 = vld [vmem:[#allocation10 + $0x148] sm:$0xff]  ;;  %v237_v12 = vld [vmem:[#allocation10 + $0x160] sm:$0xff]  ;;  %v240_v13 = vld [vmem:[#allocation10 + $0x178] sm:$0xff]  ;;  %s671_s3 = scalar_lea.vmem [#allocation9], %s670_s24  ;;  %s8022_s20 = smul.u32 24, %s897_s16 }
  0xa1   :  { %11424 = vmatpush1.bf16.msra.mxu0 %v14515_v32  ;;  %v14564_v11 = vpack.c.bf16 %v234_v6, %v231_v5  ;;  %v14572_v14 = vpack.c.bf16 %v240_v13, %v237_v12  ;;  %v165_v20 = vld [vmem:[%s16863_s5] sm:$0x7]  ;;  %v426_v5 = vstv %s425_s6  ;;  %s890_s17 = scalar_select %p889_p7, 1, 0 }
  0xa2   :  { %11426 = vmatprep.subr.bf16.mxu0 %v14518_v33  ;;  %11449 = vmatpush3.bf16.msra.mxu1 %v14531_v46  ;;  %v14622_v24 = vld [vmem:[%s16862_s4] sm:$0x7]  ;;  %v14625_v26 = vrot.slane %v165_v20, %v14612_v19  ;;  %v14629_v28 = vrot.slane %v165_v20, %v14617_v23  ;;  %v14636_v52 = vrot.slane %v165_v20, %v14633_v49  ;;  %vm427_vm1 = vcmp.eq.s32.totalorder %v426_v5, 1  ;;  %s1123_s19 = scalar_select %p1122_p8, 1, 0 }
  0xa3   :  { %11450 = vmatprep.subr.bf16.mxu1 %v16889_v7  ;;  %v191_v25 = vld [vmem:[%s190_s25] ss:$8 sm:$0x7]  ;;  %s900_s25 = sand.u32 7, %s8021_s15  ;;  %s8025_s27 = sld [smem:[#allocation5 + $0x4]] }
  0xa4   :  { %v192_v27 = vadd.f32 %v191_v25, %v14622_v24  ;;  %v439_v25 = vld [vmem:[%s438_s26] ss:$8 sm:$0x7]  ;;  %s903_s5 = sadd.s32 %s8022_s20, %s900_s25  ;;  %p1355_p9 = scmp.gt.s32.totalorder %s16859_s1, 4 }
  0xa5   :  { %11428 = vmatpush1.bf16.msra.mxu0 %v14525_v41  ;;  %s904_s28 = scalar_lea.vmem [#allocation9], %s903_s5  ;;  %s8029_s0 = sld [smem:[#allocation5 + $0x5]] }
  0xa6   :  { %11430 = vmatprep.subr.bf16.mxu0 %v14528_v42  ;;  %11452 = vmatpush3.bf16.msra.mxu1 %v14541_v55  ;;  %v406_v36 = vrot.slane %v192_v27, 1  ;;  %v416_v57 = vrot.slane %v192_v27, 2  ;;  %s1356_s10 = scalar_select %p1355_p9, 1, 0 }
  0xa7   :  { %11453 = vmatprep.subr.bf16.mxu1 %v16889_v7  ;;  %p1588_p10 = scmp.gt.s32.totalorder %s16859_s1, 5  ;;  %s8033_s20 = sld [smem:[#allocation5 + $0x6]] }
  0xa8   :  { %p1821_p11 = scmp.gt.s32.totalorder %s16859_s1, 6  ;;  %p2054_p12 = scmp.gt.s32.totalorder %s16859_s1, 7 }
  0xa9   :  { %11432 = vmatpush1.bf16.msra.mxu0 %v14535_v50  ;;  %s1130_s29 = sshra.s32 %s8025_s27, 3  ;;  %s1133_s26 = sand.u32 7, %s8025_s27 }
  0xaa   :  { %11434 = vmatprep.subr.bf16.mxu0 %v14538_v51  ;;  %11455 = vmatpush3.bf16.msra.mxu1 %v14551_v63  ;;  %s8026_s11 = smul.u32 24, %s1130_s29 }
  0xab   :  { %11456 = vmatprep.subr.bf16.mxu1 %v16889_v7  ;;  %s1363_s13 = sshra.s32 %s8029_s0, 3 }
  0xac   :  { %s1136_s2 = sadd.s32 %s8026_s11, %s1133_s26  ;;  %s8030_s24 = smul.u32 24, %s1363_s13 }
  0xad   :  { %11436 = vmatpush1.bf16.msra.mxu0 %v14545_v59  ;;  %s1137_s21 = scalar_lea.vmem [#allocation9], %s1136_s2  ;;  %s1596_s25 = sshra.s32 %s8033_s20, 3 }
  0xae   :  { %11438 = vmatprep.subr.bf16.mxu0 %v14548_v60  ;;  %11458 = vmatpush3.bf16.msra.mxu1 %v14559_v4  ;;  %s1589_s16 = scalar_select %p1588_p10, 1, 0 }
  0xaf   :  { %11459 = vmatprep.subr.bf16.mxu1 %v16889_v7  ;;  %s8034_s5 = smul.u32 24, %s1596_s25  ;;  %s8037_s26 = sld [smem:[#allocation5 + $0x7]] }
  0xb0   :  { %s1822_s11 = scalar_select %p1821_p11, 1, 0 }
  0xb1   :  { %11440 = vmatpush1.bf16.msra.mxu0 %v14555_v2 }
  0xb2   :  { %11466 = vmatprep.subr.bf16.mxu0 %v14487_v3  ;;  %11461 = vmatpush3.bf16.msra.mxu1 %v14564_v11 }
  0xb3   :  { %11462 = vmatprep.subr.bf16.mxu1 %v16889_v7 }
  0xb4   :  { %322 = vmatmul.mubr.f32.vlgmr.msra.gmra.mrb[0].mxu0 %v14267_v8 }
  0xb5   :  { %11468 = vmatpush1.bf16.msra.mxu0 %v14493_v9  ;;  %553 = vmatprep.mubr.f32.mxu0 %v14267_v8  ;;  %s1829_s2 = sshra.s32 %s8037_s26, 3 }
  0xb6   :  { %11470 = vmatprep.subr.bf16.mxu0 %v14495_v10  ;;  %11464 = vmatpush3.bf16.msra.mxu1 %v14572_v14 }
  0xb7   :  { %11497 = vmatprep.subr.bf16.mxu1 %v16889_v7 }
  0xb9   :  { %11472 = vmatpush1.bf16.msra.mxu0 %v14501_v15  ;;  %9202 = vmatmul.mubr.f32.vlgmr.msra.gmra.mrb[0].mxu1 %v14267_v8 }
  0xba   :  { %11474 = vmatprep.subr.bf16.mxu0 %v14504_v16  ;;  %11499 = vmatpush3.bf16.msra.mxu1 %v14512_v29 }
  0xbb   :  { %11500 = vmatprep.subr.bf16.mxu1 %v16889_v7  ;;  %9236 = vmatprep.mubr.msk.f32.mxu1 %vm14268_vm0, %v14267_v8 }
  0xbd   :  { %11476 = vmatpush1.bf16.msra.mxu0 %v14507_v21 }
  0xbe   :  { %11478 = vmatprep.subr.bf16.mxu0 %v14510_v22  ;;  %11502 = vmatpush3.bf16.msra.mxu1 %v14521_v37 }
  0xbf   :  { %11503 = vmatprep.subr.bf16.mxu1 %v16889_v7 }
  0xc1   :  { %11480 = vmatpush1.bf16.msra.mxu0 %v14515_v32 }
  0xc2   :  { %11482 = vmatprep.subr.bf16.mxu0 %v14518_v33  ;;  %11505 = vmatpush3.bf16.msra.mxu1 %v14531_v46 }
  0xc3   :  { %11506 = vmatprep.subr.bf16.mxu1 %v16889_v7 }
  0xc5   :  { %11484 = vmatpush1.bf16.msra.mxu0 %v14525_v41 }
  0xc6   :  { %11486 = vmatprep.subr.bf16.mxu0 %v14528_v42  ;;  %11508 = vmatpush3.bf16.msra.mxu1 %v14541_v55 }
  0xc7   :  { %11509 = vmatprep.subr.bf16.mxu1 %v16889_v7 }
  0xc9   :  { %11488 = vmatpush1.bf16.msra.mxu0 %v14535_v50 }
  0xca   :  { %11490 = vmatprep.subr.bf16.mxu0 %v14538_v51  ;;  %11511 = vmatpush3.bf16.msra.mxu1 %v14551_v63 }
  0xcb   :  { %11512 = vmatprep.subr.bf16.mxu1 %v16889_v7 }
  0xcd   :  { %11492 = vmatpush1.bf16.msra.mxu0 %v14545_v59 }
  0xce   :  { %11494 = vmatprep.subr.bf16.mxu0 %v14548_v60  ;;  %11514 = vmatpush3.bf16.msra.mxu1 %v14559_v4 }
  0xcf   :  { %11515 = vmatprep.subr.bf16.mxu1 %v16889_v7 }
  0xd1   :  { %11496 = vmatpush1.bf16.msra.mxu0 %v14555_v2 }
  0xd2   :  { %11522 = vmatprep.subr.bf16.mxu0 %v14487_v3  ;;  %11517 = vmatpush3.bf16.msra.mxu1 %v14564_v11 }
  0xd3   :  { %11518 = vmatprep.subr.bf16.mxu1 %v16889_v7 }
  0xd6   :  { %11520 = vmatpush3.bf16.msra.mxu1 %v14572_v14 }
  0xd7   :  { %11553 = vmatprep.subr.bf16.mxu1 %v16889_v7 }
 0x187   :  { %v323_v30 = vpop.f32.mrb[0].mxu0 }
 0x188   :  { %v324_v31 = vadd.f32 %v323_v30, %v14625_v26  ;;  %v325_v34 = vpop.f32.mrb[1].mxu0 }
 0x189   :  { %v326_v35 = vadd.f32 %v325_v34, %v14629_v28 }
 0x18a   :  { %v398_v38 = vadd.f32 %v324_v31, %v192_v27  ;;  %v440_v27 = vadd.f32 %v439_v25, %v14622_v24 }
 0x18b   :  { %v408_v40 = vadd.f32 %v406_v36, %v326_v35 }
 0x18c   :  { %v8009_v39 = vmul.f32 -1.442695, %v398_v38  ;;  %v394_v43 = vpop.f32.mrb[0].mxu1 }
 0x18d   :  { %v8010_v44 = vmul.f32 -1.442695, %v408_v40  ;;  %v9203_v45 = vpop.f32.mrb[1].mxu1  ;;  %v395_v56 = vadd.f32 %v394_v43, %v14636_v52 }
 0x18e   :  { %13780 = vpow2.f32 %v8009_v39 }
 0x18f   :  { %13782 = vpow2.f32 %v8010_v44 }
 0x198   :  { %v13781_v47 = vpop.eup %13780 }
 0x199   :  { %v402_v48 = vadd.f32 1.0, %v13781_v47  ;;  %v13783_v53 = vpop.eup %13782 }
 0x19a   :  { %v412_v54 = vadd.f32 1.0, %v13783_v53 }
 0x19b   :  { %13784 = vrcp.f32 %v402_v48 }
 0x19c   :  { %13786 = vrcp.f32 %v412_v54 }
 0x1a5   :  { %v13785_v58 = vpop.eup %13784 }
 0x1a6   :  { %v415_v61 = vmul.f32 %v13785_v58, %v395_v56  ;;  %v13787_v0 = vpop.eup %13786  ;;  %v648_v56 = vrot.slane %v440_v27, 2 }
 0x1a7   :  { %v420_v1 = vsub.f32 1.0, %v13787_v0  ;;  %v422_v13 = vmul.f32 0.0, %v13787_v0 }
 0x1a8   :  { %v418_v62 = vadd.f32 %v416_v57, %v415_v61 }
 0x1aa   :  { %13788 = vtanh.f32 %v418_v62 }
 0x1b4   :  { %v13789_v6 = vpop.eup %13788 }
 0x1b5   :  { %v421_v12 = vmul.f32 %v13789_v6, %v420_v1  ;;  %v658_v1 = vstv %s657_s30  ;;  %s1832_s30 = sand.u32 7, %s8037_s26 }
 0x1b6   :  { %vm659_vm2 = vcmp.eq.s32.totalorder %v658_v1, 1 }
 0x1b7   :  { %v423_v18 = vadd.f32 %v422_v13, %v421_v12 }
 0x1b9   :  { %8013 = vmatmul.mubr.msk.f32.vlgmr.msra.gmra.mrb[2].mxu0 %vm427_vm1, %v423_v18  ;;  %9237 = vmatmul.mubr.msk.f32.vlgmr.msra.gmra.mrb[2].mxu1 %vm427_vm1, %v423_v18  ;;  %v14642_v20 = vsel %vm427_vm1, %v423_v18, 0.0 }
 0x1ba   :  { %11524 = vmatpush1.bf16.msra.mxu0 %v14493_v9  ;;  %11555 = vmatpush3.bf16.msra.mxu1 %v14512_v29  ;;  %429 = vst [vmem:[#allocation2] sm:$0x1] %v14642_v20 }
 0x1bb   :  { %11526 = vmatprep.subr.bf16.mxu0 %v14495_v10  ;;  %11556 = vmatprep.subr.bf16.mxu1 %v16889_v7 }
 0x1bc   :  { %786 = vmatprep.mubr.f32.mxu0 %v14267_v8  ;;  %9271 = vmatprep.mubr.msk.f32.mxu1 %vm14268_vm0, %v14267_v8 }
 0x1be   :  { %11528 = vmatpush1.bf16.msra.mxu0 %v14501_v15  ;;  %11558 = vmatpush3.bf16.msra.mxu1 %v14521_v37 }
 0x1bf   :  { %11530 = vmatprep.subr.bf16.mxu0 %v14504_v16  ;;  %11559 = vmatprep.subr.bf16.mxu1 %v16889_v7 }
 0x1c2   :  { %11532 = vmatpush1.bf16.msra.mxu0 %v14507_v21  ;;  %11561 = vmatpush3.bf16.msra.mxu1 %v14531_v46 }
 0x1c3   :  { %11534 = vmatprep.subr.bf16.mxu0 %v14510_v22  ;;  %11562 = vmatprep.subr.bf16.mxu1 %v16889_v7 }
 0x1c6   :  { %11536 = vmatpush1.bf16.msra.mxu0 %v14515_v32  ;;  %11564 = vmatpush3.bf16.msra.mxu1 %v14541_v55 }
 0x1c7   :  { %11538 = vmatprep.subr.bf16.mxu0 %v14518_v33  ;;  %11565 = vmatprep.subr.bf16.mxu1 %v16889_v7 }
 0x1ca   :  { %11540 = vmatpush1.bf16.msra.mxu0 %v14525_v41  ;;  %11567 = vmatpush3.bf16.msra.mxu1 %v14551_v63 }
 0x1cb   :  { %11542 = vmatprep.subr.bf16.mxu0 %v14528_v42  ;;  %11568 = vmatprep.subr.bf16.mxu1 %v16889_v7 }
 0x1ce   :  { %11544 = vmatpush1.bf16.msra.mxu0 %v14535_v50  ;;  %11570 = vmatpush3.bf16.msra.mxu1 %v14559_v4 }
 0x1cf   :  { %11546 = vmatprep.subr.bf16.mxu0 %v14538_v51  ;;  %11571 = vmatprep.subr.bf16.mxu1 %v16889_v7 }
 0x1d2   :  { %11548 = vmatpush1.bf16.msra.mxu0 %v14545_v59  ;;  %11573 = vmatpush3.bf16.msra.mxu1 %v14564_v11 }
 0x1d3   :  { %11550 = vmatprep.subr.bf16.mxu0 %v14548_v60  ;;  %11574 = vmatprep.subr.bf16.mxu1 %v16889_v7 }
 0x1d6   :  { %11552 = vmatpush1.bf16.msra.mxu0 %v14555_v2  ;;  %11576 = vmatpush3.bf16.msra.mxu1 %v14572_v14 }
 0x1d7   :  { %11578 = vmatprep.subr.bf16.mxu0 %v14487_v3  ;;  %11609 = vmatprep.subr.bf16.mxu1 %v16889_v7  ;;  %v638_v3 = vrot.slane %v440_v27, 1 }
 0x28c   :  { %v555_v30 = vpop.f32.mrb[2].mxu0  ;;  %v626_v31 = vpop.f32.mrb[2].mxu1 }
 0x28d   :  { %v556_v34 = vadd.f32 %v555_v30, %v14625_v26  ;;  %v557_v35 = vpop.f32.mrb[3].mxu0  ;;  %v9238_v36 = vpop.f32.mrb[3].mxu1  ;;  %v627_v54 = vadd.f32 %v626_v31, %v14636_v52 }
 0x28e   :  { %v558_v38 = vadd.f32 %v557_v35, %v14629_v28 }
 0x28f   :  { %v630_v39 = vadd.f32 %v556_v34, %v440_v27  ;;  %v891_v27 = vstv %s890_s17 }
 0x290   :  { %v640_v43 = vadd.f32 %v638_v3, %v558_v38  ;;  %vm892_vm3 = vcmp.eq.s32.totalorder %v891_v27, 1  ;;  %v1141_v3 = vld [vmem:[#allocation10 + $0x8] sm:$0xff] }
 0x291   :  { %v8015_v40 = vmul.f32 -1.442695, %v630_v39  ;;  %v1144_v39 = vld [vmem:[#allocation10 + $0x20] sm:$0xff] }
 0x292   :  { %v8016_v44 = vmul.f32 -1.442695, %v640_v43  ;;  %v1140_v43 = vld [vmem:[#allocation10] sm:$0xff] }
 0x293   :  { %13790 = vpow2.f32 %v8015_v40  ;;  %v14743_v40 = vpack.c.bf16 %v1144_v39, %v1141_v3  ;;  %v1177_v3 = vld [vmem:[#allocation10 + $0x128] sm:$0xff]  ;;  %v1180_v39 = vld [vmem:[#allocation10 + $0x140] sm:$0xff] }
 0x294   :  { %13792 = vpow2.f32 %v8016_v44  ;;  %v1143_v44 = vld [vmem:[#allocation10 + $0x18] sm:$0xff] }
 0x29d   :  { %v13791_v45 = vpop.eup %13790 }
 0x29e   :  { %v634_v47 = vadd.f32 1.0, %v13791_v45  ;;  %v13793_v48 = vpop.eup %13792  ;;  %v1142_v45 = vld [vmem:[#allocation10 + $0x10] sm:$0xff] }
 0x29f   :  { %v644_v53 = vadd.f32 1.0, %v13793_v48  ;;  %v1145_v48 = vld [vmem:[#allocation10 + $0x28] sm:$0xff] }
 0x2a0   :  { %13794 = vrcp.f32 %v634_v47  ;;  %v14745_v47 = vpack.c.bf16 %v1143_v44, %v1140_v43  ;;  %v1176_v43 = vld [vmem:[#allocation10 + $0x120] sm:$0xff]  ;;  %v14800_v44 = vpack.c.bf16 %v1180_v39, %v1177_v3 }
 0x2a1   :  { %13796 = vrcp.f32 %v644_v53  ;;  %v14748_v53 = vpack.c.bf16 %v1145_v48, %v1142_v45  ;;  %v1179_v45 = vld [vmem:[#allocation10 + $0x138] sm:$0xff]  ;;  %v1178_v48 = vld [vmem:[#allocation10 + $0x130] sm:$0xff] }
 0x2aa   :  { %v13795_v57 = vpop.eup %13794 }
 0x2ab   :  { %v647_v58 = vmul.f32 %v13795_v57, %v627_v54  ;;  %v13797_v62 = vpop.eup %13796  ;;  %v1147_v54 = vld [vmem:[#allocation10 + $0x38] sm:$0xff]  ;;  %v1146_v57 = vld [vmem:[#allocation10 + $0x30] sm:$0xff] }
 0x2ac   :  { %v652_v0 = vsub.f32 1.0, %v13797_v62  ;;  %v654_v12 = vmul.f32 %v13797_v62, %v14642_v20 }
 0x2ad   :  { %v650_v61 = vadd.f32 %v648_v56, %v647_v58  ;;  %v1150_v56 = vld [vmem:[#allocation10 + $0x50] sm:$0xff]  ;;  %v1149_v58 = vld [vmem:[#allocation10 + $0x48] sm:$0xff] }
 0x2ae   :  { %v14755_v62 = vpack.c.bf16 %v1149_v58, %v1146_v57  ;;  %v1186_v57 = vld [vmem:[#allocation10 + $0x170] sm:$0xff]  ;;  %v14803_v58 = vpack.c.bf16 %v1179_v45, %v1176_v43 }
 0x2af   :  { %13798 = vtanh.f32 %v650_v61  ;;  %v1148_v61 = vld [vmem:[#allocation10 + $0x40] sm:$0xff] }
 0x2b9   :  { %v13799_v5 = vpop.eup %13798 }
 0x2ba   :  { %v653_v6 = vmul.f32 %v13799_v5, %v652_v0  ;;  %v1151_v0 = vld [vmem:[#allocation10 + $0x58] sm:$0xff]  ;;  %v1153_v5 = vld [vmem:[#allocation10 + $0x68] sm:$0xff] }
 0x2bb   :  { %v14758_v1 = vpack.c.bf16 %v1151_v0, %v1148_v61 }
 0x2bc   :  { %v655_v13 = vadd.f32 %v654_v12, %v653_v6  ;;  %v1156_v6 = vld [vmem:[#allocation10 + $0x80] sm:$0xff] }
 0x2bd   :  { %v14762_v12 = vpack.c.bf16 %v1156_v6, %v1153_v5  ;;  %v1182_v5 = vld [vmem:[#allocation10 + $0x150] sm:$0xff]  ;;  %v1185_v6 = vld [vmem:[#allocation10 + $0x168] sm:$0xff] }
 0x2be   :  { %v660_v18 = vsel %vm659_vm2, %v655_v13, 0.0  ;;  %v14689_v25 = vsel %vm659_vm2, %v655_v13, %v14642_v20  ;;  %v1152_v13 = vld [vmem:[#allocation10 + $0x60] sm:$0xff] }
 0x2bf   :  { %661 = vst [vmem:[#allocation2 + $0x1] sm:$0x1] %v660_v18  ;;  %787 = vmatmul.mubr.f32.vlgmr.msra.gmra.mrb[4].mxu0 %v14689_v25  ;;  %9272 = vmatmul.mubr.f32.vlgmr.msra.gmra.mrb[4].mxu1 %v14689_v25  ;;  %v1155_v18 = vld [vmem:[#allocation10 + $0x78] sm:$0xff] }
 0x2c0   :  { %11580 = vmatpush1.bf16.msra.mxu0 %v14493_v9  ;;  %11611 = vmatpush3.bf16.msra.mxu1 %v14512_v29  ;;  %v672_v9 = vld [vmem:[%s671_s3] ss:$8 sm:$0x7]  ;;  %s1366_s3 = sand.u32 7, %s8029_s0 }
 0x2c1   :  { %11582 = vmatprep.subr.bf16.mxu0 %v14495_v10  ;;  %11612 = vmatprep.subr.bf16.mxu1 %v16889_v7  ;;  %v673_v10 = vadd.f32 %v672_v9, %v14622_v24  ;;  %v14765_v9 = vpack.c.bf16 %v1155_v18, %v1152_v13  ;;  %v1184_v13 = vld [vmem:[#allocation10 + $0x160] sm:$0xff]  ;;  %v1187_v18 = vld [vmem:[#allocation10 + $0x178] sm:$0xff]  ;;  %s1369_s23 = sadd.s32 %s8030_s24, %s1366_s3 }
 0x2c2   :  { %1019 = vmatprep.mubr.f32.mxu0 %v14267_v8  ;;  %9306 = vmatprep.mubr.msk.f32.mxu1 %vm14268_vm0, %v14267_v8  ;;  %s1370_s22 = scalar_lea.vmem [#allocation9], %s1369_s23 }
 0x2c3   :  { %s2055_s24 = scalar_select %p2054_p12, 1, 0 }
 0x2c4   :  { %11584 = vmatpush1.bf16.msra.mxu0 %v14501_v15  ;;  %11614 = vmatpush3.bf16.msra.mxu1 %v14521_v37 }
 0x2c5   :  { %11586 = vmatprep.subr.bf16.mxu0 %v14504_v16  ;;  %11615 = vmatprep.subr.bf16.mxu1 %v16889_v7 }
 0x2c8   :  { %11588 = vmatpush1.bf16.msra.mxu0 %v14507_v21  ;;  %11617 = vmatpush3.bf16.msra.mxu1 %v14531_v46 }
 0x2c9   :  { %11590 = vmatprep.subr.bf16.mxu0 %v14510_v22  ;;  %11618 = vmatprep.subr.bf16.mxu1 %v16889_v7 }
 0x2cc   :  { %11592 = vmatpush1.bf16.msra.mxu0 %v14515_v32  ;;  %11620 = vmatpush3.bf16.msra.mxu1 %v14541_v55 }
 0x2cd   :  { %11594 = vmatprep.subr.bf16.mxu0 %v14518_v33  ;;  %11621 = vmatprep.subr.bf16.mxu1 %v16889_v7  ;;  %v871_v33 = vrot.slane %v673_v10, 1 }
 0x2d0   :  { %11596 = vmatpush1.bf16.msra.mxu0 %v14525_v41  ;;  %11623 = vmatpush3.bf16.msra.mxu1 %v14551_v63  ;;  %v881_v63 = vrot.slane %v673_v10, 2 }
 0x2d1   :  { %11598 = vmatprep.subr.bf16.mxu0 %v14528_v42  ;;  %11624 = vmatprep.subr.bf16.mxu1 %v16889_v7 }
 0x2d4   :  { %11600 = vmatpush1.bf16.msra.mxu0 %v14535_v50  ;;  %11626 = vmatpush3.bf16.msra.mxu1 %v14559_v4 }
 0x2d5   :  { %11602 = vmatprep.subr.bf16.mxu0 %v14538_v51  ;;  %11627 = vmatprep.subr.bf16.mxu1 %v16889_v7 }
 0x2d8   :  { %11604 = vmatpush1.bf16.msra.mxu0 %v14545_v59  ;;  %11629 = vmatpush3.bf16.msra.mxu1 %v14564_v11 }
 0x2d9   :  { %11606 = vmatprep.subr.bf16.mxu0 %v14548_v60  ;;  %11630 = vmatprep.subr.bf16.mxu1 %v16889_v7 }
 0x2dc   :  { %11608 = vmatpush1.bf16.msra.mxu0 %v14555_v2  ;;  %11632 = vmatpush3.bf16.msra.mxu1 %v14572_v14 }
 0x2dd   :  { %11665 = vmatprep.subr.bf16.mxu1 %v16889_v7  ;;  %11634 = vmatprep.subr.bf16.mxu0 %v14743_v40 }
 0x392   :  { %v788_v15 = vpop.f32.mrb[4].mxu0  ;;  %v859_v16 = vpop.f32.mrb[4].mxu1 }
 0x393   :  { %v789_v21 = vadd.f32 %v788_v15, %v14625_v26  ;;  %v790_v22 = vpop.f32.mrb[5].mxu0  ;;  %v9273_v29 = vpop.f32.mrb[5].mxu1  ;;  %v860_v60 = vadd.f32 %v859_v16, %v14636_v52  ;;  %v1159_v16 = vld [vmem:[#allocation10 + $0x98] sm:$0xff] }
 0x394   :  { %v791_v32 = vadd.f32 %v790_v22, %v14629_v28  ;;  %v1158_v29 = vld [vmem:[#allocation10 + $0x90] sm:$0xff] }
 0x395   :  { %v863_v37 = vadd.f32 %v789_v21, %v673_v10  ;;  %v1157_v10 = vld [vmem:[#allocation10 + $0x88] sm:$0xff]  ;;  %v1162_v21 = vld [vmem:[#allocation10 + $0xb0] sm:$0xff] }
 0x396   :  { %v873_v42 = vadd.f32 %v871_v33, %v791_v32  ;;  %v14772_v22 = vpack.c.bf16 %v1162_v21, %v1159_v16  ;;  %v1161_v32 = vld [vmem:[#allocation10 + $0xa8] sm:$0xff]  ;;  %v1160_v33 = vld [vmem:[#allocation10 + $0xa0] sm:$0xff] }
 0x397   :  { %v8019_v41 = vmul.f32 -1.442695, %v863_v37  ;;  %v14775_v37 = vpack.c.bf16 %v1161_v32, %v1158_v29  ;;  %v905_v16 = vld [vmem:[%s904_s28] ss:$8 sm:$0x7]  ;;  %s1599_s28 = sand.u32 7, %s8033_s20 }
 0x398   :  { %v8020_v46 = vmul.f32 -1.442695, %v873_v42  ;;  %v906_v21 = vadd.f32 %v905_v16, %v14622_v24  ;;  %s1602_s6 = sadd.s32 %s8034_s5, %s1599_s28 }
 0x399   :  { %13800 = vpow2.f32 %v8019_v41  ;;  %v1163_v41 = vld [vmem:[#allocation10 + $0xb8] sm:$0xff]  ;;  %s1603_s18 = scalar_lea.vmem [#allocation9], %s1602_s6 }
 0x39a   :  { %13802 = vpow2.f32 %v8020_v46  ;;  %v14778_v42 = vpack.c.bf16 %v1163_v41, %v1160_v33  ;;  %v1165_v46 = vld [vmem:[#allocation10 + $0xc8] sm:$0xff]  ;;  %v1114_v3 = vrot.slane %v906_v21, 2 }
 0x3a3   :  { %v13801_v50 = vpop.eup %13800 }
 0x3a4   :  { %v867_v51 = vadd.f32 1.0, %v13801_v50  ;;  %v13803_v55 = vpop.eup %13802  ;;  %v1168_v50 = vld [vmem:[#allocation10 + $0xe0] sm:$0xff] }
 0x3a5   :  { %v877_v59 = vadd.f32 1.0, %v13803_v55  ;;  %v1164_v55 = vld [vmem:[#allocation10 + $0xc0] sm:$0xff] }
 0x3a6   :  { %13804 = vrcp.f32 %v867_v51  ;;  %v14782_v51 = vpack.c.bf16 %v1168_v50, %v1165_v46 }
 0x3a7   :  { %13806 = vrcp.f32 %v877_v59  ;;  %v1167_v59 = vld [vmem:[#allocation10 + $0xd8] sm:$0xff] }
 0x3b0   :  { %v13805_v2 = vpop.eup %13804 }
 0x3b1   :  { %v880_v4 = vmul.f32 %v13805_v2, %v860_v60  ;;  %v13807_v14 = vpop.eup %13806  ;;  %v1166_v60 = vld [vmem:[#allocation10 + $0xd0] sm:$0xff]  ;;  %v1169_v2 = vld [vmem:[#allocation10 + $0xe8] sm:$0xff] }
 0x3b2   :  { %v885_v20 = vsub.f32 1.0, %v13807_v14  ;;  %v887_v34 = vmul.f32 %v13807_v14, %v14689_v25  ;;  %v1174_v14 = vld [vmem:[#allocation10 + $0x110] sm:$0xff] }
 0x3b3   :  { %v883_v11 = vadd.f32 %v881_v63, %v880_v4  ;;  %v14785_v63 = vpack.c.bf16 %v1167_v59, %v1164_v55  ;;  %v14788_v4 = vpack.c.bf16 %v1169_v2, %v1166_v60  ;;  %v1104_v55 = vrot.slane %v906_v21, 1 }
 0x3b5   :  { %13808 = vtanh.f32 %v883_v11  ;;  %v1171_v11 = vld [vmem:[#allocation10 + $0xf8] sm:$0xff] }
 0x3b6   :  { %v14791_v27 = vpack.c.bf16 %v1174_v14, %v1171_v11 }
 0x3bf   :  { %v13809_v30 = vpop.eup %13808 }
 0x3c0   :  { %v886_v31 = vmul.f32 %v13809_v30, %v885_v20  ;;  %v1170_v20 = vld [vmem:[#allocation10 + $0xf0] sm:$0xff]  ;;  %v1173_v30 = vld [vmem:[#allocation10 + $0x108] sm:$0xff] }
 0x3c2   :  { %v888_v35 = vadd.f32 %v887_v34, %v886_v31  ;;  %v1172_v31 = vld [vmem:[#allocation10 + $0x100] sm:$0xff]  ;;  %v1175_v34 = vld [vmem:[#allocation10 + $0x118] sm:$0xff] }
 0x3c4   :  { %v893_v36 = vsel %vm892_vm3, %v888_v35, 0.0  ;;  %v14736_v38 = vsel %vm892_vm3, %v888_v35, %v14689_v25  ;;  %v1154_v25 = vld [vmem:[#allocation10 + $0x70] sm:$0xff]  ;;  %v14794_v35 = vpack.c.bf16 %v1173_v30, %v1170_v20 }
 0x3c5   :  { %894 = vst [vmem:[#allocation2 + $0x2] sm:$0x1] %v893_v36  ;;  %1020 = vmatmul.mubr.f32.vlgmr.msra.gmra.mrb[6].mxu0 %v14736_v38  ;;  %9307 = vmatmul.mubr.f32.vlgmr.msra.gmra.mrb[6].mxu1 %v14736_v38  ;;  %v14768_v15 = vpack.c.bf16 %v1157_v10, %v1154_v25  ;;  %v14796_v36 = vpack.c.bf16 %v1175_v34, %v1172_v31 }
 0x3c6   :  { %1252 = vmatprep.mubr.f32.mxu0 %v14267_v8  ;;  %9341 = vmatprep.mubr.msk.f32.mxu1 %vm14268_vm0, %v14267_v8  ;;  %v14752_v8 = vpack.c.bf16 %v1150_v56, %v1147_v54  ;;  %v1181_v54 = vld [vmem:[#allocation10 + $0x148] sm:$0xff]  ;;  %v1183_v56 = vld [vmem:[#allocation10 + $0x158] sm:$0xff]  ;;  %v14813_v25 = vpack.c.bf16 %v1185_v6, %v1182_v5  ;;  %v14817_v10 = vpack.c.bf16 %v1187_v18, %v1184_v13 }
 0x3c7   :  { %11636 = vmatpush1.bf16.msra.mxu0 %v14745_v47  ;;  %11667 = vmatpush3.bf16.msra.mxu1 %v14748_v53  ;;  %v14807_v61 = vpack.c.bf16 %v1181_v54, %v1178_v48  ;;  %v14809_v0 = vpack.c.bf16 %v1186_v57, %v1183_v56  ;;  %v1124_v56 = vstv %s1123_s19 }
 0x3c8   :  { %11668 = vmatprep.subr.bf16.mxu1 %v16889_v7  ;;  %11638 = vmatprep.subr.bf16.mxu0 %v14752_v8  ;;  %vm1125_vm4 = vcmp.eq.s32.totalorder %v1124_v56, 1 }
 0x3cb   :  { %11640 = vmatpush1.bf16.msra.mxu0 %v14755_v62  ;;  %11670 = vmatpush3.bf16.msra.mxu1 %v14758_v1 }
 0x3cc   :  { %11671 = vmatprep.subr.bf16.mxu1 %v16889_v7  ;;  %11642 = vmatprep.subr.bf16.mxu0 %v14762_v12 }
 0x3cf   :  { %11644 = vmatpush1.bf16.msra.mxu0 %v14765_v9  ;;  %11673 = vmatpush3.bf16.msra.mxu1 %v14768_v15 }
 0x3d0   :  { %11674 = vmatprep.subr.bf16.mxu1 %v16889_v7  ;;  %11646 = vmatprep.subr.bf16.mxu0 %v14772_v22 }
 0x3d3   :  { %11648 = vmatpush1.bf16.msra.mxu0 %v14775_v37  ;;  %11676 = vmatpush3.bf16.msra.mxu1 %v14778_v42 }
 0x3d4   :  { %11677 = vmatprep.subr.bf16.mxu1 %v16889_v7  ;;  %11650 = vmatprep.subr.bf16.mxu0 %v14782_v51 }
 0x3d7   :  { %11652 = vmatpush1.bf16.msra.mxu0 %v14785_v63  ;;  %11679 = vmatpush3.bf16.msra.mxu1 %v14788_v4 }
 0x3d8   :  { %11654 = vmatprep.subr.bf16.mxu0 %v14791_v27  ;;  %11680 = vmatprep.subr.bf16.mxu1 %v16889_v7 }
 0x3db   :  { %11656 = vmatpush1.bf16.msra.mxu0 %v14794_v35  ;;  %11682 = vmatpush3.bf16.msra.mxu1 %v14796_v36 }
 0x3dc   :  { %11658 = vmatprep.subr.bf16.mxu0 %v14800_v44  ;;  %11683 = vmatprep.subr.bf16.mxu1 %v16889_v7 }
 0x3df   :  { %11660 = vmatpush1.bf16.msra.mxu0 %v14803_v58  ;;  %11685 = vmatpush3.bf16.msra.mxu1 %v14807_v61 }
 0x3e0   :  { %11662 = vmatprep.subr.bf16.mxu0 %v14809_v0  ;;  %11686 = vmatprep.subr.bf16.mxu1 %v16889_v7 }
 0x3e3   :  { %11664 = vmatpush1.bf16.msra.mxu0 %v14813_v25  ;;  %11688 = vmatpush3.bf16.msra.mxu1 %v14817_v10 }
 0x3e4   :  { %11690 = vmatprep.subr.bf16.mxu0 %v14743_v40  ;;  %11721 = vmatprep.subr.bf16.mxu1 %v16889_v7 }
 0x498   :  { %v1021_v29 = vpop.f32.mrb[6].mxu0  ;;  %v1092_v32 = vpop.f32.mrb[6].mxu1 }
 0x499   :  { %v1022_v33 = vadd.f32 %v1021_v29, %v14625_v26  ;;  %v1023_v41 = vpop.f32.mrb[7].mxu0  ;;  %v9308_v46 = vpop.f32.mrb[7].mxu1  ;;  %v1093_v34 = vadd.f32 %v1092_v32, %v14636_v52 }
 0x49a   :  { %v1024_v50 = vadd.f32 %v1023_v41, %v14629_v28 }
 0x49b   :  { %v1096_v59 = vadd.f32 %v1022_v33, %v906_v21  ;;  %v14841_v21 = vld [vmem:[#allocation2 + $0x8] sm:$0xff] }
 0x49c   :  { %v1106_v2 = vadd.f32 %v1104_v55, %v1024_v50 }
 0x49d   :  { %v8023_v60 = vmul.f32 -1.442695, %v1096_v59 }
 0x49e   :  { %v8024_v11 = vmul.f32 -1.442695, %v1106_v2 }
 0x49f   :  { %13810 = vpow2.f32 %v8023_v60 }
 0x4a0   :  { %13812 = vpow2.f32 %v8024_v11 }
 0x4a9   :  { %v13811_v14 = vpop.eup %13810 }
 0x4aa   :  { %v1100_v20 = vadd.f32 1.0, %v13811_v14  ;;  %v13813_v30 = vpop.eup %13812 }
 0x4ab   :  { %v1110_v31 = vadd.f32 1.0, %v13813_v30 }
 0x4ac   :  { %13814 = vrcp.f32 %v1100_v20 }
 0x4ad   :  { %13816 = vrcp.f32 %v1110_v31 }
 0x4b6   :  { %v13815_v39 = vpop.eup %13814 }
 0x4b7   :  { %v1113_v43 = vmul.f32 %v13815_v39, %v1093_v34  ;;  %v13817_v48 = vpop.eup %13816 }
 0x4b8   :  { %v1118_v54 = vsub.f32 1.0, %v13817_v48  ;;  %v1120_v6 = vmul.f32 %v13817_v48, %v14736_v38 }
 0x4b9   :  { %v1116_v45 = vadd.f32 %v1114_v3, %v1113_v43 }
 0x4bb   :  { %13818 = vtanh.f32 %v1116_v45 }
 0x4c5   :  { %v13819_v57 = vpop.eup %13818 }
 0x4c6   :  { %v1119_v5 = vmul.f32 %v13819_v57, %v1118_v54  ;;  %v1357_v57 = vstv %s1356_s10 }
 0x4c7   :  { %vm1358_vm5 = vcmp.eq.s32.totalorder %v1357_v57, 1 }
 0x4c8   :  { %v1121_v13 = vadd.f32 %v1120_v6, %v1119_v5 }
 0x4ca   :  { %v1126_v18 = vsel %vm1125_vm4, %v1121_v13, 0.0  ;;  %v14833_v16 = vsel %vm1125_vm4, %v1121_v13, %v14736_v38  ;;  %v1138_v38 = vld [vmem:[%s1137_s21] ss:$8 sm:$0x7]  ;;  %s8038_s21 = smul.u32 24, %s1829_s2 }
 0x4cb   :  { %1127 = vst [vmem:[#allocation2 + $0x3] sm:$0x1] %v1126_v18  ;;  %1253 = vmatmul.mubr.f32.vlgmr.msra.gmra.mrb[8].mxu0 %v14833_v16  ;;  %9342 = vmatmul.mubr.f32.vlgmr.msra.gmra.mrb[8].mxu1 %v14833_v16  ;;  %v1139_v29 = vadd.f32 %v1138_v38, %v14622_v24 }
 0x4cc   :  { %11692 = vmatpush1.bf16.msra.mxu0 %v14745_v47  ;;  %11723 = vmatpush3.bf16.msra.mxu1 %v14748_v53  ;;  %s1835_s7 = sadd.s32 %s8038_s21, %s1832_s30 }
 0x4cd   :  { %11694 = vmatprep.subr.bf16.mxu0 %v14752_v8  ;;  %11724 = vmatprep.subr.bf16.mxu1 %v16889_v7  ;;  %v1337_v59 = vrot.slane %v1139_v29, 1  ;;  %v1347_v39 = vrot.slane %v1139_v29, 2  ;;  %s1836_s10 = scalar_lea.vmem [#allocation9], %s1835_s7 }
 0x4ce   :  { %1485 = vmatprep.mubr.f32.mxu0 %v14841_v21  ;;  %9376 = vmatprep.mubr.msk.f32.mxu1 %vm14268_vm0, %v14841_v21 }
 0x4d0   :  { %11696 = vmatpush1.bf16.msra.mxu0 %v14755_v62  ;;  %11726 = vmatpush3.bf16.msra.mxu1 %v14758_v1 }
 0x4d1   :  { %11698 = vmatprep.subr.bf16.mxu0 %v14762_v12  ;;  %11727 = vmatprep.subr.bf16.mxu1 %v16889_v7 }
 0x4d4   :  { %11700 = vmatpush1.bf16.msra.mxu0 %v14765_v9  ;;  %11729 = vmatpush3.bf16.msra.mxu1 %v14768_v15 }
 0x4d5   :  { %11702 = vmatprep.subr.bf16.mxu0 %v14772_v22  ;;  %11730 = vmatprep.subr.bf16.mxu1 %v16889_v7 }
 0x4d8   :  { %11704 = vmatpush1.bf16.msra.mxu0 %v14775_v37  ;;  %11732 = vmatpush3.bf16.msra.mxu1 %v14778_v42 }
 0x4d9   :  { %11706 = vmatprep.subr.bf16.mxu0 %v14782_v51  ;;  %11733 = vmatprep.subr.bf16.mxu1 %v16889_v7 }
 0x4dc   :  { %11708 = vmatpush1.bf16.msra.mxu0 %v14785_v63  ;;  %11735 = vmatpush3.bf16.msra.mxu1 %v14788_v4 }
 0x4dd   :  { %11710 = vmatprep.subr.bf16.mxu0 %v14791_v27  ;;  %11736 = vmatprep.subr.bf16.mxu1 %v16889_v7 }
 0x4e0   :  { %11712 = vmatpush1.bf16.msra.mxu0 %v14794_v35  ;;  %11738 = vmatpush3.bf16.msra.mxu1 %v14796_v36 }
 0x4e1   :  { %11714 = vmatprep.subr.bf16.mxu0 %v14800_v44  ;;  %11739 = vmatprep.subr.bf16.mxu1 %v16889_v7 }
 0x4e4   :  { %11716 = vmatpush1.bf16.msra.mxu0 %v14803_v58  ;;  %11741 = vmatpush3.bf16.msra.mxu1 %v14807_v61 }
 0x4e5   :  { %11718 = vmatprep.subr.bf16.mxu0 %v14809_v0  ;;  %11742 = vmatprep.subr.bf16.mxu1 %v16889_v7 }
 0x4e8   :  { %11720 = vmatpush1.bf16.msra.mxu0 %v14813_v25  ;;  %11744 = vmatpush3.bf16.msra.mxu1 %v14817_v10 }
 0x4e9   :  { %11746 = vmatprep.subr.bf16.mxu0 %v14743_v40  ;;  %11777 = vmatprep.subr.bf16.mxu1 %v16889_v7 }
 0x59e   :  { %v1254_v32 = vpop.f32.mrb[8].mxu0  ;;  %v1325_v33 = vpop.f32.mrb[8].mxu1 }
 0x59f   :  { %v1255_v41 = vadd.f32 %v1254_v32, %v14625_v26  ;;  %v1256_v46 = vpop.f32.mrb[9].mxu0  ;;  %v9343_v50 = vpop.f32.mrb[9].mxu1  ;;  %v1326_v3 = vadd.f32 %v1325_v33, %v14636_v52 }
 0x5a0   :  { %v1257_v55 = vadd.f32 %v1256_v46, %v14629_v28 }
 0x5a1   :  { %v1329_v60 = vadd.f32 %v1255_v41, %v1139_v29 }
 0x5a2   :  { %v1339_v11 = vadd.f32 %v1337_v59, %v1257_v55 }
 0x5a3   :  { %v8027_v2 = vmul.f32 -1.442695, %v1329_v60 }
 0x5a4   :  { %v8028_v14 = vmul.f32 -1.442695, %v1339_v11 }
 0x5a5   :  { %13820 = vpow2.f32 %v8027_v2 }
 0x5a6   :  { %13822 = vpow2.f32 %v8028_v14 }
 0x5af   :  { %v13821_v20 = vpop.eup %13820 }
 0x5b0   :  { %v1333_v30 = vadd.f32 1.0, %v13821_v20  ;;  %v13823_v31 = vpop.eup %13822 }
 0x5b1   :  { %v1343_v34 = vadd.f32 1.0, %v13823_v31 }
 0x5b2   :  { %13824 = vrcp.f32 %v1333_v30 }
 0x5b3   :  { %13826 = vrcp.f32 %v1343_v34 }
 0x5bc   :  { %v13825_v43 = vpop.eup %13824 }
 0x5bd   :  { %v1346_v45 = vmul.f32 %v13825_v43, %v1326_v3  ;;  %v13827_v54 = vpop.eup %13826 }
 0x5be   :  { %v1351_v56 = vsub.f32 1.0, %v13827_v54  ;;  %v1353_v13 = vmul.f32 %v13827_v54, %v14833_v16 }
 0x5bf   :  { %v1349_v48 = vadd.f32 %v1347_v39, %v1346_v45 }
 0x5c1   :  { %13828 = vtanh.f32 %v1349_v48 }
 0x5cb   :  { %v13829_v5 = vpop.eup %13828 }
 0x5cc   :  { %v1352_v6 = vmul.f32 %v13829_v5, %v1351_v56  ;;  %v1590_v56 = vstv %s1589_s16 }
 0x5cd   :  { %vm1591_vm6 = vcmp.eq.s32.totalorder %v1590_v56, 1  ;;  %v2149_v56 = vld [vmem:[#allocation12 + $0x68] sm:$0xff] }
 0x5ce   :  { %v1354_v18 = vadd.f32 %v1353_v13, %v1352_v6 }
 0x5d0   :  { %v1359_v38 = vsel %vm1358_vm5, %v1354_v18, 0.0  ;;  %v14883_v29 = vsel %vm1358_vm5, %v1354_v18, %v14833_v16  ;;  %v1371_v16 = vld [vmem:[%s1370_s22] ss:$8 sm:$0x7] }
 0x5d1   :  { %1360 = vst [vmem:[#allocation2 + $0x4] sm:$0x1] %v1359_v38  ;;  %1486 = vmatmul.mubr.f32.vlgmr.msra.gmra.mrb[10].mxu0 %v14883_v29  ;;  %9377 = vmatmul.mubr.f32.vlgmr.msra.gmra.mrb[10].mxu1 %v14883_v29  ;;  %v1372_v32 = vadd.f32 %v1371_v16, %v14622_v24 }
 0x5d2   :  { %11748 = vmatpush1.bf16.msra.mxu0 %v14745_v47  ;;  %11779 = vmatpush3.bf16.msra.mxu1 %v14748_v53 }
 0x5d3   :  { %11750 = vmatprep.subr.bf16.mxu0 %v14752_v8  ;;  %11780 = vmatprep.subr.bf16.mxu1 %v16889_v7  ;;  %v1580_v3 = vrot.slane %v1372_v32, 2 }
 0x5d4   :  { %1718 = vmatprep.mubr.f32.mxu0 %v14841_v21  ;;  %9411 = vmatprep.mubr.msk.f32.mxu1 %vm14268_vm0, %v14841_v21 }
 0x5d6   :  { %11752 = vmatpush1.bf16.msra.mxu0 %v14755_v62  ;;  %11782 = vmatpush3.bf16.msra.mxu1 %v14758_v1 }
 0x5d7   :  { %11754 = vmatprep.subr.bf16.mxu0 %v14762_v12  ;;  %11783 = vmatprep.subr.bf16.mxu1 %v16889_v7 }
 0x5da   :  { %11756 = vmatpush1.bf16.msra.mxu0 %v14765_v9  ;;  %11785 = vmatpush3.bf16.msra.mxu1 %v14768_v15 }
 0x5db   :  { %11758 = vmatprep.subr.bf16.mxu0 %v14772_v22  ;;  %11786 = vmatprep.subr.bf16.mxu1 %v16889_v7 }
 0x5de   :  { %11760 = vmatpush1.bf16.msra.mxu0 %v14775_v37  ;;  %11788 = vmatpush3.bf16.msra.mxu1 %v14778_v42 }
 0x5df   :  { %11762 = vmatprep.subr.bf16.mxu0 %v14782_v51  ;;  %11789 = vmatprep.subr.bf16.mxu1 %v16889_v7 }
 0x5e2   :  { %11764 = vmatpush1.bf16.msra.mxu0 %v14785_v63  ;;  %11791 = vmatpush3.bf16.msra.mxu1 %v14788_v4 }
 0x5e3   :  { %11766 = vmatprep.subr.bf16.mxu0 %v14791_v27  ;;  %11792 = vmatprep.subr.bf16.mxu1 %v16889_v7 }
 0x5e6   :  { %11768 = vmatpush1.bf16.msra.mxu0 %v14794_v35  ;;  %11794 = vmatpush3.bf16.msra.mxu1 %v14796_v36 }
 0x5e7   :  { %11770 = vmatprep.subr.bf16.mxu0 %v14800_v44  ;;  %11795 = vmatprep.subr.bf16.mxu1 %v16889_v7 }
 0x5ea   :  { %11772 = vmatpush1.bf16.msra.mxu0 %v14803_v58  ;;  %11797 = vmatpush3.bf16.msra.mxu1 %v14807_v61 }
 0x5eb   :  { %11774 = vmatprep.subr.bf16.mxu0 %v14809_v0  ;;  %11798 = vmatprep.subr.bf16.mxu1 %v16889_v7 }
 0x5ee   :  { %11776 = vmatpush1.bf16.msra.mxu0 %v14813_v25  ;;  %11800 = vmatpush3.bf16.msra.mxu1 %v14817_v10 }
 0x5ef   :  { %11802 = vmatprep.subr.bf16.mxu0 %v14743_v40  ;;  %11833 = vmatprep.subr.bf16.mxu1 %v16889_v7  ;;  %v1570_v40 = vrot.slane %v1372_v32, 1 }
 0x6a4   :  { %v1487_v33 = vpop.f32.mrb[10].mxu0  ;;  %v1558_v41 = vpop.f32.mrb[10].mxu1 }
 0x6a5   :  { %v1488_v46 = vadd.f32 %v1487_v33, %v14625_v26  ;;  %v1489_v50 = vpop.f32.mrb[11].mxu0  ;;  %v9378_v55 = vpop.f32.mrb[11].mxu1  ;;  %v1559_v34 = vadd.f32 %v1558_v41, %v14636_v52 }
 0x6a6   :  { %v1490_v59 = vadd.f32 %v1489_v50, %v14629_v28  ;;  %v2136_v50 = vld [vmem:[#allocation12] sm:$0xff] }
 0x6a7   :  { %v1562_v60 = vadd.f32 %v1488_v46, %v1372_v32  ;;  %v1823_v46 = vstv %s1822_s11 }
 0x6a8   :  { %v1572_v11 = vadd.f32 %v1570_v40, %v1490_v59  ;;  %v2139_v59 = vld [vmem:[#allocation12 + $0x18] sm:$0xff]  ;;  %v2138_v40 = vld [vmem:[#allocation12 + $0x10] sm:$0xff]  ;;  %vm1824_vm7 = vcmp.eq.s32.totalorder %v1823_v46, 1  ;;  %v2169_v46 = vld [vmem:[#allocation12 + $0x108] sm:$0xff] }
 0x6a9   :  { %v8031_v2 = vmul.f32 -1.442695, %v1562_v60  ;;  %v2141_v60 = vld [vmem:[#allocation12 + $0x28] sm:$0xff] }
 0x6aa   :  { %v8032_v14 = vmul.f32 -1.442695, %v1572_v11 }
 0x6ab   :  { %13830 = vpow2.f32 %v8031_v2 }
 0x6ac   :  { %13832 = vpow2.f32 %v8032_v14  ;;  %v2143_v14 = vld [vmem:[#allocation12 + $0x38] sm:$0xff] }
 0x6b5   :  { %v13831_v20 = vpop.eup %13830 }
 0x6b6   :  { %v1566_v30 = vadd.f32 1.0, %v13831_v20  ;;  %v13833_v31 = vpop.eup %13832  ;;  %v2146_v20 = vld [vmem:[#allocation12 + $0x50] sm:$0xff] }
 0x6b7   :  { %v1576_v24 = vadd.f32 1.0, %v13833_v31  ;;  %v14985_v31 = vpack.c.bf16 %v2139_v59, %v2136_v50  ;;  %v2168_v50 = vld [vmem:[#allocation12 + $0x100] sm:$0xff]  ;;  %v2171_v59 = vld [vmem:[#allocation12 + $0x118] sm:$0xff] }
 0x6b8   :  { %13834 = vrcp.f32 %v1566_v30 }
 0x6b9   :  { %13836 = vrcp.f32 %v1576_v24  ;;  %v14987_v24 = vpack.c.bf16 %v2141_v60, %v2138_v40  ;;  %v15045_v40 = vpack.c.bf16 %v2171_v59, %v2168_v50  ;;  %v2173_v60 = vld [vmem:[#allocation12 + $0x128] sm:$0xff]  ;;  %v2349_v50 = vld [vmem:[#allocation13 + $0x40] sm:$0xff] }
 0x6bb   :  { %17037 = vst [vmem:[#allocation29_spill] sm:$0xff] %v14987_v24  ;;  %17043 = vst [vmem:[#allocation35_spill] sm:$0xff] %v15045_v40 }
 0x6c2   :  { %v13835_v39 = vpop.eup %13834 }
 0x6c3   :  { %v1579_v43 = vmul.f32 %v13835_v39, %v1559_v34  ;;  %v13837_v48 = vpop.eup %13836  ;;  %v2142_v34 = vld [vmem:[#allocation12 + $0x30] sm:$0xff]  ;;  %v2145_v39 = vld [vmem:[#allocation12 + $0x48] sm:$0xff] }
 0x6c4   :  { %v1584_v54 = vsub.f32 1.0, %v13837_v48  ;;  %v1586_v6 = vmul.f32 %v13837_v48, %v14883_v29 }
 0x6c5   :  { %v1582_v45 = vadd.f32 %v1580_v3, %v1579_v43  ;;  %v14989_v3 = vpack.c.bf16 %v2146_v20, %v2143_v14  ;;  %v2144_v43 = vld [vmem:[#allocation12 + $0x40] sm:$0xff]  ;;  %v2175_v20 = vld [vmem:[#allocation12 + $0x138] sm:$0xff] }
 0x6c6   :  { %v2172_v14 = vld [vmem:[#allocation12 + $0x120] sm:$0xff] }
 0x6c7   :  { %13838 = vtanh.f32 %v1582_v45  ;;  %v2147_v45 = vld [vmem:[#allocation12 + $0x58] sm:$0xff] }
 0x6d1   :  { %v13839_v57 = vpop.eup %13838 }
 0x6d2   :  { %v1585_v5 = vmul.f32 %v13839_v57, %v1584_v54  ;;  %v2152_v57 = vld [vmem:[#allocation12 + $0x80] sm:$0xff] }
 0x6d4   :  { %v1587_v13 = vadd.f32 %v1586_v6, %v1585_v5  ;;  %v14998_v5 = vpack.c.bf16 %v2145_v39, %v2142_v34  ;;  %v15000_v6 = vpack.c.bf16 %v2147_v45, %v2144_v43  ;;  %v15052_v34 = vpack.c.bf16 %v2175_v20, %v2172_v14  ;;  %v2177_v39 = vld [vmem:[#allocation12 + $0x148] sm:$0xff]  ;;  %v2179_v45 = vld [vmem:[#allocation12 + $0x158] sm:$0xff]  ;;  %v2357_v20 = vld [vmem:[#allocation13 + $0x80] sm:$0xff] }
 0x6d5   :  { %v2354_v14 = vld [vmem:[#allocation13 + $0x68] sm:$0xff] }
 0x6d6   :  { %v1592_v18 = vsel %vm1591_vm6, %v1587_v13, 0.0  ;;  %v14931_v38 = vsel %vm1591_vm6, %v1587_v13, %v14883_v29  ;;  %17038 = vst [vmem:[#allocation30_spill] sm:$0xff] %v15000_v6  ;;  %v2148_v13 = vld [vmem:[#allocation12 + $0x60] sm:$0xff]  ;;  %17045 = vst [vmem:[#allocation37_spill] sm:$0xff] %v15052_v34 }
 0x6d7   :  { %1593 = vst [vmem:[#allocation2 + $0x5] sm:$0x1] %v1592_v18  ;;  %1719 = vmatmul.mubr.f32.vlgmr.msra.gmra.mrb[12].mxu0 %v14931_v38  ;;  %9412 = vmatmul.mubr.f32.vlgmr.msra.gmra.mrb[12].mxu1 %v14931_v38  ;;  %v15004_v18 = vpack.c.bf16 %v2152_v57, %v2149_v56  ;;  %v2178_v57 = vld [vmem:[#allocation12 + $0x150] sm:$0xff] }
 0x6d8   :  { %11804 = vmatpush1.bf16.msra.mxu0 %v14745_v47  ;;  %11835 = vmatpush3.bf16.msra.mxu1 %v14748_v53  ;;  %v2137_v47 = vld [vmem:[#allocation12 + $0x8] sm:$0xff]  ;;  %v2140_v53 = vld [vmem:[#allocation12 + $0x20] sm:$0xff] }
 0x6d9   :  { %11806 = vmatprep.subr.bf16.mxu0 %v14752_v8  ;;  %11836 = vmatprep.subr.bf16.mxu1 %v16889_v7  ;;  %v14969_v8 = vpack.c.bf16 %v2140_v53, %v2137_v47  ;;  %v2150_v47 = vld [vmem:[#allocation12 + $0x70] sm:$0xff]  ;;  %v2153_v53 = vld [vmem:[#allocation12 + $0x88] sm:$0xff] }
 0x6da   :  { %1951 = vmatprep.mubr.f32.mxu0 %v14841_v21  ;;  %9446 = vmatprep.mubr.msk.f32.mxu1 %vm14268_vm0, %v14841_v21 }
 0x6dc   :  { %11808 = vmatpush1.bf16.msra.mxu0 %v14755_v62  ;;  %11838 = vmatpush3.bf16.msra.mxu1 %v14758_v1  ;;  %v1604_v62 = vld [vmem:[%s1603_s18] ss:$8 sm:$0x7] }
 0x6dd   :  { %11810 = vmatprep.subr.bf16.mxu0 %v14762_v12  ;;  %11839 = vmatprep.subr.bf16.mxu1 %v16889_v7  ;;  %v14975_v1 = vld [vmem:[%s16862_s4] sm:$0x7] }
 0x6de   :  { %v1605_v12 = vadd.f32 %v14975_v1, %v1604_v62  ;;  %v2155_v62 = vld [vmem:[#allocation12 + $0x98] sm:$0xff] }
 0x6e0   :  { %11812 = vmatpush1.bf16.msra.mxu0 %v14765_v9  ;;  %11841 = vmatpush3.bf16.msra.mxu1 %v14768_v15 }
 0x6e1   :  { %11814 = vmatprep.subr.bf16.mxu0 %v14772_v22  ;;  %11842 = vmatprep.subr.bf16.mxu1 %v16889_v7 }
 0x6e4   :  { %11816 = vmatpush1.bf16.msra.mxu0 %v14775_v37  ;;  %11844 = vmatpush3.bf16.msra.mxu1 %v14778_v42 }
 0x6e5   :  { %11818 = vmatprep.subr.bf16.mxu0 %v14782_v51  ;;  %11845 = vmatprep.subr.bf16.mxu1 %v16889_v7 }
 0x6e8   :  { %11820 = vmatpush1.bf16.msra.mxu0 %v14785_v63  ;;  %11847 = vmatpush3.bf16.msra.mxu1 %v14788_v4  ;;  %v1803_v63 = vrot.slane %v1605_v12, 1 }
 0x6e9   :  { %11822 = vmatprep.subr.bf16.mxu0 %v14791_v27  ;;  %11848 = vmatprep.subr.bf16.mxu1 %v16889_v7 }
 0x6ec   :  { %11824 = vmatpush1.bf16.msra.mxu0 %v14794_v35  ;;  %11850 = vmatpush3.bf16.msra.mxu1 %v14796_v36 }
 0x6ed   :  { %11826 = vmatprep.subr.bf16.mxu0 %v14800_v44  ;;  %11851 = vmatprep.subr.bf16.mxu1 %v16889_v7 }
 0x6f0   :  { %11828 = vmatpush1.bf16.msra.mxu0 %v14803_v58  ;;  %11853 = vmatpush3.bf16.msra.mxu1 %v14807_v61 }
 0x6f1   :  { %11830 = vmatprep.subr.bf16.mxu0 %v14809_v0  ;;  %11854 = vmatprep.subr.bf16.mxu1 %v16889_v7 }
 0x6f4   :  { %11832 = vmatpush1.bf16.msra.mxu0 %v14813_v25  ;;  %11856 = vmatpush3.bf16.msra.mxu1 %v14817_v10  ;;  %v1813_v10 = vrot.slane %v1605_v12, 2 }
 0x6f5   :  { %11889 = vmatprep.subr.bf16.mxu1 %v16889_v7  ;;  %11858 = vmatprep.subr.bf16.mxu0 %v14969_v8 }
 0x7aa   :  { %v1720_v9 = vpop.f32.mrb[12].mxu0  ;;  %v1791_v15 = vpop.f32.mrb[12].mxu1 }
 0x7ab   :  { %v1721_v22 = vadd.f32 %v1720_v9, %v14625_v26  ;;  %v1722_v37 = vpop.f32.mrb[13].mxu0  ;;  %v9413_v42 = vpop.f32.mrb[13].mxu1  ;;  %v1792_v25 = vadd.f32 %v1791_v15, %v14636_v52  ;;  %v15013_v15 = vpack.c.bf16 %v2153_v53, %v2150_v47  ;;  %v2183_v53 = vld [vmem:[#allocation12 + $0x178] sm:$0xff] }
 0x7ac   :  { %v1723_v51 = vadd.f32 %v1722_v37, %v14629_v28  ;;  %v2154_v37 = vld [vmem:[#allocation12 + $0x90] sm:$0xff]  ;;  %v2157_v42 = vld [vmem:[#allocation12 + $0xa8] sm:$0xff] }
 0x7ad   :  { %v1795_v4 = vadd.f32 %v1721_v22, %v1605_v12  ;;  %v2158_v12 = vld [vmem:[#allocation12 + $0xb0] sm:$0xff]  ;;  %17039 = vst [vmem:[#allocation31_spill] sm:$0xff] %v15013_v15 }
 0x7ae   :  { %v1805_v35 = vadd.f32 %v1803_v63, %v1723_v51  ;;  %v15017_v22 = vpack.c.bf16 %v2158_v12, %v2155_v62  ;;  %v2156_v51 = vld [vmem:[#allocation12 + $0xa0] sm:$0xff]  ;;  %v15023_v63 = vpack.c.bf16 %v2157_v42, %v2154_v37  ;;  %v15065_v62 = vand.u32 127, %v242_v17  ;;  %v2342_v37 = vld [vmem:[#allocation13 + $0x8] sm:$0xff] }
 0x7af   :  { %v8035_v27 = vmul.f32 -1.442695, %v1795_v4  ;;  %v2159_v4 = vld [vmem:[#allocation12 + $0xb8] sm:$0xff]  ;;  %v2345_v42 = vld [vmem:[#allocation13 + $0x20] sm:$0xff]  ;;  %v2346_v17 = vld [vmem:[#allocation13 + $0x28] sm:$0xff] }
 0x7b0   :  { %v8036_v36 = vmul.f32 -1.442695, %v1805_v35  ;;  %v2161_v35 = vld [vmem:[#allocation12 + $0xc8] sm:$0xff]  ;;  %17049 = vst [vmem:[#allocation41_spill] sm:$0xff] %v15065_v62  ;;  %vm2133_vm8 = vcmp.eq.s32.totalorder %v15065_v62, 1  ;;  %vm2131_vm10 = vcmp.lt.s32.totalorder %v15065_v62, 8 }
 0x7b1   :  { %13840 = vpow2.f32 %v8035_v27  ;;  %v15025_v27 = vpack.c.bf16 %v2159_v4, %v2156_v51  ;;  %v15072_v51 = vpack.c.bf16 %v2345_v42, %v2342_v37  ;;  %v2341_v4 = vld [vmem:[#allocation13] sm:$0xff]  ;;  %v2363_v37 = vld [vmem:[#allocation13 + $0xb0] sm:$0xff]  ;;  %vm3040_vm2 = vcmp.eq.s32.totalorder %v15065_v62, 0 }
 0x7b2   :  { %13842 = vpow2.f32 %v8036_v36  ;;  %v2164_v36 = vld [vmem:[#allocation12 + $0xe0] sm:$0xff]  ;;  %vm4441_vm6 = vcmp.eq.s32.totalorder %v15065_v62, 2 }
 0x7b3   :  { %17040 = vst [vmem:[#allocation32_spill] sm:$0xff] %v15025_v27  ;;  %17051 = vst [vmem:[#allocation43_spill] sm:$0xff] %v15072_v51 }
 0x7bb   :  { %v13841_v44 = vpop.eup %13840 }
 0x7bc   :  { %v1799_v58 = vadd.f32 1.0, %v13841_v44  ;;  %v13843_v61 = vpop.eup %13842  ;;  %v15029_v44 = vpack.c.bf16 %v2164_v36, %v2161_v35  ;;  %v2344_v35 = vld [vmem:[#allocation13 + $0x18] sm:$0xff]  ;;  %v2343_v36 = vld [vmem:[#allocation13 + $0x10] sm:$0xff] }
 0x7bd   :  { %v1809_v0 = vadd.f32 1.0, %v13843_v61  ;;  %v2163_v61 = vld [vmem:[#allocation12 + $0xd8] sm:$0xff] }
 0x7be   :  { %13844 = vrcp.f32 %v1799_v58  ;;  %v2160_v58 = vld [vmem:[#allocation12 + $0xc0] sm:$0xff] }
 0x7bf   :  { %13846 = vrcp.f32 %v1809_v0  ;;  %v2162_v0 = vld [vmem:[#allocation12 + $0xd0] sm:$0xff] }
 0x7c8   :  { %v13845_v29 = vpop.eup %13844 }
 0x7c9   :  { %v1812_v16 = vmul.f32 %v13845_v29, %v1792_v25  ;;  %v13847_v33 = vpop.eup %13846  ;;  %v15032_v25 = vpack.c.bf16 %v2163_v61, %v2160_v58  ;;  %v15075_v58 = vpack.c.bf16 %v2344_v35, %v2341_v4  ;;  %v15079_v61 = vpack.c.bf16 %v2346_v17, %v2343_v36  ;;  %v2359_v4 = vld [vmem:[#allocation13 + $0x90] sm:$0xff]  ;;  %v2362_v35 = vld [vmem:[#allocation13 + $0xa8] sm:$0xff]  ;;  %v2361_v36 = vld [vmem:[#allocation13 + $0xa0] sm:$0xff] }
 0x7ca   :  { %v1817_v41 = vsub.f32 1.0, %v13847_v33  ;;  %v1819_v11 = vmul.f32 %v13847_v33, %v14931_v38  ;;  %v15115_v17 = vpack.c.bf16 %v2362_v35, %v2359_v4  ;;  %v2374_v35 = vld [vmem:[#allocation13 + $0x108] sm:$0xff] }
 0x7cb   :  { %v1815_v32 = vadd.f32 %v1813_v10, %v1812_v16  ;;  %v2165_v10 = vld [vmem:[#allocation12 + $0xe8] sm:$0xff]  ;;  %v2167_v16 = vld [vmem:[#allocation12 + $0xf8] sm:$0xff]  ;;  %17052 = vst [vmem:[#allocation44_spill] sm:$0xff] %v15075_v58  ;;  %17053 = vst [vmem:[#allocation45_spill] sm:$0xff] %v15079_v61 }
 0x7cc   :  { %v15035_v29 = vpack.c.bf16 %v2165_v10, %v2162_v0  ;;  %v16877_v0 = vmov 1.0   ;;  %v2348_v10 = vld [vmem:[#allocation13 + $0x38] sm:$0xff]  ;;  %17061 = vst [vmem:[#allocation53_spill] sm:$0xff] %v15115_v17 }
 0x7cd   :  { %13848 = vtanh.f32 %v1815_v32  ;;  %v2170_v32 = vld [vmem:[#allocation12 + $0x110] sm:$0xff] }
 0x7ce   :  { %17041 = vst [vmem:[#allocation33_spill] sm:$0xff] %v15035_v29  ;;  %v15039_v33 = vpack.c.bf16 %v2170_v32, %v2167_v16  ;;  %v2351_v16 = vld [vmem:[#allocation13 + $0x50] sm:$0xff] }
 0x7cf   :  { %v15089_v32 = vpack.c.bf16 %v2351_v16, %v2348_v10  ;;  %v2364_v10 = vld [vmem:[#allocation13 + $0xb8] sm:$0xff] }
 0x7d0   :  { %17042 = vst [vmem:[#allocation34_spill] sm:$0xff] %v15039_v33  ;;  %v15118_v16 = vpack.c.bf16 %v2364_v10, %v2361_v36  ;;  %v2373_v36 = vld [vmem:[#allocation13 + $0x100] sm:$0xff]  ;;  %v2376_v10 = vld [vmem:[#allocation13 + $0x118] sm:$0xff] }
 0x7d1   :  { %17054 = vst [vmem:[#allocation46_spill] sm:$0xff] %v15089_v32 }
 0x7d2   :  { %17062 = vst [vmem:[#allocation54_spill] sm:$0xff] %v15118_v16 }
 0x7d7   :  { %v13849_v55 = vpop.eup %13848 }
 0x7d8   :  { %v1818_v2 = vmul.f32 %v13849_v55, %v1817_v41  ;;  %v2166_v41 = vld [vmem:[#allocation12 + $0xf0] sm:$0xff] }
 0x7d9   :  { %v15042_v55 = vpack.c.bf16 %v2169_v46, %v2166_v41  ;;  %v2347_v41 = vld [vmem:[#allocation13 + $0x30] sm:$0xff]  ;;  %v2350_v46 = vld [vmem:[#allocation13 + $0x48] sm:$0xff] }
 0x7da   :  { %v1820_v30 = vadd.f32 %v1819_v11, %v1818_v2  ;;  %v2176_v2 = vld [vmem:[#allocation12 + $0x140] sm:$0xff]  ;;  %v15092_v59 = vpack.c.bf16 %v2350_v46, %v2347_v41  ;;  %v2366_v41 = vld [vmem:[#allocation13 + $0xc8] sm:$0xff] }
 0x7db   :  { %v15049_v11 = vpack.c.bf16 %v2176_v2, %v2173_v60  ;;  %v2352_v60 = vld [vmem:[#allocation13 + $0x58] sm:$0xff]  ;;  %v2369_v46 = vld [vmem:[#allocation13 + $0xe0] sm:$0xff] }
 0x7dc   :  { %v1825_v48 = vsel %vm1824_vm7, %v1820_v30, 0.0  ;;  %v14992_v54 = vsel %vm1824_vm7, %v1820_v30, %v14931_v38  ;;  %v2151_v38 = vld [vmem:[#allocation12 + $0x78] sm:$0xff]  ;;  %v2174_v30 = vld [vmem:[#allocation12 + $0x130] sm:$0xff]  ;;  %17055 = vst [vmem:[#allocation47_spill] sm:$0xff] %v15092_v59  ;;  %v15096_v2 = vpack.c.bf16 %v2352_v60, %v2349_v50  ;;  %v15122_v50 = vpack.c.bf16 %v2369_v46, %v2366_v41  ;;  %v2365_v60 = vld [vmem:[#allocation13 + $0xc0] sm:$0xff] }
 0x7dd   :  { %1826 = vst [vmem:[#allocation2 + $0x6] sm:$0x1] %v1825_v48  ;;  %1952 = vmatmul.mubr.f32.vlgmr.msra.gmra.mrb[14].mxu0 %v14992_v54  ;;  %9447 = vmatmul.mubr.f32.vlgmr.msra.gmra.mrb[14].mxu1 %v14992_v54  ;;  %v15011_v9 = vpack.c.bf16 %v2151_v38, %v2148_v13  ;;  %17044 = vst [vmem:[#allocation36_spill] sm:$0xff] %v15049_v11  ;;  %v15055_v43 = vpack.c.bf16 %v2177_v39, %v2174_v30  ;;  %v2182_v48 = vld [vmem:[#allocation12 + $0x170] sm:$0xff]  ;;  %v2181_v13 = vld [vmem:[#allocation12 + $0x168] sm:$0xff] }
 0x7de   :  { %11860 = vmatpush1.bf16.msra.mxu0 %v14985_v31  ;;  %11891 = vmatpush3.bf16.msra.mxu1 %v14987_v24  ;;  %v15059_v56 = vpack.c.bf16 %v2182_v48, %v2179_v45  ;;  %v2180_v38 = vld [vmem:[#allocation12 + $0x160] sm:$0xff]  ;;  %v15062_v47 = vpack.c.bf16 %v2181_v13, %v2178_v57  ;;  %17056 = vst [vmem:[#allocation48_spill] sm:$0xff] %v15096_v2  ;;  %v2356_v45 = vld [vmem:[#allocation13 + $0x78] sm:$0xff]  ;;  %v2355_v48 = vld [vmem:[#allocation13 + $0x70] sm:$0xff] }
 0x7df   :  { %11862 = vmatprep.subr.bf16.mxu0 %v14989_v3  ;;  %11892 = vmatprep.subr.bf16.mxu1 %v16889_v7  ;;  %17046 = vst [vmem:[#allocation38_spill] sm:$0xff] %v15055_v43  ;;  %v15068_v12 = vpack.c.bf16 %v2183_v53, %v2180_v38  ;;  %v15102_v30 = vpack.c.bf16 %v2357_v20, %v2354_v14  ;;  %v2353_v39 = vld [vmem:[#allocation13 + $0x60] sm:$0xff]  ;;  %v2358_v13 = vld [vmem:[#allocation13 + $0x88] sm:$0xff]  ;;  %v2360_v53 = vld [vmem:[#allocation13 + $0x98] sm:$0xff] }
 0x7e0   :  { %2264 = vmatprep.mubr.f32.mxu0 %v14841_v21  ;;  %9481 = vmatprep.mubr.msk.f32.mxu1 %vm14268_vm0, %v14841_v21  ;;  %17047 = vst [vmem:[#allocation39_spill] sm:$0xff] %v15059_v56  ;;  %17048 = vst [vmem:[#allocation40_spill] sm:$0xff] %v15062_v47  ;;  %v15105_v57 = vpack.c.bf16 %v2356_v45, %v2353_v39  ;;  %v15108_v38 = vpack.c.bf16 %v2358_v13, %v2355_v48  ;;  %v2368_v14 = vld [vmem:[#allocation13 + $0xd8] sm:$0xff]  ;;  %v2367_v20 = vld [vmem:[#allocation13 + $0xd0] sm:$0xff] }
 0x7e1   :  { %17050 = vst [vmem:[#allocation42_spill] sm:$0xff] %v15068_v12  ;;  %17057 = vst [vmem:[#allocation49_spill] sm:$0xff] %v15102_v30  ;;  %v15112_v42 = vpack.c.bf16 %v2363_v37, %v2360_v53  ;;  %v15125_v39 = vpack.c.bf16 %v2368_v14, %v2365_v60  ;;  %v2370_v45 = vld [vmem:[#allocation13 + $0xe8] sm:$0xff]  ;;  %v2372_v13 = vld [vmem:[#allocation13 + $0xf8] sm:$0xff]  ;;  %v15136_v46 = vpack.c.bf16 %v2376_v10, %v2373_v36 }
 0x7e2   :  { %11864 = vmatpush1.bf16.msra.mxu0 %v14998_v5  ;;  %11894 = vmatpush3.bf16.msra.mxu1 %v15000_v6  ;;  %17058 = vst [vmem:[#allocation50_spill] sm:$0xff] %v15105_v57  ;;  %17059 = vst [vmem:[#allocation51_spill] sm:$0xff] %v15108_v38  ;;  %v15128_v48 = vpack.c.bf16 %v2370_v45, %v2367_v20  ;;  %v2375_v53 = vld [vmem:[#allocation13 + $0x110] sm:$0xff]  ;;  %v2378_v60 = vld [vmem:[#allocation13 + $0x128] sm:$0xff] }
 0x7e3   :  { %11866 = vmatprep.subr.bf16.mxu0 %v15004_v18  ;;  %11895 = vmatprep.subr.bf16.mxu1 %v16889_v7  ;;  %17060 = vst [vmem:[#allocation52_spill] sm:$0xff] %v15112_v42  ;;  %17063 = vst [vmem:[#allocation55_spill] sm:$0xff] %v15122_v50  ;;  %v2371_v37 = vld [vmem:[#allocation13 + $0xf0] sm:$0xff]  ;;  %v15130_v4 = vpack.c.bf16 %v2375_v53, %v2372_v13  ;;  %v2381_v14 = vld [vmem:[#allocation13 + $0x140] sm:$0xff] }
 0x7e4   :  { %17064 = vst [vmem:[#allocation56_spill] sm:$0xff] %v15125_v39  ;;  %17065 = vst [vmem:[#allocation57_spill] sm:$0xff] %v15128_v48  ;;  %v15134_v41 = vpack.c.bf16 %v2374_v35, %v2371_v37  ;;  %v2377_v20 = vld [vmem:[#allocation13 + $0x120] sm:$0xff]  ;;  %v15140_v45 = vpack.c.bf16 %v2381_v14, %v2378_v60  ;;  %v2380_v13 = vld [vmem:[#allocation13 + $0x138] sm:$0xff] }
 0x7e5   :  { %17066 = vst [vmem:[#allocation58_spill] sm:$0xff] %v15130_v4  ;;  %17068 = vst [vmem:[#allocation60_spill] sm:$0xff] %v15136_v46  ;;  %v2379_v53 = vld [vmem:[#allocation13 + $0x130] sm:$0xff]  ;;  %v15144_v37 = vpack.c.bf16 %v2380_v13, %v2377_v20  ;;  %v2386_v60 = vld [vmem:[#allocation13 + $0x168] sm:$0xff] }
 0x7e6   :  { %11868 = vmatpush1.bf16.msra.mxu0 %v15011_v9  ;;  %11897 = vmatpush3.bf16.msra.mxu1 %v15013_v15  ;;  %17067 = vst [vmem:[#allocation59_spill] sm:$0xff] %v15134_v41  ;;  %17069 = vst [vmem:[#allocation61_spill] sm:$0xff] %v15140_v45  ;;  %v2383_v36 = vld [vmem:[#allocation13 + $0x150] sm:$0xff]  ;;  %v2385_v14 = vld [vmem:[#allocation13 + $0x160] sm:$0xff] }
 0x7e7   :  { %11870 = vmatprep.subr.bf16.mxu0 %v15017_v22  ;;  %11898 = vmatprep.subr.bf16.mxu1 %v16889_v7  ;;  %17070 = vst [vmem:[#allocation62_spill] sm:$0xff] %v15144_v37 }
 0x7ea   :  { %11872 = vmatpush1.bf16.msra.mxu0 %v15023_v63  ;;  %11900 = vmatpush3.bf16.msra.mxu1 %v15025_v27 }
 0x7eb   :  { %11901 = vmatprep.subr.bf16.mxu1 %v16889_v7  ;;  %11874 = vmatprep.subr.bf16.mxu0 %v15029_v44 }
 0x7ee   :  { %11876 = vmatpush1.bf16.msra.mxu0 %v15032_v25  ;;  %11903 = vmatpush3.bf16.msra.mxu1 %v15035_v29 }
 0x7ef   :  { %11904 = vmatprep.subr.bf16.mxu1 %v16889_v7  ;;  %11878 = vmatprep.subr.bf16.mxu0 %v15039_v33 }
 0x7f2   :  { %11880 = vmatpush1.bf16.msra.mxu0 %v15042_v55  ;;  %11906 = vmatpush3.bf16.msra.mxu1 %v15045_v40 }
 0x7f3   :  { %11907 = vmatprep.subr.bf16.mxu1 %v16889_v7  ;;  %11882 = vmatprep.subr.bf16.mxu0 %v15049_v11 }
 0x7f6   :  { %11884 = vmatpush1.bf16.msra.mxu0 %v15052_v34  ;;  %11909 = vmatpush3.bf16.msra.mxu1 %v15055_v43 }
 0x7f7   :  { %11910 = vmatprep.subr.bf16.mxu1 %v16889_v7  ;;  %11886 = vmatprep.subr.bf16.mxu0 %v15059_v56 }
 0x7fa   :  { %11888 = vmatpush1.bf16.msra.mxu0 %v15062_v47  ;;  %11912 = vmatpush3.bf16.msra.mxu1 %v15068_v12 }
 0x7fb   :  { %11945 = vmatprep.subr.bf16.mxu1 %v16889_v7  ;;  %11914 = vmatprep.subr.bf16.mxu0 %v15072_v51 }
 0x7fd   :  { %8042 = vmatmul.mubr.msk.f32.vlgmr.msra.gmra.mrb[16].mxu0 %vm2133_vm8, %v16877_v0  ;;  %9482 = vmatmul.mubr.msk.f32.vlgmr.msra.gmra.mrb[16].mxu1 %vm2133_vm8, %v16877_v0  ;;  %v2382_v0 = vld [vmem:[#allocation13 + $0x148] sm:$0xff] }
 0x7fe   :  { %11916 = vmatpush1.bf16.msra.mxu0 %v15075_v58  ;;  %11947 = vmatpush3.bf16.msra.mxu1 %v15079_v61  ;;  %v15146_v35 = vpack.c.bf16 %v2382_v0, %v2379_v53  ;;  %v1837_v0 = vld [vmem:[%s1836_s10] ss:$8 sm:$0x7] }
 0x7ff   :  { %11948 = vmatprep.subr.bf16.mxu1 %v16889_v7  ;;  %2469 = vmatprep.mubr.f32.mxu0 %v14841_v21 }
 0x800   :  { %11918 = vmatprep.subr.bf16.mxu0 %v15089_v32  ;;  %9516 = vmatprep.mubr.msk.f32.mxu1 %vm14268_vm0, %v14841_v21  ;;  %17071 = vst [vmem:[#allocation63_spill] sm:$0xff] %v15146_v35 }
 0x802   :  { %11920 = vmatpush1.bf16.msra.mxu0 %v15092_v59  ;;  %11950 = vmatpush3.bf16.msra.mxu1 %v15096_v2 }
 0x803   :  { %11951 = vmatprep.subr.bf16.mxu1 %v16889_v7  ;;  %11922 = vmatprep.subr.bf16.mxu0 %v15102_v30 }
 0x806   :  { %11924 = vmatpush1.bf16.msra.mxu0 %v15105_v57  ;;  %11953 = vmatpush3.bf16.msra.mxu1 %v15108_v38 }
 0x807   :  { %11954 = vmatprep.subr.bf16.mxu1 %v16889_v7  ;;  %11926 = vmatprep.subr.bf16.mxu0 %v15112_v42 }
 0x80a   :  { %11928 = vmatpush1.bf16.msra.mxu0 %v15115_v17  ;;  %11956 = vmatpush3.bf16.msra.mxu1 %v15118_v16 }
 0x80b   :  { %11957 = vmatprep.subr.bf16.mxu1 %v16889_v7  ;;  %11930 = vmatprep.subr.bf16.mxu0 %v15122_v50  ;;  %v2384_v50 = vld [vmem:[#allocation13 + $0x158] sm:$0xff] }
 0x80e   :  { %11932 = vmatpush1.bf16.msra.mxu0 %v15125_v39  ;;  %11959 = vmatpush3.bf16.msra.mxu1 %v15128_v48  ;;  %v2387_v39 = vld [vmem:[#allocation13 + $0x170] sm:$0xff] }
 0x80f   :  { %11934 = vmatprep.subr.bf16.mxu0 %v15130_v4  ;;  %11960 = vmatprep.subr.bf16.mxu1 %v16889_v7  ;;  %v15150_v10 = vpack.c.bf16 %v2387_v39, %v2384_v50  ;;  %v2388_v4 = vld [vmem:[#allocation13 + $0x178] sm:$0xff]  ;;  %v1838_v50 = vadd.f32 %v14975_v1, %v1837_v0 }
 0x810   :  { %v15156_v20 = vpack.c.bf16 %v2388_v4, %v2385_v14 }
 0x811   :  { %17072 = vst [vmem:[#allocation64_spill] sm:$0xff] %v15150_v10  ;;  %v2036_v14 = vrot.slane %v1838_v50, 1 }
 0x812   :  { %11936 = vmatpush1.bf16.msra.mxu0 %v15134_v41  ;;  %11962 = vmatpush3.bf16.msra.mxu1 %v15136_v46  ;;  %v15154_v41 = vpack.c.bf16 %v2386_v60, %v2383_v36  ;;  %17074 = vst [vmem:[#allocation66_spill] sm:$0xff] %v15156_v20  ;;  %v2046_v46 = vrot.slane %v1838_v50, 2 }
 0x813   :  { %11938 = vmatprep.subr.bf16.mxu0 %v15140_v45  ;;  %11963 = vmatprep.subr.bf16.mxu1 %v16889_v7 }
 0x814   :  { %17073 = vst [vmem:[#allocation65_spill] sm:$0xff] %v15154_v41 }
 0x816   :  { %11940 = vmatpush1.bf16.msra.mxu0 %v15144_v37  ;;  %11965 = vmatpush3.bf16.msra.mxu1 %v15146_v35 }
 0x817   :  { %11942 = vmatprep.subr.bf16.mxu0 %v15150_v10  ;;  %11966 = vmatprep.subr.bf16.mxu1 %v16889_v7 }
 0x81a   :  { %11944 = vmatpush1.bf16.msra.mxu0 %v15154_v41  ;;  %11968 = vmatpush3.bf16.msra.mxu1 %v15156_v20 }
 0x81b   :  { %11993 = vmatprep.subr.bf16.mxu1 %v16889_v7  ;;  %11969 = vmatprep.subr.bf16.mxu0 %v16889_v7 }
 0x8b0   :  { %v1953_v39 = vpop.f32.mrb[14].mxu0  ;;  %v2024_v4 = vpop.f32.mrb[14].mxu1 }
 0x8b1   :  { %v1954_v13 = vadd.f32 %v1953_v39, %v14625_v26  ;;  %v1955_v53 = vpop.f32.mrb[15].mxu0  ;;  %v9448_v36 = vpop.f32.mrb[15].mxu1  ;;  %v2025_v0 = vadd.f32 %v2024_v4, %v14636_v52  ;;  %v15186_v4 = vld [vmem:[#allocation2 + $0x8] sm:$0xff] }
 0x8b2   :  { %v1956_v60 = vadd.f32 %v1955_v53, %v14629_v28 }
 0x8b3   :  { %v2028_v20 = vadd.f32 %v1954_v13, %v1838_v50 }
 0x8b4   :  { %v2038_v41 = vadd.f32 %v2036_v14, %v1956_v60 }
 0x8b5   :  { %v8039_v7 = vmul.f32 -1.442695, %v2028_v20 }
 0x8b6   :  { %v8040_v10 = vmul.f32 -1.442695, %v2038_v41  ;;  %v2056_v41 = vstv %s2055_s24 }
 0x8b7   :  { %13850 = vpow2.f32 %v8039_v7  ;;  %vm2057_vm9 = vcmp.eq.s32.totalorder %v2056_v41, 1 }
 0x8b8   :  { %13852 = vpow2.f32 %v8040_v10 }
 0x8c1   :  { %v13851_v35 = vpop.eup %13850 }
 0x8c2   :  { %v2032_v37 = vadd.f32 1.0, %v13851_v35  ;;  %v13853_v45 = vpop.eup %13852 }
 0x8c3   :  { %v2042_v1 = vadd.f32 1.0, %v13853_v45 }
 0x8c4   :  { %13854 = vrcp.f32 %v2032_v37 }
 0x8c5   :  { %13856 = vrcp.f32 %v2042_v1 }
 0x8ce   :  { %v13855_v26 = vpop.eup %13854 }
 0x8cf   :  { %v2045_v39 = vmul.f32 %v13855_v26, %v2025_v0  ;;  %v13857_v7 = vpop.eup %13856 }
 0x8d0   :  { %v2050_v28 = vsub.f32 1.0, %v13857_v7  ;;  %v2052_v45 = vmul.f32 %v13857_v7, %v14992_v54 }
 0x8d1   :  { %v2048_v36 = vadd.f32 %v2046_v46, %v2045_v39 }
 0x8d3   :  { %13858 = vtanh.f32 %v2048_v36 }
 0x8dd   :  { %v13859_v35 = vpop.eup %13858 }
 0x8de   :  { %v2051_v37 = vmul.f32 %v13859_v35, %v2050_v28 }
 0x8e0   :  { %v2053_v52 = vadd.f32 %v2052_v45, %v2051_v37 }
 0x8e2   :  { %v2058_v10 = vsel %vm2057_vm9, %v2053_v52, 0.0  ;;  %v15173_v20 = vsel %vm2057_vm9, %v2053_v52, %v14992_v54  ;;  %v17076_v54 = vmov 0.0|0.0  }
 0x8e3   :  { %2059 = vst [vmem:[#allocation2 + $0x7] sm:$0x1] %v2058_v10  ;;  %2470 = vmatmul.mubr.f32.vlgmr.msra.gmra.mrb[16].mxu0 %v15173_v20  ;;  %9517 = vmatmul.mubr.f32.vlgmr.msra.gmra.mrb[18].mxu1 %v15173_v20 }
 0x8e4   :  { %9551 = vmatprep.mubr.msk.f32.mxu0 %vm14268_vm0, %v14841_v21  ;;  %9586 = vmatprep.mubr.msk.f32.mxu1 %vm14268_vm0, %v14841_v21 }
 0x8ea   :  { %v2061_v46 = vld [vmem:[#allocation2] sm:$0xff] }
 0x8eb   :  { %2077 = vxpose.xlu0.b32.start [1/16] %v2061_v46, 128  ;;  %v15182_v50 = vpack.c.bf16 %v14841_v21, %v2061_v46  ;;  %v15199_v21 = vpop.f32.mrb[16].mxu1 }
 0x8ec   :  { %v9483_v13 = vpop.f32.mrb[17].mxu1 }
 0x8ed   :  { %17075 = vst [vmem:[#allocation67_spill] sm:$0xff] %v15182_v50  ;;  %11995 = vmatpush3.bf16.msra.mxu1 %v15182_v50 }
 0x8ee   :  { %11996 = vmatprep.subr.bf16.mxu1 %v17076_v54 }
 0x8ef   :  { %2078 = vxpose.xlu0.b32.cont [2/16] %v15186_v4, 128 }
 0x8f3   :  { %2079 = vxpose.xlu0.b32.cont [3/16] %v15186_v4, 128 }
 0x8f7   :  { %2080 = vxpose.xlu0.b32.cont [4/16] %v15186_v4, 128 }
 0x8fb   :  { %2081 = vxpose.xlu0.b32.cont [5/16] %v15186_v4, 128 }
 0x8ff   :  { %2082 = vxpose.xlu0.b32.cont [6/16] %v15186_v4, 128 }
 0x903   :  { %2083 = vxpose.xlu0.b32.cont [7/16] %v15186_v4, 128 }
 0x907   :  { %2084 = vxpose.xlu0.b32.cont [8/16] %v15186_v4, 128 }
 0x90b   :  { %2085 = vxpose.xlu0.b32.cont [9/16] %v15186_v4, 128 }
 0x90f   :  { %2086 = vxpose.xlu0.b32.cont [10/16] %v15186_v4, 128 }
 0x913   :  { %2087 = vxpose.xlu0.b32.cont [11/16] %v15186_v4, 128 }
 0x917   :  { %2088 = vxpose.xlu0.b32.cont [12/16] %v15186_v4, 128 }
 0x91b   :  { %2089 = vxpose.xlu0.b32.cont [13/16] %v15186_v4, 128 }
 0x91f   :  { %2090 = vxpose.xlu0.b32.cont [14/16] %v15186_v4, 128 }
 0x923   :  { %2091 = vxpose.xlu0.b32.cont [15/16] %v15186_v4, 128 }
 0x927   :  { %2092 = vxpose.xlu0.b32.end [16/16] %v15186_v4, 128 }
 0x96b   :  { %v2093_v53 = vpop.trf.xlu0 }
 0x96f   :  { %v2094_v60 = vpop.trf.xlu0 }
 0x970   :  { %v15205_v14 = vpack.c.bf16 %v2094_v60, %v2093_v53 }
 0x972   :  { %17077 = vst [vmem:[#allocation68_spill] sm:$0xff] %v15205_v14  ;;  %11971 = vmatpush3.bf16.msra.mxu0 %v15205_v14 }
 0x973   :  { %v2095_v1 = vpop.trf.xlu0  ;;  %11972 = vmatprep.subr.bf16.mxu0 %v17076_v54 }
 0x977   :  { %v2096_v0 = vpop.trf.xlu0 }
 0x978   :  { %v15209_v26 = vpack.c.bf16 %v2096_v0, %v2095_v1 }
 0x97a   :  { %17078 = vst [vmem:[#allocation69_spill] sm:$0xff] %v15209_v26  ;;  %11974 = vmatpush3.bf16.msra.mxu0 %v15209_v26 }
 0x97b   :  { %v2097_v39 = vpop.trf.xlu0  ;;  %11975 = vmatprep.subr.bf16.mxu0 %v17076_v54 }
 0x97f   :  { %v2098_v36 = vpop.trf.xlu0 }
 0x980   :  { %v15213_v7 = vpack.c.bf16 %v2098_v36, %v2097_v39 }
 0x982   :  { %17079 = vst [vmem:[#allocation70_spill] sm:$0xff] %v15213_v7  ;;  %11977 = vmatpush3.bf16.msra.mxu0 %v15213_v7 }
 0x983   :  { %v2099_v28 = vpop.trf.xlu0  ;;  %11978 = vmatprep.subr.bf16.mxu0 %v17076_v54 }
 0x987   :  { %v2100_v41 = vpop.trf.xlu0 }
 0x988   :  { %v15217_v35 = vpack.c.bf16 %v2100_v41, %v2099_v28  ;;  %v2126_v28 = vld [vmem:[%s16867_s9] sm:$0x7] }
 0x989   :  { %v2125_v41 = vld [vmem:[%s16866_s8] sm:$0x7] }
 0x98a   :  { %17080 = vst [vmem:[#allocation71_spill] sm:$0xff] %v15217_v35  ;;  %11980 = vmatpush3.bf16.msra.mxu0 %v15217_v35 }
 0x98b   :  { %v2101_v37 = vpop.trf.xlu0  ;;  %11981 = vmatprep.subr.bf16.mxu0 %v17076_v54 }
 0x98f   :  { %v2102_v45 = vpop.trf.xlu0 }
 0x990   :  { %v15221_v52 = vpack.c.bf16 %v2102_v45, %v2101_v37  ;;  %v2188_v37 = vrot.slane %v2125_v41, %v14612_v19  ;;  %v2393_v45 = vrot.slane %v2126_v28, %v14612_v19 }
 0x992   :  { %17081 = vst [vmem:[#allocation72_spill] sm:$0xff] %v15221_v52  ;;  %11983 = vmatpush3.bf16.msra.mxu0 %v15221_v52 }
 0x993   :  { %v2103_v10 = vpop.trf.xlu0  ;;  %11984 = vmatprep.subr.bf16.mxu0 %v17076_v54 }
 0x997   :  { %v2104_v46 = vpop.trf.xlu0 }
 0x998   :  { %v15225_v13 = vpack.c.bf16 %v2104_v46, %v2103_v10  ;;  %v2192_v10 = vrot.slane %v2125_v41, %v14617_v23  ;;  %v2397_v46 = vrot.slane %v2126_v28, %v14617_v23 }
 0x99a   :  { %17082 = vst [vmem:[#allocation73_spill] sm:$0xff] %v15225_v13  ;;  %11986 = vmatpush3.bf16.msra.mxu0 %v15225_v13 }
 0x99b   :  { %v2105_v53 = vpop.trf.xlu0  ;;  %11987 = vmatprep.subr.bf16.mxu0 %v17076_v54 }
 0x99f   :  { %v2106_v60 = vpop.trf.xlu0 }
 0x9a0   :  { %v15229_v1 = vpack.c.bf16 %v2106_v60, %v2105_v53  ;;  %v15247_v53 = vadd.f32 %v2393_v45, %v2188_v37  ;;  %v15254_v37 = vrot.slane %v2126_v28, %v14633_v49  ;;  %v15257_v45 = vrot.slane %v2125_v41, %v14633_v49 }
 0x9a1   :  { %v14270_v49 = vmov -1e+30  }
 0x9a2   :  { %17083 = vst [vmem:[#allocation74_spill] sm:$0xff] %v15229_v1  ;;  %11989 = vmatpush3.bf16.msra.mxu0 %v15229_v1 }
 0x9a3   :  { %v2107_v0 = vpop.trf.xlu0  ;;  %11990 = vmatprep.subr.bf16.mxu0 %v17076_v54 }
 0x9a7   :  { %v2108_v39 = vpop.trf.xlu0 }
 0x9a8   :  { %v15233_v36 = vpack.c.bf16 %v2108_v39, %v2107_v0  ;;  %v15249_v39 = vadd.f32 %v2397_v46, %v2192_v10 }
 0x9aa   :  { %17084 = vst [vmem:[#allocation75_spill] sm:$0xff] %v15233_v36  ;;  %11992 = vmatpush3.bf16.msra.mxu0 %v15233_v36 }
 0x9ab   :  { %12017 = vmatprep.subr.bf16.mxu0 %v17076_v54 }
 0x9b6   :  { %v2471_v60 = vpop.f32.mrb[16].mxu0  ;;  %v2542_v0 = vpop.f32.mrb[18].mxu1 }
 0x9b7   :  { %v13714_v36 = vadd.f32 %v15247_v53, %v2471_v60  ;;  %v2473_v1 = vpop.f32.mrb[17].mxu0  ;;  %v9518_v13 = vpop.f32.mrb[19].mxu1  ;;  %v2543_v46 = vadd.f32 %v2542_v0, %v15254_v37 }
 0x9b8   :  { %v13716_v35 = vadd.f32 %v15249_v39, %v2473_v1  ;;  %v2338_v1 = vadd.f32 %v15199_v21, %v15257_v45  ;;  %v15269_v21 = vsel %vm2131_vm10, 0.0, %v14270_v49 }
 0x9b9   :  { %v8044_v52 = vmul.f32 -1.442695, %v13714_v36  ;;  %17085 = vst [vmem:[#allocation76_spill] sm:$0xff] %v15269_v21 }
 0x9ba   :  { %v8045_v7 = vmul.f32 -1.442695, %v13716_v35 }
 0x9bb   :  { %13860 = vpow2.f32 %v8044_v52 }
 0x9bc   :  { %13862 = vpow2.f32 %v8045_v7 }
 0x9c5   :  { %v13861_v19 = vpop.eup %13860 }
 0x9c6   :  { %v2550_v26 = vadd.f32 1.0, %v13861_v19  ;;  %v13863_v23 = vpop.eup %13862 }
 0x9c7   :  { %v2557_v10 = vadd.f32 1.0, %v13863_v23 }
 0x9c8   :  { %13864 = vrcp.f32 %v2550_v26 }
 0x9c9   :  { %13866 = vrcp.f32 %v2557_v10 }
 0x9d2   :  { %v13865_v13 = vpop.eup %13864 }
 0x9d3   :  { %v2560_v52 = vmul.f32 %v13865_v13, %v2543_v46  ;;  %v13867_v35 = vpop.eup %13866 }
 0x9d4   :  { %v2563_v26 = vsub.f32 1.0, %v13867_v35  ;;  %v2565_v28 = vmul.f32 %v13867_v35, %v15173_v20  ;;  %v15275_v20 = vpack.c.bf16 %v15186_v4, %v15186_v4  ;;  %v2768_v35 = vld [vmem:[#allocation16] sm:$0xff] }
 0x9d5   :  { %v2561_v7 = vadd.f32 %v2560_v52, %v2338_v1 }
 0x9d6   :  { %17086 = vst [vmem:[#allocation77_spill] sm:$0xff] %v15275_v20  ;;  %11998 = vmatpush3.bf16.msra.mxu1 %v15275_v20 }
 0x9d7   :  { %13868 = vtanh.f32 %v2561_v7  ;;  %11999 = vmatprep.subr.bf16.mxu1 %v17076_v54 }
 0x9da   :  { %12001 = vmatpush3.bf16.msra.mxu1 %v15275_v20 }
 0x9db   :  { %12002 = vmatprep.subr.bf16.mxu1 %v17076_v54 }
 0x9de   :  { %12004 = vmatpush3.bf16.msra.mxu1 %v15275_v20 }
 0x9df   :  { %12005 = vmatprep.subr.bf16.mxu1 %v17076_v54 }
 0x9e1   :  { %v13869_v36 = vpop.eup %13868 }
 0x9e2   :  { %v2564_v60 = vmul.f32 %v13869_v36, %v2563_v26  ;;  %12007 = vmatpush3.bf16.msra.mxu1 %v15275_v20  ;;  %v2769_v26 = vld [vmem:[#allocation16 + $0x8] sm:$0xff]  ;;  %v2770_v36 = vld [vmem:[#allocation16 + $0x10] sm:$0xff] }
 0x9e3   :  { %12008 = vmatprep.subr.bf16.mxu1 %v17076_v54 }
 0x9e4   :  { %v15263_v19 = vadd.f32 %v2565_v28, %v2564_v60  ;;  %v15292_v60 = vpack.c.bf16 %v2769_v26, %v2768_v35  ;;  %v2771_v28 = vld [vmem:[#allocation16 + $0x18] sm:$0xff]  ;;  %v2778_v26 = vld [vmem:[#allocation16 + $0x50] sm:$0xff] }
 0x9e5   :  { %v15295_v49 = vpack.c.bf16 %v2771_v28, %v2770_v36  ;;  %v2779_v36 = vld [vmem:[#allocation16 + $0x58] sm:$0xff] }
 0x9e6   :  { %9552 = vmatmul.mubr.f32.vlgmr.msra.gmra.mrb[18].mxu0 %v15263_v19  ;;  %12010 = vmatpush3.bf16.msra.mxu1 %v15275_v20  ;;  %v15311_v28 = vpack.c.bf16 %v2779_v36, %v2778_v26  ;;  %v2752_v36 = vld [vmem:[#allocation15] sm:$0xff] }
 0x9e7   :  { %9621 = vmatprep.mubr.msk.f32.mxu0 %vm14268_vm0, %v15186_v4  ;;  %12011 = vmatprep.subr.bf16.mxu1 %v17076_v54 }
 0x9e8   :  { %12019 = vmatpush3.bf16.msra.mxu0 %v15292_v60  ;;  %17089 = vst [vmem:[#allocation80_spill] sm:$0xff] %v15311_v28 }
 0x9e9   :  { %12020 = vmatprep.subr.bf16.mxu0 %v17076_v54 }
 0x9ea   :  { %12013 = vmatpush3.bf16.msra.mxu1 %v15275_v20 }
 0x9eb   :  { %12014 = vmatprep.subr.bf16.mxu1 %v17076_v54 }
 0x9ec   :  { %12022 = vmatpush3.bf16.msra.mxu0 %v15295_v49 }
 0x9ed   :  { %12023 = vmatprep.subr.bf16.mxu0 %v17076_v54 }
 0x9ee   :  { %12016 = vmatpush3.bf16.msra.mxu1 %v15275_v20 }
 0x9ef   :  { %12041 = vmatprep.subr.bf16.mxu1 %v17076_v54 }
 0xab9   :  { %v2649_v41 = vpop.f32.mrb[18].mxu0 }
 0xaba   :  { %v2650_v0 = vadd.f32 %v2649_v41, %v15269_v21  ;;  %v9553_v23 = vpop.f32.mrb[19].mxu0  ;;  %v2772_v41 = vld [vmem:[#allocation16 + $0x20] sm:$0xff]  ;;  %v2753_v21 = vld [vmem:[#allocation15 + $0x8] sm:$0xff] }
 0xabc   :  { %v2654_v10 = vsel %vm2653_vm11, %v2650_v0, -inf }
 0xabd   :  { %2655 = vmax.xlane.f32.xlu1 %v2654_v10  ;;  %v2774_v10 = vld [vmem:[#allocation16 + $0x30] sm:$0xff] }
 0xb4a   :  { %v2656_v46 = vpop.xlane.xlu1 %2655 }
 0xb4b   :  { %v2657_v13 = vsub.f32 %v2650_v0, %v2656_v46  ;;  %v2773_v0 = vld [vmem:[#allocation16 + $0x28] sm:$0xff]  ;;  %v2775_v46 = vld [vmem:[#allocation16 + $0x38] sm:$0xff] }
 0xb4c   :  { %v15299_v23 = vpack.c.bf16 %v2773_v0, %v2772_v41  ;;  %v2780_v41 = vld [vmem:[#allocation16 + $0x60] sm:$0xff]  ;;  %v2781_v0 = vld [vmem:[#allocation16 + $0x68] sm:$0xff] }
 0xb4d   :  { %v2658_v1 = vmul.f32 1.442695, %v2657_v13  ;;  %v15303_v13 = vpack.c.bf16 %v2775_v46, %v2774_v10  ;;  %v15315_v10 = vpack.c.bf16 %v2781_v0, %v2780_v41  ;;  %v2782_v46 = vld [vmem:[#allocation16 + $0x70] sm:$0xff]  ;;  %v15324_v0 = vpack.c.bf16 %v2753_v21, %v2752_v36 }
 0xb4e   :  { %12025 = vmatpush3.bf16.msra.mxu0 %v15299_v23  ;;  %v2758_v21 = vld [vmem:[#allocation15 + $0x30] sm:$0xff] }
 0xb4f   :  { %13870 = vpow2.f32 %v2658_v1  ;;  %17087 = vst [vmem:[#allocation78_spill] sm:$0xff] %v15303_v13  ;;  %12026 = vmatprep.subr.bf16.mxu0 %v17076_v54  ;;  %v2776_v1 = vld [vmem:[#allocation16 + $0x40] sm:$0xff] }
 0xb52   :  { %12028 = vmatpush3.bf16.msra.mxu0 %v15303_v13  ;;  %v2755_v13 = vld [vmem:[#allocation15 + $0x18] sm:$0xff] }
 0xb53   :  { %12029 = vmatprep.subr.bf16.mxu0 %v17076_v54 }
 0xb59   :  { %v13871_v52 = vpop.eup %13870 }
 0xb5a   :  { %v2660_v7 = vsel %vm2653_vm11, %v13871_v52, 0.0 }
 0xb5b   :  { %2661 = vadd.xlane.f32.xlu1 %v2660_v7  ;;  %v2777_v7 = vld [vmem:[#allocation16 + $0x48] sm:$0xff] }
 0xb5c   :  { %v15307_v35 = vpack.c.bf16 %v2777_v7, %v2776_v1  ;;  %v2783_v1 = vld [vmem:[#allocation16 + $0x78] sm:$0xff] }
 0xb5d   :  { %v15319_v7 = vpack.c.bf16 %v2783_v1, %v2782_v46  ;;  %v2756_v1 = vld [vmem:[#allocation15 + $0x20] sm:$0xff] }
 0xb5e   :  { %17088 = vst [vmem:[#allocation79_spill] sm:$0xff] %v15307_v35  ;;  %12031 = vmatpush3.bf16.msra.mxu0 %v15307_v35  ;;  %v2754_v35 = vld [vmem:[#allocation15 + $0x10] sm:$0xff] }
 0xb5f   :  { %12032 = vmatprep.subr.bf16.mxu0 %v17076_v54  ;;  %17090 = vst [vmem:[#allocation81_spill] sm:$0xff] %v15319_v7  ;;  %v15327_v46 = vpack.c.bf16 %v2755_v13, %v2754_v35  ;;  %v2760_v13 = vld [vmem:[#allocation15 + $0x40] sm:$0xff]  ;;  %v2761_v35 = vld [vmem:[#allocation15 + $0x48] sm:$0xff] }
 0xb60   :  { %v15341_v36 = vpack.c.bf16 %v2761_v35, %v2760_v13  ;;  %v2766_v13 = vld [vmem:[#allocation15 + $0x70] sm:$0xff]  ;;  %v2767_v35 = vld [vmem:[#allocation15 + $0x78] sm:$0xff] }
 0xb62   :  { %12034 = vmatpush3.bf16.msra.mxu0 %v15311_v28 }
 0xb63   :  { %12035 = vmatprep.subr.bf16.mxu0 %v17076_v54 }
 0xb66   :  { %12037 = vmatpush3.bf16.msra.mxu0 %v15315_v10 }
 0xb67   :  { %12038 = vmatprep.subr.bf16.mxu0 %v17076_v54 }
 0xb6a   :  { %12040 = vmatpush3.bf16.msra.mxu0 %v15319_v7 }
 0xb6b   :  { %12065 = vmatprep.subr.bf16.mxu0 %v17076_v54 }
 0xbe8   :  { %v2662_v26 = vpop.xlane.xlu1 %2661 }
 0xbe9   :  { %13872 = vrcp.f32 %v2662_v26  ;;  %v2757_v26 = vld [vmem:[#allocation15 + $0x28] sm:$0xff] }
 0xbea   :  { %v15333_v7 = vpack.c.bf16 %v2757_v26, %v2756_v1  ;;  %v2763_v1 = vld [vmem:[#allocation15 + $0x58] sm:$0xff] }
 0xbec   :  { %17091 = vst [vmem:[#allocation82_spill] sm:$0xff] %v15333_v7 }
 0xbf3   :  { %v13873_v41 = vpop.eup %13872 }
 0xbf4   :  { %v2665_v28 = vmul.f32 %v13873_v41, %v13871_v52  ;;  %v2759_v52 = vld [vmem:[#allocation15 + $0x38] sm:$0xff]  ;;  %v2762_v41 = vld [vmem:[#allocation15 + $0x50] sm:$0xff] }
 0xbf5   :  { %v15345_v26 = vpack.c.bf16 %v2763_v1, %v2762_v41  ;;  %v2926_v41 = vld [vmem:[#allocation18] sm:$0xff]  ;;  %v2927_v1 = vld [vmem:[#allocation18 + $0x8] sm:$0xff] }
 0xbf6   :  { %9587 = vmatmul.mubr.f32.vlgmr.msra.gmra.mrb[20].mxu1 %v2665_v28  ;;  %v15337_v28 = vpack.c.bf16 %v2759_v52, %v2758_v21  ;;  %v2764_v21 = vld [vmem:[#allocation15 + $0x60] sm:$0xff]  ;;  %v2765_v52 = vld [vmem:[#allocation15 + $0x68] sm:$0xff] }
 0xbf7   :  { %12043 = vmatpush3.bf16.msra.mxu1 %v15324_v0  ;;  %9656 = vmatprep.mubr.msk.f32.mxu1 %vm14268_vm0, %v15186_v4 }
 0xbf8   :  { %12044 = vmatprep.subr.bf16.mxu1 %v17076_v54  ;;  %17092 = vst [vmem:[#allocation83_spill] sm:$0xff] %v15337_v28 }
 0xbfb   :  { %12046 = vmatpush3.bf16.msra.mxu1 %v15327_v46 }
 0xbfc   :  { %12047 = vmatprep.subr.bf16.mxu1 %v17076_v54 }
 0xbff   :  { %12049 = vmatpush3.bf16.msra.mxu1 %v15333_v7  ;;  %v15349_v7 = vpack.c.bf16 %v2765_v52, %v2764_v21  ;;  %v15376_v21 = vpack.c.bf16 %v2927_v1, %v2926_v41  ;;  %v2928_v52 = vld [vmem:[#allocation18 + $0x10] sm:$0xff] }
 0xc00   :  { %12050 = vmatprep.subr.bf16.mxu1 %v17076_v54  ;;  %v2932_v1 = vld [vmem:[#allocation18 + $0x30] sm:$0xff] }
 0xc01   :  { %17093 = vst [vmem:[#allocation84_spill] sm:$0xff] %v15376_v21 }
 0xc03   :  { %12052 = vmatpush3.bf16.msra.mxu1 %v15337_v28  ;;  %v15353_v28 = vpack.c.bf16 %v2767_v35, %v2766_v13  ;;  %v2929_v13 = vld [vmem:[#allocation18 + $0x18] sm:$0xff] }
 0xc04   :  { %12053 = vmatprep.subr.bf16.mxu1 %v17076_v54 }
 0xc07   :  { %12055 = vmatpush3.bf16.msra.mxu1 %v15341_v36 }
 0xc08   :  { %12056 = vmatprep.subr.bf16.mxu1 %v17076_v54 }
 0xc0b   :  { %12058 = vmatpush3.bf16.msra.mxu1 %v15345_v26 }
 0xc0c   :  { %12059 = vmatprep.subr.bf16.mxu1 %v17076_v54 }
 0xc0f   :  { %12061 = vmatpush3.bf16.msra.mxu1 %v15349_v7 }
 0xc10   :  { %12062 = vmatprep.subr.bf16.mxu1 %v17076_v54 }
 0xc13   :  { %12064 = vmatpush3.bf16.msra.mxu1 %v15353_v28 }
 0xc14   :  { %12090 = vmatprep.subr.bf16.mxu1 %v14969_v8 }
 0xc16   :  { %9657 = vmatmul.mubr.f32.vlgmr.msra.gmra.mrb[22].mxu1 %v15263_v19 }
 0xc17   :  { %12092 = vmatpush1.bf16.msra.mxu1 %v14985_v31  ;;  %3110 = vmatprep.mubr.f32.mxu1 %v15186_v4 }
 0xc18   :  { %12094 = vmatprep.subr.bf16.mxu1 %v14989_v3 }
 0xc1b   :  { %12096 = vmatpush1.bf16.msra.mxu1 %v14998_v5 }
 0xc1c   :  { %12098 = vmatprep.subr.bf16.mxu1 %v15004_v18 }
 0xc1f   :  { %12100 = vmatpush1.bf16.msra.mxu1 %v15011_v9 }
 0xc20   :  { %12102 = vmatprep.subr.bf16.mxu1 %v15017_v22 }
 0xc23   :  { %12104 = vmatpush1.bf16.msra.mxu1 %v15023_v63 }
 0xc24   :  { %12106 = vmatprep.subr.bf16.mxu1 %v15029_v44 }
 0xc27   :  { %12108 = vmatpush1.bf16.msra.mxu1 %v15032_v25 }
 0xc28   :  { %12110 = vmatprep.subr.bf16.mxu1 %v15039_v33 }
 0xc2b   :  { %12112 = vmatpush1.bf16.msra.mxu1 %v15042_v55 }
 0xc2c   :  { %12114 = vmatprep.subr.bf16.mxu1 %v15049_v11  ;;  %v15379_v11 = vpack.c.bf16 %v2929_v13, %v2928_v52 }
 0xc2e   :  { %17094 = vst [vmem:[#allocation85_spill] sm:$0xff] %v15379_v11 }
 0xc2f   :  { %12116 = vmatpush1.bf16.msra.mxu1 %v15052_v34  ;;  %v2941_v34 = vld [vmem:[#allocation18 + $0x78] sm:$0xff] }
 0xc30   :  { %12118 = vmatprep.subr.bf16.mxu1 %v15059_v56  ;;  %v2939_v56 = vld [vmem:[#allocation18 + $0x68] sm:$0xff] }
 0xc33   :  { %12120 = vmatpush1.bf16.msra.mxu1 %v15062_v47  ;;  %v2930_v47 = vld [vmem:[#allocation18 + $0x20] sm:$0xff] }
 0xc34   :  { %12146 = vmatprep.subr.bf16.mxu1 %v15072_v51  ;;  %v2931_v51 = vld [vmem:[#allocation18 + $0x28] sm:$0xff] }
 0xc35   :  { %v15385_v41 = vpack.c.bf16 %v2931_v51, %v2930_v47  ;;  %v2936_v51 = vld [vmem:[#allocation18 + $0x50] sm:$0xff] }
 0xc37   :  { %17095 = vst [vmem:[#allocation86_spill] sm:$0xff] %v15385_v41 }
 0xcc9   :  { %v2748_v35 = vpop.f32.mrb[20].mxu1 }
 0xcca   :  { %v9588_v33 = vpop.f32.mrb[21].mxu1  ;;  %9622 = vmatmul.mubr.f32.vlgmr.msra.gmra.mrb[20].mxu0 %v2748_v35 }
 0xccb   :  { %12067 = vmatpush3.bf16.msra.mxu0 %v15376_v21  ;;  %9691 = vmatprep.mubr.msk.f32.mxu0 %vm14268_vm0, %v15186_v4  ;;  %v2933_v33 = vld [vmem:[#allocation18 + $0x38] sm:$0xff]  ;;  %v2934_v21 = vld [vmem:[#allocation18 + $0x40] sm:$0xff] }
 0xccc   :  { %12068 = vmatprep.subr.bf16.mxu0 %v17076_v54  ;;  %v15389_v35 = vpack.c.bf16 %v2933_v33, %v2932_v1  ;;  %v2938_v33 = vld [vmem:[#allocation18 + $0x60] sm:$0xff] }
 0xcce   :  { %17096 = vst [vmem:[#allocation87_spill] sm:$0xff] %v15389_v35 }
 0xccf   :  { %12070 = vmatpush3.bf16.msra.mxu0 %v15379_v11  ;;  %v2935_v11 = vld [vmem:[#allocation18 + $0x48] sm:$0xff] }
 0xcd0   :  { %12071 = vmatprep.subr.bf16.mxu0 %v17076_v54  ;;  %v15394_v47 = vpack.c.bf16 %v2935_v11, %v2934_v21  ;;  %v15413_v21 = vld [vmem:[%s16870_s12] sm:$0x1] }
 0xcd1   :  { %17101 = vst [vmem:[#allocation92_spill] sm:$0xff] %v15413_v21 }
 0xcd2   :  { %17097 = vst [vmem:[#allocation88_spill] sm:$0xff] %v15394_v47 }
 0xcd3   :  { %12073 = vmatpush3.bf16.msra.mxu0 %v15385_v41  ;;  %v2937_v41 = vld [vmem:[#allocation18 + $0x58] sm:$0xff] }
 0xcd4   :  { %12074 = vmatprep.subr.bf16.mxu0 %v17076_v54  ;;  %v15398_v1 = vpack.c.bf16 %v2937_v41, %v2936_v51 }
 0xcd6   :  { %17098 = vst [vmem:[#allocation89_spill] sm:$0xff] %v15398_v1 }
 0xcd7   :  { %12076 = vmatpush3.bf16.msra.mxu0 %v15389_v35  ;;  %v15401_v35 = vpack.c.bf16 %v2939_v56, %v2938_v33 }
 0xcd8   :  { %12077 = vmatprep.subr.bf16.mxu0 %v17076_v54 }
 0xcd9   :  { %17099 = vst [vmem:[#allocation90_spill] sm:$0xff] %v15401_v35 }
 0xcdb   :  { %12079 = vmatpush3.bf16.msra.mxu0 %v15394_v47 }
 0xcdc   :  { %12080 = vmatprep.subr.bf16.mxu0 %v17076_v54 }
 0xcdf   :  { %12082 = vmatpush3.bf16.msra.mxu0 %v15398_v1 }
 0xce0   :  { %12083 = vmatprep.subr.bf16.mxu0 %v17076_v54 }
 0xce3   :  { %12085 = vmatpush3.bf16.msra.mxu0 %v15401_v35 }
 0xce4   :  { %12086 = vmatprep.subr.bf16.mxu0 %v17076_v54 }
 0xce9   :  { %v2920_v52 = vpop.f32.mrb[22].mxu1 }
 0xcea   :  { %v9658_v13 = vpop.f32.mrb[23].mxu1 }
 0xceb   :  { %v2940_v13 = vld [vmem:[#allocation18 + $0x70] sm:$0xff] }
 0xcec   :  { %v15405_v11 = vpack.c.bf16 %v2941_v34, %v2940_v13  ;;  %v15437_v34 = vld [vmem:[%s16872_s14] sm:$0x1] }
 0xced   :  { %17102 = vst [vmem:[#allocation93_spill] sm:$0xff] %v15437_v34 }
 0xcee   :  { %17100 = vst [vmem:[#allocation91_spill] sm:$0xff] %v15405_v11  ;;  %12088 = vmatpush3.bf16.msra.mxu0 %v15405_v11 }
 0xcef   :  { %12121 = vmatprep.subr.bf16.mxu0 %v17076_v54 }
 0xd9d   :  { %v2850_v56 = vpop.f32.mrb[20].mxu0 }
 0xd9e   :  { %v2921_v41 = vadd.f32 %v2920_v52, %v2850_v56  ;;  %v9623_v51 = vpop.f32.mrb[21].mxu0 }
 0xda0   :  { %v2924_v33 = vadd.f32 %v2921_v41, %v15413_v21 }
 0xda2   :  { %13874 = vtanh.f32 %v2924_v33 }
 0xdac   :  { %v13875_v35 = vpop.eup %13874 }
 0xdad   :  { %9692 = vmatmul.mubr.f32.vlgmr.msra.gmra.mrb[22].mxu0 %v13875_v35 }
 0xdae   :  { %12123 = vmatpush3.bf16.msra.mxu0 %v14987_v24  ;;  %9726 = vmatprep.mubr.msk.f32.mxu0 %vm14268_vm0, %v15186_v4 }
 0xdaf   :  { %12124 = vmatprep.subr.bf16.mxu0 %v17076_v54 }
 0xdb2   :  { %12126 = vmatpush3.bf16.msra.mxu0 %v15000_v6 }
 0xdb3   :  { %12127 = vmatprep.subr.bf16.mxu0 %v17076_v54 }
 0xdb6   :  { %12129 = vmatpush3.bf16.msra.mxu0 %v15013_v15 }
 0xdb7   :  { %12130 = vmatprep.subr.bf16.mxu0 %v17076_v54 }
 0xdba   :  { %12132 = vmatpush3.bf16.msra.mxu0 %v15025_v27 }
 0xdbb   :  { %12133 = vmatprep.subr.bf16.mxu0 %v17076_v54 }
 0xdbe   :  { %12135 = vmatpush3.bf16.msra.mxu0 %v15035_v29 }
 0xdbf   :  { %12136 = vmatprep.subr.bf16.mxu0 %v17076_v54 }
 0xdc2   :  { %12138 = vmatpush3.bf16.msra.mxu0 %v15045_v40 }
 0xdc3   :  { %12139 = vmatprep.subr.bf16.mxu0 %v17076_v54 }
 0xdc6   :  { %12141 = vmatpush3.bf16.msra.mxu0 %v15055_v43 }
 0xdc7   :  { %12142 = vmatprep.subr.bf16.mxu0 %v17076_v54 }
 0xdca   :  { %12144 = vmatpush3.bf16.msra.mxu0 %v15068_v12 }
 0xdcb   :  { %12177 = vmatprep.subr.bf16.mxu0 %v17076_v54 }
 0xe80   :  { %v3008_v35 = vpop.f32.mrb[22].mxu0 }
 0xe81   :  { %v15440_v52 = vadd.f32 %v3008_v35, %v15437_v34  ;;  %v9693_v13 = vpop.f32.mrb[23].mxu0 }
 0xe83   :  { %17103 = vst [vmem:[#allocation94_spill] sm:$0xff] %v15440_v52  ;;  %v3012_v56 = vsel %vm2653_vm11, %v15440_v52, -inf }
 0xe84   :  { %3013 = vmax.xlane.f32.xlu1 %v3012_v56 }
 0xf11   :  { %v15444_v41 = vpop.xlane.xlu1 %3013 }
 0xf12   :  { %17104 = vst [vmem:[#allocation95_spill] sm:$0xff] %v15444_v41  ;;  %vm3015_vm12 = vcmp.eq.f32.partialorder %v15440_v52, %v15444_v41  ;;  %v17105_v52 = vmov 1.0   ;;  %v17118_v41 = vld [vmem:[#allocation70_spill] sm:$0xff] }
 0xf13   :  { %v3016_v51 = vsel %vm3015_vm12, %v15065_v62, 128  ;;  %vm5142_vm12 = vcmp.eq.s32.totalorder %v15065_v62, 3 }
 0xf14   :  { %v3017_v33 = vsel %vm2653_vm11, %v3016_v51, 2147483647  ;;  %v17113_v51 = vld [vmem:[#allocation63_spill] sm:$0xff] }
 0xf15   :  { %v3019_v12 = vshra.s32 %v3017_v33, 16  ;;  %v3018_v40 = vand.u32 65535, %v3017_v33  ;;  %v17114_v33 = vld [vmem:[#allocation64_spill] sm:$0xff] }
 0xf17   :  { %v3021_v43 = vcvt.s32.f32 %v3019_v12  ;;  %v3020_v34 = vcvt.s32.f32 %v3018_v40  ;;  %v17109_v40 = vld [vmem:[#allocation59_spill] sm:$0xff]  ;;  %v17111_v12 = vld [vmem:[#allocation61_spill] sm:$0xff] }
 0xf19   :  { %3022 = vmin.xlane.f32.xlu1 %v3021_v43 }
 0xfa6   :  { %v3023_v35 = vpop.xlane.xlu1 %3022 }
 0xfa7   :  { %vm3024_vm13 = vcmp.eq.f32.partialorder %v3021_v43, %v3023_v35  ;;  %v3029_v29 = vcvt.f32.s32 %v3023_v35  ;;  %v17110_v43 = vld [vmem:[#allocation60_spill] sm:$0xff]  ;;  %v17115_v35 = vld [vmem:[#allocation65_spill] sm:$0xff] }
 0xfa8   :  { %v3025_v13 = vsel %vm3024_vm13, %v3020_v34, inf  ;;  %v17112_v34 = vld [vmem:[#allocation62_spill] sm:$0xff] }
 0xfa9   :  { %3026 = vmin.xlane.f32.xlu1 %v3025_v13  ;;  %v3030_v27 = vshll.u32 %v3029_v29, 16  ;;  %v17108_v29 = vld [vmem:[#allocation58_spill] sm:$0xff] }
 0xfaa   :  { %v17116_v13 = vld [vmem:[#allocation66_spill] sm:$0xff] }
0x1036   :  { %v3027_v56 = vpop.xlane.xlu1 %3026 }
0x1037   :  { %v3028_v15 = vcvt.f32.s32 %v3027_v56  ;;  %v17117_v56 = vld [vmem:[#allocation69_spill] sm:$0xff] }
0x1039   :  { %v15450_v6 = vadd.s32 %v3030_v27, %v3028_v15  ;;  %v17106_v15 = vld [vmem:[#allocation55_spill] sm:$0xff]  ;;  %v17107_v27 = vld [vmem:[#allocation56_spill] sm:$0xff] }
0x103b   :  { %vm3043_vm14 = vcmp.eq.s32.totalorder %v15065_v62, %v15450_v6 }
0x103c   :  { %8047 = vmatmul.mubr.msk.f32.vlgmr.msra.gmra.mrb[24].mxu1 %vm3043_vm14, %v17105_v52  ;;  %9727 = vmatmul.mubr.msk.f32.vlgmr.msra.gmra.mrb[24].mxu0 %vm3043_vm14, %v17105_v52 }
0x103d   :  { %12148 = vmatpush1.bf16.msra.mxu1 %v15075_v58  ;;  %12179 = vmatpush3.bf16.msra.mxu0 %v15079_v61 }
0x103e   :  { %12150 = vmatprep.subr.bf16.mxu1 %v15089_v32  ;;  %12180 = vmatprep.subr.bf16.mxu0 %v17076_v54 }
0x103f   :  { %3251 = vmatprep.mubr.f32.mxu1 %v15186_v4  ;;  %9761 = vmatprep.mubr.msk.f32.mxu0 %vm14268_vm0, %v15186_v4 }
0x1041   :  { %12152 = vmatpush1.bf16.msra.mxu1 %v15092_v59  ;;  %12182 = vmatpush3.bf16.msra.mxu0 %v15096_v2 }
0x1042   :  { %12154 = vmatprep.subr.bf16.mxu1 %v15102_v30  ;;  %12183 = vmatprep.subr.bf16.mxu0 %v17076_v54 }
0x1045   :  { %12156 = vmatpush1.bf16.msra.mxu1 %v15105_v57  ;;  %12185 = vmatpush3.bf16.msra.mxu0 %v15108_v38 }
0x1046   :  { %12158 = vmatprep.subr.bf16.mxu1 %v15112_v42  ;;  %12186 = vmatprep.subr.bf16.mxu0 %v17076_v54 }
0x1049   :  { %12160 = vmatpush1.bf16.msra.mxu1 %v15115_v17  ;;  %12188 = vmatpush3.bf16.msra.mxu0 %v15118_v16 }
0x104a   :  { %12162 = vmatprep.subr.bf16.mxu1 %v17106_v15  ;;  %12189 = vmatprep.subr.bf16.mxu0 %v17076_v54 }
0x104d   :  { %12164 = vmatpush1.bf16.msra.mxu1 %v17107_v27  ;;  %12191 = vmatpush3.bf16.msra.mxu0 %v15128_v48 }
0x104e   :  { %12166 = vmatprep.subr.bf16.mxu1 %v17108_v29  ;;  %12192 = vmatprep.subr.bf16.mxu0 %v17076_v54 }
0x1051   :  { %12168 = vmatpush1.bf16.msra.mxu1 %v17109_v40  ;;  %12194 = vmatpush3.bf16.msra.mxu0 %v17110_v43 }
0x1052   :  { %12170 = vmatprep.subr.bf16.mxu1 %v17111_v12  ;;  %12195 = vmatprep.subr.bf16.mxu0 %v17076_v54 }
0x1055   :  { %12172 = vmatpush1.bf16.msra.mxu1 %v17112_v34  ;;  %12197 = vmatpush3.bf16.msra.mxu0 %v17113_v51 }
0x1056   :  { %12174 = vmatprep.subr.bf16.mxu1 %v17114_v33  ;;  %12198 = vmatprep.subr.bf16.mxu0 %v17076_v54 }
0x1059   :  { %12176 = vmatpush1.bf16.msra.mxu1 %v17115_v35  ;;  %12200 = vmatpush3.bf16.msra.mxu0 %v17116_v13 }
0x105a   :  { %12201 = vmatprep.subr.bf16.mxu1 %v17076_v54  ;;  %12225 = vmatprep.subr.bf16.mxu0 %v17076_v54 }
0x105c   :  { %3252 = vmatmul.mubr.f32.vlgmr.msra.gmra.mrb[24].mxu1 %v15263_v19  ;;  %9762 = vmatmul.mubr.f32.vlgmr.msra.gmra.mrb[26].mxu0 %v15263_v19 }
0x105d   :  { %12203 = vmatpush3.bf16.msra.mxu1 %v15205_v14  ;;  %12227 = vmatpush3.bf16.msra.mxu0 %v15182_v50  ;;  %v17119_v50 = vld [vmem:[#allocation71_spill] sm:$0xff] }
0x105e   :  { %12204 = vmatprep.subr.bf16.mxu1 %v17076_v54  ;;  %9796 = vmatprep.mubr.msk.f32.mxu1 %vm14268_vm0, %v15186_v4 }
0x105f   :  { %12228 = vmatprep.subr.bf16.mxu0 %v17076_v54  ;;  %9831 = vmatprep.mubr.msk.f32.mxu0 %vm14268_vm0, %v15186_v4 }
0x1061   :  { %12206 = vmatpush3.bf16.msra.mxu1 %v17117_v56  ;;  %12230 = vmatpush3.bf16.msra.mxu0 %v15275_v20  ;;  %v17120_v56 = vld [vmem:[#allocation72_spill] sm:$0xff] }
0x1062   :  { %12207 = vmatprep.subr.bf16.mxu1 %v17076_v54  ;;  %12231 = vmatprep.subr.bf16.mxu0 %v17076_v54 }
0x1065   :  { %12209 = vmatpush3.bf16.msra.mxu1 %v17118_v41  ;;  %12233 = vmatpush3.bf16.msra.mxu0 %v15275_v20  ;;  %v17121_v41 = vld [vmem:[#allocation73_spill] sm:$0xff] }
0x1066   :  { %12210 = vmatprep.subr.bf16.mxu1 %v17076_v54  ;;  %12234 = vmatprep.subr.bf16.mxu0 %v17076_v54 }
0x1069   :  { %12212 = vmatpush3.bf16.msra.mxu1 %v17119_v50  ;;  %12236 = vmatpush3.bf16.msra.mxu0 %v15275_v20  ;;  %v17122_v50 = vld [vmem:[#allocation74_spill] sm:$0xff] }
0x106a   :  { %12213 = vmatprep.subr.bf16.mxu1 %v17076_v54  ;;  %12237 = vmatprep.subr.bf16.mxu0 %v17076_v54 }
0x106d   :  { %12215 = vmatpush3.bf16.msra.mxu1 %v17120_v56  ;;  %12239 = vmatpush3.bf16.msra.mxu0 %v15275_v20  ;;  %v17123_v56 = vld [vmem:[#allocation75_spill] sm:$0xff] }
0x106e   :  { %12216 = vmatprep.subr.bf16.mxu1 %v17076_v54  ;;  %12240 = vmatprep.subr.bf16.mxu0 %v17076_v54 }
0x1071   :  { %12218 = vmatpush3.bf16.msra.mxu1 %v17121_v41  ;;  %12242 = vmatpush3.bf16.msra.mxu0 %v15275_v20 }
0x1072   :  { %12219 = vmatprep.subr.bf16.mxu1 %v17076_v54  ;;  %12243 = vmatprep.subr.bf16.mxu0 %v17076_v54 }
0x1075   :  { %12221 = vmatpush3.bf16.msra.mxu1 %v17122_v50  ;;  %12245 = vmatpush3.bf16.msra.mxu0 %v15275_v20 }
0x1076   :  { %12222 = vmatprep.subr.bf16.mxu1 %v17076_v54  ;;  %12246 = vmatprep.subr.bf16.mxu0 %v17076_v54 }
0x1079   :  { %12224 = vmatpush3.bf16.msra.mxu1 %v17123_v56  ;;  %12248 = vmatpush3.bf16.msra.mxu0 %v15275_v20 }
0x107a   :  { %12273 = vmatprep.subr.bf16.mxu0 %v17076_v54  ;;  %12249 = vmatprep.subr.bf16.mxu1 %v17076_v54 }
0x110f   :  { %v3183_v41 = vpop.f32.mrb[24].mxu0 }
0x1110   :  { %v9728_v14 = vpop.f32.mrb[25].mxu0  ;;  %v3184_v27 = vadd.f32 %v3183_v41, %v15257_v45  ;;  %v17127_v41 = vld [vmem:[#allocation81_spill] sm:$0xff] }
0x112f   :  { %v3253_v13 = vpop.f32.mrb[24].mxu1  ;;  %v3324_v35 = vpop.f32.mrb[26].mxu0 }
0x1130   :  { %v13718_v50 = vadd.f32 %v15247_v53, %v3253_v13  ;;  %v3255_v33 = vpop.f32.mrb[25].mxu1  ;;  %v9763_v51 = vpop.f32.mrb[27].mxu0  ;;  %v3325_v48 = vadd.f32 %v3324_v35, %v15254_v37 }
0x1131   :  { %v13720_v12 = vadd.f32 %v15249_v39, %v3255_v33 }
0x1132   :  { %v8049_v34 = vmul.f32 -1.442695, %v13718_v50 }
0x1133   :  { %v8050_v43 = vmul.f32 -1.442695, %v13720_v12 }
0x1134   :  { %13876 = vpow2.f32 %v8049_v34 }
0x1135   :  { %13878 = vpow2.f32 %v8050_v43 }
0x113e   :  { %v13877_v56 = vpop.eup %13876 }
0x113f   :  { %v3332_v20 = vadd.f32 1.0, %v13877_v56  ;;  %v13879_v40 = vpop.eup %13878 }
0x1140   :  { %v3339_v29 = vadd.f32 1.0, %v13879_v40 }
0x1141   :  { %13880 = vrcp.f32 %v3332_v20  ;;  %v17126_v20 = vld [vmem:[#allocation80_spill] sm:$0xff] }
0x1142   :  { %13882 = vrcp.f32 %v3339_v29 }
0x114b   :  { %v13881_v14 = vpop.eup %13880 }
0x114c   :  { %v3342_v15 = vmul.f32 %v13881_v14, %v3325_v48  ;;  %v13883_v50 = vpop.eup %13882  ;;  %v17124_v48 = vld [vmem:[#allocation78_spill] sm:$0xff] }
0x114d   :  { %v3345_v51 = vsub.f32 1.0, %v13883_v50  ;;  %v3347_v43 = vmul.f32 %v13883_v50, %v15263_v19  ;;  %v17125_v19 = vld [vmem:[#allocation79_spill] sm:$0xff] }
0x114e   :  { %v3343_v13 = vadd.f32 %v3342_v15, %v3184_v27  ;;  %v17128_v27 = vld [vmem:[#allocation76_spill] sm:$0xff] }
0x1150   :  { %13884 = vtanh.f32 %v3343_v13 }
0x115a   :  { %v13885_v33 = vpop.eup %13884 }
0x115b   :  { %v3346_v34 = vmul.f32 %v13885_v33, %v3345_v51 }
0x115d   :  { %v15534_v12 = vadd.f32 %v3347_v43, %v3346_v34 }
0x115f   :  { %9797 = vmatmul.mubr.f32.vlgmr.msra.gmra.mrb[26].mxu1 %v15534_v12 }
0x1160   :  { %12251 = vmatpush3.bf16.msra.mxu1 %v15292_v60  ;;  %9866 = vmatprep.mubr.msk.f32.mxu1 %vm14268_vm0, %v15186_v4 }
0x1161   :  { %12252 = vmatprep.subr.bf16.mxu1 %v17076_v54 }
0x1164   :  { %12254 = vmatpush3.bf16.msra.mxu1 %v15295_v49 }
0x1165   :  { %12255 = vmatprep.subr.bf16.mxu1 %v17076_v54 }
0x1168   :  { %12257 = vmatpush3.bf16.msra.mxu1 %v15299_v23 }
0x1169   :  { %12258 = vmatprep.subr.bf16.mxu1 %v17076_v54 }
0x116c   :  { %12260 = vmatpush3.bf16.msra.mxu1 %v17124_v48 }
0x116d   :  { %12261 = vmatprep.subr.bf16.mxu1 %v17076_v54 }
0x1170   :  { %12263 = vmatpush3.bf16.msra.mxu1 %v17125_v19 }
0x1171   :  { %12264 = vmatprep.subr.bf16.mxu1 %v17076_v54 }
0x1174   :  { %12266 = vmatpush3.bf16.msra.mxu1 %v17126_v20 }
0x1175   :  { %12267 = vmatprep.subr.bf16.mxu1 %v17076_v54 }
0x1178   :  { %12269 = vmatpush3.bf16.msra.mxu1 %v15315_v10 }
0x1179   :  { %12270 = vmatprep.subr.bf16.mxu1 %v17076_v54 }
0x117c   :  { %12272 = vmatpush3.bf16.msra.mxu1 %v17127_v41 }
0x117d   :  { %12297 = vmatprep.subr.bf16.mxu1 %v17076_v54 }
0x1232   :  { %v3415_v15 = vpop.f32.mrb[26].mxu1 }
0x1233   :  { %v3416_v29 = vadd.f32 %v3415_v15, %v17128_v27  ;;  %v9798_v40 = vpop.f32.mrb[27].mxu1  ;;  %v17129_v15 = vld [vmem:[#allocation82_spill] sm:$0xff] }
0x1234   :  { %v17131_v40 = vld [vmem:[#allocation34_spill] sm:$0xff] }
0x1235   :  { %v3419_v35 = vsel %vm2653_vm11, %v3416_v29, -inf }
0x1236   :  { %3420 = vmax.xlane.f32.xlu1 %v3419_v35  ;;  %v17132_v35 = vld [vmem:[#allocation36_spill] sm:$0xff] }
0x12c3   :  { %v3421_v56 = vpop.xlane.xlu1 %3420 }
0x12c4   :  { %v3422_v14 = vsub.f32 %v3416_v29, %v3421_v56  ;;  %v17130_v29 = vld [vmem:[#allocation83_spill] sm:$0xff]  ;;  %v17133_v56 = vld [vmem:[#allocation37_spill] sm:$0xff] }
0x12c6   :  { %v3423_v13 = vmul.f32 1.442695, %v3422_v14  ;;  %v17134_v14 = vld [vmem:[#allocation39_spill] sm:$0xff] }
0x12c8   :  { %13886 = vpow2.f32 %v3423_v13  ;;  %v17135_v13 = vld [vmem:[#allocation40_spill] sm:$0xff] }
0x12d2   :  { %v13887_v50 = vpop.eup %13886 }
0x12d3   :  { %v3425_v51 = vsel %vm2653_vm11, %v13887_v50, 0.0 }
0x12d4   :  { %3426 = vadd.xlane.f32.xlu1 %v3425_v51 }
0x1361   :  { %v3427_v33 = vpop.xlane.xlu1 %3426 }
0x1362   :  { %13888 = vrcp.f32 %v3427_v33 }
0x136c   :  { %v13889_v34 = vpop.eup %13888 }
0x136d   :  { %v3430_v43 = vmul.f32 %v13889_v34, %v13887_v50  ;;  %v17136_v50 = vld [vmem:[#allocation43_spill] sm:$0xff]  ;;  %v17137_v34 = vld [vmem:[#allocation84_spill] sm:$0xff] }
0x136f   :  { %9832 = vmatmul.mubr.f32.vlgmr.msra.gmra.mrb[28].mxu0 %v3430_v43  ;;  %v17138_v43 = vld [vmem:[#allocation85_spill] sm:$0xff] }
0x1370   :  { %12275 = vmatpush3.bf16.msra.mxu0 %v15324_v0  ;;  %9901 = vmatprep.mubr.msk.f32.mxu0 %vm14268_vm0, %v15186_v4 }
0x1371   :  { %12276 = vmatprep.subr.bf16.mxu0 %v17076_v54 }
0x1374   :  { %12278 = vmatpush3.bf16.msra.mxu0 %v15327_v46 }
0x1375   :  { %12279 = vmatprep.subr.bf16.mxu0 %v17076_v54 }
0x1378   :  { %12281 = vmatpush3.bf16.msra.mxu0 %v17129_v15 }
0x1379   :  { %12282 = vmatprep.subr.bf16.mxu0 %v17076_v54 }
0x137c   :  { %12284 = vmatpush3.bf16.msra.mxu0 %v17130_v29 }
0x137d   :  { %12285 = vmatprep.subr.bf16.mxu0 %v17076_v54 }
0x1380   :  { %12287 = vmatpush3.bf16.msra.mxu0 %v15341_v36 }
0x1381   :  { %12288 = vmatprep.subr.bf16.mxu0 %v17076_v54 }
0x1384   :  { %12290 = vmatpush3.bf16.msra.mxu0 %v15345_v26 }
0x1385   :  { %12291 = vmatprep.subr.bf16.mxu0 %v17076_v54 }
0x1388   :  { %12293 = vmatpush3.bf16.msra.mxu0 %v15349_v7 }
0x1389   :  { %12294 = vmatprep.subr.bf16.mxu0 %v17076_v54 }
0x138c   :  { %12296 = vmatpush3.bf16.msra.mxu0 %v15353_v28 }
0x138d   :  { %12322 = vmatprep.subr.bf16.mxu0 %v14969_v8 }
0x138f   :  { %9902 = vmatmul.mubr.f32.vlgmr.msra.gmra.mrb[30].mxu0 %v15534_v12 }
0x1390   :  { %12324 = vmatpush1.bf16.msra.mxu0 %v14985_v31  ;;  %3810 = vmatprep.mubr.f32.mxu0 %v15186_v4 }
0x1391   :  { %12326 = vmatprep.subr.bf16.mxu0 %v14989_v3 }
0x1394   :  { %12328 = vmatpush1.bf16.msra.mxu0 %v14998_v5 }
0x1395   :  { %12330 = vmatprep.subr.bf16.mxu0 %v15004_v18 }
0x1398   :  { %12332 = vmatpush1.bf16.msra.mxu0 %v15011_v9 }
0x1399   :  { %12334 = vmatprep.subr.bf16.mxu0 %v15017_v22 }
0x139c   :  { %12336 = vmatpush1.bf16.msra.mxu0 %v15023_v63 }
0x139d   :  { %12338 = vmatprep.subr.bf16.mxu0 %v15029_v44 }
0x13a0   :  { %12340 = vmatpush1.bf16.msra.mxu0 %v15032_v25 }
0x13a1   :  { %12342 = vmatprep.subr.bf16.mxu0 %v17131_v40 }
0x13a4   :  { %12344 = vmatpush1.bf16.msra.mxu0 %v15042_v55 }
0x13a5   :  { %12346 = vmatprep.subr.bf16.mxu0 %v17132_v35 }
0x13a8   :  { %12348 = vmatpush1.bf16.msra.mxu0 %v17133_v56  ;;  %v17139_v56 = vld [vmem:[#allocation86_spill] sm:$0xff] }
0x13a9   :  { %12350 = vmatprep.subr.bf16.mxu0 %v17134_v14 }
0x13ac   :  { %12352 = vmatpush1.bf16.msra.mxu0 %v17135_v13  ;;  %v17140_v13 = vld [vmem:[#allocation87_spill] sm:$0xff] }
0x13ad   :  { %12378 = vmatprep.subr.bf16.mxu0 %v17136_v50 }
0x1442   :  { %v3497_v51 = vpop.f32.mrb[28].mxu0 }
0x1443   :  { %v9833_v33 = vpop.f32.mrb[29].mxu0  ;;  %9867 = vmatmul.mubr.f32.vlgmr.msra.gmra.mrb[28].mxu1 %v3497_v51 }
0x1444   :  { %12299 = vmatpush3.bf16.msra.mxu1 %v17137_v34  ;;  %9936 = vmatprep.mubr.msk.f32.mxu1 %vm14268_vm0, %v15186_v4  ;;  %v17141_v4 = vld [vmem:[#allocation90_spill] sm:$0xff] }
0x1445   :  { %12300 = vmatprep.subr.bf16.mxu1 %v17076_v54 }
0x1448   :  { %12302 = vmatpush3.bf16.msra.mxu1 %v17138_v43 }
0x1449   :  { %12303 = vmatprep.subr.bf16.mxu1 %v17076_v54 }
0x144c   :  { %12305 = vmatpush3.bf16.msra.mxu1 %v17139_v56 }
0x144d   :  { %12306 = vmatprep.subr.bf16.mxu1 %v17076_v54 }
0x1450   :  { %12308 = vmatpush3.bf16.msra.mxu1 %v17140_v13 }
0x1451   :  { %12309 = vmatprep.subr.bf16.mxu1 %v17076_v54 }
0x1454   :  { %12311 = vmatpush3.bf16.msra.mxu1 %v15394_v47 }
0x1455   :  { %12312 = vmatprep.subr.bf16.mxu1 %v17076_v54 }
0x1458   :  { %12314 = vmatpush3.bf16.msra.mxu1 %v15398_v1  ;;  %v15614_v1 = vld [vmem:[#allocation2 + $0x8] sm:$0xff] }
0x1459   :  { %12315 = vmatprep.subr.bf16.mxu1 %v17076_v54 }
0x145c   :  { %12317 = vmatpush3.bf16.msra.mxu1 %v17141_v4 }
0x145d   :  { %12318 = vmatprep.subr.bf16.mxu1 %v17076_v54 }
0x1460   :  { %12320 = vmatpush3.bf16.msra.mxu1 %v15405_v11  ;;  %v17142_v11 = vld [vmem:[#allocation30_spill] sm:$0xff] }
0x1461   :  { %12353 = vmatprep.subr.bf16.mxu1 %v17076_v54 }
0x1462   :  { %v3637_v51 = vpop.f32.mrb[30].mxu0 }
0x1463   :  { %v9903_v33 = vpop.f32.mrb[31].mxu0 }
0x1516   :  { %v3567_v13 = vpop.f32.mrb[28].mxu1 }
0x1517   :  { %v3638_v56 = vadd.f32 %v3637_v51, %v3567_v13  ;;  %v9868_v43 = vpop.f32.mrb[29].mxu1  ;;  %v17143_v13 = vld [vmem:[#allocation31_spill] sm:$0xff]  ;;  %v17148_v51 = vld [vmem:[#allocation42_spill] sm:$0xff] }
0x1518   :  { %v17147_v43 = vld [vmem:[#allocation38_spill] sm:$0xff] }
0x1519   :  { %v3641_v47 = vadd.f32 %v3638_v56, %v15413_v21  ;;  %v17145_v56 = vld [vmem:[#allocation33_spill] sm:$0xff] }
0x151b   :  { %13890 = vtanh.f32 %v3641_v47  ;;  %v17144_v47 = vld [vmem:[#allocation32_spill] sm:$0xff] }
0x1525   :  { %v13891_v34 = vpop.eup %13890 }
0x1526   :  { %9937 = vmatmul.mubr.f32.vlgmr.msra.gmra.mrb[30].mxu1 %v13891_v34  ;;  %v17146_v34 = vld [vmem:[#allocation35_spill] sm:$0xff] }
0x1527   :  { %12355 = vmatpush3.bf16.msra.mxu1 %v14987_v24  ;;  %9971 = vmatprep.mubr.msk.f32.mxu1 %vm14268_vm0, %v15614_v1 }
0x1528   :  { %12356 = vmatprep.subr.bf16.mxu1 %v17076_v54 }
0x152b   :  { %12358 = vmatpush3.bf16.msra.mxu1 %v17142_v11 }
0x152c   :  { %12359 = vmatprep.subr.bf16.mxu1 %v17076_v54 }
0x152f   :  { %12361 = vmatpush3.bf16.msra.mxu1 %v17143_v13 }
0x1530   :  { %12362 = vmatprep.subr.bf16.mxu1 %v17076_v54 }
0x1533   :  { %12364 = vmatpush3.bf16.msra.mxu1 %v17144_v47  ;;  %v17149_v47 = vld [vmem:[#allocation93_spill] sm:$0xff] }
0x1534   :  { %12365 = vmatprep.subr.bf16.mxu1 %v17076_v54 }
0x1537   :  { %12367 = vmatpush3.bf16.msra.mxu1 %v17145_v56 }
0x1538   :  { %12368 = vmatprep.subr.bf16.mxu1 %v17076_v54 }
0x153b   :  { %12370 = vmatpush3.bf16.msra.mxu1 %v17146_v34 }
0x153c   :  { %12371 = vmatprep.subr.bf16.mxu1 %v17076_v54 }
0x153f   :  { %12373 = vmatpush3.bf16.msra.mxu1 %v17147_v43 }
0x1540   :  { %12374 = vmatprep.subr.bf16.mxu1 %v17076_v54 }
0x1543   :  { %12376 = vmatpush3.bf16.msra.mxu1 %v17148_v51 }
0x1544   :  { %12409 = vmatprep.subr.bf16.mxu1 %v17076_v54 }
0x15f9   :  { %v3709_v33 = vpop.f32.mrb[30].mxu1 }
0x15fa   :  { %v15634_v13 = vadd.f32 %v3709_v33, %v17149_v47  ;;  %v9938_v11 = vpop.f32.mrb[31].mxu1 }
0x15fc   :  { %17150 = vst [vmem:[#allocation78_spill] sm:$0xff] %v15634_v13  ;;  %v3713_v56 = vsel %vm2653_vm11, %v15634_v13, -inf }
0x15fd   :  { %3714 = vmax.xlane.f32.xlu1 %v3713_v56 }
0x168a   :  { %v15638_v34 = vpop.xlane.xlu1 %3714 }
0x168b   :  { %17151 = vst [vmem:[#allocation79_spill] sm:$0xff] %v15638_v34  ;;  %vm3716_vm15 = vcmp.eq.f32.partialorder %v15634_v13, %v15638_v34  ;;  %v17165_v34 = vld [vmem:[#allocation67_spill] sm:$0xff] }
0x168c   :  { %v3717_v43 = vsel %vm3716_vm15, %v15065_v62, 128 }
0x168d   :  { %v3718_v51 = vsel %vm2653_vm11, %v3717_v43, 2147483647  ;;  %v3041_v43 = vsel %vm3040_vm2, %v15450_v6, 0  ;;  %v17152_v6 = vld [vmem:[#allocation55_spill] sm:$0xff] }
0x168e   :  { %v3720_v24 = vshra.s32 %v3718_v51, 16  ;;  %v3719_v4 = vand.u32 65535, %v3718_v51  ;;  %v17160_v51 = vld [vmem:[#allocation63_spill] sm:$0xff] }
0x1690   :  { %v3722_v21 = vcvt.s32.f32 %v3720_v24  ;;  %v3721_v47 = vcvt.s32.f32 %v3719_v4  ;;  %v17157_v4 = vld [vmem:[#allocation60_spill] sm:$0xff] }
0x1692   :  { %3723 = vmin.xlane.f32.xlu1 %v3722_v21 }
0x171f   :  { %v3724_v33 = vpop.xlane.xlu1 %3723 }
0x1720   :  { %vm3725_vm1 = vcmp.eq.f32.partialorder %v3722_v21, %v3724_v33  ;;  %v3730_v50 = vcvt.f32.s32 %v3724_v33  ;;  %v17153_v21 = vld [vmem:[#allocation56_spill] sm:$0xff] }
0x1721   :  { %v3726_v11 = vsel %vm3725_vm1, %v3721_v47, inf  ;;  %v17159_v47 = vld [vmem:[#allocation62_spill] sm:$0xff]  ;;  %v17161_v33 = vld [vmem:[#allocation64_spill] sm:$0xff]  ;;  %vm5843_vm1 = vcmp.eq.s32.totalorder %v15065_v62, 4 }
0x1722   :  { %3727 = vmin.xlane.f32.xlu1 %v3726_v11  ;;  %v3731_v14 = vshll.u32 %v3730_v50, 16  ;;  %v17156_v50 = vld [vmem:[#allocation59_spill] sm:$0xff]  ;;  %v17162_v11 = vld [vmem:[#allocation65_spill] sm:$0xff] }
0x17af   :  { %v3728_v56 = vpop.xlane.xlu1 %3727 }
0x17b0   :  { %v3729_v35 = vcvt.f32.s32 %v3728_v56  ;;  %v17163_v56 = vld [vmem:[#allocation66_spill] sm:$0xff] }
0x17b2   :  { %v3732_v13 = vadd.s32 %v3731_v14, %v3729_v35  ;;  %v17154_v35 = vld [vmem:[#allocation57_spill] sm:$0xff]  ;;  %v17155_v14 = vld [vmem:[#allocation58_spill] sm:$0xff] }
0x17b4   :  { %v15650_v24 = vsel %vm2133_vm8, %v3732_v13, %v3041_v43  ;;  %vm3743_vm3 = vcmp.eq.s32.totalorder %v15065_v62, %v3732_v13  ;;  %v17158_v13 = vld [vmem:[#allocation61_spill] sm:$0xff]  ;;  %v17164_v43 = vld [vmem:[#allocation68_spill] sm:$0xff] }
0x17b5   :  { %8052 = vmatmul.mubr.msk.f32.vlgmr.msra.gmra.mrb[32].mxu0 %vm3743_vm3, %v17105_v52  ;;  %9972 = vmatmul.mubr.msk.f32.vlgmr.msra.gmra.mrb[32].mxu1 %vm3743_vm3, %v17105_v52 }
0x17b6   :  { %12380 = vmatpush1.bf16.msra.mxu0 %v15075_v58  ;;  %12411 = vmatpush3.bf16.msra.mxu1 %v15079_v61 }
0x17b7   :  { %12382 = vmatprep.subr.bf16.mxu0 %v15089_v32  ;;  %12412 = vmatprep.subr.bf16.mxu1 %v17076_v54 }
0x17b8   :  { %3951 = vmatprep.mubr.f32.mxu0 %v15614_v1  ;;  %10006 = vmatprep.mubr.msk.f32.mxu1 %vm14268_vm0, %v15614_v1 }
0x17ba   :  { %12384 = vmatpush1.bf16.msra.mxu0 %v15092_v59  ;;  %12414 = vmatpush3.bf16.msra.mxu1 %v15096_v2 }
0x17bb   :  { %12386 = vmatprep.subr.bf16.mxu0 %v15102_v30  ;;  %12415 = vmatprep.subr.bf16.mxu1 %v17076_v54 }
0x17be   :  { %12388 = vmatpush1.bf16.msra.mxu0 %v15105_v57  ;;  %12417 = vmatpush3.bf16.msra.mxu1 %v15108_v38 }
0x17bf   :  { %12390 = vmatprep.subr.bf16.mxu0 %v15112_v42  ;;  %12418 = vmatprep.subr.bf16.mxu1 %v17076_v54 }
0x17c2   :  { %12392 = vmatpush1.bf16.msra.mxu0 %v15115_v17  ;;  %12420 = vmatpush3.bf16.msra.mxu1 %v15118_v16 }
0x17c3   :  { %12394 = vmatprep.subr.bf16.mxu0 %v17152_v6  ;;  %12421 = vmatprep.subr.bf16.mxu1 %v17076_v54 }
0x17c6   :  { %12396 = vmatpush1.bf16.msra.mxu0 %v17153_v21  ;;  %12423 = vmatpush3.bf16.msra.mxu1 %v17154_v35 }
0x17c7   :  { %12398 = vmatprep.subr.bf16.mxu0 %v17155_v14  ;;  %12424 = vmatprep.subr.bf16.mxu1 %v17076_v54 }
0x17ca   :  { %12400 = vmatpush1.bf16.msra.mxu0 %v17156_v50  ;;  %12426 = vmatpush3.bf16.msra.mxu1 %v17157_v4 }
0x17cb   :  { %12402 = vmatprep.subr.bf16.mxu0 %v17158_v13  ;;  %12427 = vmatprep.subr.bf16.mxu1 %v17076_v54 }
0x17ce   :  { %12404 = vmatpush1.bf16.msra.mxu0 %v17159_v47  ;;  %12429 = vmatpush3.bf16.msra.mxu1 %v17160_v51 }
0x17cf   :  { %12406 = vmatprep.subr.bf16.mxu0 %v17161_v33  ;;  %12430 = vmatprep.subr.bf16.mxu1 %v17076_v54 }
0x17d2   :  { %12408 = vmatpush1.bf16.msra.mxu0 %v17162_v11  ;;  %12432 = vmatpush3.bf16.msra.mxu1 %v17163_v56  ;;  %v17166_v56 = vld [vmem:[#allocation69_spill] sm:$0xff] }
0x17d3   :  { %12433 = vmatprep.subr.bf16.mxu0 %v17076_v54  ;;  %12457 = vmatprep.subr.bf16.mxu1 %v17076_v54  ;;  %v17167_v11 = vld [vmem:[#allocation77_spill] sm:$0xff] }
0x17d5   :  { %3952 = vmatmul.mubr.f32.vlgmr.msra.gmra.mrb[32].mxu0 %v15534_v12  ;;  %10007 = vmatmul.mubr.f32.vlgmr.msra.gmra.mrb[34].mxu1 %v15534_v12 }
0x17d6   :  { %12435 = vmatpush3.bf16.msra.mxu0 %v17164_v43  ;;  %12459 = vmatpush3.bf16.msra.mxu1 %v17165_v34  ;;  %v17168_v43 = vld [vmem:[#allocation70_spill] sm:$0xff]  ;;  %v17169_v34 = vld [vmem:[#allocation71_spill] sm:$0xff] }
0x17d7   :  { %12436 = vmatprep.subr.bf16.mxu0 %v17076_v54  ;;  %10041 = vmatprep.mubr.msk.f32.mxu0 %vm14268_vm0, %v15614_v1 }
0x17d8   :  { %12460 = vmatprep.subr.bf16.mxu1 %v17076_v54  ;;  %10076 = vmatprep.mubr.msk.f32.mxu1 %vm14268_vm0, %v15614_v1 }
0x17da   :  { %12438 = vmatpush3.bf16.msra.mxu0 %v17166_v56  ;;  %12462 = vmatpush3.bf16.msra.mxu1 %v17167_v11  ;;  %v17170_v56 = vld [vmem:[#allocation72_spill] sm:$0xff] }
0x17db   :  { %12439 = vmatprep.subr.bf16.mxu0 %v17076_v54  ;;  %12463 = vmatprep.subr.bf16.mxu1 %v17076_v54 }
0x17de   :  { %12441 = vmatpush3.bf16.msra.mxu0 %v17168_v43  ;;  %12465 = vmatpush3.bf16.msra.mxu1 %v17167_v11  ;;  %v17171_v43 = vld [vmem:[#allocation73_spill] sm:$0xff] }
0x17df   :  { %12442 = vmatprep.subr.bf16.mxu0 %v17076_v54  ;;  %12466 = vmatprep.subr.bf16.mxu1 %v17076_v54 }
0x17e2   :  { %12444 = vmatpush3.bf16.msra.mxu0 %v17169_v34  ;;  %12468 = vmatpush3.bf16.msra.mxu1 %v17167_v11  ;;  %v17172_v34 = vld [vmem:[#allocation74_spill] sm:$0xff] }
0x17e3   :  { %12445 = vmatprep.subr.bf16.mxu0 %v17076_v54  ;;  %12469 = vmatprep.subr.bf16.mxu1 %v17076_v54 }
0x17e6   :  { %12447 = vmatpush3.bf16.msra.mxu0 %v17170_v56  ;;  %12471 = vmatpush3.bf16.msra.mxu1 %v17167_v11  ;;  %v17173_v56 = vld [vmem:[#allocation75_spill] sm:$0xff] }
0x17e7   :  { %12448 = vmatprep.subr.bf16.mxu0 %v17076_v54  ;;  %12472 = vmatprep.subr.bf16.mxu1 %v17076_v54 }
0x17ea   :  { %12450 = vmatpush3.bf16.msra.mxu0 %v17171_v43  ;;  %12474 = vmatpush3.bf16.msra.mxu1 %v17167_v11 }
0x17eb   :  { %12451 = vmatprep.subr.bf16.mxu0 %v17076_v54  ;;  %12475 = vmatprep.subr.bf16.mxu1 %v17076_v54 }
0x17ee   :  { %12453 = vmatpush3.bf16.msra.mxu0 %v17172_v34  ;;  %12477 = vmatpush3.bf16.msra.mxu1 %v17167_v11 }
0x17ef   :  { %12454 = vmatprep.subr.bf16.mxu0 %v17076_v54  ;;  %12478 = vmatprep.subr.bf16.mxu1 %v17076_v54 }
0x17f2   :  { %12456 = vmatpush3.bf16.msra.mxu0 %v17173_v56  ;;  %12480 = vmatpush3.bf16.msra.mxu1 %v17167_v11 }
0x17f3   :  { %12505 = vmatprep.subr.bf16.mxu1 %v17076_v54  ;;  %12481 = vmatprep.subr.bf16.mxu0 %v17076_v54 }
0x1888   :  { %v3883_v43 = vpop.f32.mrb[32].mxu1 }
0x1889   :  { %v9973_v33 = vpop.f32.mrb[33].mxu1  ;;  %v3884_v17 = vadd.f32 %v3883_v43, %v15257_v45 }
0x18a8   :  { %v3953_v51 = vpop.f32.mrb[32].mxu0  ;;  %v4024_v47 = vpop.f32.mrb[34].mxu1 }
0x18a9   :  { %v13722_v34 = vadd.f32 %v15247_v53, %v3953_v51  ;;  %v3955_v13 = vpop.f32.mrb[33].mxu0  ;;  %v10008_v4 = vpop.f32.mrb[35].mxu1  ;;  %v4025_v16 = vadd.f32 %v4024_v47, %v15254_v37 }
0x18aa   :  { %v13724_v14 = vadd.f32 %v15249_v39, %v3955_v13 }
0x18ab   :  { %v8054_v50 = vmul.f32 -1.442695, %v13722_v34 }
0x18ac   :  { %v8055_v35 = vmul.f32 -1.442695, %v13724_v14 }
0x18ad   :  { %13892 = vpow2.f32 %v8054_v50 }
0x18ae   :  { %13894 = vpow2.f32 %v8055_v35 }
0x18b7   :  { %v13893_v56 = vpop.eup %13892 }
0x18b8   :  { %v4032_v11 = vadd.f32 1.0, %v13893_v56  ;;  %v13895_v21 = vpop.eup %13894 }
0x18b9   :  { %v4039_v6 = vadd.f32 1.0, %v13895_v21 }
0x18ba   :  { %13896 = vrcp.f32 %v4032_v11 }
0x18bb   :  { %13898 = vrcp.f32 %v4039_v6 }
0x18c4   :  { %v13897_v33 = vpop.eup %13896 }
0x18c5   :  { %v4042_v42 = vmul.f32 %v13897_v33, %v4025_v16  ;;  %v13899_v34 = vpop.eup %13898 }
0x18c6   :  { %v4045_v4 = vsub.f32 1.0, %v13899_v34  ;;  %v4047_v35 = vmul.f32 %v13899_v34, %v15534_v12  ;;  %v17174_v34 = vld [vmem:[#allocation36_spill] sm:$0xff] }
0x18c7   :  { %v4043_v51 = vadd.f32 %v4042_v42, %v3884_v17 }
0x18c9   :  { %13900 = vtanh.f32 %v4043_v51 }
0x18d3   :  { %v13901_v13 = vpop.eup %13900 }
0x18d4   :  { %v4046_v50 = vmul.f32 %v13901_v13, %v4045_v4  ;;  %v17175_v4 = vld [vmem:[#allocation37_spill] sm:$0xff]  ;;  %v17176_v13 = vld [vmem:[#allocation39_spill] sm:$0xff] }
0x18d6   :  { %v15733_v14 = vadd.f32 %v4047_v35, %v4046_v50  ;;  %v17177_v50 = vld [vmem:[#allocation40_spill] sm:$0xff]  ;;  %v17178_v35 = vld [vmem:[#allocation43_spill] sm:$0xff] }
0x18d8   :  { %10042 = vmatmul.mubr.f32.vlgmr.msra.gmra.mrb[34].mxu0 %v15733_v14 }
0x18d9   :  { %12483 = vmatpush3.bf16.msra.mxu0 %v15292_v60  ;;  %10111 = vmatprep.mubr.msk.f32.mxu0 %vm14268_vm0, %v15614_v1 }
0x18da   :  { %12484 = vmatprep.subr.bf16.mxu0 %v17076_v54 }
0x18dd   :  { %12486 = vmatpush3.bf16.msra.mxu0 %v15295_v49 }
0x18de   :  { %12487 = vmatprep.subr.bf16.mxu0 %v17076_v54 }
0x18e1   :  { %12489 = vmatpush3.bf16.msra.mxu0 %v15299_v23 }
0x18e2   :  { %12490 = vmatprep.subr.bf16.mxu0 %v17076_v54 }
0x18e5   :  { %12492 = vmatpush3.bf16.msra.mxu0 %v17124_v48 }
0x18e6   :  { %12493 = vmatprep.subr.bf16.mxu0 %v17076_v54 }
0x18e9   :  { %12495 = vmatpush3.bf16.msra.mxu0 %v17125_v19 }
0x18ea   :  { %12496 = vmatprep.subr.bf16.mxu0 %v17076_v54 }
0x18ed   :  { %12498 = vmatpush3.bf16.msra.mxu0 %v17126_v20 }
0x18ee   :  { %12499 = vmatprep.subr.bf16.mxu0 %v17076_v54 }
0x18f1   :  { %12501 = vmatpush3.bf16.msra.mxu0 %v15315_v10 }
0x18f2   :  { %12502 = vmatprep.subr.bf16.mxu0 %v17076_v54 }
0x18f5   :  { %12504 = vmatpush3.bf16.msra.mxu0 %v17127_v41 }
0x18f6   :  { %12529 = vmatprep.subr.bf16.mxu0 %v17076_v54 }
0x19ab   :  { %v4115_v42 = vpop.f32.mrb[34].mxu0 }
0x19ac   :  { %v4116_v17 = vadd.f32 %v4115_v42, %v17128_v27  ;;  %v10043_v16 = vpop.f32.mrb[35].mxu0 }
0x19ad   :  { %v17179_v16 = vld [vmem:[#allocation84_spill] sm:$0xff] }
0x19ae   :  { %v4119_v12 = vsel %vm2653_vm11, %v4116_v17, -inf }
0x19af   :  { %4120 = vmax.xlane.f32.xlu1 %v4119_v12  ;;  %v17180_v12 = vld [vmem:[#allocation85_spill] sm:$0xff] }
0x1a3c   :  { %v4121_v6 = vpop.xlane.xlu1 %4120 }
0x1a3d   :  { %v4122_v21 = vsub.f32 %v4116_v17, %v4121_v6  ;;  %v17181_v6 = vld [vmem:[#allocation86_spill] sm:$0xff] }
0x1a3f   :  { %v4123_v47 = vmul.f32 1.442695, %v4122_v21  ;;  %v17182_v21 = vld [vmem:[#allocation87_spill] sm:$0xff] }
0x1a41   :  { %13902 = vpow2.f32 %v4123_v47  ;;  %v17183_v47 = vld [vmem:[#allocation88_spill] sm:$0xff] }
0x1a4b   :  { %v13903_v11 = vpop.eup %13902 }
0x1a4c   :  { %v4125_v56 = vsel %vm2653_vm11, %v13903_v11, 0.0 }
0x1a4d   :  { %4126 = vadd.xlane.f32.xlu1 %v4125_v56  ;;  %v17185_v56 = vld [vmem:[#allocation90_spill] sm:$0xff] }
0x1ada   :  { %v4127_v43 = vpop.xlane.xlu1 %4126 }
0x1adb   :  { %13904 = vrcp.f32 %v4127_v43  ;;  %v17186_v43 = vld [vmem:[#allocation91_spill] sm:$0xff] }
0x1ae5   :  { %v13905_v33 = vpop.eup %13904 }
0x1ae6   :  { %v4130_v51 = vmul.f32 %v13905_v33, %v13903_v11  ;;  %v17184_v11 = vld [vmem:[#allocation89_spill] sm:$0xff] }
0x1ae8   :  { %10077 = vmatmul.mubr.f32.vlgmr.msra.gmra.mrb[36].mxu1 %v4130_v51 }
0x1ae9   :  { %12507 = vmatpush3.bf16.msra.mxu1 %v15324_v0  ;;  %10146 = vmatprep.mubr.msk.f32.mxu1 %vm14268_vm0, %v15614_v1 }
0x1aea   :  { %12508 = vmatprep.subr.bf16.mxu1 %v17076_v54 }
0x1aed   :  { %12510 = vmatpush3.bf16.msra.mxu1 %v15327_v46 }
0x1aee   :  { %12511 = vmatprep.subr.bf16.mxu1 %v17076_v54 }
0x1af1   :  { %12513 = vmatpush3.bf16.msra.mxu1 %v17129_v15 }
0x1af2   :  { %12514 = vmatprep.subr.bf16.mxu1 %v17076_v54 }
0x1af5   :  { %12516 = vmatpush3.bf16.msra.mxu1 %v17130_v29 }
0x1af6   :  { %12517 = vmatprep.subr.bf16.mxu1 %v17076_v54 }
0x1af9   :  { %12519 = vmatpush3.bf16.msra.mxu1 %v15341_v36 }
0x1afa   :  { %12520 = vmatprep.subr.bf16.mxu1 %v17076_v54 }
0x1afd   :  { %12522 = vmatpush3.bf16.msra.mxu1 %v15345_v26 }
0x1afe   :  { %12523 = vmatprep.subr.bf16.mxu1 %v17076_v54 }
0x1b01   :  { %12525 = vmatpush3.bf16.msra.mxu1 %v15349_v7 }
0x1b02   :  { %12526 = vmatprep.subr.bf16.mxu1 %v17076_v54 }
0x1b05   :  { %12528 = vmatpush3.bf16.msra.mxu1 %v15353_v28 }
0x1b06   :  { %12554 = vmatprep.subr.bf16.mxu1 %v14969_v8 }
0x1b08   :  { %10147 = vmatmul.mubr.f32.vlgmr.msra.gmra.mrb[38].mxu1 %v15733_v14 }
0x1b09   :  { %12556 = vmatpush1.bf16.msra.mxu1 %v14985_v31  ;;  %4511 = vmatprep.mubr.f32.mxu1 %v15614_v1 }
0x1b0a   :  { %12558 = vmatprep.subr.bf16.mxu1 %v14989_v3 }
0x1b0d   :  { %12560 = vmatpush1.bf16.msra.mxu1 %v14998_v5 }
0x1b0e   :  { %12562 = vmatprep.subr.bf16.mxu1 %v15004_v18 }
0x1b11   :  { %12564 = vmatpush1.bf16.msra.mxu1 %v15011_v9 }
0x1b12   :  { %12566 = vmatprep.subr.bf16.mxu1 %v15017_v22 }
0x1b15   :  { %12568 = vmatpush1.bf16.msra.mxu1 %v15023_v63 }
0x1b16   :  { %12570 = vmatprep.subr.bf16.mxu1 %v15029_v44 }
0x1b19   :  { %12572 = vmatpush1.bf16.msra.mxu1 %v15032_v25 }
0x1b1a   :  { %12574 = vmatprep.subr.bf16.mxu1 %v17131_v40 }
0x1b1d   :  { %12576 = vmatpush1.bf16.msra.mxu1 %v15042_v55 }
0x1b1e   :  { %12578 = vmatprep.subr.bf16.mxu1 %v17174_v34 }
0x1b21   :  { %12580 = vmatpush1.bf16.msra.mxu1 %v17175_v4 }
0x1b22   :  { %12582 = vmatprep.subr.bf16.mxu1 %v17176_v13 }
0x1b25   :  { %12584 = vmatpush1.bf16.msra.mxu1 %v17177_v50 }
0x1b26   :  { %12610 = vmatprep.subr.bf16.mxu1 %v17178_v35 }
0x1bbb   :  { %v4197_v42 = vpop.f32.mrb[36].mxu1 }
0x1bbc   :  { %v10078_v17 = vpop.f32.mrb[37].mxu1  ;;  %10112 = vmatmul.mubr.f32.vlgmr.msra.gmra.mrb[36].mxu0 %v4197_v42 }
0x1bbd   :  { %12531 = vmatpush3.bf16.msra.mxu0 %v17179_v16  ;;  %10181 = vmatprep.mubr.msk.f32.mxu0 %vm14268_vm0, %v15614_v1 }
0x1bbe   :  { %12532 = vmatprep.subr.bf16.mxu0 %v17076_v54 }
0x1bc1   :  { %12534 = vmatpush3.bf16.msra.mxu0 %v17180_v12 }
0x1bc2   :  { %12535 = vmatprep.subr.bf16.mxu0 %v17076_v54 }
0x1bc5   :  { %12537 = vmatpush3.bf16.msra.mxu0 %v17181_v6 }
0x1bc6   :  { %12538 = vmatprep.subr.bf16.mxu0 %v17076_v54 }
0x1bc9   :  { %12540 = vmatpush3.bf16.msra.mxu0 %v17182_v21 }
0x1bca   :  { %12541 = vmatprep.subr.bf16.mxu0 %v17076_v54 }
0x1bcd   :  { %12543 = vmatpush3.bf16.msra.mxu0 %v17183_v47  ;;  %v17187_v47 = vld [vmem:[#allocation92_spill] sm:$0xff] }
0x1bce   :  { %12544 = vmatprep.subr.bf16.mxu0 %v17076_v54 }
0x1bd1   :  { %12546 = vmatpush3.bf16.msra.mxu0 %v17184_v11  ;;  %v17188_v11 = vld [vmem:[#allocation29_spill] sm:$0xff] }
0x1bd2   :  { %12547 = vmatprep.subr.bf16.mxu0 %v17076_v54 }
0x1bd5   :  { %12549 = vmatpush3.bf16.msra.mxu0 %v17185_v56 }
0x1bd6   :  { %12550 = vmatprep.subr.bf16.mxu0 %v17076_v54 }
0x1bd9   :  { %12552 = vmatpush3.bf16.msra.mxu0 %v17186_v43  ;;  %v17189_v43 = vld [vmem:[#allocation30_spill] sm:$0xff] }
0x1bda   :  { %12585 = vmatprep.subr.bf16.mxu0 %v17076_v54 }
0x1bdb   :  { %v4337_v33 = vpop.f32.mrb[38].mxu1 }
0x1bdc   :  { %v10148_v51 = vpop.f32.mrb[39].mxu1 }
0x1bdd   :  { %v17190_v51 = vld [vmem:[#allocation31_spill] sm:$0xff] }
0x1c8f   :  { %v4267_v42 = vpop.f32.mrb[36].mxu0 }
0x1c90   :  { %v4338_v17 = vadd.f32 %v4337_v33, %v4267_v42  ;;  %v10113_v21 = vpop.f32.mrb[37].mxu0  ;;  %v17195_v33 = vld [vmem:[#allocation42_spill] sm:$0xff] }
0x1c91   :  { %v17191_v21 = vld [vmem:[#allocation32_spill] sm:$0xff] }
0x1c92   :  { %v4341_v6 = vadd.f32 %v4338_v17, %v17187_v47  ;;  %v17194_v47 = vld [vmem:[#allocation38_spill] sm:$0xff]  ;;  %v17196_v17 = vld [vmem:[#allocation93_spill] sm:$0xff] }
0x1c94   :  { %13906 = vtanh.f32 %v4341_v6  ;;  %v17193_v6 = vld [vmem:[#allocation35_spill] sm:$0xff] }
0x1c9e   :  { %v13907_v12 = vpop.eup %13906 }
0x1c9f   :  { %10182 = vmatmul.mubr.f32.vlgmr.msra.gmra.mrb[38].mxu0 %v13907_v12  ;;  %v17192_v12 = vld [vmem:[#allocation33_spill] sm:$0xff] }
0x1ca0   :  { %12587 = vmatpush3.bf16.msra.mxu0 %v17188_v11  ;;  %10216 = vmatprep.mubr.msk.f32.mxu0 %vm14268_vm0, %v15614_v1 }
0x1ca1   :  { %12588 = vmatprep.subr.bf16.mxu0 %v17076_v54 }
0x1ca4   :  { %12590 = vmatpush3.bf16.msra.mxu0 %v17189_v43 }
0x1ca5   :  { %12591 = vmatprep.subr.bf16.mxu0 %v17076_v54 }
0x1ca8   :  { %12593 = vmatpush3.bf16.msra.mxu0 %v17190_v51 }
0x1ca9   :  { %12594 = vmatprep.subr.bf16.mxu0 %v17076_v54 }
0x1cac   :  { %12596 = vmatpush3.bf16.msra.mxu0 %v17191_v21 }
0x1cad   :  { %12597 = vmatprep.subr.bf16.mxu0 %v17076_v54 }
0x1cb0   :  { %12599 = vmatpush3.bf16.msra.mxu0 %v17192_v12 }
0x1cb1   :  { %12600 = vmatprep.subr.bf16.mxu0 %v17076_v54 }
0x1cb4   :  { %12602 = vmatpush3.bf16.msra.mxu0 %v17193_v6 }
0x1cb5   :  { %12603 = vmatprep.subr.bf16.mxu0 %v17076_v54 }
0x1cb8   :  { %12605 = vmatpush3.bf16.msra.mxu0 %v17194_v47 }
0x1cb9   :  { %12606 = vmatprep.subr.bf16.mxu0 %v17076_v54 }
0x1cbc   :  { %12608 = vmatpush3.bf16.msra.mxu0 %v17195_v33 }
0x1cbd   :  { %12641 = vmatprep.subr.bf16.mxu0 %v17076_v54 }
0x1d72   :  { %v4409_v42 = vpop.f32.mrb[38].mxu0 }
0x1d73   :  { %v15831_v21 = vadd.f32 %v4409_v42, %v17196_v17  ;;  %v10183_v51 = vpop.f32.mrb[39].mxu0 }
0x1d75   :  { %17197 = vst [vmem:[#allocation80_spill] sm:$0xff] %v15831_v21  ;;  %v4413_v12 = vsel %vm2653_vm11, %v15831_v21, -inf }
0x1d76   :  { %4414 = vmax.xlane.f32.xlu1 %v4413_v12 }
0x1e03   :  { %v15835_v6 = vpop.xlane.xlu1 %4414 }
0x1e04   :  { %17198 = vst [vmem:[#allocation81_spill] sm:$0xff] %v15835_v6  ;;  %vm4416_vm4 = vcmp.eq.f32.partialorder %v15831_v21, %v15835_v6  ;;  %v17212_v6 = vld [vmem:[#allocation65_spill] sm:$0xff] }
0x1e05   :  { %v4417_v47 = vsel %vm4416_vm4, %v15065_v62, 128 }
0x1e06   :  { %v4418_v33 = vsel %vm2653_vm11, %v4417_v47, 2147483647 }
0x1e07   :  { %v4420_v43 = vshra.s32 %v4418_v33, 16  ;;  %v4419_v56 = vand.u32 65535, %v4418_v33  ;;  %v17207_v33 = vld [vmem:[#allocation60_spill] sm:$0xff] }
0x1e09   :  { %v4422_v11 = vcvt.s32.f32 %v4420_v43  ;;  %v4421_v17 = vcvt.s32.f32 %v4419_v56  ;;  %v17204_v56 = vld [vmem:[#allocation57_spill] sm:$0xff]  ;;  %v17205_v43 = vld [vmem:[#allocation58_spill] sm:$0xff] }
0x1e0b   :  { %4423 = vmin.xlane.f32.xlu1 %v4422_v11 }
0x1e98   :  { %v4424_v42 = vpop.xlane.xlu1 %4423 }
0x1e99   :  { %vm4425_vm5 = vcmp.eq.f32.partialorder %v4422_v11, %v4424_v42  ;;  %v4430_v16 = vcvt.f32.s32 %v4424_v42  ;;  %v17203_v11 = vld [vmem:[#allocation56_spill] sm:$0xff]  ;;  %v17208_v42 = vld [vmem:[#allocation61_spill] sm:$0xff] }
0x1e9a   :  { %v4426_v51 = vsel %vm4425_vm5, %v4421_v17, inf  ;;  %v17209_v17 = vld [vmem:[#allocation62_spill] sm:$0xff] }
0x1e9b   :  { %4427 = vmin.xlane.f32.xlu1 %v4426_v51  ;;  %v4431_v35 = vshll.u32 %v4430_v16, 16  ;;  %v17202_v16 = vld [vmem:[#allocation55_spill] sm:$0xff] }
0x1e9c   :  { %v17210_v51 = vld [vmem:[#allocation63_spill] sm:$0xff] }
0x1f28   :  { %v4428_v12 = vpop.xlane.xlu1 %4427 }
0x1f29   :  { %v4429_v50 = vcvt.f32.s32 %v4428_v12  ;;  %v17211_v12 = vld [vmem:[#allocation64_spill] sm:$0xff] }
0x1f2b   :  { %v4432_v21 = vadd.s32 %v4431_v35, %v4429_v50  ;;  %v17200_v50 = vld [vmem:[#allocation53_spill] sm:$0xff]  ;;  %v17201_v35 = vld [vmem:[#allocation54_spill] sm:$0xff] }
0x1f2d   :  { %v15845_v47 = vsel %vm4441_vm6, %v4432_v21, %v15650_v24  ;;  %vm4444_vm7 = vcmp.eq.s32.totalorder %v15065_v62, %v4432_v21  ;;  %v17199_v24 = vld [vmem:[#allocation52_spill] sm:$0xff]  ;;  %v17206_v21 = vld [vmem:[#allocation59_spill] sm:$0xff] }
0x1f2e   :  { %8057 = vmatmul.mubr.msk.f32.vlgmr.msra.gmra.mrb[40].mxu1 %vm4444_vm7, %v17105_v52  ;;  %10217 = vmatmul.mubr.msk.f32.vlgmr.msra.gmra.mrb[40].mxu0 %vm4444_vm7, %v17105_v52  ;;  %vm6544_vm7 = vcmp.eq.s32.totalorder %v15065_v62, 5 }
0x1f2f   :  { %12612 = vmatpush1.bf16.msra.mxu1 %v15075_v58  ;;  %12643 = vmatpush3.bf16.msra.mxu0 %v15079_v61 }
0x1f30   :  { %12614 = vmatprep.subr.bf16.mxu1 %v15089_v32  ;;  %12644 = vmatprep.subr.bf16.mxu0 %v17076_v54 }
0x1f31   :  { %4652 = vmatprep.mubr.f32.mxu1 %v15614_v1  ;;  %10251 = vmatprep.mubr.msk.f32.mxu0 %vm14268_vm0, %v15614_v1 }
0x1f33   :  { %12616 = vmatpush1.bf16.msra.mxu1 %v15092_v59  ;;  %12646 = vmatpush3.bf16.msra.mxu0 %v15096_v2 }
0x1f34   :  { %12618 = vmatprep.subr.bf16.mxu1 %v15102_v30  ;;  %12647 = vmatprep.subr.bf16.mxu0 %v17076_v54 }
0x1f37   :  { %12620 = vmatpush1.bf16.msra.mxu1 %v15105_v57  ;;  %12649 = vmatpush3.bf16.msra.mxu0 %v15108_v38 }
0x1f38   :  { %12622 = vmatprep.subr.bf16.mxu1 %v17199_v24  ;;  %12650 = vmatprep.subr.bf16.mxu0 %v17076_v54 }
0x1f3b   :  { %12624 = vmatpush1.bf16.msra.mxu1 %v17200_v50  ;;  %12652 = vmatpush3.bf16.msra.mxu0 %v17201_v35 }
0x1f3c   :  { %12626 = vmatprep.subr.bf16.mxu1 %v17202_v16  ;;  %12653 = vmatprep.subr.bf16.mxu0 %v17076_v54 }
0x1f3f   :  { %12628 = vmatpush1.bf16.msra.mxu1 %v17203_v11  ;;  %12655 = vmatpush3.bf16.msra.mxu0 %v17204_v56 }
0x1f40   :  { %12630 = vmatprep.subr.bf16.mxu1 %v17205_v43  ;;  %12656 = vmatprep.subr.bf16.mxu0 %v17076_v54  ;;  %v17213_v43 = vld [vmem:[#allocation66_spill] sm:$0xff] }
0x1f43   :  { %12632 = vmatpush1.bf16.msra.mxu1 %v17206_v21  ;;  %12658 = vmatpush3.bf16.msra.mxu0 %v17207_v33 }
0x1f44   :  { %12634 = vmatprep.subr.bf16.mxu1 %v17208_v42  ;;  %12659 = vmatprep.subr.bf16.mxu0 %v17076_v54  ;;  %v17214_v42 = vld [vmem:[#allocation68_spill] sm:$0xff] }
0x1f47   :  { %12636 = vmatpush1.bf16.msra.mxu1 %v17209_v17  ;;  %12661 = vmatpush3.bf16.msra.mxu0 %v17210_v51  ;;  %v17215_v17 = vld [vmem:[#allocation67_spill] sm:$0xff] }
0x1f48   :  { %12638 = vmatprep.subr.bf16.mxu1 %v17211_v12  ;;  %12662 = vmatprep.subr.bf16.mxu0 %v17076_v54 }
0x1f4b   :  { %12640 = vmatpush1.bf16.msra.mxu1 %v17212_v6  ;;  %12664 = vmatpush3.bf16.msra.mxu0 %v17213_v43  ;;  %v17216_v43 = vld [vmem:[#allocation69_spill] sm:$0xff] }
0x1f4c   :  { %12665 = vmatprep.subr.bf16.mxu1 %v17076_v54  ;;  %12689 = vmatprep.subr.bf16.mxu0 %v17076_v54  ;;  %v17217_v6 = vld [vmem:[#allocation77_spill] sm:$0xff] }
0x1f4e   :  { %4653 = vmatmul.mubr.f32.vlgmr.msra.gmra.mrb[40].mxu1 %v15733_v14  ;;  %10252 = vmatmul.mubr.f32.vlgmr.msra.gmra.mrb[42].mxu0 %v15733_v14 }
0x1f4f   :  { %12667 = vmatpush3.bf16.msra.mxu1 %v17214_v42  ;;  %12691 = vmatpush3.bf16.msra.mxu0 %v17215_v17  ;;  %v17218_v42 = vld [vmem:[#allocation70_spill] sm:$0xff]  ;;  %v17219_v17 = vld [vmem:[#allocation71_spill] sm:$0xff] }
0x1f50   :  { %12668 = vmatprep.subr.bf16.mxu1 %v17076_v54  ;;  %10286 = vmatprep.mubr.msk.f32.mxu1 %vm14268_vm0, %v15614_v1 }
0x1f51   :  { %12692 = vmatprep.subr.bf16.mxu0 %v17076_v54  ;;  %10321 = vmatprep.mubr.msk.f32.mxu0 %vm14268_vm0, %v15614_v1 }
0x1f53   :  { %12670 = vmatpush3.bf16.msra.mxu1 %v17216_v43  ;;  %12694 = vmatpush3.bf16.msra.mxu0 %v17217_v6  ;;  %v17220_v43 = vld [vmem:[#allocation72_spill] sm:$0xff] }
0x1f54   :  { %12671 = vmatprep.subr.bf16.mxu1 %v17076_v54  ;;  %12695 = vmatprep.subr.bf16.mxu0 %v17076_v54 }
0x1f57   :  { %12673 = vmatpush3.bf16.msra.mxu1 %v17218_v42  ;;  %12697 = vmatpush3.bf16.msra.mxu0 %v17217_v6  ;;  %v17221_v42 = vld [vmem:[#allocation73_spill] sm:$0xff] }
0x1f58   :  { %12674 = vmatprep.subr.bf16.mxu1 %v17076_v54  ;;  %12698 = vmatprep.subr.bf16.mxu0 %v17076_v54 }
0x1f5b   :  { %12676 = vmatpush3.bf16.msra.mxu1 %v17219_v17  ;;  %12700 = vmatpush3.bf16.msra.mxu0 %v17217_v6  ;;  %v17222_v17 = vld [vmem:[#allocation74_spill] sm:$0xff] }
0x1f5c   :  { %12677 = vmatprep.subr.bf16.mxu1 %v17076_v54  ;;  %12701 = vmatprep.subr.bf16.mxu0 %v17076_v54 }
0x1f5f   :  { %12679 = vmatpush3.bf16.msra.mxu1 %v17220_v43  ;;  %12703 = vmatpush3.bf16.msra.mxu0 %v17217_v6  ;;  %v17223_v43 = vld [vmem:[#allocation75_spill] sm:$0xff] }
0x1f60   :  { %12680 = vmatprep.subr.bf16.mxu1 %v17076_v54  ;;  %12704 = vmatprep.subr.bf16.mxu0 %v17076_v54 }
0x1f63   :  { %12682 = vmatpush3.bf16.msra.mxu1 %v17221_v42  ;;  %12706 = vmatpush3.bf16.msra.mxu0 %v17217_v6 }
0x1f64   :  { %12683 = vmatprep.subr.bf16.mxu1 %v17076_v54  ;;  %12707 = vmatprep.subr.bf16.mxu0 %v17076_v54 }
0x1f67   :  { %12685 = vmatpush3.bf16.msra.mxu1 %v17222_v17  ;;  %12709 = vmatpush3.bf16.msra.mxu0 %v17217_v6 }
0x1f68   :  { %12686 = vmatprep.subr.bf16.mxu1 %v17076_v54  ;;  %12710 = vmatprep.subr.bf16.mxu0 %v17076_v54 }
0x1f6b   :  { %12688 = vmatpush3.bf16.msra.mxu1 %v17223_v43  ;;  %12712 = vmatpush3.bf16.msra.mxu0 %v17217_v6 }
0x1f6c   :  { %12737 = vmatprep.subr.bf16.mxu0 %v17076_v54  ;;  %12713 = vmatprep.subr.bf16.mxu1 %v17076_v54 }
0x2001   :  { %v4584_v42 = vpop.f32.mrb[40].mxu0 }
0x2002   :  { %v10218_v12 = vpop.f32.mrb[41].mxu0  ;;  %v4585_v57 = vadd.f32 %v4584_v42, %v15257_v45 }
0x2021   :  { %v4654_v51 = vpop.f32.mrb[40].mxu1  ;;  %v4725_v33 = vpop.f32.mrb[42].mxu0 }
0x2022   :  { %v13726_v17 = vadd.f32 %v15247_v53, %v4654_v51  ;;  %v4656_v21 = vpop.f32.mrb[41].mxu1  ;;  %v10253_v56 = vpop.f32.mrb[43].mxu0  ;;  %v4726_v38 = vadd.f32 %v4725_v33, %v15254_v37 }
0x2023   :  { %v13728_v16 = vadd.f32 %v15249_v39, %v4656_v21 }
0x2024   :  { %v8059_v11 = vmul.f32 -1.442695, %v13726_v17 }
0x2025   :  { %v8060_v35 = vmul.f32 -1.442695, %v13728_v16 }
0x2026   :  { %13908 = vpow2.f32 %v8059_v11 }
0x2027   :  { %13910 = vpow2.f32 %v8060_v35 }
0x2030   :  { %v13909_v43 = vpop.eup %13908 }
0x2031   :  { %v4733_v6 = vadd.f32 1.0, %v13909_v43  ;;  %v13911_v50 = vpop.eup %13910 }
0x2032   :  { %v4740_v24 = vadd.f32 1.0, %v13911_v50 }
0x2033   :  { %13912 = vrcp.f32 %v4733_v6 }
0x2034   :  { %13914 = vrcp.f32 %v4740_v24 }
0x203d   :  { %v13913_v12 = vpop.eup %13912 }
0x203e   :  { %v4743_v30 = vmul.f32 %v13913_v12, %v4726_v38  ;;  %v13915_v56 = vpop.eup %13914 }
0x203f   :  { %v4746_v17 = vsub.f32 1.0, %v13915_v56  ;;  %v4748_v35 = vmul.f32 %v13915_v56, %v15733_v14  ;;  %v17224_v56 = vld [vmem:[#allocation40_spill] sm:$0xff] }
0x2040   :  { %v4744_v51 = vadd.f32 %v4743_v30, %v4585_v57 }
0x2042   :  { %13916 = vtanh.f32 %v4744_v51 }
0x204c   :  { %v13917_v21 = vpop.eup %13916 }
0x204d   :  { %v4747_v11 = vmul.f32 %v13917_v21, %v4746_v17  ;;  %v17225_v17 = vld [vmem:[#allocation43_spill] sm:$0xff] }
0x204f   :  { %v15928_v16 = vadd.f32 %v4748_v35, %v4747_v11  ;;  %v17226_v35 = vld [vmem:[#allocation84_spill] sm:$0xff] }
0x2051   :  { %10287 = vmatmul.mubr.f32.vlgmr.msra.gmra.mrb[42].mxu1 %v15928_v16 }
0x2052   :  { %12715 = vmatpush3.bf16.msra.mxu1 %v15292_v60  ;;  %10356 = vmatprep.mubr.msk.f32.mxu1 %vm14268_vm0, %v15614_v1 }
0x2053   :  { %12716 = vmatprep.subr.bf16.mxu1 %v17076_v54 }
0x2056   :  { %12718 = vmatpush3.bf16.msra.mxu1 %v15295_v49 }
0x2057   :  { %12719 = vmatprep.subr.bf16.mxu1 %v17076_v54 }
0x205a   :  { %12721 = vmatpush3.bf16.msra.mxu1 %v15299_v23 }
0x205b   :  { %12722 = vmatprep.subr.bf16.mxu1 %v17076_v54 }
0x205e   :  { %12724 = vmatpush3.bf16.msra.mxu1 %v17124_v48 }
0x205f   :  { %12725 = vmatprep.subr.bf16.mxu1 %v17076_v54 }
0x2062   :  { %12727 = vmatpush3.bf16.msra.mxu1 %v17125_v19 }
0x2063   :  { %12728 = vmatprep.subr.bf16.mxu1 %v17076_v54 }
0x2066   :  { %12730 = vmatpush3.bf16.msra.mxu1 %v17126_v20 }
0x2067   :  { %12731 = vmatprep.subr.bf16.mxu1 %v17076_v54 }
0x206a   :  { %12733 = vmatpush3.bf16.msra.mxu1 %v15315_v10 }
0x206b   :  { %12734 = vmatprep.subr.bf16.mxu1 %v17076_v54 }
0x206e   :  { %12736 = vmatpush3.bf16.msra.mxu1 %v17127_v41 }
0x206f   :  { %12761 = vmatprep.subr.bf16.mxu1 %v17076_v54 }
0x2124   :  { %v4816_v30 = vpop.f32.mrb[42].mxu1 }
0x2125   :  { %v4817_v57 = vadd.f32 %v4816_v30, %v17128_v27  ;;  %v10288_v38 = vpop.f32.mrb[43].mxu1  ;;  %v17227_v30 = vld [vmem:[#allocation85_spill] sm:$0xff] }
0x2126   :  { %v17229_v38 = vld [vmem:[#allocation87_spill] sm:$0xff] }
0x2127   :  { %v4820_v14 = vsel %vm2653_vm11, %v4817_v57, -inf }
0x2128   :  { %4821 = vmax.xlane.f32.xlu1 %v4820_v14  ;;  %v17230_v14 = vld [vmem:[#allocation88_spill] sm:$0xff] }
0x21b5   :  { %v4822_v6 = vpop.xlane.xlu1 %4821 }
0x21b6   :  { %v4823_v24 = vsub.f32 %v4817_v57, %v4822_v6  ;;  %v17228_v57 = vld [vmem:[#allocation86_spill] sm:$0xff]  ;;  %v17231_v6 = vld [vmem:[#allocation89_spill] sm:$0xff] }
0x21b8   :  { %v4824_v50 = vmul.f32 1.442695, %v4823_v24  ;;  %v17232_v24 = vld [vmem:[#allocation90_spill] sm:$0xff] }
0x21ba   :  { %13918 = vpow2.f32 %v4824_v50  ;;  %v17233_v50 = vld [vmem:[#allocation91_spill] sm:$0xff] }
0x21c4   :  { %v13919_v43 = vpop.eup %13918 }
0x21c5   :  { %v4826_v33 = vsel %vm2653_vm11, %v13919_v43, 0.0 }
0x21c6   :  { %4827 = vadd.xlane.f32.xlu0 %v4826_v33 }
0x2253   :  { %v4828_v42 = vpop.xlane.xlu0 %4827 }
0x2254   :  { %13920 = vrcp.f32 %v4828_v42 }
0x225e   :  { %v13921_v12 = vpop.eup %13920 }
0x225f   :  { %v4831_v51 = vmul.f32 %v13921_v12, %v13919_v43 }
0x2261   :  { %10322 = vmatmul.mubr.f32.vlgmr.msra.gmra.mrb[44].mxu0 %v4831_v51 }
0x2262   :  { %12739 = vmatpush3.bf16.msra.mxu0 %v15324_v0  ;;  %10391 = vmatprep.mubr.msk.f32.mxu0 %vm14268_vm0, %v15614_v1 }
0x2263   :  { %12740 = vmatprep.subr.bf16.mxu0 %v17076_v54 }
0x2266   :  { %12742 = vmatpush3.bf16.msra.mxu0 %v15327_v46 }
0x2267   :  { %12743 = vmatprep.subr.bf16.mxu0 %v17076_v54 }
0x226a   :  { %12745 = vmatpush3.bf16.msra.mxu0 %v17129_v15 }
0x226b   :  { %12746 = vmatprep.subr.bf16.mxu0 %v17076_v54 }
0x226e   :  { %12748 = vmatpush3.bf16.msra.mxu0 %v17130_v29 }
0x226f   :  { %12749 = vmatprep.subr.bf16.mxu0 %v17076_v54 }
0x2272   :  { %12751 = vmatpush3.bf16.msra.mxu0 %v15341_v36 }
0x2273   :  { %12752 = vmatprep.subr.bf16.mxu0 %v17076_v54 }
0x2276   :  { %12754 = vmatpush3.bf16.msra.mxu0 %v15345_v26 }
0x2277   :  { %12755 = vmatprep.subr.bf16.mxu0 %v17076_v54 }
0x227a   :  { %12757 = vmatpush3.bf16.msra.mxu0 %v15349_v7 }
0x227b   :  { %12758 = vmatprep.subr.bf16.mxu0 %v17076_v54 }
0x227e   :  { %12760 = vmatpush3.bf16.msra.mxu0 %v15353_v28 }
0x227f   :  { %12786 = vmatprep.subr.bf16.mxu0 %v14969_v8 }
0x2281   :  { %10392 = vmatmul.mubr.f32.vlgmr.msra.gmra.mrb[46].mxu0 %v15928_v16 }
0x2282   :  { %12788 = vmatpush1.bf16.msra.mxu0 %v14985_v31  ;;  %5212 = vmatprep.mubr.f32.mxu0 %v15614_v1 }
0x2283   :  { %12790 = vmatprep.subr.bf16.mxu0 %v14989_v3 }
0x2286   :  { %12792 = vmatpush1.bf16.msra.mxu0 %v14998_v5 }
0x2287   :  { %12794 = vmatprep.subr.bf16.mxu0 %v15004_v18 }
0x228a   :  { %12796 = vmatpush1.bf16.msra.mxu0 %v15011_v9 }
0x228b   :  { %12798 = vmatprep.subr.bf16.mxu0 %v15017_v22 }
0x228e   :  { %12800 = vmatpush1.bf16.msra.mxu0 %v15023_v63 }
0x228f   :  { %12802 = vmatprep.subr.bf16.mxu0 %v15029_v44 }
0x2292   :  { %12804 = vmatpush1.bf16.msra.mxu0 %v15032_v25 }
0x2293   :  { %12806 = vmatprep.subr.bf16.mxu0 %v17131_v40 }
0x2296   :  { %12808 = vmatpush1.bf16.msra.mxu0 %v15042_v55 }
0x2297   :  { %12810 = vmatprep.subr.bf16.mxu0 %v17174_v34 }
0x229a   :  { %12812 = vmatpush1.bf16.msra.mxu0 %v17175_v4 }
0x229b   :  { %12814 = vmatprep.subr.bf16.mxu0 %v17176_v13 }
0x229e   :  { %12816 = vmatpush1.bf16.msra.mxu0 %v17224_v56 }
0x229f   :  { %12842 = vmatprep.subr.bf16.mxu0 %v17225_v17 }
0x2334   :  { %v4898_v21 = vpop.f32.mrb[44].mxu0 }
0x2335   :  { %v10323_v11 = vpop.f32.mrb[45].mxu0  ;;  %10357 = vmatmul.mubr.f32.vlgmr.msra.gmra.mrb[44].mxu1 %v4898_v21  ;;  %v16009_v21 = vld [vmem:[%s16870_s12] sm:$0x1] }
0x2336   :  { %12763 = vmatpush3.bf16.msra.mxu1 %v17226_v35  ;;  %10426 = vmatprep.mubr.msk.f32.mxu1 %vm14268_vm0, %v15614_v1  ;;  %17234 = vst [vmem:[#allocation76_spill] sm:$0xff] %v16009_v21 }
0x2337   :  { %12764 = vmatprep.subr.bf16.mxu1 %v17076_v54 }
0x233a   :  { %12766 = vmatpush3.bf16.msra.mxu1 %v17227_v30 }
0x233b   :  { %12767 = vmatprep.subr.bf16.mxu1 %v17076_v54 }
0x233e   :  { %12769 = vmatpush3.bf16.msra.mxu1 %v17228_v57 }
0x233f   :  { %12770 = vmatprep.subr.bf16.mxu1 %v17076_v54 }
0x2342   :  { %12772 = vmatpush3.bf16.msra.mxu1 %v17229_v38 }
0x2343   :  { %12773 = vmatprep.subr.bf16.mxu1 %v17076_v54 }
0x2346   :  { %12775 = vmatpush3.bf16.msra.mxu1 %v17230_v14 }
0x2347   :  { %12776 = vmatprep.subr.bf16.mxu1 %v17076_v54 }
0x234a   :  { %12778 = vmatpush3.bf16.msra.mxu1 %v17231_v6  ;;  %v17235_v6 = vld [vmem:[#allocation29_spill] sm:$0xff] }
0x234b   :  { %12779 = vmatprep.subr.bf16.mxu1 %v17076_v54 }
0x234e   :  { %12781 = vmatpush3.bf16.msra.mxu1 %v17232_v24 }
0x234f   :  { %12782 = vmatprep.subr.bf16.mxu1 %v17076_v54 }
0x2352   :  { %12784 = vmatpush3.bf16.msra.mxu1 %v17233_v50 }
0x2353   :  { %12817 = vmatprep.subr.bf16.mxu1 %v17076_v54 }
0x2354   :  { %v5038_v43 = vpop.f32.mrb[46].mxu0 }
0x2355   :  { %v10393_v33 = vpop.f32.mrb[47].mxu0 }
0x2356   :  { %v17236_v33 = vld [vmem:[#allocation30_spill] sm:$0xff] }
0x2408   :  { %v4968_v42 = vpop.f32.mrb[44].mxu1 }
0x2409   :  { %v5039_v12 = vadd.f32 %v5038_v43, %v4968_v42  ;;  %v10358_v51 = vpop.f32.mrb[45].mxu1  ;;  %v17237_v43 = vld [vmem:[#allocation31_spill] sm:$0xff]  ;;  %v17238_v42 = vld [vmem:[#allocation32_spill] sm:$0xff] }
0x240a   :  { %v17242_v51 = vld [vmem:[#allocation42_spill] sm:$0xff] }
0x240b   :  { %v5042_v11 = vadd.f32 %v16009_v21, %v5039_v12  ;;  %v17240_v12 = vld [vmem:[#allocation35_spill] sm:$0xff] }
0x240d   :  { %13922 = vtanh.f32 %v5042_v11 }
0x2417   :  { %v13923_v24 = vpop.eup %13922 }
0x2418   :  { %10427 = vmatmul.mubr.f32.vlgmr.msra.gmra.mrb[46].mxu1 %v13923_v24  ;;  %v17239_v24 = vld [vmem:[#allocation33_spill] sm:$0xff] }
0x2419   :  { %12819 = vmatpush3.bf16.msra.mxu1 %v17235_v6  ;;  %10461 = vmatprep.mubr.msk.f32.mxu1 %vm14268_vm0, %v15614_v1  ;;  %v17241_v1 = vld [vmem:[#allocation38_spill] sm:$0xff] }
0x241a   :  { %12820 = vmatprep.subr.bf16.mxu1 %v17076_v54 }
0x241d   :  { %12822 = vmatpush3.bf16.msra.mxu1 %v17236_v33 }
0x241e   :  { %12823 = vmatprep.subr.bf16.mxu1 %v17076_v54 }
0x2421   :  { %12825 = vmatpush3.bf16.msra.mxu1 %v17237_v43 }
0x2422   :  { %12826 = vmatprep.subr.bf16.mxu1 %v17076_v54 }
0x2425   :  { %12828 = vmatpush3.bf16.msra.mxu1 %v17238_v42  ;;  %v16033_v42 = vld [vmem:[%s16872_s14] sm:$0x1] }
0x2426   :  { %12829 = vmatprep.subr.bf16.mxu1 %v17076_v54  ;;  %17243 = vst [vmem:[#allocation82_spill] sm:$0xff] %v16033_v42 }
0x2429   :  { %12831 = vmatpush3.bf16.msra.mxu1 %v17239_v24 }
0x242a   :  { %12832 = vmatprep.subr.bf16.mxu1 %v17076_v54 }
0x242d   :  { %12834 = vmatpush3.bf16.msra.mxu1 %v17240_v12 }
0x242e   :  { %12835 = vmatprep.subr.bf16.mxu1 %v17076_v54 }
0x2431   :  { %12837 = vmatpush3.bf16.msra.mxu1 %v17241_v1 }
0x2432   :  { %12838 = vmatprep.subr.bf16.mxu1 %v17076_v54 }
0x2435   :  { %12840 = vmatpush3.bf16.msra.mxu1 %v17242_v51 }
0x2436   :  { %12873 = vmatprep.subr.bf16.mxu1 %v17076_v54 }
0x24eb   :  { %v5110_v11 = vpop.f32.mrb[46].mxu1 }
0x24ec   :  { %v16036_v24 = vadd.f32 %v16033_v42, %v5110_v11  ;;  %v10428_v12 = vpop.f32.mrb[47].mxu1 }
0x24ee   :  { %17244 = vst [vmem:[#allocation83_spill] sm:$0xff] %v16036_v24  ;;  %v5114_v43 = vsel %vm2653_vm11, %v16036_v24, -inf }
0x24ef   :  { %5115 = vmax.xlane.f32.xlu1 %v5114_v43 }
0x257c   :  { %v16040_v1 = vpop.xlane.xlu1 %5115 }
0x257d   :  { %17245 = vst [vmem:[#allocation34_spill] sm:$0xff] %v16040_v1  ;;  %vm5117_vm9 = vcmp.eq.f32.partialorder %v16036_v24, %v16040_v1  ;;  %v17258_v1 = vld [vmem:[#allocation61_spill] sm:$0xff] }
0x257e   :  { %v5118_v51 = vsel %vm5117_vm9, %v15065_v62, 128 }
0x257f   :  { %v5119_v33 = vsel %vm2653_vm11, %v5118_v51, 2147483647 }
0x2580   :  { %v5121_v6 = vshra.s32 %v5119_v33, 16  ;;  %v5120_v50 = vand.u32 65535, %v5119_v33  ;;  %v17252_v33 = vld [vmem:[#allocation55_spill] sm:$0xff] }
0x2582   :  { %v5123_v21 = vcvt.s32.f32 %v5121_v6  ;;  %v5122_v42 = vcvt.s32.f32 %v5120_v50  ;;  %v17249_v6 = vld [vmem:[#allocation52_spill] sm:$0xff]  ;;  %v17250_v50 = vld [vmem:[#allocation53_spill] sm:$0xff] }
0x2584   :  { %5124 = vmin.xlane.f32.xlu1 %v5123_v21 }
0x2611   :  { %v5125_v11 = vpop.xlane.xlu1 %5124 }
0x2612   :  { %vm5126_vm10 = vcmp.eq.f32.partialorder %v5123_v21, %v5125_v11  ;;  %v5131_v14 = vcvt.f32.s32 %v5125_v11  ;;  %v17251_v21 = vld [vmem:[#allocation54_spill] sm:$0xff] }
0x2613   :  { %v5127_v12 = vsel %vm5126_vm10, %v5122_v42, inf  ;;  %v17253_v42 = vld [vmem:[#allocation56_spill] sm:$0xff]  ;;  %v17255_v11 = vld [vmem:[#allocation58_spill] sm:$0xff] }
0x2614   :  { %5128 = vmin.xlane.f32.xlu1 %v5127_v12  ;;  %v5132_v38 = vshll.u32 %v5131_v14, 16  ;;  %v17248_v14 = vld [vmem:[#allocation51_spill] sm:$0xff] }
0x2615   :  { %v17256_v12 = vld [vmem:[#allocation59_spill] sm:$0xff] }
0x26a1   :  { %v5129_v43 = vpop.xlane.xlu1 %5128 }
0x26a2   :  { %v5130_v57 = vcvt.f32.s32 %v5129_v43  ;;  %v17257_v43 = vld [vmem:[#allocation60_spill] sm:$0xff] }
0x26a4   :  { %v5133_v24 = vadd.s32 %v5132_v38, %v5130_v57  ;;  %v16059_v57 = vld [vmem:[#allocation2 + $0x8] sm:$0xff] }
0x26a5   :  { %v17247_v38 = vld [vmem:[#allocation50_spill] sm:$0xff] }
0x26a6   :  { %v16050_v51 = vsel %vm5142_vm12, %v5133_v24, %v15845_v47  ;;  %vm5145_vm13 = vcmp.eq.s32.totalorder %v15065_v62, %v5133_v24  ;;  %v17246_v47 = vld [vmem:[#allocation49_spill] sm:$0xff] }
0x26a7   :  { %8062 = vmatmul.mubr.msk.f32.vlgmr.msra.gmra.mrb[48].mxu0 %vm5145_vm13, %v17105_v52  ;;  %10462 = vmatmul.mubr.msk.f32.vlgmr.msra.gmra.mrb[48].mxu1 %vm5145_vm13, %v17105_v52  ;;  %v17254_v24 = vld [vmem:[#allocation57_spill] sm:$0xff] }
0x26a8   :  { %12844 = vmatpush1.bf16.msra.mxu0 %v15075_v58  ;;  %12875 = vmatpush3.bf16.msra.mxu1 %v15079_v61 }
0x26a9   :  { %12846 = vmatprep.subr.bf16.mxu0 %v15089_v32  ;;  %12876 = vmatprep.subr.bf16.mxu1 %v17076_v54 }
0x26aa   :  { %5353 = vmatprep.mubr.f32.mxu0 %v16059_v57  ;;  %10496 = vmatprep.mubr.msk.f32.mxu1 %vm14268_vm0, %v16059_v57 }
0x26ac   :  { %12848 = vmatpush1.bf16.msra.mxu0 %v15092_v59  ;;  %12878 = vmatpush3.bf16.msra.mxu1 %v15096_v2 }
0x26ad   :  { %12850 = vmatprep.subr.bf16.mxu0 %v17246_v47  ;;  %12879 = vmatprep.subr.bf16.mxu1 %v17076_v54 }
0x26b0   :  { %12852 = vmatpush1.bf16.msra.mxu0 %v17247_v38  ;;  %12881 = vmatpush3.bf16.msra.mxu1 %v17248_v14 }
0x26b1   :  { %12854 = vmatprep.subr.bf16.mxu0 %v17249_v6  ;;  %12882 = vmatprep.subr.bf16.mxu1 %v17076_v54 }
0x26b4   :  { %12856 = vmatpush1.bf16.msra.mxu0 %v17250_v50  ;;  %12884 = vmatpush3.bf16.msra.mxu1 %v17251_v21  ;;  %v17259_v21 = vld [vmem:[#allocation62_spill] sm:$0xff]  ;;  %v17261_v50 = vld [vmem:[#allocation64_spill] sm:$0xff] }
0x26b5   :  { %12858 = vmatprep.subr.bf16.mxu0 %v17252_v33  ;;  %12885 = vmatprep.subr.bf16.mxu1 %v17076_v54  ;;  %v17260_v33 = vld [vmem:[#allocation63_spill] sm:$0xff] }
0x26b8   :  { %12860 = vmatpush1.bf16.msra.mxu0 %v17253_v42  ;;  %12887 = vmatpush3.bf16.msra.mxu1 %v17254_v24  ;;  %v17262_v24 = vld [vmem:[#allocation65_spill] sm:$0xff] }
0x26b9   :  { %12862 = vmatprep.subr.bf16.mxu0 %v17255_v11  ;;  %12888 = vmatprep.subr.bf16.mxu1 %v17076_v54  ;;  %v17263_v11 = vld [vmem:[#allocation66_spill] sm:$0xff] }
0x26bc   :  { %12864 = vmatpush1.bf16.msra.mxu0 %v17256_v12  ;;  %12890 = vmatpush3.bf16.msra.mxu1 %v17257_v43 }
0x26bd   :  { %12866 = vmatprep.subr.bf16.mxu0 %v17258_v1  ;;  %12891 = vmatprep.subr.bf16.mxu1 %v17076_v54  ;;  %v17264_v1 = vld [vmem:[#allocation68_spill] sm:$0xff] }
0x26c0   :  { %12868 = vmatpush1.bf16.msra.mxu0 %v17259_v21  ;;  %12893 = vmatpush3.bf16.msra.mxu1 %v17260_v33  ;;  %v17265_v21 = vld [vmem:[#allocation67_spill] sm:$0xff] }
0x26c1   :  { %12870 = vmatprep.subr.bf16.mxu0 %v17261_v50  ;;  %12894 = vmatprep.subr.bf16.mxu1 %v17076_v54 }
0x26c4   :  { %12872 = vmatpush1.bf16.msra.mxu0 %v17262_v24  ;;  %12896 = vmatpush3.bf16.msra.mxu1 %v17263_v11  ;;  %v17266_v11 = vld [vmem:[#allocation69_spill] sm:$0xff] }
0x26c5   :  { %12897 = vmatprep.subr.bf16.mxu0 %v17076_v54  ;;  %12921 = vmatprep.subr.bf16.mxu1 %v17076_v54  ;;  %v17267_v24 = vld [vmem:[#allocation77_spill] sm:$0xff] }
0x26c7   :  { %5354 = vmatmul.mubr.f32.vlgmr.msra.gmra.mrb[48].mxu0 %v15928_v16  ;;  %10497 = vmatmul.mubr.f32.vlgmr.msra.gmra.mrb[50].mxu1 %v15928_v16 }
0x26c8   :  { %12899 = vmatpush3.bf16.msra.mxu0 %v17264_v1  ;;  %12923 = vmatpush3.bf16.msra.mxu1 %v17265_v21  ;;  %v17268_v1 = vld [vmem:[#allocation70_spill] sm:$0xff]  ;;  %v17269_v21 = vld [vmem:[#allocation71_spill] sm:$0xff] }
0x26c9   :  { %12900 = vmatprep.subr.bf16.mxu0 %v17076_v54  ;;  %10531 = vmatprep.mubr.msk.f32.mxu0 %vm14268_vm0, %v16059_v57 }
0x26ca   :  { %12924 = vmatprep.subr.bf16.mxu1 %v17076_v54  ;;  %10566 = vmatprep.mubr.msk.f32.mxu1 %vm14268_vm0, %v16059_v57 }
0x26cc   :  { %12902 = vmatpush3.bf16.msra.mxu0 %v17266_v11  ;;  %12926 = vmatpush3.bf16.msra.mxu1 %v17267_v24  ;;  %v17270_v11 = vld [vmem:[#allocation72_spill] sm:$0xff] }
0x26cd   :  { %12903 = vmatprep.subr.bf16.mxu0 %v17076_v54  ;;  %12927 = vmatprep.subr.bf16.mxu1 %v17076_v54 }
0x26d0   :  { %12905 = vmatpush3.bf16.msra.mxu0 %v17268_v1  ;;  %12929 = vmatpush3.bf16.msra.mxu1 %v17267_v24  ;;  %v17271_v1 = vld [vmem:[#allocation73_spill] sm:$0xff] }
0x26d1   :  { %12906 = vmatprep.subr.bf16.mxu0 %v17076_v54  ;;  %12930 = vmatprep.subr.bf16.mxu1 %v17076_v54 }
0x26d4   :  { %12908 = vmatpush3.bf16.msra.mxu0 %v17269_v21  ;;  %12932 = vmatpush3.bf16.msra.mxu1 %v17267_v24  ;;  %v17272_v21 = vld [vmem:[#allocation74_spill] sm:$0xff] }
0x26d5   :  { %12909 = vmatprep.subr.bf16.mxu0 %v17076_v54  ;;  %12933 = vmatprep.subr.bf16.mxu1 %v17076_v54 }
0x26d8   :  { %12911 = vmatpush3.bf16.msra.mxu0 %v17270_v11  ;;  %12935 = vmatpush3.bf16.msra.mxu1 %v17267_v24  ;;  %v17273_v11 = vld [vmem:[#allocation75_spill] sm:$0xff] }
0x26d9   :  { %12912 = vmatprep.subr.bf16.mxu0 %v17076_v54  ;;  %12936 = vmatprep.subr.bf16.mxu1 %v17076_v54 }
0x26dc   :  { %12914 = vmatpush3.bf16.msra.mxu0 %v17271_v1  ;;  %12938 = vmatpush3.bf16.msra.mxu1 %v17267_v24 }
0x26dd   :  { %12915 = vmatprep.subr.bf16.mxu0 %v17076_v54  ;;  %12939 = vmatprep.subr.bf16.mxu1 %v17076_v54 }
0x26e0   :  { %12917 = vmatpush3.bf16.msra.mxu0 %v17272_v21  ;;  %12941 = vmatpush3.bf16.msra.mxu1 %v17267_v24 }
0x26e1   :  { %12918 = vmatprep.subr.bf16.mxu0 %v17076_v54  ;;  %12942 = vmatprep.subr.bf16.mxu1 %v17076_v54 }
0x26e4   :  { %12920 = vmatpush3.bf16.msra.mxu0 %v17273_v11  ;;  %12944 = vmatpush3.bf16.msra.mxu1 %v17267_v24 }
0x26e5   :  { %12969 = vmatprep.subr.bf16.mxu1 %v17076_v54  ;;  %12945 = vmatprep.subr.bf16.mxu0 %v17076_v54 }
0x277a   :  { %v5285_v1 = vpop.f32.mrb[48].mxu1 }
0x277b   :  { %v10463_v50 = vpop.f32.mrb[49].mxu1  ;;  %v5286_v32 = vadd.f32 %v5285_v1, %v15257_v45 }
0x279a   :  { %v5355_v33 = vpop.f32.mrb[48].mxu0  ;;  %v5426_v43 = vpop.f32.mrb[50].mxu1 }
0x279b   :  { %v13730_v21 = vadd.f32 %v15247_v53, %v5355_v33  ;;  %v5357_v12 = vpop.f32.mrb[49].mxu0  ;;  %v10498_v42 = vpop.f32.mrb[51].mxu1  ;;  %v5427_v59 = vadd.f32 %v5426_v43, %v15254_v37 }
0x279c   :  { %v13732_v14 = vadd.f32 %v15249_v39, %v5357_v12 }
0x279d   :  { %v8064_v6 = vmul.f32 -1.442695, %v13730_v21 }
0x279e   :  { %v8065_v38 = vmul.f32 -1.442695, %v13732_v14 }
0x279f   :  { %13924 = vpow2.f32 %v8064_v6 }
0x27a0   :  { %13926 = vpow2.f32 %v8065_v38 }
0x27a9   :  { %v13925_v11 = vpop.eup %13924 }
0x27aa   :  { %v5434_v24 = vadd.f32 1.0, %v13925_v11  ;;  %v13927_v47 = vpop.eup %13926 }
0x27ab   :  { %v5441_v2 = vadd.f32 1.0, %v13927_v47 }
0x27ac   :  { %13928 = vrcp.f32 %v5434_v24 }
0x27ad   :  { %13930 = vrcp.f32 %v5441_v2 }
0x27b6   :  { %v13929_v50 = vpop.eup %13928 }
0x27b7   :  { %v5444_v61 = vmul.f32 %v13929_v50, %v5427_v59  ;;  %v13931_v21 = vpop.eup %13930 }
0x27b8   :  { %v5447_v42 = vsub.f32 1.0, %v13931_v21  ;;  %v5449_v38 = vmul.f32 %v13931_v21, %v15928_v16 }
0x27b9   :  { %v5445_v33 = vadd.f32 %v5444_v61, %v5286_v32 }
0x27bb   :  { %13932 = vtanh.f32 %v5445_v33 }
0x27c5   :  { %v13933_v12 = vpop.eup %13932 }
0x27c6   :  { %v5448_v6 = vmul.f32 %v13933_v12, %v5447_v42  ;;  %v17274_v12 = vld [vmem:[#allocation86_spill] sm:$0xff] }
0x27c8   :  { %v16135_v14 = vadd.f32 %v5449_v38, %v5448_v6  ;;  %v17275_v6 = vld [vmem:[#allocation87_spill] sm:$0xff]  ;;  %v17276_v38 = vld [vmem:[#allocation88_spill] sm:$0xff] }
0x27ca   :  { %10532 = vmatmul.mubr.f32.vlgmr.msra.gmra.mrb[50].mxu0 %v16135_v14 }
0x27cb   :  { %12947 = vmatpush3.bf16.msra.mxu0 %v15292_v60  ;;  %10601 = vmatprep.mubr.msk.f32.mxu0 %vm14268_vm0, %v16059_v57 }
0x27cc   :  { %12948 = vmatprep.subr.bf16.mxu0 %v17076_v54 }
0x27cf   :  { %12950 = vmatpush3.bf16.msra.mxu0 %v15295_v49 }
0x27d0   :  { %12951 = vmatprep.subr.bf16.mxu0 %v17076_v54 }
0x27d3   :  { %12953 = vmatpush3.bf16.msra.mxu0 %v15299_v23 }
0x27d4   :  { %12954 = vmatprep.subr.bf16.mxu0 %v17076_v54 }
0x27d7   :  { %12956 = vmatpush3.bf16.msra.mxu0 %v17124_v48 }
0x27d8   :  { %12957 = vmatprep.subr.bf16.mxu0 %v17076_v54 }
0x27db   :  { %12959 = vmatpush3.bf16.msra.mxu0 %v17125_v19 }
0x27dc   :  { %12960 = vmatprep.subr.bf16.mxu0 %v17076_v54 }
0x27df   :  { %12962 = vmatpush3.bf16.msra.mxu0 %v17126_v20 }
0x27e0   :  { %12963 = vmatprep.subr.bf16.mxu0 %v17076_v54 }
0x27e3   :  { %12965 = vmatpush3.bf16.msra.mxu0 %v15315_v10 }
0x27e4   :  { %12966 = vmatprep.subr.bf16.mxu0 %v17076_v54 }
0x27e7   :  { %12968 = vmatpush3.bf16.msra.mxu0 %v17127_v41 }
0x27e8   :  { %12993 = vmatprep.subr.bf16.mxu0 %v17076_v54 }
0x289d   :  { %v5517_v61 = vpop.f32.mrb[50].mxu0 }
0x289e   :  { %v5518_v32 = vadd.f32 %v5517_v61, %v17128_v27  ;;  %v10533_v59 = vpop.f32.mrb[51].mxu0  ;;  %v17277_v61 = vld [vmem:[#allocation89_spill] sm:$0xff] }
0x289f   :  { %v17279_v59 = vld [vmem:[#allocation91_spill] sm:$0xff] }
0x28a0   :  { %v5521_v2 = vsel %vm2653_vm11, %v5518_v32, -inf }
0x28a1   :  { %5522 = vmax.xlane.f32.xlu1 %v5521_v2 }
0x292e   :  { %v5523_v16 = vpop.xlane.xlu1 %5522 }
0x292f   :  { %v5524_v1 = vsub.f32 %v5518_v32, %v5523_v16  ;;  %v17278_v32 = vld [vmem:[#allocation90_spill] sm:$0xff] }
0x2931   :  { %v5525_v47 = vmul.f32 1.442695, %v5524_v1 }
0x2933   :  { %13934 = vpow2.f32 %v5525_v47 }
0x293d   :  { %v13935_v24 = vpop.eup %13934 }
0x293e   :  { %v5527_v11 = vsel %vm2653_vm11, %v13935_v24, 0.0 }
0x293f   :  { %5528 = vadd.xlane.f32.xlu1 %v5527_v11  ;;  %v17280_v11 = vld [vmem:[#allocation76_spill] sm:$0xff] }
0x29cc   :  { %v5529_v43 = vpop.xlane.xlu1 %5528 }
0x29cd   :  { %13936 = vrcp.f32 %v5529_v43 }
0x29d7   :  { %v13937_v50 = vpop.eup %13936 }
0x29d8   :  { %v5532_v33 = vmul.f32 %v13937_v50, %v13935_v24 }
0x29da   :  { %10567 = vmatmul.mubr.f32.vlgmr.msra.gmra.mrb[52].mxu1 %v5532_v33  ;;  %v17281_v33 = vld [vmem:[#allocation29_spill] sm:$0xff] }
0x29db   :  { %12971 = vmatpush3.bf16.msra.mxu1 %v15324_v0  ;;  %10636 = vmatprep.mubr.msk.f32.mxu1 %vm14268_vm0, %v16059_v57 }
0x29dc   :  { %12972 = vmatprep.subr.bf16.mxu1 %v17076_v54 }
0x29df   :  { %12974 = vmatpush3.bf16.msra.mxu1 %v15327_v46 }
0x29e0   :  { %12975 = vmatprep.subr.bf16.mxu1 %v17076_v54 }
0x29e3   :  { %12977 = vmatpush3.bf16.msra.mxu1 %v17129_v15 }
0x29e4   :  { %12978 = vmatprep.subr.bf16.mxu1 %v17076_v54 }
0x29e7   :  { %12980 = vmatpush3.bf16.msra.mxu1 %v17130_v29 }
0x29e8   :  { %12981 = vmatprep.subr.bf16.mxu1 %v17076_v54 }
0x29eb   :  { %12983 = vmatpush3.bf16.msra.mxu1 %v15341_v36 }
0x29ec   :  { %12984 = vmatprep.subr.bf16.mxu1 %v17076_v54 }
0x29ef   :  { %12986 = vmatpush3.bf16.msra.mxu1 %v15345_v26 }
0x29f0   :  { %12987 = vmatprep.subr.bf16.mxu1 %v17076_v54 }
0x29f3   :  { %12989 = vmatpush3.bf16.msra.mxu1 %v15349_v7 }
0x29f4   :  { %12990 = vmatprep.subr.bf16.mxu1 %v17076_v54 }
0x29f7   :  { %12992 = vmatpush3.bf16.msra.mxu1 %v15353_v28 }
0x29f8   :  { %13018 = vmatprep.subr.bf16.mxu1 %v14969_v8 }
0x29fa   :  { %10637 = vmatmul.mubr.f32.vlgmr.msra.gmra.mrb[54].mxu1 %v16135_v14 }
0x29fb   :  { %13020 = vmatpush1.bf16.msra.mxu1 %v14985_v31  ;;  %5913 = vmatprep.mubr.f32.mxu1 %v16059_v57 }
0x29fc   :  { %13022 = vmatprep.subr.bf16.mxu1 %v14989_v3 }
0x29ff   :  { %13024 = vmatpush1.bf16.msra.mxu1 %v14998_v5 }
0x2a00   :  { %13026 = vmatprep.subr.bf16.mxu1 %v15004_v18 }
0x2a03   :  { %13028 = vmatpush1.bf16.msra.mxu1 %v15011_v9 }
0x2a04   :  { %13030 = vmatprep.subr.bf16.mxu1 %v15017_v22 }
0x2a07   :  { %13032 = vmatpush1.bf16.msra.mxu1 %v15023_v63 }
0x2a08   :  { %13034 = vmatprep.subr.bf16.mxu1 %v15029_v44 }
0x2a0b   :  { %13036 = vmatpush1.bf16.msra.mxu1 %v15032_v25 }
0x2a0c   :  { %13038 = vmatprep.subr.bf16.mxu1 %v17131_v40 }
0x2a0f   :  { %13040 = vmatpush1.bf16.msra.mxu1 %v15042_v55 }
0x2a10   :  { %13042 = vmatprep.subr.bf16.mxu1 %v17174_v34 }
0x2a13   :  { %13044 = vmatpush1.bf16.msra.mxu1 %v17175_v4 }
0x2a14   :  { %13046 = vmatprep.subr.bf16.mxu1 %v17176_v13 }
0x2a17   :  { %13048 = vmatpush1.bf16.msra.mxu1 %v17224_v56 }
0x2a18   :  { %13074 = vmatprep.subr.bf16.mxu1 %v17225_v17 }
0x2aad   :  { %v5599_v21 = vpop.f32.mrb[52].mxu1 }
0x2aae   :  { %v10568_v42 = vpop.f32.mrb[53].mxu1  ;;  %10602 = vmatmul.mubr.f32.vlgmr.msra.gmra.mrb[52].mxu0 %v5599_v21  ;;  %v17282_v21 = vld [vmem:[#allocation30_spill] sm:$0xff] }
0x2aaf   :  { %12995 = vmatpush3.bf16.msra.mxu0 %v17226_v35  ;;  %10671 = vmatprep.mubr.msk.f32.mxu0 %vm14268_vm0, %v16059_v57  ;;  %v17283_v42 = vld [vmem:[#allocation31_spill] sm:$0xff] }
0x2ab0   :  { %12996 = vmatprep.subr.bf16.mxu0 %v17076_v54 }
0x2ab3   :  { %12998 = vmatpush3.bf16.msra.mxu0 %v17227_v30 }
0x2ab4   :  { %12999 = vmatprep.subr.bf16.mxu0 %v17076_v54 }
0x2ab7   :  { %13001 = vmatpush3.bf16.msra.mxu0 %v17274_v12 }
0x2ab8   :  { %13002 = vmatprep.subr.bf16.mxu0 %v17076_v54 }
0x2abb   :  { %13004 = vmatpush3.bf16.msra.mxu0 %v17275_v6 }
0x2abc   :  { %13005 = vmatprep.subr.bf16.mxu0 %v17076_v54 }
0x2abf   :  { %13007 = vmatpush3.bf16.msra.mxu0 %v17276_v38 }
0x2ac0   :  { %13008 = vmatprep.subr.bf16.mxu0 %v17076_v54 }
0x2ac3   :  { %13010 = vmatpush3.bf16.msra.mxu0 %v17277_v61 }
0x2ac4   :  { %13011 = vmatprep.subr.bf16.mxu0 %v17076_v54 }
0x2ac7   :  { %13013 = vmatpush3.bf16.msra.mxu0 %v17278_v32 }
0x2ac8   :  { %13014 = vmatprep.subr.bf16.mxu0 %v17076_v54 }
0x2acb   :  { %13016 = vmatpush3.bf16.msra.mxu0 %v17279_v59 }
0x2acc   :  { %13049 = vmatprep.subr.bf16.mxu0 %v17076_v54 }
0x2acd   :  { %v5739_v2 = vpop.f32.mrb[54].mxu1 }
0x2ace   :  { %v10638_v16 = vpop.f32.mrb[55].mxu1 }
0x2acf   :  { %v17285_v16 = vld [vmem:[#allocation33_spill] sm:$0xff] }
0x2b81   :  { %v5669_v1 = vpop.f32.mrb[52].mxu0 }
0x2b82   :  { %v5740_v47 = vadd.f32 %v5739_v2, %v5669_v1  ;;  %v10603_v24 = vpop.f32.mrb[53].mxu0  ;;  %v17284_v2 = vld [vmem:[#allocation32_spill] sm:$0xff]  ;;  %v17286_v1 = vld [vmem:[#allocation35_spill] sm:$0xff] }
0x2b83   :  { %v17288_v24 = vld [vmem:[#allocation42_spill] sm:$0xff] }
0x2b84   :  { %v5743_v43 = vadd.f32 %v17280_v11, %v5740_v47  ;;  %v17287_v47 = vld [vmem:[#allocation38_spill] sm:$0xff] }
0x2b86   :  { %13938 = vtanh.f32 %v5743_v43 }
0x2b90   :  { %v13939_v50 = vpop.eup %13938 }
0x2b91   :  { %10672 = vmatmul.mubr.f32.vlgmr.msra.gmra.mrb[54].mxu0 %v13939_v50  ;;  %v17289_v50 = vld [vmem:[#allocation82_spill] sm:$0xff] }
0x2b92   :  { %13051 = vmatpush3.bf16.msra.mxu0 %v17281_v33  ;;  %10706 = vmatprep.mubr.msk.f32.mxu0 %vm14268_vm0, %v16059_v57 }
0x2b93   :  { %13052 = vmatprep.subr.bf16.mxu0 %v17076_v54 }
0x2b96   :  { %13054 = vmatpush3.bf16.msra.mxu0 %v17282_v21 }
0x2b97   :  { %13055 = vmatprep.subr.bf16.mxu0 %v17076_v54 }
0x2b9a   :  { %13057 = vmatpush3.bf16.msra.mxu0 %v17283_v42 }
0x2b9b   :  { %13058 = vmatprep.subr.bf16.mxu0 %v17076_v54 }
0x2b9e   :  { %13060 = vmatpush3.bf16.msra.mxu0 %v17284_v2 }
0x2b9f   :  { %13061 = vmatprep.subr.bf16.mxu0 %v17076_v54 }
0x2ba2   :  { %13063 = vmatpush3.bf16.msra.mxu0 %v17285_v16 }
0x2ba3   :  { %13064 = vmatprep.subr.bf16.mxu0 %v17076_v54 }
0x2ba6   :  { %13066 = vmatpush3.bf16.msra.mxu0 %v17286_v1 }
0x2ba7   :  { %13067 = vmatprep.subr.bf16.mxu0 %v17076_v54 }
0x2baa   :  { %13069 = vmatpush3.bf16.msra.mxu0 %v17287_v47 }
0x2bab   :  { %13070 = vmatprep.subr.bf16.mxu0 %v17076_v54 }
0x2bae   :  { %13072 = vmatpush3.bf16.msra.mxu0 %v17288_v24 }
0x2baf   :  { %13105 = vmatprep.subr.bf16.mxu0 %v17076_v54 }
0x2c64   :  { %v5811_v43 = vpop.f32.mrb[54].mxu0 }
0x2c65   :  { %v16233_v2 = vadd.f32 %v17289_v50, %v5811_v43  ;;  %v10673_v42 = vpop.f32.mrb[55].mxu0 }
0x2c67   :  { %17290 = vst [vmem:[#allocation36_spill] sm:$0xff] %v16233_v2  ;;  %v5815_v16 = vsel %vm2653_vm11, %v16233_v2, -inf }
0x2c68   :  { %5816 = vmax.xlane.f32.xlu1 %v5815_v16 }
0x2cf5   :  { %v16237_v1 = vpop.xlane.xlu1 %5816 }
0x2cf6   :  { %17291 = vst [vmem:[#allocation37_spill] sm:$0xff] %v16237_v1  ;;  %vm5818_vm14 = vcmp.eq.f32.partialorder %v16233_v2, %v16237_v1  ;;  %v17306_v1 = vld [vmem:[#allocation58_spill] sm:$0xff] }
0x2cf7   :  { %v5819_v47 = vsel %vm5818_vm14, %v15065_v62, 128 }
0x2cf8   :  { %v5820_v24 = vsel %vm2653_vm11, %v5819_v47, 2147483647 }
0x2cf9   :  { %v5822_v21 = vshra.s32 %v5820_v24, 16  ;;  %v5821_v11 = vand.u32 65535, %v5820_v24  ;;  %v17301_v24 = vld [vmem:[#allocation53_spill] sm:$0xff] }
0x2cfb   :  { %v5824_v33 = vcvt.s32.f32 %v5822_v21  ;;  %v5823_v50 = vcvt.s32.f32 %v5821_v11  ;;  %v17293_v11 = vld [vmem:[#allocation45_spill] sm:$0xff]  ;;  %v17299_v21 = vld [vmem:[#allocation51_spill] sm:$0xff] }
0x2cfd   :  { %5825 = vmin.xlane.f32.xlu1 %v5824_v33 }
0x2d8a   :  { %v5826_v43 = vpop.xlane.xlu1 %5825 }
0x2d8b   :  { %vm5827_vm15 = vcmp.eq.f32.partialorder %v5824_v33, %v5826_v43  ;;  %v5832_v59 = vcvt.f32.s32 %v5826_v43  ;;  %v17298_v33 = vld [vmem:[#allocation50_spill] sm:$0xff]  ;;  %v17303_v43 = vld [vmem:[#allocation55_spill] sm:$0xff] }
0x2d8c   :  { %v5828_v42 = vsel %vm5827_vm15, %v5823_v50, inf  ;;  %v17302_v50 = vld [vmem:[#allocation54_spill] sm:$0xff] }
0x2d8d   :  { %5829 = vmin.xlane.f32.xlu1 %v5828_v42  ;;  %v5833_v32 = vshll.u32 %v5832_v59, 16  ;;  %v17294_v59 = vld [vmem:[#allocation46_spill] sm:$0xff]  ;;  %v17304_v42 = vld [vmem:[#allocation56_spill] sm:$0xff] }
0x2e1a   :  { %v5830_v16 = vpop.xlane.xlu1 %5829 }
0x2e1b   :  { %v5831_v61 = vcvt.f32.s32 %v5830_v16  ;;  %v17305_v16 = vld [vmem:[#allocation57_spill] sm:$0xff] }
0x2e1d   :  { %v5834_v2 = vadd.s32 %v5833_v32, %v5831_v61  ;;  %v17296_v61 = vld [vmem:[#allocation48_spill] sm:$0xff]  ;;  %v17297_v32 = vld [vmem:[#allocation49_spill] sm:$0xff] }
0x2e1f   :  { %v16247_v47 = vsel %vm5843_vm1, %v5834_v2, %v16050_v51  ;;  %vm5846_vm3 = vcmp.eq.s32.totalorder %v15065_v62, %v5834_v2  ;;  %v17295_v51 = vld [vmem:[#allocation47_spill] sm:$0xff]  ;;  %v17300_v2 = vld [vmem:[#allocation52_spill] sm:$0xff] }
0x2e20   :  { %17292 = vst [vmem:[#allocation39_spill] sm:$0xff] %v16247_v47  ;;  %8067 = vmatmul.mubr.msk.f32.vlgmr.msra.gmra.mrb[56].mxu1 %vm5846_vm3, %v17105_v52  ;;  %10707 = vmatmul.mubr.msk.f32.vlgmr.msra.gmra.mrb[56].mxu0 %vm5846_vm3, %v17105_v52 }
0x2e21   :  { %13076 = vmatpush1.bf16.msra.mxu1 %v15075_v58  ;;  %13107 = vmatpush3.bf16.msra.mxu0 %v17293_v11 }
0x2e22   :  { %13078 = vmatprep.subr.bf16.mxu1 %v17294_v59  ;;  %13108 = vmatprep.subr.bf16.mxu0 %v17076_v54 }
0x2e23   :  { %6054 = vmatprep.mubr.f32.mxu1 %v16059_v57  ;;  %10741 = vmatprep.mubr.msk.f32.mxu0 %vm14268_vm0, %v16059_v57 }
0x2e25   :  { %13080 = vmatpush1.bf16.msra.mxu1 %v17295_v51  ;;  %13110 = vmatpush3.bf16.msra.mxu0 %v17296_v61 }
0x2e26   :  { %13082 = vmatprep.subr.bf16.mxu1 %v17297_v32  ;;  %13111 = vmatprep.subr.bf16.mxu0 %v17076_v54 }
0x2e29   :  { %13084 = vmatpush1.bf16.msra.mxu1 %v17298_v33  ;;  %13113 = vmatpush3.bf16.msra.mxu0 %v17299_v21  ;;  %v17307_v21 = vld [vmem:[#allocation59_spill] sm:$0xff]  ;;  %v17309_v33 = vld [vmem:[#allocation61_spill] sm:$0xff] }
0x2e2a   :  { %13086 = vmatprep.subr.bf16.mxu1 %v17300_v2  ;;  %13114 = vmatprep.subr.bf16.mxu0 %v17076_v54  ;;  %v17308_v2 = vld [vmem:[#allocation60_spill] sm:$0xff] }
0x2e2d   :  { %13088 = vmatpush1.bf16.msra.mxu1 %v17301_v24  ;;  %13116 = vmatpush3.bf16.msra.mxu0 %v17302_v50  ;;  %v17310_v50 = vld [vmem:[#allocation62_spill] sm:$0xff]  ;;  %v17312_v24 = vld [vmem:[#allocation64_spill] sm:$0xff] }
0x2e2e   :  { %13090 = vmatprep.subr.bf16.mxu1 %v17303_v43  ;;  %13117 = vmatprep.subr.bf16.mxu0 %v17076_v54  ;;  %v17311_v43 = vld [vmem:[#allocation63_spill] sm:$0xff] }
0x2e31   :  { %13092 = vmatpush1.bf16.msra.mxu1 %v17304_v42  ;;  %13119 = vmatpush3.bf16.msra.mxu0 %v17305_v16  ;;  %v17313_v16 = vld [vmem:[#allocation65_spill] sm:$0xff] }
0x2e32   :  { %13094 = vmatprep.subr.bf16.mxu1 %v17306_v1  ;;  %13120 = vmatprep.subr.bf16.mxu0 %v17076_v54  ;;  %v17314_v1 = vld [vmem:[#allocation66_spill] sm:$0xff] }
0x2e35   :  { %13096 = vmatpush1.bf16.msra.mxu1 %v17307_v21  ;;  %13122 = vmatpush3.bf16.msra.mxu0 %v17308_v2 }
0x2e36   :  { %13098 = vmatprep.subr.bf16.mxu1 %v17309_v33  ;;  %13123 = vmatprep.subr.bf16.mxu0 %v17076_v54  ;;  %v17315_v33 = vld [vmem:[#allocation68_spill] sm:$0xff] }
0x2e39   :  { %13100 = vmatpush1.bf16.msra.mxu1 %v17310_v50  ;;  %13125 = vmatpush3.bf16.msra.mxu0 %v17311_v43  ;;  %v17316_v50 = vld [vmem:[#allocation67_spill] sm:$0xff] }
0x2e3a   :  { %13102 = vmatprep.subr.bf16.mxu1 %v17312_v24  ;;  %13126 = vmatprep.subr.bf16.mxu0 %v17076_v54 }
0x2e3d   :  { %13104 = vmatpush1.bf16.msra.mxu1 %v17313_v16  ;;  %13128 = vmatpush3.bf16.msra.mxu0 %v17314_v1  ;;  %v17317_v1 = vld [vmem:[#allocation69_spill] sm:$0xff] }
0x2e3e   :  { %13129 = vmatprep.subr.bf16.mxu1 %v17076_v54  ;;  %13153 = vmatprep.subr.bf16.mxu0 %v17076_v54  ;;  %v17318_v16 = vld [vmem:[#allocation77_spill] sm:$0xff] }
0x2e40   :  { %6055 = vmatmul.mubr.f32.vlgmr.msra.gmra.mrb[56].mxu1 %v16135_v14  ;;  %10742 = vmatmul.mubr.f32.vlgmr.msra.gmra.mrb[58].mxu0 %v16135_v14 }
0x2e41   :  { %13131 = vmatpush3.bf16.msra.mxu1 %v17315_v33  ;;  %13155 = vmatpush3.bf16.msra.mxu0 %v17316_v50  ;;  %v17319_v33 = vld [vmem:[#allocation70_spill] sm:$0xff]  ;;  %v17320_v50 = vld [vmem:[#allocation71_spill] sm:$0xff] }
0x2e42   :  { %13132 = vmatprep.subr.bf16.mxu1 %v17076_v54  ;;  %10776 = vmatprep.mubr.msk.f32.mxu1 %vm14268_vm0, %v16059_v57 }
0x2e43   :  { %13156 = vmatprep.subr.bf16.mxu0 %v17076_v54  ;;  %10811 = vmatprep.mubr.msk.f32.mxu0 %vm14268_vm0, %v16059_v57 }
0x2e45   :  { %13134 = vmatpush3.bf16.msra.mxu1 %v17317_v1  ;;  %13158 = vmatpush3.bf16.msra.mxu0 %v17318_v16  ;;  %v17321_v1 = vld [vmem:[#allocation72_spill] sm:$0xff] }
0x2e46   :  { %13135 = vmatprep.subr.bf16.mxu1 %v17076_v54  ;;  %13159 = vmatprep.subr.bf16.mxu0 %v17076_v54 }
0x2e49   :  { %13137 = vmatpush3.bf16.msra.mxu1 %v17319_v33  ;;  %13161 = vmatpush3.bf16.msra.mxu0 %v17318_v16  ;;  %v17322_v33 = vld [vmem:[#allocation73_spill] sm:$0xff] }
0x2e4a   :  { %13138 = vmatprep.subr.bf16.mxu1 %v17076_v54  ;;  %13162 = vmatprep.subr.bf16.mxu0 %v17076_v54 }
0x2e4d   :  { %13140 = vmatpush3.bf16.msra.mxu1 %v17320_v50  ;;  %13164 = vmatpush3.bf16.msra.mxu0 %v17318_v16  ;;  %v17323_v50 = vld [vmem:[#allocation74_spill] sm:$0xff] }
0x2e4e   :  { %13141 = vmatprep.subr.bf16.mxu1 %v17076_v54  ;;  %13165 = vmatprep.subr.bf16.mxu0 %v17076_v54 }
0x2e51   :  { %13143 = vmatpush3.bf16.msra.mxu1 %v17321_v1  ;;  %13167 = vmatpush3.bf16.msra.mxu0 %v17318_v16  ;;  %v17324_v1 = vld [vmem:[#allocation75_spill] sm:$0xff] }
0x2e52   :  { %13144 = vmatprep.subr.bf16.mxu1 %v17076_v54  ;;  %13168 = vmatprep.subr.bf16.mxu0 %v17076_v54 }
0x2e55   :  { %13146 = vmatpush3.bf16.msra.mxu1 %v17322_v33  ;;  %13170 = vmatpush3.bf16.msra.mxu0 %v17318_v16 }
0x2e56   :  { %13147 = vmatprep.subr.bf16.mxu1 %v17076_v54  ;;  %13171 = vmatprep.subr.bf16.mxu0 %v17076_v54 }
0x2e59   :  { %13149 = vmatpush3.bf16.msra.mxu1 %v17323_v50  ;;  %13173 = vmatpush3.bf16.msra.mxu0 %v17318_v16 }
0x2e5a   :  { %13150 = vmatprep.subr.bf16.mxu1 %v17076_v54  ;;  %13174 = vmatprep.subr.bf16.mxu0 %v17076_v54 }
0x2e5d   :  { %13152 = vmatpush3.bf16.msra.mxu1 %v17324_v1  ;;  %13176 = vmatpush3.bf16.msra.mxu0 %v17318_v16 }
0x2e5e   :  { %13201 = vmatprep.subr.bf16.mxu0 %v17076_v54  ;;  %13177 = vmatprep.subr.bf16.mxu1 %v17076_v54 }
0x2ef3   :  { %v5986_v33 = vpop.f32.mrb[56].mxu0 }
0x2ef4   :  { %v10708_v24 = vpop.f32.mrb[57].mxu0  ;;  %v5987_v52 = vadd.f32 %v5986_v33, %v15257_v45 }
0x2f13   :  { %v6056_v43 = vpop.f32.mrb[56].mxu1  ;;  %v6127_v2 = vpop.f32.mrb[58].mxu0 }
0x2f14   :  { %v13734_v50 = vadd.f32 %v15247_v53, %v6056_v43  ;;  %v6058_v21 = vpop.f32.mrb[57].mxu1  ;;  %v10743_v42 = vpop.f32.mrb[59].mxu0  ;;  %v6128_v58 = vadd.f32 %v6127_v2, %v15254_v37 }
0x2f15   :  { %v13736_v61 = vadd.f32 %v15249_v39, %v6058_v21 }
0x2f16   :  { %v8069_v32 = vmul.f32 -1.442695, %v13734_v50 }
0x2f17   :  { %v8070_v51 = vmul.f32 -1.442695, %v13736_v61 }
0x2f18   :  { %13940 = vpow2.f32 %v8069_v32 }
0x2f19   :  { %13942 = vpow2.f32 %v8070_v51 }
0x2f22   :  { %v13941_v1 = vpop.eup %13940 }
0x2f23   :  { %v6135_v16 = vadd.f32 1.0, %v13941_v1  ;;  %v13943_v59 = vpop.eup %13942 }
0x2f24   :  { %v6142_v11 = vadd.f32 1.0, %v13943_v59 }
0x2f25   :  { %13944 = vrcp.f32 %v6135_v16 }
0x2f26   :  { %13946 = vrcp.f32 %v6142_v11 }
0x2f2f   :  { %v13945_v24 = vpop.eup %13944 }
0x2f30   :  { %v6145_v47 = vmul.f32 %v13945_v24, %v6128_v58  ;;  %v13947_v50 = vpop.eup %13946 }
0x2f31   :  { %v6148_v42 = vsub.f32 1.0, %v13947_v50  ;;  %v6150_v51 = vmul.f32 %v13947_v50, %v16135_v14 }
0x2f32   :  { %v6146_v43 = vadd.f32 %v6145_v47, %v5987_v52 }
0x2f34   :  { %13948 = vtanh.f32 %v6146_v43 }
0x2f3e   :  { %v13949_v21 = vpop.eup %13948 }
0x2f3f   :  { %v6149_v32 = vmul.f32 %v13949_v21, %v6148_v42  ;;  %v17325_v21 = vld [vmem:[#allocation89_spill] sm:$0xff] }
0x2f41   :  { %v16330_v61 = vadd.f32 %v6150_v51, %v6149_v32  ;;  %v17326_v32 = vld [vmem:[#allocation90_spill] sm:$0xff]  ;;  %v17327_v51 = vld [vmem:[#allocation91_spill] sm:$0xff] }
0x2f43   :  { %10777 = vmatmul.mubr.f32.vlgmr.msra.gmra.mrb[58].mxu1 %v16330_v61 }
0x2f44   :  { %13179 = vmatpush3.bf16.msra.mxu1 %v15292_v60  ;;  %10846 = vmatprep.mubr.msk.f32.mxu1 %vm14268_vm0, %v16059_v57 }
0x2f45   :  { %13180 = vmatprep.subr.bf16.mxu1 %v17076_v54 }
0x2f48   :  { %13182 = vmatpush3.bf16.msra.mxu1 %v15295_v49 }
0x2f49   :  { %13183 = vmatprep.subr.bf16.mxu1 %v17076_v54 }
0x2f4c   :  { %13185 = vmatpush3.bf16.msra.mxu1 %v15299_v23 }
0x2f4d   :  { %13186 = vmatprep.subr.bf16.mxu1 %v17076_v54 }
0x2f50   :  { %13188 = vmatpush3.bf16.msra.mxu1 %v17124_v48 }
0x2f51   :  { %13189 = vmatprep.subr.bf16.mxu1 %v17076_v54 }
0x2f54   :  { %13191 = vmatpush3.bf16.msra.mxu1 %v17125_v19 }
0x2f55   :  { %13192 = vmatprep.subr.bf16.mxu1 %v17076_v54 }
0x2f58   :  { %13194 = vmatpush3.bf16.msra.mxu1 %v17126_v20 }
0x2f59   :  { %13195 = vmatprep.subr.bf16.mxu1 %v17076_v54 }
0x2f5c   :  { %13197 = vmatpush3.bf16.msra.mxu1 %v15315_v10 }
0x2f5d   :  { %13198 = vmatprep.subr.bf16.mxu1 %v17076_v54 }
0x2f60   :  { %13200 = vmatpush3.bf16.msra.mxu1 %v17127_v41 }
0x2f61   :  { %13225 = vmatprep.subr.bf16.mxu1 %v17076_v54 }
0x3016   :  { %v6218_v58 = vpop.f32.mrb[58].mxu1 }
0x3017   :  { %v6219_v52 = vadd.f32 %v6218_v58, %v17128_v27  ;;  %v10778_v14 = vpop.f32.mrb[59].mxu1 }
0x3019   :  { %v6222_v1 = vsel %vm2653_vm11, %v6219_v52, -inf }
0x301a   :  { %6223 = vmax.xlane.f32.xlu1 %v6222_v1 }
0x30a7   :  { %v6224_v47 = vpop.xlane.xlu1 %6223 }
0x30a8   :  { %v6225_v11 = vsub.f32 %v6219_v52, %v6224_v47 }
0x30aa   :  { %v6226_v59 = vmul.f32 1.442695, %v6225_v11  ;;  %v17328_v11 = vld [vmem:[#allocation76_spill] sm:$0xff] }
0x30ac   :  { %13950 = vpow2.f32 %v6226_v59 }
0x30b6   :  { %v13951_v33 = vpop.eup %13950 }
0x30b7   :  { %v6228_v2 = vsel %vm2653_vm11, %v13951_v33, 0.0 }
0x30b8   :  { %6229 = vadd.xlane.f32.xlu1 %v6228_v2  ;;  %v17329_v2 = vld [vmem:[#allocation29_spill] sm:$0xff] }
0x3145   :  { %v6230_v16 = vpop.xlane.xlu1 %6229 }
0x3146   :  { %13952 = vrcp.f32 %v6230_v16  ;;  %v17330_v16 = vld [vmem:[#allocation30_spill] sm:$0xff] }
0x3150   :  { %v13953_v24 = vpop.eup %13952 }
0x3151   :  { %v6233_v43 = vmul.f32 %v13953_v24, %v13951_v33  ;;  %v17331_v24 = vld [vmem:[#allocation31_spill] sm:$0xff] }
0x3153   :  { %10812 = vmatmul.mubr.f32.vlgmr.msra.gmra.mrb[60].mxu0 %v6233_v43  ;;  %v17332_v43 = vld [vmem:[#allocation32_spill] sm:$0xff] }
0x3154   :  { %13203 = vmatpush3.bf16.msra.mxu0 %v15324_v0  ;;  %10881 = vmatprep.mubr.msk.f32.mxu0 %vm14268_vm0, %v16059_v57 }
0x3155   :  { %13204 = vmatprep.subr.bf16.mxu0 %v17076_v54 }
0x3158   :  { %13206 = vmatpush3.bf16.msra.mxu0 %v15327_v46 }
0x3159   :  { %13207 = vmatprep.subr.bf16.mxu0 %v17076_v54 }
0x315c   :  { %13209 = vmatpush3.bf16.msra.mxu0 %v17129_v15 }
0x315d   :  { %13210 = vmatprep.subr.bf16.mxu0 %v17076_v54 }
0x3160   :  { %13212 = vmatpush3.bf16.msra.mxu0 %v17130_v29 }
0x3161   :  { %13213 = vmatprep.subr.bf16.mxu0 %v17076_v54 }
0x3164   :  { %13215 = vmatpush3.bf16.msra.mxu0 %v15341_v36 }
0x3165   :  { %13216 = vmatprep.subr.bf16.mxu0 %v17076_v54 }
0x3168   :  { %13218 = vmatpush3.bf16.msra.mxu0 %v15345_v26 }
0x3169   :  { %13219 = vmatprep.subr.bf16.mxu0 %v17076_v54 }
0x316c   :  { %13221 = vmatpush3.bf16.msra.mxu0 %v15349_v7 }
0x316d   :  { %13222 = vmatprep.subr.bf16.mxu0 %v17076_v54 }
0x3170   :  { %13224 = vmatpush3.bf16.msra.mxu0 %v15353_v28 }
0x3171   :  { %13250 = vmatprep.subr.bf16.mxu0 %v14969_v8 }
0x3173   :  { %10882 = vmatmul.mubr.f32.vlgmr.msra.gmra.mrb[62].mxu0 %v16330_v61 }
0x3174   :  { %13252 = vmatpush1.bf16.msra.mxu0 %v14985_v31  ;;  %6614 = vmatprep.mubr.f32.mxu0 %v16059_v57 }
0x3175   :  { %13254 = vmatprep.subr.bf16.mxu0 %v14989_v3 }
0x3178   :  { %13256 = vmatpush1.bf16.msra.mxu0 %v14998_v5 }
0x3179   :  { %13258 = vmatprep.subr.bf16.mxu0 %v15004_v18 }
0x317c   :  { %13260 = vmatpush1.bf16.msra.mxu0 %v15011_v9 }
0x317d   :  { %13262 = vmatprep.subr.bf16.mxu0 %v15017_v22 }
0x3180   :  { %13264 = vmatpush1.bf16.msra.mxu0 %v15023_v63 }
0x3181   :  { %13266 = vmatprep.subr.bf16.mxu0 %v15029_v44 }
0x3184   :  { %13268 = vmatpush1.bf16.msra.mxu0 %v15032_v25 }
0x3185   :  { %13270 = vmatprep.subr.bf16.mxu0 %v17131_v40 }
0x3188   :  { %13272 = vmatpush1.bf16.msra.mxu0 %v15042_v55 }
0x3189   :  { %13274 = vmatprep.subr.bf16.mxu0 %v17174_v34 }
0x318c   :  { %13276 = vmatpush1.bf16.msra.mxu0 %v17175_v4 }
0x318d   :  { %13278 = vmatprep.subr.bf16.mxu0 %v17176_v13 }
0x3190   :  { %13280 = vmatpush1.bf16.msra.mxu0 %v17224_v56 }
0x3191   :  { %13306 = vmatprep.subr.bf16.mxu0 %v17225_v17 }
0x3226   :  { %v6300_v50 = vpop.f32.mrb[60].mxu0 }
0x3227   :  { %v10813_v42 = vpop.f32.mrb[61].mxu0  ;;  %10847 = vmatmul.mubr.f32.vlgmr.msra.gmra.mrb[60].mxu1 %v6300_v50  ;;  %v17333_v50 = vld [vmem:[#allocation33_spill] sm:$0xff] }
0x3228   :  { %13227 = vmatpush3.bf16.msra.mxu1 %v17226_v35  ;;  %10916 = vmatprep.mubr.msk.f32.mxu1 %vm14268_vm0, %v16059_v57  ;;  %v17334_v42 = vld [vmem:[#allocation35_spill] sm:$0xff] }
0x3229   :  { %13228 = vmatprep.subr.bf16.mxu1 %v17076_v54 }
0x322c   :  { %13230 = vmatpush3.bf16.msra.mxu1 %v17227_v30 }
0x322d   :  { %13231 = vmatprep.subr.bf16.mxu1 %v17076_v54 }
0x3230   :  { %13233 = vmatpush3.bf16.msra.mxu1 %v17274_v12 }
0x3231   :  { %13234 = vmatprep.subr.bf16.mxu1 %v17076_v54 }
0x3234   :  { %13236 = vmatpush3.bf16.msra.mxu1 %v17275_v6 }
0x3235   :  { %13237 = vmatprep.subr.bf16.mxu1 %v17076_v54 }
0x3238   :  { %13239 = vmatpush3.bf16.msra.mxu1 %v17276_v38 }
0x3239   :  { %13240 = vmatprep.subr.bf16.mxu1 %v17076_v54 }
0x323c   :  { %13242 = vmatpush3.bf16.msra.mxu1 %v17325_v21 }
0x323d   :  { %13243 = vmatprep.subr.bf16.mxu1 %v17076_v54 }
0x3240   :  { %13245 = vmatpush3.bf16.msra.mxu1 %v17326_v32 }
0x3241   :  { %13246 = vmatprep.subr.bf16.mxu1 %v17076_v54 }
0x3244   :  { %13248 = vmatpush3.bf16.msra.mxu1 %v17327_v51 }
0x3245   :  { %13281 = vmatprep.subr.bf16.mxu1 %v17076_v54 }
0x3246   :  { %v6440_v58 = vpop.f32.mrb[62].mxu0 }
0x3247   :  { %v10883_v52 = vpop.f32.mrb[63].mxu0 }
0x3248   :  { %v17336_v52 = vld [vmem:[#allocation42_spill] sm:$0xff] }
0x32fa   :  { %v6370_v14 = vpop.f32.mrb[60].mxu1 }
0x32fb   :  { %v6441_v1 = vadd.f32 %v6440_v58, %v6370_v14  ;;  %v10848_v47 = vpop.f32.mrb[61].mxu1  ;;  %v17335_v58 = vld [vmem:[#allocation38_spill] sm:$0xff] }
0x32fd   :  { %v6444_v59 = vadd.f32 %v17328_v11, %v6441_v1  ;;  %v17337_v1 = vld [vmem:[#allocation82_spill] sm:$0xff] }
0x32ff   :  { %13954 = vtanh.f32 %v6444_v59 }
0x3309   :  { %v13955_v33 = vpop.eup %13954 }
0x330a   :  { %10917 = vmatmul.mubr.f32.vlgmr.msra.gmra.mrb[62].mxu1 %v13955_v33 }
0x330b   :  { %13283 = vmatpush3.bf16.msra.mxu1 %v17329_v2  ;;  %10951 = vmatprep.mubr.msk.f32.mxu1 %vm14268_vm0, %v16059_v57 }
0x330c   :  { %13284 = vmatprep.subr.bf16.mxu1 %v17076_v54 }
0x330f   :  { %13286 = vmatpush3.bf16.msra.mxu1 %v17330_v16 }
0x3310   :  { %13287 = vmatprep.subr.bf16.mxu1 %v17076_v54 }
0x3313   :  { %13289 = vmatpush3.bf16.msra.mxu1 %v17331_v24 }
0x3314   :  { %13290 = vmatprep.subr.bf16.mxu1 %v17076_v54 }
0x3317   :  { %13292 = vmatpush3.bf16.msra.mxu1 %v17332_v43 }
0x3318   :  { %13293 = vmatprep.subr.bf16.mxu1 %v17076_v54 }
0x331b   :  { %13295 = vmatpush3.bf16.msra.mxu1 %v17333_v50 }
0x331c   :  { %13296 = vmatprep.subr.bf16.mxu1 %v17076_v54 }
0x331f   :  { %13298 = vmatpush3.bf16.msra.mxu1 %v17334_v42 }
0x3320   :  { %13299 = vmatprep.subr.bf16.mxu1 %v17076_v54 }
0x3323   :  { %13301 = vmatpush3.bf16.msra.mxu1 %v17335_v58 }
0x3324   :  { %13302 = vmatprep.subr.bf16.mxu1 %v17076_v54 }
0x3327   :  { %13304 = vmatpush3.bf16.msra.mxu1 %v17336_v52 }
0x3328   :  { %13337 = vmatprep.subr.bf16.mxu1 %v17076_v54 }
0x33dd   :  { %v6512_v14 = vpop.f32.mrb[62].mxu1 }
0x33de   :  { %v16428_v47 = vadd.f32 %v17337_v1, %v6512_v14  ;;  %v10918_v11 = vpop.f32.mrb[63].mxu1 }
0x33e0   :  { %17338 = vst [vmem:[#allocation92_spill] sm:$0xff] %v16428_v47  ;;  %v6516_v59 = vsel %vm2653_vm11, %v16428_v47, -inf }
0x33e1   :  { %6517 = vmax.xlane.f32.xlu1 %v6516_v59 }
0x346e   :  { %v16432_v33 = vpop.xlane.xlu1 %6517 }
0x346f   :  { %17339 = vst [vmem:[#allocation93_spill] sm:$0xff] %v16432_v33  ;;  %vm6519_vm4 = vcmp.eq.f32.partialorder %v16428_v47, %v16432_v33  ;;  %v17340_v33 = vld [vmem:[#allocation39_spill] sm:$0xff] }
0x3470   :  { %v6520_v58 = vsel %vm6519_vm4, %v15065_v62, 128 }
0x3471   :  { %v6521_v52 = vsel %vm2653_vm11, %v6520_v58, 2147483647  ;;  %v17342_v58 = vmov 1.0  }
0x3472   :  { %v6523_v42 = vshra.s32 %v6521_v52, 16  ;;  %v6522_v43 = vand.u32 65535, %v6521_v52  ;;  %v17348_v52 = vld [vmem:[#allocation49_spill] sm:$0xff] }
0x3474   :  { %v6525_v50 = vcvt.s32.f32 %v6523_v42  ;;  %v6524_v1 = vcvt.s32.f32 %v6522_v43  ;;  %v17343_v43 = vld [vmem:[#allocation44_spill] sm:$0xff] }
0x3476   :  { %6526 = vmin.xlane.f32.xlu1 %v6525_v50 }
0x3503   :  { %v6527_v14 = vpop.xlane.xlu1 %6526 }
0x3504   :  { %vm6528_vm5 = vcmp.eq.f32.partialorder %v6525_v50, %v6527_v14  ;;  %v6533_v24 = vcvt.f32.s32 %v6527_v14  ;;  %v17344_v50 = vld [vmem:[#allocation45_spill] sm:$0xff]  ;;  %v17351_v14 = vld [vmem:[#allocation52_spill] sm:$0xff] }
0x3505   :  { %v6529_v11 = vsel %vm6528_vm5, %v6524_v1, inf  ;;  %v17352_v1 = vld [vmem:[#allocation53_spill] sm:$0xff] }
0x3506   :  { %6530 = vmin.xlane.f32.xlu0 %v6529_v11  ;;  %v6534_v16 = vshll.u32 %v6533_v24, 16  ;;  %v17345_v24 = vld [vmem:[#allocation46_spill] sm:$0xff] }
0x3507   :  { %v17353_v11 = vld [vmem:[#allocation54_spill] sm:$0xff] }
0x3593   :  { %v6531_v59 = vpop.xlane.xlu0 %6530 }
0x3594   :  { %v6532_v2 = vcvt.f32.s32 %v6531_v59  ;;  %v17355_v59 = vld [vmem:[#allocation56_spill] sm:$0xff] }
0x3596   :  { %v6535_v47 = vadd.s32 %v6534_v16, %v6532_v2  ;;  %v17346_v2 = vld [vmem:[#allocation47_spill] sm:$0xff]  ;;  %v17347_v16 = vld [vmem:[#allocation48_spill] sm:$0xff] }
0x3598   :  { %vm6547_vm9 = vcmp.eq.s32.totalorder %v15065_v62, %v6535_v47  ;;  %v16443_v42 = vsel %vm6544_vm7, %v6535_v47, %v17340_v33  ;;  %v17349_v47 = vld [vmem:[#allocation50_spill] sm:$0xff]  ;;  %v17350_v33 = vld [vmem:[#allocation51_spill] sm:$0xff] }
0x3599   :  { %17341 = vst [vmem:[#allocation40_spill] sm:$0xff] %v16443_v42  ;;  %8072 = vmatmul.mubr.msk.f32.vlgmr.msra.gmra.mrb[64].mxu0 %vm6547_vm9, %v17342_v58  ;;  %10952 = vmatmul.mubr.msk.f32.vlgmr.msra.gmra.mrb[64].mxu1 %vm6547_vm9, %v17342_v58 }
0x359a   :  { %13308 = vmatpush1.bf16.msra.mxu0 %v17343_v43  ;;  %13339 = vmatpush3.bf16.msra.mxu1 %v17344_v50 }
0x359b   :  { %13310 = vmatprep.subr.bf16.mxu0 %v17345_v24  ;;  %13340 = vmatprep.subr.bf16.mxu1 %v17076_v54 }
0x359c   :  { %6755 = vmatprep.mubr.f32.mxu0 %v16059_v57  ;;  %10986 = vmatprep.mubr.msk.f32.mxu1 %vm14268_vm0, %v16059_v57  ;;  %v17354_v57 = vld [vmem:[#allocation55_spill] sm:$0xff] }
0x359e   :  { %13312 = vmatpush1.bf16.msra.mxu0 %v17346_v2  ;;  %13342 = vmatpush3.bf16.msra.mxu1 %v17347_v16  ;;  %v17357_v16 = vld [vmem:[#allocation58_spill] sm:$0xff] }
0x359f   :  { %13314 = vmatprep.subr.bf16.mxu0 %v17348_v52  ;;  %13343 = vmatprep.subr.bf16.mxu1 %v17076_v54  ;;  %v17356_v52 = vld [vmem:[#allocation57_spill] sm:$0xff] }
0x35a2   :  { %13316 = vmatpush1.bf16.msra.mxu0 %v17349_v47  ;;  %13345 = vmatpush3.bf16.msra.mxu1 %v17350_v33  ;;  %v17358_v33 = vld [vmem:[#allocation59_spill] sm:$0xff]  ;;  %v17360_v47 = vld [vmem:[#allocation61_spill] sm:$0xff] }
0x35a3   :  { %13318 = vmatprep.subr.bf16.mxu0 %v17351_v14  ;;  %13346 = vmatprep.subr.bf16.mxu1 %v17076_v54  ;;  %v17359_v14 = vld [vmem:[#allocation60_spill] sm:$0xff] }
0x35a6   :  { %13320 = vmatpush1.bf16.msra.mxu0 %v17352_v1  ;;  %13348 = vmatpush3.bf16.msra.mxu1 %v17353_v11  ;;  %v17361_v11 = vld [vmem:[#allocation62_spill] sm:$0xff]  ;;  %v17363_v1 = vld [vmem:[#allocation64_spill] sm:$0xff] }
0x35a7   :  { %13322 = vmatprep.subr.bf16.mxu0 %v17354_v57  ;;  %13349 = vmatprep.subr.bf16.mxu1 %v17076_v54  ;;  %v17362_v57 = vld [vmem:[#allocation63_spill] sm:$0xff] }
0x35aa   :  { %13324 = vmatpush1.bf16.msra.mxu0 %v17355_v59  ;;  %13351 = vmatpush3.bf16.msra.mxu1 %v17356_v52  ;;  %v17364_v52 = vld [vmem:[#allocation65_spill] sm:$0xff] }
0x35ab   :  { %13326 = vmatprep.subr.bf16.mxu0 %v17357_v16  ;;  %13352 = vmatprep.subr.bf16.mxu1 %v17076_v54  ;;  %v17365_v16 = vld [vmem:[#allocation66_spill] sm:$0xff] }
0x35ae   :  { %13328 = vmatpush1.bf16.msra.mxu0 %v17358_v33  ;;  %13354 = vmatpush3.bf16.msra.mxu1 %v17359_v14 }
0x35af   :  { %13330 = vmatprep.subr.bf16.mxu0 %v17360_v47  ;;  %13355 = vmatprep.subr.bf16.mxu1 %v17076_v54  ;;  %v17366_v47 = vld [vmem:[#allocation68_spill] sm:$0xff] }
0x35b2   :  { %13332 = vmatpush1.bf16.msra.mxu0 %v17361_v11  ;;  %13357 = vmatpush3.bf16.msra.mxu1 %v17362_v57  ;;  %v17367_v11 = vld [vmem:[#allocation67_spill] sm:$0xff] }
0x35b3   :  { %13334 = vmatprep.subr.bf16.mxu0 %v17363_v1  ;;  %13358 = vmatprep.subr.bf16.mxu1 %v17076_v54  ;;  %v16487_v1 = vld [vmem:[#allocation2 + $0x8] sm:$0xff] }
0x35b6   :  { %13336 = vmatpush1.bf16.msra.mxu0 %v17364_v52  ;;  %13360 = vmatpush3.bf16.msra.mxu1 %v17365_v16  ;;  %v17368_v16 = vld [vmem:[#allocation69_spill] sm:$0xff] }
0x35b7   :  { %13361 = vmatprep.subr.bf16.mxu0 %v17076_v54  ;;  %13385 = vmatprep.subr.bf16.mxu1 %v17076_v54  ;;  %v17369_v52 = vld [vmem:[#allocation77_spill] sm:$0xff] }
0x35b9   :  { %6756 = vmatmul.mubr.f32.vlgmr.msra.gmra.mrb[64].mxu0 %v16330_v61  ;;  %10987 = vmatmul.mubr.f32.vlgmr.msra.gmra.mrb[66].mxu1 %v16330_v61 }
0x35ba   :  { %13363 = vmatpush3.bf16.msra.mxu0 %v17366_v47  ;;  %13387 = vmatpush3.bf16.msra.mxu1 %v17367_v11  ;;  %v17370_v11 = vld [vmem:[#allocation70_spill] sm:$0xff]  ;;  %v17371_v47 = vld [vmem:[#allocation71_spill] sm:$0xff] }
0x35bb   :  { %13364 = vmatprep.subr.bf16.mxu0 %v17076_v54  ;;  %11021 = vmatprep.mubr.msk.f32.mxu0 %vm14268_vm0, %v16487_v1 }
0x35bc   :  { %13388 = vmatprep.subr.bf16.mxu1 %v17076_v54  ;;  %11056 = vmatprep.mubr.msk.f32.mxu1 %vm14268_vm0, %v16487_v1 }
0x35be   :  { %13366 = vmatpush3.bf16.msra.mxu0 %v17368_v16  ;;  %13390 = vmatpush3.bf16.msra.mxu1 %v17369_v52  ;;  %v17372_v16 = vld [vmem:[#allocation72_spill] sm:$0xff] }
0x35bf   :  { %13367 = vmatprep.subr.bf16.mxu0 %v17076_v54  ;;  %13391 = vmatprep.subr.bf16.mxu1 %v17076_v54 }
0x35c2   :  { %13369 = vmatpush3.bf16.msra.mxu0 %v17370_v11  ;;  %13393 = vmatpush3.bf16.msra.mxu1 %v17369_v52  ;;  %v17373_v11 = vld [vmem:[#allocation73_spill] sm:$0xff] }
0x35c3   :  { %13370 = vmatprep.subr.bf16.mxu0 %v17076_v54  ;;  %13394 = vmatprep.subr.bf16.mxu1 %v17076_v54 }
0x35c6   :  { %13372 = vmatpush3.bf16.msra.mxu0 %v17371_v47  ;;  %13396 = vmatpush3.bf16.msra.mxu1 %v17369_v52  ;;  %v17374_v47 = vld [vmem:[#allocation74_spill] sm:$0xff] }
0x35c7   :  { %13373 = vmatprep.subr.bf16.mxu0 %v17076_v54  ;;  %13397 = vmatprep.subr.bf16.mxu1 %v17076_v54 }
0x35ca   :  { %13375 = vmatpush3.bf16.msra.mxu0 %v17372_v16  ;;  %13399 = vmatpush3.bf16.msra.mxu1 %v17369_v52  ;;  %v17375_v16 = vld [vmem:[#allocation75_spill] sm:$0xff] }
0x35cb   :  { %13376 = vmatprep.subr.bf16.mxu0 %v17076_v54  ;;  %13400 = vmatprep.subr.bf16.mxu1 %v17076_v54 }
0x35ce   :  { %13378 = vmatpush3.bf16.msra.mxu0 %v17373_v11  ;;  %13402 = vmatpush3.bf16.msra.mxu1 %v17369_v52 }
0x35cf   :  { %13379 = vmatprep.subr.bf16.mxu0 %v17076_v54  ;;  %13403 = vmatprep.subr.bf16.mxu1 %v17076_v54 }
0x35d2   :  { %13381 = vmatpush3.bf16.msra.mxu0 %v17374_v47  ;;  %13405 = vmatpush3.bf16.msra.mxu1 %v17369_v52 }
0x35d3   :  { %13382 = vmatprep.subr.bf16.mxu0 %v17076_v54  ;;  %13406 = vmatprep.subr.bf16.mxu1 %v17076_v54 }
0x35d6   :  { %13384 = vmatpush3.bf16.msra.mxu0 %v17375_v16  ;;  %13408 = vmatpush3.bf16.msra.mxu1 %v17369_v52 }
0x35d7   :  { %13433 = vmatprep.subr.bf16.mxu1 %v17076_v54  ;;  %13409 = vmatprep.subr.bf16.mxu0 %v17076_v54 }
0x366c   :  { %v6687_v11 = vpop.f32.mrb[64].mxu1 }
0x366d   :  { %v10953_v57 = vpop.f32.mrb[65].mxu1  ;;  %v6688_v51 = vadd.f32 %v6687_v11, %v15257_v45 }
0x368c   :  { %v6757_v14 = vpop.f32.mrb[64].mxu0  ;;  %v6828_v33 = vpop.f32.mrb[66].mxu1 }
0x368d   :  { %v13738_v47 = vadd.f32 %v15247_v53, %v6757_v14  ;;  %v6759_v59 = vpop.f32.mrb[65].mxu0  ;;  %v10988_v2 = vpop.f32.mrb[67].mxu1  ;;  %v6829_v62 = vadd.f32 %v6828_v33, %v15254_v37 }
0x368e   :  { %v13740_v50 = vadd.f32 %v15249_v39, %v6759_v59 }
0x368f   :  { %v8074_v24 = vmul.f32 -1.442695, %v13738_v47 }
0x3690   :  { %v8075_v43 = vmul.f32 -1.442695, %v13740_v50 }
0x3691   :  { %13956 = vpow2.f32 %v8074_v24 }
0x3692   :  { %13958 = vpow2.f32 %v8075_v43 }
0x369b   :  { %v13957_v16 = vpop.eup %13956 }
0x369c   :  { %v6836_v52 = vadd.f32 1.0, %v13957_v16  ;;  %v13959_v58 = vpop.eup %13958 }
0x369d   :  { %v6843_v42 = vadd.f32 1.0, %v13959_v58 }
0x369e   :  { %13960 = vrcp.f32 %v6836_v52 }
0x369f   :  { %13962 = vrcp.f32 %v6843_v42 }
0x36a8   :  { %v13961_v57 = vpop.eup %13960 }
0x36a9   :  { %v6846_v32 = vmul.f32 %v13961_v57, %v6829_v62  ;;  %v13963_v2 = vpop.eup %13962 }
0x36aa   :  { %v6849_v47 = vsub.f32 1.0, %v13963_v2  ;;  %v6851_v43 = vmul.f32 %v13963_v2, %v16330_v61  ;;  %v17383_v2 = vld [vmem:[#allocation35_spill] sm:$0xff] }
0x36ab   :  { %v6847_v14 = vadd.f32 %v6846_v32, %v6688_v51 }
0x36ad   :  { %13964 = vtanh.f32 %v6847_v14 }
0x36b7   :  { %v13965_v59 = vpop.eup %13964 }
0x36b8   :  { %v6850_v24 = vmul.f32 %v13965_v59, %v6849_v47  ;;  %v17384_v47 = vld [vmem:[#allocation38_spill] sm:$0xff] }
0x36b9   :  { %v17385_v59 = vld [vmem:[#allocation42_spill] sm:$0xff] }
0x36ba   :  { %v16527_v50 = vadd.f32 %v6851_v43, %v6850_v24  ;;  %v16632_v43 = vld [vmem:[%s16872_s14] sm:$0x1]  ;;  %s14271_s14 = smov [#allocation20]  }
0x36bb   :  { %s7967_s19 = sshll.u32 %s14271_s14, 4  ;;  %s7968_s19 = int_to_ptr.vmem [resolvable:$true] %s7967_s19 }
0x36bc   :  { %11022 = vmatmul.mubr.f32.vlgmr.msra.gmra.mrb[66].mxu0 %v16527_v50  ;;  %s14196_s27 = scalar_lea.vmem %s7968_s19, 16  ;;  %s14200_s4 = scalar_lea.vmem %s7968_s19, 32 }
0x36bd   :  { %13411 = vmatpush3.bf16.msra.mxu0 %v15292_v60  ;;  %11091 = vmatprep.mubr.msk.f32.mxu0 %vm14268_vm0, %v16487_v1  ;;  %p14197_p13 = scmp.ne.s32.totalorder %s7968_s19, %s14196_s27  ;;  %p14201_p0 = scmp.lt.s32.totalorder %s7968_s19, %s7968_s19 }
0x36be   :  { %13412 = vmatprep.subr.bf16.mxu0 %v17076_v54  ;;  %p14202_p1 = scmp.lt.s32.totalorder %s14200_s4, %s14196_s27 }
0x36c0   :  { %p14203_p2 = por %p14202_p1, %p14201_p0 }
0x36c1   :  { %13414 = vmatpush3.bf16.msra.mxu0 %v15295_v49 }
0x36c2   :  { %13415 = vmatprep.subr.bf16.mxu0 %v17076_v54  ;;  %p14204_p3 = pnand %p14203_p2, %p14197_p13 }
0x36c5   :  { %13417 = vmatpush3.bf16.msra.mxu0 %v15299_v23 }
0x36c6   :  { %13418 = vmatprep.subr.bf16.mxu0 %v17076_v54 }
0x36c9   :  { %13420 = vmatpush3.bf16.msra.mxu0 %v17124_v48 }
0x36ca   :  { %13421 = vmatprep.subr.bf16.mxu0 %v17076_v54 }
0x36cd   :  { %13423 = vmatpush3.bf16.msra.mxu0 %v17125_v19 }
0x36ce   :  { %13424 = vmatprep.subr.bf16.mxu0 %v17076_v54 }
0x36d1   :  { %13426 = vmatpush3.bf16.msra.mxu0 %v17126_v20 }
0x36d2   :  { %13427 = vmatprep.subr.bf16.mxu0 %v17076_v54 }
0x36d5   :  { %13429 = vmatpush3.bf16.msra.mxu0 %v15315_v10 }
0x36d6   :  { %13430 = vmatprep.subr.bf16.mxu0 %v17076_v54 }
0x36d9   :  { %13432 = vmatpush3.bf16.msra.mxu0 %v17127_v41 }
0x36da   :  { %13457 = vmatprep.subr.bf16.mxu0 %v17076_v54 }
0x378f   :  { %v6919_v62 = vpop.f32.mrb[66].mxu0 }
0x3790   :  { %v6920_v61 = vadd.f32 %v6919_v62, %v17128_v27  ;;  %v11023_v32 = vpop.f32.mrb[67].mxu0 }
0x3792   :  { %v6923_v51 = vsel %vm2653_vm11, %v6920_v61, -inf }
0x3793   :  { %6924 = vmax.xlane.f32.xlu1 %v6923_v51 }
0x3820   :  { %v6925_v42 = vpop.xlane.xlu1 %6924 }
0x3821   :  { %v6926_v58 = vsub.f32 %v6920_v61, %v6925_v42  ;;  %v17386_v42 = vld [vmem:[#allocation41_spill] sm:$0xff] }
0x3822   :  { %vm7245_vm14 = vcmp.eq.s32.totalorder %v17386_v42, 6 }
0x3823   :  { %v6927_v16 = vmul.f32 1.442695, %v6926_v58 }
0x3825   :  { %13966 = vpow2.f32 %v6927_v16 }
0x382f   :  { %v13967_v52 = vpop.eup %13966 }
0x3830   :  { %v6929_v33 = vsel %vm2653_vm11, %v13967_v52, 0.0 }
0x3831   :  { %6930 = vadd.xlane.f32.xlu0 %v6929_v33 }
0x38be   :  { %v6931_v11 = vpop.xlane.xlu0 %6930 }
0x38bf   :  { %13968 = vrcp.f32 %v6931_v11 }
0x38c9   :  { %v13969_v57 = vpop.eup %13968 }
0x38ca   :  { %v6934_v14 = vmul.f32 %v13969_v57, %v13967_v52 }
0x38cc   :  { %11057 = vmatmul.mubr.f32.vlgmr.msra.gmra.mrb[68].mxu1 %v6934_v14 }
0x38cd   :  { %13435 = vmatpush3.bf16.msra.mxu1 %v15324_v0  ;;  %11126 = vmatprep.mubr.msk.f32.mxu1 %vm14268_vm0, %v16487_v1 }
0x38ce   :  { %13436 = vmatprep.subr.bf16.mxu1 %v17076_v54 }
0x38d1   :  { %13438 = vmatpush3.bf16.msra.mxu1 %v15327_v46 }
0x38d2   :  { %13439 = vmatprep.subr.bf16.mxu1 %v17076_v54 }
0x38d5   :  { %13441 = vmatpush3.bf16.msra.mxu1 %v17129_v15 }
0x38d6   :  { %13442 = vmatprep.subr.bf16.mxu1 %v17076_v54 }
0x38d9   :  { %13444 = vmatpush3.bf16.msra.mxu1 %v17130_v29 }
0x38da   :  { %13445 = vmatprep.subr.bf16.mxu1 %v17076_v54 }
0x38dd   :  { %13447 = vmatpush3.bf16.msra.mxu1 %v15341_v36 }
0x38de   :  { %13448 = vmatprep.subr.bf16.mxu1 %v17076_v54 }
0x38e1   :  { %13450 = vmatpush3.bf16.msra.mxu1 %v15345_v26 }
0x38e2   :  { %13451 = vmatprep.subr.bf16.mxu1 %v17076_v54 }
0x38e5   :  { %13453 = vmatpush3.bf16.msra.mxu1 %v15349_v7 }
0x38e6   :  { %13454 = vmatprep.subr.bf16.mxu1 %v17076_v54 }
0x38e9   :  { %13456 = vmatpush3.bf16.msra.mxu1 %v15353_v28 }
0x38ea   :  { %13482 = vmatprep.subr.bf16.mxu1 %v14969_v8 }
0x38ec   :  { %11127 = vmatmul.mubr.f32.vlgmr.msra.gmra.mrb[70].mxu1 %v16527_v50 }
0x38ed   :  { %13484 = vmatpush1.bf16.msra.mxu1 %v14985_v31  ;;  %7315 = vmatprep.mubr.f32.mxu1 %v16487_v1 }
0x38ee   :  { %13486 = vmatprep.subr.bf16.mxu1 %v14989_v3  ;;  %v17376_v3 = vld [vmem:[#allocation90_spill] sm:$0xff] }
0x38f1   :  { %13488 = vmatpush1.bf16.msra.mxu1 %v14998_v5  ;;  %v17377_v5 = vld [vmem:[#allocation91_spill] sm:$0xff] }
0x38f2   :  { %13490 = vmatprep.subr.bf16.mxu1 %v15004_v18 }
0x38f5   :  { %13492 = vmatpush1.bf16.msra.mxu1 %v15011_v9 }
0x38f6   :  { %13494 = vmatprep.subr.bf16.mxu1 %v15017_v22 }
0x38f9   :  { %13496 = vmatpush1.bf16.msra.mxu1 %v15023_v63 }
0x38fa   :  { %13498 = vmatprep.subr.bf16.mxu1 %v15029_v44 }
0x38fd   :  { %13500 = vmatpush1.bf16.msra.mxu1 %v15032_v25  ;;  %v16608_v25 = vld [vmem:[%s16870_s12] sm:$0x1] }
0x38fe   :  { %13502 = vmatprep.subr.bf16.mxu1 %v17131_v40 }
0x3901   :  { %13504 = vmatpush1.bf16.msra.mxu1 %v15042_v55 }
0x3902   :  { %13506 = vmatprep.subr.bf16.mxu1 %v17174_v34  ;;  %v17378_v34 = vld [vmem:[#allocation29_spill] sm:$0xff] }
0x3905   :  { %13508 = vmatpush1.bf16.msra.mxu1 %v17175_v4  ;;  %v17379_v4 = vld [vmem:[#allocation30_spill] sm:$0xff] }
0x3906   :  { %13510 = vmatprep.subr.bf16.mxu1 %v17176_v13  ;;  %v17380_v13 = vld [vmem:[#allocation31_spill] sm:$0xff] }
0x3909   :  { %13512 = vmatpush1.bf16.msra.mxu1 %v17224_v56  ;;  %v17381_v56 = vld [vmem:[#allocation32_spill] sm:$0xff] }
0x390a   :  { %13538 = vmatprep.subr.bf16.mxu1 %v17225_v17  ;;  %v17382_v17 = vld [vmem:[#allocation33_spill] sm:$0xff] }
0x399f   :  { %v7001_v8 = vpop.f32.mrb[68].mxu1 }
0x39a0   :  { %v11058_v31 = vpop.f32.mrb[69].mxu1  ;;  %11092 = vmatmul.mubr.f32.vlgmr.msra.gmra.mrb[68].mxu0 %v7001_v8 }
0x39a1   :  { %13459 = vmatpush3.bf16.msra.mxu0 %v17226_v35  ;;  %11161 = vmatprep.mubr.msk.f32.mxu0 %vm14268_vm0, %v16487_v1 }
0x39a2   :  { %13460 = vmatprep.subr.bf16.mxu0 %v17076_v54 }
0x39a5   :  { %13462 = vmatpush3.bf16.msra.mxu0 %v17227_v30 }
0x39a6   :  { %13463 = vmatprep.subr.bf16.mxu0 %v17076_v54 }
0x39a9   :  { %13465 = vmatpush3.bf16.msra.mxu0 %v17274_v12 }
0x39aa   :  { %13466 = vmatprep.subr.bf16.mxu0 %v17076_v54 }
0x39ad   :  { %13468 = vmatpush3.bf16.msra.mxu0 %v17275_v6 }
0x39ae   :  { %13469 = vmatprep.subr.bf16.mxu0 %v17076_v54 }
0x39b1   :  { %13471 = vmatpush3.bf16.msra.mxu0 %v17276_v38 }
0x39b2   :  { %13472 = vmatprep.subr.bf16.mxu0 %v17076_v54 }
0x39b5   :  { %13474 = vmatpush3.bf16.msra.mxu0 %v17325_v21 }
0x39b6   :  { %13475 = vmatprep.subr.bf16.mxu0 %v17076_v54 }
0x39b9   :  { %13477 = vmatpush3.bf16.msra.mxu0 %v17376_v3 }
0x39ba   :  { %13478 = vmatprep.subr.bf16.mxu0 %v17076_v54 }
0x39bd   :  { %13480 = vmatpush3.bf16.msra.mxu0 %v17377_v5 }
0x39be   :  { %13513 = vmatprep.subr.bf16.mxu0 %v17076_v54 }
0x39bf   :  { %v7141_v18 = vpop.f32.mrb[70].mxu1 }
0x39c0   :  { %v11128_v9 = vpop.f32.mrb[71].mxu1 }
0x3a73   :  { %v7071_v22 = vpop.f32.mrb[68].mxu0 }
0x3a74   :  { %v7142_v63 = vadd.f32 %v7141_v18, %v7071_v22  ;;  %v11093_v44 = vpop.f32.mrb[69].mxu0 }
0x3a75   :  { %v17387_v44 = vld [vmem:[#allocation40_spill] sm:$0xff] }
0x3a76   :  { %v7145_v55 = vadd.f32 %v16608_v25, %v7142_v63 }
0x3a78   :  { %13970 = vtanh.f32 %v7145_v55 }
0x3a82   :  { %v13971_v40 = vpop.eup %13970 }
0x3a83   :  { %11162 = vmatmul.mubr.f32.vlgmr.msra.gmra.mrb[70].mxu0 %v13971_v40  ;;  %v17388_v40 = vmov 1.0  }
0x3a84   :  { %13515 = vmatpush3.bf16.msra.mxu0 %v17378_v34  ;;  %11196 = vmatprep.mubr.msk.f32.mxu0 %vm14268_vm0, %v16487_v1  ;;  %v17389_v34 = vld [vmem:[#allocation44_spill] sm:$0xff] }
0x3a85   :  { %13516 = vmatprep.subr.bf16.mxu0 %v17076_v54 }
0x3a88   :  { %13518 = vmatpush3.bf16.msra.mxu0 %v17379_v4  ;;  %v17390_v4 = vld [vmem:[#allocation45_spill] sm:$0xff] }
0x3a89   :  { %13519 = vmatprep.subr.bf16.mxu0 %v17076_v54 }
0x3a8c   :  { %13521 = vmatpush3.bf16.msra.mxu0 %v17380_v13  ;;  %v17391_v13 = vld [vmem:[#allocation46_spill] sm:$0xff] }
0x3a8d   :  { %13522 = vmatprep.subr.bf16.mxu0 %v17076_v54 }
0x3a90   :  { %13524 = vmatpush3.bf16.msra.mxu0 %v17381_v56  ;;  %v17392_v56 = vld [vmem:[#allocation47_spill] sm:$0xff] }
0x3a91   :  { %13525 = vmatprep.subr.bf16.mxu0 %v17076_v54 }
0x3a94   :  { %13527 = vmatpush3.bf16.msra.mxu0 %v17382_v17  ;;  %v17393_v17 = vld [vmem:[#allocation48_spill] sm:$0xff] }
0x3a95   :  { %13528 = vmatprep.subr.bf16.mxu0 %v17076_v54 }
0x3a98   :  { %13530 = vmatpush3.bf16.msra.mxu0 %v17383_v2  ;;  %v17394_v2 = vld [vmem:[#allocation49_spill] sm:$0xff] }
0x3a99   :  { %13531 = vmatprep.subr.bf16.mxu0 %v17076_v54 }
0x3a9c   :  { %13533 = vmatpush3.bf16.msra.mxu0 %v17384_v47  ;;  %v17395_v47 = vld [vmem:[#allocation50_spill] sm:$0xff] }
0x3a9d   :  { %13534 = vmatprep.subr.bf16.mxu0 %v17076_v54 }
0x3aa0   :  { %13536 = vmatpush3.bf16.msra.mxu0 %v17385_v59  ;;  %v17396_v59 = vld [vmem:[#allocation51_spill] sm:$0xff] }
0x3aa1   :  { %13569 = vmatprep.subr.bf16.mxu0 %v17076_v54 }
0x3b56   :  { %v7213_v24 = vpop.f32.mrb[70].mxu0 }
0x3b57   :  { %v16635_v62 = vadd.f32 %v16632_v43, %v7213_v24  ;;  %v11163_v61 = vpop.f32.mrb[71].mxu0  ;;  %v17397_v24 = vld [vmem:[#allocation52_spill] sm:$0xff] }
0x3b58   :  { %v17398_v61 = vld [vmem:[#allocation53_spill] sm:$0xff] }
0x3b59   :  { %v7217_v32 = vsel %vm2653_vm11, %v16635_v62, -inf }
0x3b5a   :  { %7218 = vmax.xlane.f32.xlu1 %v7217_v32  ;;  %v17399_v32 = vld [vmem:[#allocation54_spill] sm:$0xff] }
0x3be7   :  { %v16639_v51 = vpop.xlane.xlu1 %7218 }
0x3be8   :  { %vm7220_vm10 = vcmp.eq.f32.partialorder %v16635_v62, %v16639_v51 }
0x3be9   :  { %v7221_v58 = vsel %vm7220_vm10, %v17386_v42, 128 }
0x3bea   :  { %v7222_v16 = vsel %vm2653_vm11, %v7221_v58, 2147483647  ;;  %v17400_v58 = vld [vmem:[#allocation55_spill] sm:$0xff] }
0x3beb   :  { %v7224_v52 = vshra.s32 %v7222_v16, 16  ;;  %v7223_v11 = vand.u32 65535, %v7222_v16  ;;  %v17401_v16 = vld [vmem:[#allocation56_spill] sm:$0xff] }
0x3bed   :  { %v7226_v33 = vcvt.s32.f32 %v7224_v52  ;;  %v7225_v14 = vcvt.s32.f32 %v7223_v11  ;;  %v17402_v52 = vld [vmem:[#allocation57_spill] sm:$0xff]  ;;  %v17404_v11 = vld [vmem:[#allocation59_spill] sm:$0xff] }
0x3bef   :  { %7227 = vmin.xlane.f32.xlu0 %v7226_v33 }
0x3c7c   :  { %v7228_v57 = vpop.xlane.xlu0 %7227 }
0x3c7d   :  { %vm7229_vm13 = vcmp.eq.f32.partialorder %v7226_v33, %v7228_v57  ;;  %v7234_v31 = vcvt.f32.s32 %v7228_v57  ;;  %v17403_v33 = vld [vmem:[#allocation58_spill] sm:$0xff]  ;;  %v17405_v57 = vld [vmem:[#allocation60_spill] sm:$0xff] }
0x3c7e   :  { %v7230_v8 = vsel %vm7229_vm13, %v7225_v14, inf  ;;  %v17406_v14 = vld [vmem:[#allocation61_spill] sm:$0xff] }
0x3c7f   :  { %7231 = vmin.xlane.f32.xlu1 %v7230_v8  ;;  %v7235_v9 = vshll.u32 %v7234_v31, 16  ;;  %v17407_v8 = vld [vmem:[#allocation62_spill] sm:$0xff]  ;;  %v17408_v31 = vld [vmem:[#allocation63_spill] sm:$0xff] }
0x3d0c   :  { %v7232_v18 = vpop.xlane.xlu1 %7231 }
0x3d0d   :  { %v7233_v22 = vcvt.f32.s32 %v7232_v18  ;;  %v17409_v18 = vld [vmem:[#allocation64_spill] sm:$0xff] }
0x3d0f   :  { %v7236_v63 = vadd.s32 %v7235_v9, %v7233_v22  ;;  %v17410_v9 = vld [vmem:[#allocation65_spill] sm:$0xff]  ;;  %v17411_v22 = vld [vmem:[#allocation66_spill] sm:$0xff] }
0x3d11   :  { %vm7248_vm15 = vcmp.eq.s32.totalorder %v17386_v42, %v7236_v63  ;;  %v16650_v55 = vsel %vm7245_vm14, %v7236_v63, %v17387_v44  ;;  %v17412_v63 = vld [vmem:[#allocation68_spill] sm:$0xff]  ;;  %v17413_v44 = vld [vmem:[#allocation67_spill] sm:$0xff] }
0x3d12   :  { %8077 = vmatmul.mubr.msk.f32.vlgmr.msra.gmra.mrb[72].mxu1 %vm7248_vm15, %v17388_v40  ;;  %11197 = vmatmul.mubr.msk.f32.vlgmr.msra.gmra.mrb[72].mxu0 %vm7248_vm15, %v17388_v40  ;;  %v17414_v40 = vld [vmem:[#allocation69_spill] sm:$0xff] }
0x3d13   :  { %13540 = vmatpush1.bf16.msra.mxu1 %v17389_v34  ;;  %13571 = vmatpush3.bf16.msra.mxu0 %v17390_v4  ;;  %v17415_v34 = vld [vmem:[#allocation77_spill] sm:$0xff]  ;;  %v17416_v4 = vld [vmem:[#allocation70_spill] sm:$0xff] }
0x3d14   :  { %13542 = vmatprep.subr.bf16.mxu1 %v17391_v13  ;;  %13572 = vmatprep.subr.bf16.mxu0 %v17076_v54  ;;  %v17417_v13 = vld [vmem:[#allocation71_spill] sm:$0xff] }
0x3d15   :  { %7456 = vmatprep.mubr.f32.mxu1 %v16487_v1  ;;  %11231 = vmatprep.mubr.msk.f32.mxu0 %vm14268_vm0, %v16487_v1 }
0x3d17   :  { %13544 = vmatpush1.bf16.msra.mxu1 %v17392_v56  ;;  %13574 = vmatpush3.bf16.msra.mxu0 %v17393_v17  ;;  %v17418_v56 = vld [vmem:[#allocation72_spill] sm:$0xff]  ;;  %v17419_v17 = vld [vmem:[#allocation73_spill] sm:$0xff] }
0x3d18   :  { %13546 = vmatprep.subr.bf16.mxu1 %v17394_v2  ;;  %13575 = vmatprep.subr.bf16.mxu0 %v17076_v54  ;;  %v17420_v2 = vld [vmem:[#allocation74_spill] sm:$0xff] }
0x3d1b   :  { %13548 = vmatpush1.bf16.msra.mxu1 %v17395_v47  ;;  %13577 = vmatpush3.bf16.msra.mxu0 %v17396_v59  ;;  %v17421_v47 = vld [vmem:[#allocation75_spill] sm:$0xff] }
0x3d1c   :  { %13550 = vmatprep.subr.bf16.mxu1 %v17397_v24  ;;  %13578 = vmatprep.subr.bf16.mxu0 %v17076_v54 }
0x3d1f   :  { %13552 = vmatpush1.bf16.msra.mxu1 %v17398_v61  ;;  %13580 = vmatpush3.bf16.msra.mxu0 %v17399_v32 }
0x3d20   :  { %13554 = vmatprep.subr.bf16.mxu1 %v17400_v58  ;;  %13581 = vmatprep.subr.bf16.mxu0 %v17076_v54 }
0x3d23   :  { %13556 = vmatpush1.bf16.msra.mxu1 %v17401_v16  ;;  %13583 = vmatpush3.bf16.msra.mxu0 %v17402_v52 }
0x3d24   :  { %13558 = vmatprep.subr.bf16.mxu1 %v17403_v33  ;;  %13584 = vmatprep.subr.bf16.mxu0 %v17076_v54 }
0x3d27   :  { %13560 = vmatpush1.bf16.msra.mxu1 %v17404_v11  ;;  %13586 = vmatpush3.bf16.msra.mxu0 %v17405_v57 }
0x3d28   :  { %13562 = vmatprep.subr.bf16.mxu1 %v17406_v14  ;;  %13587 = vmatprep.subr.bf16.mxu0 %v17076_v54 }
0x3d2b   :  { %13564 = vmatpush1.bf16.msra.mxu1 %v17407_v8  ;;  %13589 = vmatpush3.bf16.msra.mxu0 %v17408_v31 }
0x3d2c   :  { %13566 = vmatprep.subr.bf16.mxu1 %v17409_v18  ;;  %13590 = vmatprep.subr.bf16.mxu0 %v17076_v54 }
0x3d2f   :  { %13568 = vmatpush1.bf16.msra.mxu1 %v17410_v9  ;;  %13592 = vmatpush3.bf16.msra.mxu0 %v17411_v22 }
0x3d30   :  { %13593 = vmatprep.subr.bf16.mxu1 %v17076_v54  ;;  %13617 = vmatprep.subr.bf16.mxu0 %v17076_v54 }
0x3d32   :  { %7457 = vmatmul.mubr.f32.vlgmr.msra.gmra.mrb[72].mxu1 %v16527_v50  ;;  %11232 = vmatmul.mubr.f32.vlgmr.msra.gmra.mrb[74].mxu0 %v16527_v50 }
0x3d33   :  { %13595 = vmatpush3.bf16.msra.mxu1 %v17412_v63  ;;  %13619 = vmatpush3.bf16.msra.mxu0 %v17413_v44 }
0x3d34   :  { %13596 = vmatprep.subr.bf16.mxu1 %v17076_v54  ;;  %11266 = vmatprep.mubr.msk.f32.mxu1 %vm14268_vm0, %v16487_v1 }
0x3d35   :  { %13620 = vmatprep.subr.bf16.mxu0 %v17076_v54  ;;  %11301 = vmatprep.mubr.msk.f32.mxu0 %vm14268_vm0, %v16487_v1 }
0x3d37   :  { %13598 = vmatpush3.bf16.msra.mxu1 %v17414_v40  ;;  %13622 = vmatpush3.bf16.msra.mxu0 %v17415_v34 }
0x3d38   :  { %13599 = vmatprep.subr.bf16.mxu1 %v17076_v54  ;;  %13623 = vmatprep.subr.bf16.mxu0 %v17076_v54 }
0x3d3b   :  { %13601 = vmatpush3.bf16.msra.mxu1 %v17416_v4  ;;  %13625 = vmatpush3.bf16.msra.mxu0 %v17415_v34 }
0x3d3c   :  { %13602 = vmatprep.subr.bf16.mxu1 %v17076_v54  ;;  %13626 = vmatprep.subr.bf16.mxu0 %v17076_v54 }
0x3d3f   :  { %13604 = vmatpush3.bf16.msra.mxu1 %v17417_v13  ;;  %13628 = vmatpush3.bf16.msra.mxu0 %v17415_v34 }
0x3d40   :  { %13605 = vmatprep.subr.bf16.mxu1 %v17076_v54  ;;  %13629 = vmatprep.subr.bf16.mxu0 %v17076_v54 }
0x3d43   :  { %13607 = vmatpush3.bf16.msra.mxu1 %v17418_v56  ;;  %13631 = vmatpush3.bf16.msra.mxu0 %v17415_v34 }
0x3d44   :  { %13608 = vmatprep.subr.bf16.mxu1 %v17076_v54  ;;  %13632 = vmatprep.subr.bf16.mxu0 %v17076_v54 }
0x3d47   :  { %13610 = vmatpush3.bf16.msra.mxu1 %v17419_v17  ;;  %13634 = vmatpush3.bf16.msra.mxu0 %v17415_v34 }
0x3d48   :  { %13611 = vmatprep.subr.bf16.mxu1 %v17076_v54  ;;  %13635 = vmatprep.subr.bf16.mxu0 %v17076_v54 }
0x3d4b   :  { %13613 = vmatpush3.bf16.msra.mxu1 %v17420_v2  ;;  %13637 = vmatpush3.bf16.msra.mxu0 %v17415_v34 }
0x3d4c   :  { %13614 = vmatprep.subr.bf16.mxu1 %v17076_v54  ;;  %13638 = vmatprep.subr.bf16.mxu0 %v17076_v54 }
0x3d4f   :  { %13616 = vmatpush3.bf16.msra.mxu1 %v17421_v47  ;;  %13640 = vmatpush3.bf16.msra.mxu0 %v17415_v34 }
0x3d50   :  { %13665 = vmatprep.subr.bf16.mxu0 %v17076_v54  ;;  %13641 = vmatprep.subr.bf16.mxu1 %v17076_v54 }
0x3de5   :  { %v7388_v59 = vpop.f32.mrb[72].mxu0 }
0x3de6   :  { %v11198_v24 = vpop.f32.mrb[73].mxu0  ;;  %v7389_v63 = vadd.f32 %v7388_v59, %v15257_v45 }
0x3e05   :  { %v7458_v61 = vpop.f32.mrb[72].mxu1  ;;  %v7529_v32 = vpop.f32.mrb[74].mxu0 }
0x3e06   :  { %v13742_v58 = vadd.f32 %v15247_v53, %v7458_v61  ;;  %v7460_v16 = vpop.f32.mrb[73].mxu1  ;;  %v11233_v52 = vpop.f32.mrb[75].mxu0  ;;  %v7530_v9 = vadd.f32 %v7529_v32, %v15254_v37 }
0x3e07   :  { %v13744_v11 = vadd.f32 %v15249_v39, %v7460_v16 }
0x3e08   :  { %v8079_v33 = vmul.f32 -1.442695, %v13742_v58 }
0x3e09   :  { %v8080_v57 = vmul.f32 -1.442695, %v13744_v11 }
0x3e0a   :  { %13972 = vpow2.f32 %v8079_v33 }
0x3e0b   :  { %13974 = vpow2.f32 %v8080_v57 }
0x3e14   :  { %v13973_v14 = vpop.eup %13972 }
0x3e15   :  { %v7537_v8 = vadd.f32 1.0, %v13973_v14  ;;  %v13975_v31 = vpop.eup %13974  ;;  %v17428_v14 = vld [vmem:[#allocation79_spill] sm:$0xff] }
0x3e16   :  { %v7544_v18 = vadd.f32 1.0, %v13975_v31 }
0x3e17   :  { %13976 = vrcp.f32 %v7537_v8  ;;  %v17429_v8 = vld [vmem:[#allocation78_spill] sm:$0xff] }
0x3e18   :  { %13978 = vrcp.f32 %v7544_v18  ;;  %v3733_v31 = vsub.f32 %v17429_v8, %v17428_v14 }
0x3e1a   :  { %v3734_v18 = vmul.f32 1.442695, %v3733_v31 }
0x3e21   :  { %v13977_v22 = vpop.eup %13976 }
0x3e22   :  { %v7547_v44 = vmul.f32 %v13977_v22, %v7530_v9  ;;  %v13979_v40 = vpop.eup %13978  ;;  %v17430_v9 = vld [vmem:[#allocation34_spill] sm:$0xff]  ;;  %v17431_v22 = vld [vmem:[#allocation83_spill] sm:$0xff] }
0x3e23   :  { %v7550_v34 = vsub.f32 1.0, %v13979_v40  ;;  %v7552_v13 = vmul.f32 %v13979_v40, %v16527_v50  ;;  %v17433_v40 = vld [vmem:[#allocation92_spill] sm:$0xff] }
0x3e24   :  { %v7548_v53 = vadd.f32 %v7547_v44, %v7389_v63  ;;  %v5134_v63 = vsub.f32 %v17431_v22, %v17430_v9 }
0x3e26   :  { %13980 = vtanh.f32 %v7548_v53  ;;  %v5135_v44 = vmul.f32 1.442695, %v5134_v63  ;;  %v17432_v53 = vld [vmem:[#allocation93_spill] sm:$0xff] }
0x3e30   :  { %v13981_v39 = vpop.eup %13980 }
0x3e31   :  { %v7551_v4 = vmul.f32 %v13981_v39, %v7550_v34  ;;  %v6536_v34 = vsub.f32 %v17433_v40, %v17432_v53 }
0x3e33   :  { %v7553_v56 = vadd.f32 %v7552_v13, %v7551_v4  ;;  %v6537_v4 = vmul.f32 1.442695, %v6536_v34 }
0x3e35   :  { %11267 = vmatmul.mubr.f32.vlgmr.msra.gmra.mrb[74].mxu1 %v7553_v56 }
0x3e36   :  { %13643 = vmatpush3.bf16.msra.mxu1 %v15292_v60  ;;  %11336 = vmatprep.mubr.msk.f32.mxu1 %vm14268_vm0, %v16487_v1 }
0x3e37   :  { %13644 = vmatprep.subr.bf16.mxu1 %v17076_v54 }
0x3e3a   :  { %13646 = vmatpush3.bf16.msra.mxu1 %v15295_v49 }
0x3e3b   :  { %13647 = vmatprep.subr.bf16.mxu1 %v17076_v54 }
0x3e3e   :  { %13649 = vmatpush3.bf16.msra.mxu1 %v15299_v23 }
0x3e3f   :  { %13650 = vmatprep.subr.bf16.mxu1 %v17076_v54 }
0x3e42   :  { %13652 = vmatpush3.bf16.msra.mxu1 %v17124_v48 }
0x3e43   :  { %13653 = vmatprep.subr.bf16.mxu1 %v17076_v54 }
0x3e46   :  { %13655 = vmatpush3.bf16.msra.mxu1 %v17125_v19 }
0x3e47   :  { %13656 = vmatprep.subr.bf16.mxu1 %v17076_v54 }
0x3e4a   :  { %13658 = vmatpush3.bf16.msra.mxu1 %v17126_v20 }
0x3e4b   :  { %13659 = vmatprep.subr.bf16.mxu1 %v17076_v54 }
0x3e4e   :  { %13661 = vmatpush3.bf16.msra.mxu1 %v15315_v10 }
0x3e4f   :  { %13662 = vmatprep.subr.bf16.mxu1 %v17076_v54 }
0x3e52   :  { %13664 = vmatpush3.bf16.msra.mxu1 %v17127_v41 }
0x3e53   :  { %13689 = vmatprep.subr.bf16.mxu1 %v17076_v54 }
0x3f08   :  { %v7620_v37 = vpop.f32.mrb[74].mxu1 }
0x3f09   :  { %v7621_v45 = vadd.f32 %v7620_v37, %v17128_v27  ;;  %v11268_v60 = vpop.f32.mrb[75].mxu1 }
0x3f0b   :  { %v7624_v49 = vsel %vm2653_vm11, %v7621_v45, -inf }
0x3f0c   :  { %7625 = vmax.xlane.f32.xlu0 %v7624_v49 }
0x3f99   :  { %v7626_v23 = vpop.xlane.xlu0 %7625 }
0x3f9a   :  { %v7627_v48 = vsub.f32 %v7621_v45, %v7626_v23 }
0x3f9c   :  { %v7628_v19 = vmul.f32 1.442695, %v7627_v48 }
0x3f9e   :  { %13982 = vpow2.f32 %v7628_v19 }
0x3fa8   :  { %v13983_v20 = vpop.eup %13982 }
0x3fa9   :  { %v7630_v10 = vsel %vm2653_vm11, %v13983_v20, 0.0 }
0x3faa   :  { %7631 = vadd.xlane.f32.xlu1 %v7630_v10 }
0x4037   :  { %v7632_v50 = vpop.xlane.xlu1 %7631 }
0x4038   :  { %13984 = vrcp.f32 %v7632_v50 }
0x4042   :  { %v13985_v41 = vpop.eup %13984 }
0x4043   :  { %v7635_v17 = vmul.f32 %v13985_v41, %v13983_v20 }
0x4045   :  { %11302 = vmatmul.mubr.f32.vlgmr.msra.gmra.mrb[76].mxu0 %v7635_v17 }
0x4046   :  { %13667 = vmatpush3.bf16.msra.mxu0 %v15324_v0  ;;  %11371 = vmatprep.mubr.msk.f32.mxu0 %vm14268_vm0, %v16487_v1 }
0x4047   :  { %13668 = vmatprep.subr.bf16.mxu0 %v17076_v54 }
0x404a   :  { %13670 = vmatpush3.bf16.msra.mxu0 %v15327_v46 }
0x404b   :  { %13671 = vmatprep.subr.bf16.mxu0 %v17076_v54 }
0x404e   :  { %13673 = vmatpush3.bf16.msra.mxu0 %v17129_v15 }
0x404f   :  { %13674 = vmatprep.subr.bf16.mxu0 %v17076_v54 }
0x4052   :  { %13676 = vmatpush3.bf16.msra.mxu0 %v17130_v29 }
0x4053   :  { %13677 = vmatprep.subr.bf16.mxu0 %v17076_v54 }
0x4056   :  { %13679 = vmatpush3.bf16.msra.mxu0 %v15341_v36 }
0x4057   :  { %13680 = vmatprep.subr.bf16.mxu0 %v17076_v54 }
0x405a   :  { %13682 = vmatpush3.bf16.msra.mxu0 %v15345_v26 }
0x405b   :  { %13683 = vmatprep.subr.bf16.mxu0 %v17076_v54 }
0x405e   :  { %13685 = vmatpush3.bf16.msra.mxu0 %v15349_v7 }
0x405f   :  { %13686 = vmatprep.subr.bf16.mxu0 %v17076_v54 }
0x4062   :  { %13688 = vmatpush3.bf16.msra.mxu0 %v15353_v28 }
0x4065   :  { %11372 = vmatmul.mubr.f32.vlgmr.msra.gmra.mrb[78].mxu0 %v7553_v56 }
0x4118   :  { %v7702_v0 = vpop.f32.mrb[76].mxu0 }
0x4119   :  { %v11303_v46 = vpop.f32.mrb[77].mxu0  ;;  %11337 = vmatmul.mubr.f32.vlgmr.msra.gmra.mrb[76].mxu1 %v7702_v0 }
0x411a   :  { %13691 = vmatpush3.bf16.msra.mxu1 %v17226_v35  ;;  %11406 = vmatprep.mubr.msk.f32.mxu1 %vm14268_vm0, %v16487_v1  ;;  %v17422_v35 = vld [vmem:[#allocation95_spill] sm:$0xff] }
0x411b   :  { %13692 = vmatprep.subr.bf16.mxu1 %v17076_v54 }
0x411e   :  { %13694 = vmatpush3.bf16.msra.mxu1 %v17227_v30  ;;  %v17423_v30 = vld [vmem:[#allocation94_spill] sm:$0xff] }
0x411f   :  { %13695 = vmatprep.subr.bf16.mxu1 %v17076_v54 }
0x4122   :  { %13697 = vmatpush3.bf16.msra.mxu1 %v17274_v12  ;;  %v3032_v12 = vsub.f32 %v17423_v30, %v17422_v35 }
0x4123   :  { %13698 = vmatprep.subr.bf16.mxu1 %v17076_v54 }
0x4126   :  { %13700 = vmatpush3.bf16.msra.mxu1 %v17275_v6  ;;  %v3033_v6 = vmul.f32 1.442695, %v3032_v12 }
0x4127   :  { %13701 = vmatprep.subr.bf16.mxu1 %v17076_v54 }
0x412a   :  { %13703 = vmatpush3.bf16.msra.mxu1 %v17276_v38  ;;  %v17424_v38 = vld [vmem:[#allocation81_spill] sm:$0xff] }
0x412b   :  { %13704 = vmatprep.subr.bf16.mxu1 %v17076_v54 }
0x412e   :  { %13706 = vmatpush3.bf16.msra.mxu1 %v17325_v21  ;;  %v17425_v21 = vld [vmem:[#allocation80_spill] sm:$0xff] }
0x412f   :  { %13707 = vmatprep.subr.bf16.mxu1 %v17076_v54  ;;  %v4433_v1 = vsub.f32 %v17425_v21, %v17424_v38 }
0x4132   :  { %13709 = vmatpush3.bf16.msra.mxu1 %v17376_v3  ;;  %v17426_v3 = vld [vmem:[#allocation37_spill] sm:$0xff] }
0x4133   :  { %13710 = vmatprep.subr.bf16.mxu1 %v17076_v54  ;;  %v4434_v54 = vmul.f32 1.442695, %v4433_v1 }
0x4136   :  { %13712 = vmatpush3.bf16.msra.mxu1 %v17377_v5  ;;  %v17427_v5 = vld [vmem:[#allocation36_spill] sm:$0xff] }
0x4137   :  { %v5835_v2 = vsub.f32 %v17427_v5, %v17426_v3 }
0x4138   :  { %v7842_v7 = vpop.f32.mrb[78].mxu0 }
0x4139   :  { %v11373_v28 = vpop.f32.mrb[79].mxu0  ;;  %v5836_v47 = vmul.f32 1.442695, %v5835_v2 }
0x41ec   :  { %v7772_v36 = vpop.f32.mrb[76].mxu1 }
0x41ed   :  { %v7843_v26 = vadd.f32 %v7842_v7, %v7772_v36  ;;  %v11338_v27 = vpop.f32.mrb[77].mxu1 }
0x41ef   :  { %v7846_v15 = vadd.f32 %v16608_v25, %v7843_v26  ;;  %v7237_v25 = vsub.f32 %v16635_v62, %v16639_v51 }
0x41f1   :  { %13986 = vtanh.f32 %v7846_v15  ;;  %v7238_v32 = vmul.f32 1.442695, %v7237_v25 }
0x41f2   :  { %13988 = vpow2.f32 %v3033_v6 }
0x41f3   :  { %13990 = vpow2.f32 %v4434_v54 }
0x41f4   :  { %13992 = vpow2.f32 %v5836_v47 }
0x41f5   :  { %13994 = vpow2.f32 %v7238_v32 }
0x41f6   :  { %13996 = vpow2.f32 %v3734_v18 }
0x41f7   :  { %13998 = vpow2.f32 %v5135_v44 }
0x41f8   :  { %14000 = vpow2.f32 %v6537_v4 }
0x41fb   :  { %v13987_v29 = vpop.eup %13986 }
0x41fc   :  { %11407 = vmatmul.mubr.f32.vlgmr.msra.gmra.mrb[78].mxu1 %v13987_v29  ;;  %v13989_v16 = vpop.eup %13988 }
0x41fd   :  { %v3035_v52 = vsel %vm2653_vm11, %v13989_v16, 0.0  ;;  %v13991_v33 = vpop.eup %13990 }
0x41fe   :  { %v4436_v11 = vsel %vm2653_vm11, %v13991_v33, 0.0  ;;  %v13993_v57 = vpop.eup %13992 }
0x41ff   :  { %v5838_v62 = vsel %vm2653_vm11, %v13993_v57, 0.0  ;;  %v13995_v51 = vpop.eup %13994 }
0x4200   :  { %v13997_v23 = vpop.eup %13996 }
0x4201   :  { %v3736_v48 = vsel %vm2653_vm11, %v13997_v23, 0.0  ;;  %v13999_v19 = vpop.eup %13998 }
0x4202   :  { %v5137_v20 = vsel %vm2653_vm11, %v13999_v19, 0.0  ;;  %v14001_v10 = vpop.eup %14000 }
0x4203   :  { %v6539_v50 = vsel %vm2653_vm11, %v14001_v10, 0.0 }
0x42cf   :  { %v7914_v59 = vpop.f32.mrb[78].mxu1 }
0x42d0   :  { %v7915_v24 = vadd.f32 %v16632_v43, %v7914_v59  ;;  %v11408_v61 = vpop.f32.mrb[79].mxu1  ;;  %v7240_v43 = vsel %vm2653_vm11, %v13995_v51, 0.0 }
0x42d2   :  { %v7918_v58 = vsel %vm2653_vm11, %v7915_v24, -inf }
0x42d3   :  { %7919 = vmax.xlane.f32.xlu0 %v7918_v58 }
0x42d7   :  { %3036 = vadd.xlane.f32.xlu0 %v3035_v52 }
0x42db   :  { %4437 = vadd.xlane.f32.xlu0 %v4436_v11 }
0x42df   :  { %5839 = vadd.xlane.f32.xlu0 %v5838_v62 }
0x42e3   :  { %7241 = vadd.xlane.f32.xlu0 %v7240_v43 }
0x4360   :  { %v7920_v39 = vpop.xlane.xlu0 %7919 }
0x4361   :  { %vm7921_vm0 = vcmp.eq.f32.partialorder %v7915_v24, %v7920_v39  ;;  %v7938_v56 = vsub.f32 %v7915_v24, %v7920_v39 }
0x4362   :  { %v7922_v13 = vsel %vm7921_vm0, %v17386_v42, 128 }
0x4363   :  { %v7923_v37 = vsel %vm2653_vm11, %v7922_v13, 2147483647  ;;  %v7939_v60 = vmul.f32 1.442695, %v7938_v56 }
0x4364   :  { %v7925_v45 = vshra.s32 %v7923_v37, 16  ;;  %v3037_v0 = vpop.xlane.xlu0 %3036  ;;  %v7924_v46 = vand.u32 65535, %v7923_v37 }
0x4365   :  { %14002 = vpow2.f32 %v7939_v60 }
0x4366   :  { %v7927_v49 = vcvt.s32.f32 %v7925_v45  ;;  %v7926_v28 = vcvt.s32.f32 %v7924_v46  ;;  %14004 = vrcp.f32 %v3037_v0 }
0x4368   :  { %7928 = vmin.xlane.f32.xlu1 %v7927_v49  ;;  %v4438_v36 = vpop.xlane.xlu0 %4437 }
0x436c   :  { %3737 = vadd.xlane.f32.xlu1 %v3736_v48  ;;  %v5840_v15 = vpop.xlane.xlu0 %5839 }
0x436f   :  { %v14003_v41 = vpop.eup %14002 }
0x4370   :  { %5138 = vadd.xlane.f32.xlu1 %v5137_v20  ;;  %v7941_v17 = vsel %vm2653_vm11, %v14003_v41, 0.0  ;;  %v14005_v35 = vpop.eup %14004  ;;  %v7242_v12 = vpop.xlane.xlu0 %7241 }
0x4371   :  { %v3042_v38 = vsel %vm3040_vm2, %v14005_v35, 0.0 }
0x4374   :  { %6540 = vadd.xlane.f32.xlu1 %v6539_v50 }
0x4378   :  { %7942 = vadd.xlane.f32.xlu1 %v7941_v17 }
0x43f5   :  { %v7929_v7 = vpop.xlane.xlu1 %7928 }
0x43f6   :  { %vm7930_vm3 = vcmp.eq.f32.partialorder %v7927_v49, %v7929_v7 }
0x43f7   :  { %v7931_v26 = vsel %vm7930_vm3, %v7926_v28, inf }
0x43f8   :  { %7932 = vmin.xlane.f32.xlu0 %v7931_v26 }
0x43f9   :  { %v3738_v27 = vpop.xlane.xlu1 %3737 }
0x43fa   :  { %14006 = vrcp.f32 %v3738_v27 }
0x43fb   :  { %14008 = vrcp.f32 %v4438_v36 }
0x43fd   :  { %v5139_v29 = vpop.xlane.xlu1 %5138 }
0x43fe   :  { %14010 = vrcp.f32 %v5139_v29 }
0x43ff   :  { %14012 = vrcp.f32 %v5840_v15 }
0x4401   :  { %v6541_v30 = vpop.xlane.xlu1 %6540 }
0x4402   :  { %14014 = vrcp.f32 %v6541_v30 }
0x4403   :  { %14016 = vrcp.f32 %v7242_v12 }
0x4404   :  { %v14007_v6 = vpop.eup %14006 }
0x4405   :  { %v7943_v21 = vpop.xlane.xlu1 %7942  ;;  %v3742_v1 = vsel %vm2133_vm8, %v14007_v6, %v3042_v38  ;;  %v14009_v54 = vpop.eup %14008  ;;  %vm7946_vm8 = vcmp.eq.s32.totalorder %v17386_v42, 7 }
0x4406   :  { %14018 = vrcp.f32 %v7943_v21  ;;  %v4443_v5 = vsel %vm4441_vm6, %v14009_v54, %v3742_v1 }
0x4408   :  { %v14011_v3 = vpop.eup %14010 }
0x4409   :  { %v5144_v2 = vsel %vm5142_vm12, %v14011_v3, %v4443_v5  ;;  %v14013_v47 = vpop.eup %14012 }
0x440a   :  { %v5845_v59 = vsel %vm5843_vm1, %v14013_v47, %v5144_v2 }
0x440c   :  { %v14015_v25 = vpop.eup %14014 }
0x440d   :  { %v6546_v24 = vsel %vm6544_vm7, %v14015_v25, %v5845_v59  ;;  %v14017_v61 = vpop.eup %14016 }
0x440e   :  { %v7247_v58 = vsel %vm7245_vm14, %v14017_v61, %v6546_v24 }
0x4410   :  { %v14019_v32 = vpop.eup %14018 }
0x4411   :  { %v7948_v16 = vsel %vm7946_vm8, %v14019_v32, %v7247_v58 }
0x4412   :  { %7950 = vst [vmem:[#allocation20] sm:$0x1] %v7948_v16 }
0x4413   :  { %14207 = shalt.err (!%p14204_p3)
}
0x4414   :  { %s17434_s26 = sld [smem:[#allocation98_spill]] }
0x441a   :  { %s14208_s2 = scalar_lea.hbm %s17434_s26, 16 }
0x441b   :  { %p14209_p4 = scmp.ne.s32.totalorder %s17434_s26, %s14208_s2  ;;  %p14212_p5 = scmp.lt.u32.totalorder %s14208_s2, %s17434_s26 }
0x441d   :  { %p14214_p6 = pnand %p14212_p5, %p14209_p4 }
0x441f   :  { %14217 = shalt.err (!%p14214_p6)
}
0x4420   :  { %7970 = dma.vmem_to_hbm [thread:$0]  %s7968_s19, 16, %s17434_s26, [#allocation21]   ;;  %v7935_v52 = vcvt.f32.s32 %v7929_v7 }
0x4421   :  { %s14272_s24 = smov [#allocation19]  }
0x4422   :  { %v7936_v11 = vshll.u32 %v7935_v52, 16  ;;  %s7957_s1 = sshll.u32 %s14272_s24, 4  ;;  %s7958_s1 = int_to_ptr.vmem [resolvable:$true] %s7957_s1 }
0x4423   :  { %s14218_s3 = scalar_lea.vmem %s7958_s1, 16  ;;  %s14222_s23 = scalar_lea.vmem %s7958_s1, 32 }
0x4424   :  { %p14219_p7 = scmp.ne.s32.totalorder %s7958_s1, %s14218_s3  ;;  %p14223_p8 = scmp.lt.s32.totalorder %s7958_s1, %s7958_s1 }
0x4425   :  { %p14224_p9 = scmp.lt.s32.totalorder %s14222_s23, %s14218_s3 }
0x4427   :  { %p14225_p10 = por %p14224_p9, %p14223_p8 }
0x4429   :  { %p14226_p11 = pnand %p14225_p10, %p14219_p7 }
0x4485   :  { %v7933_v33 = vpop.xlane.xlu0 %7932 }
0x4486   :  { %v7934_v57 = vcvt.f32.s32 %v7933_v33 }
0x4488   :  { %v7937_v62 = vadd.s32 %v7936_v11, %v7934_v57 }
0x448a   :  { %v7947_v51 = vsel %vm7946_vm8, %v7937_v62, %v16650_v55 }
0x448b   :  { %7949 = vst [vmem:[#allocation19] sm:$0x1] %v7947_v51 }
0x448c   :  { %14229 = shalt.err (!%p14226_p11)
}
0x448d   :  { %s17435_s9 = sld [smem:[#allocation97_spill]] }
0x4493   :  { %s14230_s17 = scalar_lea.hbm %s17435_s9, 16 }
0x4494   :  { %p14231_p12 = scmp.ne.s32.totalorder %s17435_s9, %s14230_s17  ;;  %p14234_p13 = scmp.lt.u32.totalorder %s14230_s17, %s17435_s9 }
0x4496   :  { %p14236_p0 = pnand %p14234_p13, %p14231_p12 }
0x4498   :  { %14239 = shalt.err (!%p14236_p0)
}
0x4499   :  { %7960 = dma.vmem_to_hbm [thread:$0]  %s7958_s1, 16, %s17435_s9, [#allocation7]  }
0x449a   :  { %14250 = dma.done.wait [#allocation7], 16  }
0x449b   :  { %14251 = vsyncadd [#allocation7], 4294967280 }
0x449c   :  { %14252 = dma.done.wait [#allocation21], 16  }
0x449d   :  { %14253 = vsyncadd [#allocation21], 4294967280 }
0x449e   :  { %7977 = vsyncpa [#allocation6], 1 }
0x449f   :  { %7978 = vsyncpa [#allocation11], 1 }
0x44a0   :  { %7979 = vsyncpa [#allocation14], 1 }
0x44a1   :  { %7980 = vsyncpa [#allocation17], 1 }
0x44a2   :  { %7981 = vsyncpa [#allocation7], 1 }
0x44a3   :  { %7982 = vsyncpa [#allocation21], 1 }
0x44a4   :  { %7983 = vsyncpa [#allocation8], 1 }

</bundles_post_ra>
